<compile_context>
chip_gen: v7x
topology: tpu7x:2x2x1
jax: 0.10.0
libtpu: 0.0.40
codegen_flags: <defaults>
</compile_context>

<pallas_src>
import math

import jax
import jax.numpy as jnp
from jax import lax
from jax.experimental import pallas as pl
from jax.experimental.pallas import tpu as pltpu


_SQRT1_2 = 0.7071067811865476
# Abramowitz & Stegun 7.1.26 erf coefficients (max |erf error| ~1.5e-7).
_ERF_P = 0.3275911
_ERF_A1 = 0.254829592
_ERF_A2 = -0.284496736
_ERF_A3 = 1.421413741
_ERF_A4 = -1.453152027
_ERF_A5 = 1.061405429


def _gelu_exact(x):
    """GELU(x) = x * Phi(x), Phi via A&S 7.1.26 erfc.

    Matches PyTorch's exact (erf) GELU to ~1e-7 absolute, but moves the
    transcendental (exp) onto the EUP slot instead of lax.erf's all-VPU
    rational polynomial; the kernel is VALU-bound so that is the slot that
    matters.
    """
    z = x * jnp.float32(_SQRT1_2)
    az = jnp.abs(z)
    t = 1.0 / (az * jnp.float32(_ERF_P) + 1.0)
    poly = t * (jnp.float32(_ERF_A1)
           + t * (jnp.float32(_ERF_A2)
           + t * (jnp.float32(_ERF_A3)
           + t * (jnp.float32(_ERF_A4)
           + t * jnp.float32(_ERF_A5)))))
    q = poly * jnp.exp(-(az * az))                        # erfc(|z|)
    cdf = jnp.where(x >= 0.0, 1.0 - 0.5 * q, 0.5 * q)     # Phi(x)
    return x * cdf


def band_magnitude_kernel(
    xt_ref,    # [B, TM]        unscaled band magnitudes, samples along lanes
    w1a_ref,   # [H+1, B]       rows 0..H-1: (w1/2)^T ; row H: est_band_params
    w2_ref,    # [H, H]         w2^T * ln_gamma   (LN affine folded in)
    w3_ref,    # [1, H]         w3^T
    vec_ref,   # [3*stride, 1]  packed {b1', b2', b3} column vectors
    o_ref,     # [1, TM]        lane-dense output row
):
    H = w2_ref.shape[0]
    stride = vec_ref.shape[0] // 3

    x = xt_ref[...]                                              # [B, TM]

    # ---- first linear (input scaling folded) + linear band model, one MXU launch ----
    b1a = vec_ref[0:H + 1, :]                                    # [H+1, 1]  (row H == 0)
    ha = jnp.dot(w1a_ref[...], x, preferred_element_type=jnp.float32) + b1a  # [H+1, TM]
    lin = ha[H:H + 1, :]                                         # [1, TM]  x @ est_band_params
    h = _gelu_exact(ha[0:H, :])                                  # [H, TM]

    # ---- LayerNorm over features (sublanes); biased var = E[h^2] - mean^2,
    #      eps=1e-5; affine is folded into w2/b2 in the wrapper ----
    inv_h = jnp.float32(1.0 / H)
    mean = jnp.sum(h, axis=0, keepdims=True) * inv_h             # [1, TM]
    msq = jnp.sum(h * h, axis=0, keepdims=True) * inv_h          # [1, TM]
    inv_std = lax.rsqrt(msq - mean * mean + jnp.float32(1e-5))   # [1, TM]
    h = h * inv_std - mean * inv_std                             # two [H,TM] passes

    # ---- second linear (gamma folded in) + GELU ----
    h = jnp.dot(w2_ref[...], h, preferred_element_type=jnp.float32) \
        + vec_ref[stride:stride + H, :]
    h = _gelu_exact(h)

    # ---- final projection, add linear band model and b3, lane-dense store ----
    out = jnp.dot(w3_ref[...], h, preferred_element_type=jnp.float32)        # [1, TM]
    o_ref[...] = out + lin + vec_ref[2 * stride:2 * stride + 1, :]


def _round_up(x, m):
    return ((x + m - 1) // m) * m


def prepare_band_params(params):
    """Fold input scaling / LN affine into the weights and pack the biases.

    Hoist this out of the per-step path (call once, pass via `prepared=`); it
    is also invoked automatically when `prepared` is not supplied.
    """
    f32 = jnp.float32
    w1 = params["w1"].astype(f32)                               # [B, H]
    b1 = params["b1"].astype(f32)                               # [H]
    B, H = w1.shape

    # (x - 10.5)/2 folded into layer 1: xs@w1 + b1 == x@(w1/2) + (b1 - 5.25*sum(w1,0))
    w1_s = w1 * 0.5
    b1_s = b1 - 5.25 * jnp.sum(w1, axis=0)

    # est_band_params fused as an extra output row of the first matmul.
    wlin_row = params["est_band_params"].astype(f32).reshape(1, B)
    w1a = jnp.concatenate([w1_s.T, wlin_row], axis=0)           # [H+1, B]

    # LayerNorm affine folded into layer 2:
    #   (h_norm*g + b) @ w2 + b2 == h_norm @ (diag(g) w2) + (b @ w2 + b2)
    gamma = params["ln_gamma"].astype(f32)
    beta = params["ln_beta"].astype(f32)
    w2 = params["w2"].astype(f32)                               # [H, H] (in, out)
    w2t = w2.T * gamma[None, :]                                 # [H_out, H_in]
    b2_f = params["b2"].astype(f32) + beta @ w2                 # [H]

    w3row = params["w3"].astype(f32).reshape(H, 1).T            # [1, H]

    # Pack {b1', b2', b3} into one sublane-aligned column array -> single DMA.
    stride = _round_up(H + 1, 8)
    vec = jnp.zeros((3 * stride, 1), f32)
    vec = vec.at[0:H, 0].set(b1_s)                              # row H stays 0 (lin row)
    vec = vec.at[stride:stride + H, 0].set(b2_f)
    vec = vec.at[2 * stride, 0].set(params["b3"].astype(f32)[0])
    return {"w1a": w1a, "w2t": w2t, "w3row": w3row, "vec": vec, "B": B, "H": H}


def band_based_magnitude_model(
    band_magnitudes,  # [N, B] float32
    distance,         # unused (kept for signature parity with the module)
    color_metrics,    # unused
    lat_rad,          # unused
    long_rad,         # unused
    params,
    *,
    prepared=None,
    tile_m=2048,      # samples (lanes) per grid step; multiple of 512, sweepable
):
    del distance, color_metrics, lat_rad, long_rad  # unused in the reference forward
    N, B = band_magnitudes.shape
    p = prepare_band_params(params) if prepared is None else prepared
    H = p["H"]
    assert p["B"] == B
    stride = p["vec"].shape[0] // 3

    # Tile sizing: big lane tiles amortize the ~0.35us/step grid overhead and
    # give long unmasked vst runs; cap so tiny N is not grossly over-padded.
    tile_m = _round_up(max(int(tile_m), 512), 512)
    tile = min(tile_m, _round_up(N, 512))
    n_pad = _round_up(N, tile)
    grid = (n_pad // tile,)

    # Lane-major (feature-major) input: every sample sits in a lane.
    xt = jnp.pad(band_magnitudes.astype(jnp.float32), ((0, n_pad - N), (0, 0))).T

    const = lambda shape: pl.BlockSpec(shape, lambda i: (0, 0))

    # Advisory cost estimate (per padded sample): 3 matmuls, ~2 GELU passes, LN.
    flops = int(n_pad) * (2 * B * (H + 1) + 2 * H * H + 2 * H + 60 * H)
    transcendentals = int(n_pad) * 2 * H                        # one exp per GELU element
    bytes_accessed = 4 * (int(n_pad) * (B + 1)
                          + (H + 1) * B + H * H + H + 3 * stride)

    out2d = pl.pallas_call(
        band_magnitude_kernel,
        out_shape=jax.ShapeDtypeStruct((1, n_pad), jnp.float32),
        grid_spec=pltpu.PrefetchScalarGridSpec(
            num_scalar_prefetch=0,
            grid=grid,
            in_specs=[
                pl.BlockSpec((B, tile), lambda i: (0, i)),      # x tile (lane-major)
                const((H + 1, B)),                              # fused w1 / est_band_params
                const((H, H)),                                  # w2^T * gamma
                const((1, H)),                                  # w3^T
                const((3 * stride, 1)),                         # packed biases
            ],
            out_specs=pl.BlockSpec((1, tile), lambda i: (0, i)),
        ),
        compiler_params=pltpu.CompilerParams(
            dimension_semantics=("parallel",),                  # megacore sharding (v7x)
            vmem_limit_bytes=32 * 1024 * 1024,                  # > v5e's 16 MiB scoped default
        ),
        cost_estimate=pl.CostEstimate(
            flops=flops,
            transcendentals=transcendentals,
            bytes_accessed=bytes_accessed,
        ),
    )(xt, p["w1a"], p["w2t"], p["w3row"], p["vec"])

    return out2d[0, :N].reshape(N, 1)


def _init_params(key, num_bands, hidden):
    """Deterministic synthetic parameters matching the module's shapes."""
    ks = jax.random.split(key, 8)

    def linear_init(k, fan_in, shape):
        bound = 1.0 / math.sqrt(fan_in)
        return jax.random.uniform(k, shape, jnp.float32, -bound, bound)

    return {
        # est_band_params: Tensor of shape [num_bands] (the linear weight)
        "est_band_params": jax.random.normal(ks[0], (num_bands,), jnp.float32) * 0.1,
        # Linear(num_bands, hidden)   (stored as [in, out])
        "w1": linear_init(ks[1], num_bands, (num_bands, hidden)),
        "b1": linear_init(ks[2], num_bands, (hidden,)),
        # LayerNorm(hidden) affine params (perturbed from default so the fold is tested)
        "ln_gamma": 1.0 + 0.1 * jax.random.normal(ks[7], (hidden,), jnp.float32),
        "ln_beta": 0.1 * jax.random.normal(ks[0], (hidden,), jnp.float32),
        # Linear(hidden, hidden)
        "w2": linear_init(ks[3], hidden, (hidden, hidden)),
        "b2": linear_init(ks[4], hidden, (hidden,)),
        # Linear(hidden, 1)
        "w3": linear_init(ks[5], hidden, (hidden, 1)),
        "b3": linear_init(ks[6], hidden, (1,)),
    }


def _reference(band_magnitudes, params):
    """Pure-JAX reference (un-folded, sample-major, exact erf) for correctness."""
    x = band_magnitudes
    lin = x @ params["est_band_params"].reshape(-1, 1)
    xs = (x - 10.5) / 2.0
    h = xs @ params["w1"] + params["b1"]
    h = 0.5 * h * (1.0 + lax.erf(h / jnp.sqrt(2.0)))
    mean = jnp.mean(h, axis=-1, keepdims=True)
    var = jnp.mean((h - mean) ** 2, axis=-1, keepdims=True)
    h = (h - mean) / jnp.sqrt(var + 1e-5)
    h = h * params["ln_gamma"] + params["ln_beta"]
    h = h @ params["w2"] + params["b2"]
    h = 0.5 * h * (1.0 + lax.erf(h / jnp.sqrt(2.0)))
    nl = h @ params["w3"] + params["b3"]
    return lin + nl


if __name__ == "__main__":
    key = jax.random.PRNGKey(0)
    k_param, k_x, k_d, k_c, k_lat, k_lon = jax.random.split(key, 6)

    N = 1037        # not a tile multiple -> exercises padding
    NUM_BANDS = 6   # number of photometric bands
    HIDDEN = 40     # hidden width from the module default

    params = _init_params(k_param, NUM_BANDS, HIDDEN)
    prepared = prepare_band_params(params)   # hoisted weight prep (done once)

    # band magnitudes around ~10.5 so the scaling is meaningful
    band_magnitudes = 10.5 + 2.0 * jax.random.normal(k_x, (N, NUM_BANDS), jnp.float32)
    # unused auxiliary inputs (kept for signature parity with the module)
    distance = jax.random.normal(k_d, (N, 1), jnp.float32)
    color_metrics = jax.random.normal(k_c, (N, 3), jnp.float32)
    lat_rad = jax.random.normal(k_lat, (N, 1), jnp.float32)
    long_rad = jax.random.normal(k_lon, (N, 1), jnp.float32)

    ref = _reference(band_magnitudes, params)

    # Default (large-tile, single grid step) path with hoisted params.
    out = band_based_magnitude_model(
        band_magnitudes, distance, color_metrics, lat_rad, long_rad, params,
        prepared=prepared,
    )
    out = jax.block_until_ready(out)
    assert out.shape == (N, 1)
    assert jnp.allclose(out, ref, atol=1e-4, rtol=1e-4), "mismatch vs JAX reference"

    # Small-tile path: exercises a multi-step grid + padding with the same kernel.
    out_small = band_based_magnitude_model(
        band_magnitudes, distance, color_metrics, lat_rad, long_rad, params,
        tile_m=512,
    )
    out_small = jax.block_until_ready(out_small)
    assert jnp.allclose(out_small, ref, atol=1e-4, rtol=1e-4), "mismatch (tile_m=512)"

    print("KERNEL_OK")
</pallas_src>

<mosaic_0001>
module attributes {stable_mosaic.version = 11 : i64} {
  func.func @band_magnitude_kernel(%arg0: i32, %arg1: memref<6x1536xf32, #tpu.memory_space<vmem>>, %arg2: memref<41x6xf32, #tpu.memory_space<vmem>>, %arg3: memref<40x40xf32, #tpu.memory_space<vmem>>, %arg4: memref<1x40xf32, #tpu.memory_space<vmem>>, %arg5: memref<144x1xf32, #tpu.memory_space<vmem>>, %arg6: memref<1x1536xf32, #tpu.memory_space<vmem>>) attributes {dimension_semantics = [#tpu.dimension_semantics<parallel>], iteration_bounds = array<i64: 1>, scalar_prefetch = 0 : i64, scratch_operands = 0 : i64, tpu.core_type = #tpu.core_type<tc>, window_params = [{transform_indices = @transform_0, window_bounds = array<i64: 6, 1536>}, {pipeline_mode = #tpu.pipeline_mode<synchronous>, transform_indices = @transform_1, window_bounds = array<i64: 41, 6>}, {pipeline_mode = #tpu.pipeline_mode<synchronous>, transform_indices = @transform_2, window_bounds = array<i64: 40, 40>}, {pipeline_mode = #tpu.pipeline_mode<synchronous>, transform_indices = @transform_3, window_bounds = array<i64: 1, 40>}, {pipeline_mode = #tpu.pipeline_mode<synchronous>, transform_indices = @transform_4, window_bounds = array<i64: 144, 1>}, {transform_indices = @transform_5, window_bounds = array<i64: 1, 1536>}]} {
    %c0 = arith.constant 0 : index
    %c0_0 = arith.constant 0 : index
    %0 = vector.load %arg1[%c0, %c0_0] : memref<6x1536xf32, #tpu.memory_space<vmem>>, vector<6x1536xf32>
    %c0_1 = arith.constant 0 : index
    %c0_2 = arith.constant 0 : index
    %1 = vector.load %arg5[%c0_1, %c0_2] : memref<144x1xf32, #tpu.memory_space<vmem>>, vector<41x1xf32>
    %c0_3 = arith.constant 0 : index
    %c0_4 = arith.constant 0 : index
    %2 = vector.load %arg2[%c0_3, %c0_4] : memref<41x6xf32, #tpu.memory_space<vmem>>, vector<41x6xf32>
    %cst = arith.constant dense<0.000000e+00> : vector<41x1536xf32>
    %3 = tpu.matmul %2, %0, %cst {dimension_numbers = #tpu.dot_dimension_numbers<[1], [0], [0], [1], [0, 0, 1, 1], [], []>} : vector<41x6xf32>, vector<6x1536xf32>, vector<41x1536xf32> -> vector<41x1536xf32>
    %4 = vector.broadcast %1 : vector<41x1xf32> to vector<41x1536xf32>
    %5 = arith.addf %3, %4 : vector<41x1536xf32>
    %6 = vector.extract_strided_slice %5 {offsets = [40, 0], sizes = [1, 1536], strides = [1, 1]} : vector<41x1536xf32> to vector<1x1536xf32>
    %7 = vector.extract_strided_slice %5 {offsets = [0, 0], sizes = [40, 1536], strides = [1, 1]} : vector<41x1536xf32> to vector<40x1536xf32>
    %cst_5 = arith.constant 0.707106769 : f32
    %8 = vector.broadcast %cst_5 : f32 to vector<40x1536xf32>
    %9 = arith.mulf %7, %8 : vector<40x1536xf32>
    %10 = math.absf %9 : vector<40x1536xf32>
    %cst_6 = arith.constant 0.327591091 : f32
    %11 = vector.broadcast %cst_6 : f32 to vector<40x1536xf32>
    %12 = arith.mulf %10, %11 : vector<40x1536xf32>
    %cst_7 = arith.constant 1.000000e+00 : f32
    %13 = vector.broadcast %cst_7 : f32 to vector<40x1536xf32>
    %14 = arith.addf %12, %13 : vector<40x1536xf32>
    %cst_8 = arith.constant 1.000000e+00 : f32
    %15 = vector.broadcast %cst_8 : f32 to vector<40x1536xf32>
    %16 = arith.divf %15, %14 : vector<40x1536xf32>
    %cst_9 = arith.constant 1.06140542 : f32
    %17 = vector.broadcast %cst_9 : f32 to vector<40x1536xf32>
    %18 = arith.mulf %16, %17 : vector<40x1536xf32>
    %cst_10 = arith.constant -1.45315206 : f32
    %19 = vector.broadcast %cst_10 : f32 to vector<40x1536xf32>
    %20 = arith.addf %19, %18 : vector<40x1536xf32>
    %21 = arith.mulf %16, %20 : vector<40x1536xf32>
    %cst_11 = arith.constant 1.42141378 : f32
    %22 = vector.broadcast %cst_11 : f32 to vector<40x1536xf32>
    %23 = arith.addf %22, %21 : vector<40x1536xf32>
    %24 = arith.mulf %16, %23 : vector<40x1536xf32>
    %cst_12 = arith.constant -0.284496725 : f32
    %25 = vector.broadcast %cst_12 : f32 to vector<40x1536xf32>
    %26 = arith.addf %25, %24 : vector<40x1536xf32>
    %27 = arith.mulf %16, %26 : vector<40x1536xf32>
    %cst_13 = arith.constant 0.254829586 : f32
    %28 = vector.broadcast %cst_13 : f32 to vector<40x1536xf32>
    %29 = arith.addf %28, %27 : vector<40x1536xf32>
    %30 = arith.mulf %16, %29 : vector<40x1536xf32>
    %31 = arith.mulf %10, %10 : vector<40x1536xf32>
    %cst_14 = arith.constant 0.000000e+00 : f32
    %32 = vector.broadcast %cst_14 : f32 to vector<40x1536xf32>
    %33 = arith.subf %32, %31 : vector<40x1536xf32>
    %34 = math.exp %33 : vector<40x1536xf32>
    %35 = arith.mulf %30, %34 : vector<40x1536xf32>
    %cst_15 = arith.constant 0.000000e+00 : f32
    %36 = vector.broadcast %cst_15 : f32 to vector<40x1536xf32>
    %37 = arith.cmpf oge, %7, %36 : vector<40x1536xf32>
    %cst_16 = arith.constant 5.000000e-01 : f32
    %38 = vector.broadcast %cst_16 : f32 to vector<40x1536xf32>
    %39 = arith.mulf %38, %35 : vector<40x1536xf32>
    %cst_17 = arith.constant 1.000000e+00 : f32
    %40 = vector.broadcast %cst_17 : f32 to vector<40x1536xf32>
    %41 = arith.subf %40, %39 : vector<40x1536xf32>
    %cst_18 = arith.constant 5.000000e-01 : f32
    %42 = vector.broadcast %cst_18 : f32 to vector<40x1536xf32>
    %43 = arith.mulf %42, %35 : vector<40x1536xf32>
    %44 = arith.select %37, %41, %43 : vector<40x1536xi1>, vector<40x1536xf32>
    %45 = arith.mulf %7, %44 : vector<40x1536xf32>
    %cst_19 = arith.constant dense<0.000000e+00> : vector<1536xf32>
    %46 = vector.multi_reduction <add>, %45, %cst_19 [0] : vector<40x1536xf32> to vector<1536xf32>
    %47 = vector.shape_cast %46 : vector<1536xf32> to vector<1x1536xf32>
    %cst_20 = arith.constant 2.500000e-02 : f32
    %48 = vector.broadcast %cst_20 : f32 to vector<1x1536xf32>
    %49 = arith.mulf %47, %48 : vector<1x1536xf32>
    %50 = arith.mulf %45, %45 : vector<40x1536xf32>
    %cst_21 = arith.constant dense<0.000000e+00> : vector<1536xf32>
    %51 = vector.multi_reduction <add>, %50, %cst_21 [0] : vector<40x1536xf32> to vector<1536xf32>
    %52 = vector.shape_cast %51 : vector<1536xf32> to vector<1x1536xf32>
    %cst_22 = arith.constant 2.500000e-02 : f32
    %53 = vector.broadcast %cst_22 : f32 to vector<1x1536xf32>
    %54 = arith.mulf %52, %53 : vector<1x1536xf32>
    %55 = arith.mulf %49, %49 : vector<1x1536xf32>
    %56 = arith.subf %54, %55 : vector<1x1536xf32>
    %cst_23 = arith.constant 9.99999974E-6 : f32
    %57 = vector.broadcast %cst_23 : f32 to vector<1x1536xf32>
    %58 = arith.addf %56, %57 : vector<1x1536xf32>
    %59 = math.rsqrt %58 : vector<1x1536xf32>
    %60 = vector.broadcast %59 : vector<1x1536xf32> to vector<40x1536xf32>
    %61 = arith.mulf %45, %60 : vector<40x1536xf32>
    %62 = arith.mulf %49, %59 : vector<1x1536xf32>
    %63 = vector.broadcast %62 : vector<1x1536xf32> to vector<40x1536xf32>
    %64 = arith.subf %61, %63 : vector<40x1536xf32>
    %c0_24 = arith.constant 0 : index
    %c0_25 = arith.constant 0 : index
    %65 = vector.load %arg3[%c0_24, %c0_25] : memref<40x40xf32, #tpu.memory_space<vmem>>, vector<40x40xf32>
    %cst_26 = arith.constant dense<0.000000e+00> : vector<40x1536xf32>
    %66 = tpu.matmul %65, %64, %cst_26 {dimension_numbers = #tpu.dot_dimension_numbers<[1], [0], [0], [1], [0, 0, 1, 1], [], []>} : vector<40x40xf32>, vector<40x1536xf32>, vector<40x1536xf32> -> vector<40x1536xf32>
    %c48 = arith.constant 48 : index
    %c0_27 = arith.constant 0 : index
    %67 = vector.load %arg5[%c48, %c0_27] : memref<144x1xf32, #tpu.memory_space<vmem>>, vector<40x1xf32>
    %68 = vector.broadcast %67 : vector<40x1xf32> to vector<40x1536xf32>
    %69 = arith.addf %66, %68 : vector<40x1536xf32>
    %cst_28 = arith.constant 0.707106769 : f32
    %70 = vector.broadcast %cst_28 : f32 to vector<40x1536xf32>
    %71 = arith.mulf %69, %70 : vector<40x1536xf32>
    %72 = math.absf %71 : vector<40x1536xf32>
    %cst_29 = arith.constant 0.327591091 : f32
    %73 = vector.broadcast %cst_29 : f32 to vector<40x1536xf32>
    %74 = arith.mulf %72, %73 : vector<40x1536xf32>
    %cst_30 = arith.constant 1.000000e+00 : f32
    %75 = vector.broadcast %cst_30 : f32 to vector<40x1536xf32>
    %76 = arith.addf %74, %75 : vector<40x1536xf32>
    %cst_31 = arith.constant 1.000000e+00 : f32
    %77 = vector.broadcast %cst_31 : f32 to vector<40x1536xf32>
    %78 = arith.divf %77, %76 : vector<40x1536xf32>
    %cst_32 = arith.constant 1.06140542 : f32
    %79 = vector.broadcast %cst_32 : f32 to vector<40x1536xf32>
    %80 = arith.mulf %78, %79 : vector<40x1536xf32>
    %cst_33 = arith.constant -1.45315206 : f32
    %81 = vector.broadcast %cst_33 : f32 to vector<40x1536xf32>
    %82 = arith.addf %81, %80 : vector<40x1536xf32>
    %83 = arith.mulf %78, %82 : vector<40x1536xf32>
    %cst_34 = arith.constant 1.42141378 : f32
    %84 = vector.broadcast %cst_34 : f32 to vector<40x1536xf32>
    %85 = arith.addf %84, %83 : vector<40x1536xf32>
    %86 = arith.mulf %78, %85 : vector<40x1536xf32>
    %cst_35 = arith.constant -0.284496725 : f32
    %87 = vector.broadcast %cst_35 : f32 to vector<40x1536xf32>
    %88 = arith.addf %87, %86 : vector<40x1536xf32>
    %89 = arith.mulf %78, %88 : vector<40x1536xf32>
    %cst_36 = arith.constant 0.254829586 : f32
    %90 = vector.broadcast %cst_36 : f32 to vector<40x1536xf32>
    %91 = arith.addf %90, %89 : vector<40x1536xf32>
    %92 = arith.mulf %78, %91 : vector<40x1536xf32>
    %93 = arith.mulf %72, %72 : vector<40x1536xf32>
    %cst_37 = arith.constant 0.000000e+00 : f32
    %94 = vector.broadcast %cst_37 : f32 to vector<40x1536xf32>
    %95 = arith.subf %94, %93 : vector<40x1536xf32>
    %96 = math.exp %95 : vector<40x1536xf32>
    %97 = arith.mulf %92, %96 : vector<40x1536xf32>
    %cst_38 = arith.constant 0.000000e+00 : f32
    %98 = vector.broadcast %cst_38 : f32 to vector<40x1536xf32>
    %99 = arith.cmpf oge, %69, %98 : vector<40x1536xf32>
    %cst_39 = arith.constant 5.000000e-01 : f32
    %100 = vector.broadcast %cst_39 : f32 to vector<40x1536xf32>
    %101 = arith.mulf %100, %97 : vector<40x1536xf32>
    %cst_40 = arith.constant 1.000000e+00 : f32
    %102 = vector.broadcast %cst_40 : f32 to vector<40x1536xf32>
    %103 = arith.subf %102, %101 : vector<40x1536xf32>
    %cst_41 = arith.constant 5.000000e-01 : f32
    %104 = vector.broadcast %cst_41 : f32 to vector<40x1536xf32>
    %105 = arith.mulf %104, %97 : vector<40x1536xf32>
    %106 = arith.select %99, %103, %105 : vector<40x1536xi1>, vector<40x1536xf32>
    %107 = arith.mulf %69, %106 : vector<40x1536xf32>
    %c0_42 = arith.constant 0 : index
    %c0_43 = arith.constant 0 : index
    %108 = vector.load %arg4[%c0_42, %c0_43] : memref<1x40xf32, #tpu.memory_space<vmem>>, vector<1x40xf32>
    %cst_44 = arith.constant dense<0.000000e+00> : vector<1x1536xf32>
    %109 = tpu.matmul %108, %107, %cst_44 {dimension_numbers = #tpu.dot_dimension_numbers<[1], [0], [0], [1], [0, 0, 1, 1], [], []>} : vector<1x40xf32>, vector<40x1536xf32>, vector<1x1536xf32> -> vector<1x1536xf32>
    %110 = arith.addf %109, %6 : vector<1x1536xf32>
    %c96 = arith.constant 96 : index
    %c0_45 = arith.constant 0 : index
    %111 = vector.load %arg5[%c96, %c0_45] : memref<144x1xf32, #tpu.memory_space<vmem>>, vector<1x1xf32>
    %112 = vector.broadcast %111 : vector<1x1xf32> to vector<1x1536xf32>
    %113 = arith.addf %110, %112 : vector<1x1536xf32>
    %c0_46 = arith.constant 0 : index
    %c0_47 = arith.constant 0 : index
    %114 = vector.load %arg6[%c0_46, %c0_47] : memref<1x1536xf32, #tpu.memory_space<vmem>>, vector<1x1536xf32>
    tpu.vector_store %arg6[%c0_46, %c0_47], %113 {strides = array<i32>} : memref<1x1536xf32, #tpu.memory_space<vmem>>, vector<1x1536xf32>,
    return
  }
  func.func @transform_0(%arg0: i32) -> (i32, i32) {
    %c0_i32 = arith.constant 0 : i32
    %c0_i32_0 = arith.constant 0 : i32
    return %c0_i32, %arg0 : i32, i32
  }
  func.func @transform_1(%arg0: i32) -> (i32, i32) {
    %c0_i32 = arith.constant 0 : i32
    %c0_i32_0 = arith.constant 0 : i32
    %c0_i32_1 = arith.constant 0 : i32
    return %c0_i32, %c0_i32_0 : i32, i32
  }
  func.func @transform_2(%arg0: i32) -> (i32, i32) {
    %c0_i32 = arith.constant 0 : i32
    %c0_i32_0 = arith.constant 0 : i32
    %c0_i32_1 = arith.constant 0 : i32
    return %c0_i32, %c0_i32_0 : i32, i32
  }
  func.func @transform_3(%arg0: i32) -> (i32, i32) {
    %c0_i32 = arith.constant 0 : i32
    %c0_i32_0 = arith.constant 0 : i32
    %c0_i32_1 = arith.constant 0 : i32
    return %c0_i32, %c0_i32_0 : i32, i32
  }
  func.func @transform_4(%arg0: i32) -> (i32, i32) {
    %c0_i32 = arith.constant 0 : i32
    %c0_i32_0 = arith.constant 0 : i32
    %c0_i32_1 = arith.constant 0 : i32
    return %c0_i32, %c0_i32_0 : i32, i32
  }
  func.func @transform_5(%arg0: i32) -> (i32, i32) {
    %c0_i32 = arith.constant 0 : i32
    %c0_i32_0 = arith.constant 0 : i32
    return %c0_i32, %arg0 : i32, i32
  }
}

</mosaic_0001>

<bundles_post_ra>
// kernel: tpu_custom_call.1
= control target key start
LH: loop header
LB: loop body
LE: loop exit
PB: predicated region body
PF: predicated region fallthrough
CT: control target
= control target key end

     0   :  { %vm94_vm0 = vcmask 1045504   ;;  %vm75_vm1 = vcmask 48128   ;;  %v10042_v5 = vmov 0.0   ;;  %s10036_s0 = inlined_call_operand.vmem [shape: f32[6,1536], index: 0, kind: input, shape index: {}]   ;;  %s10037_s1 = inlined_call_operand.vmem [shape: f32[41,6], index: 1, kind: input, shape index: {}]   ;;  %s10038_s2 = inlined_call_operand.vmem [shape: f32[40,40], index: 2, kind: input, shape index: {}]   ;;  %s10039_s3 = inlined_call_operand.vmem [shape: f32[1,40], index: 3, kind: input, shape index: {}]   ;;  %s10040_s4 = inlined_call_operand.vmem [shape: f32[144,1], index: 4, kind: input, shape index: {}]   ;;  %s10041_s5 = inlined_call_operand.hbm [shape: f32[1,1536], index: 5, kind: output, shape index: {}]  }
   0x1   :  { %v22_v0 = vld [vmem:[%s10036_s0 + $0x8] sm:$0x3f]  ;;  %v24_v1 = vld [vmem:[%s10036_s0 + $0x18] sm:$0x3f]  ;;  %v21_v2 = vld [vmem:[%s10036_s0] sm:$0x3f]  ;;  %195 = vmatprep.mubr.f32.mxu0 %v10042_v5  ;;  %296 = vmatprep.mubr.f32.mxu1 %v10042_v5 }
   0x2   :  { %5417 = vmatprep.subr.msk.mxu0 %vm94_vm0, %v22_v0  ;;  %5425 = vmatprep.subr.msk.mxu1 %vm94_vm0, %v24_v1  ;;  %v23_v3 = vld [vmem:[%s10036_s0 + $0x10] sm:$0x3f]  ;;  %v6206_v4 = vld [vmem:[%s10037_s1] sm:$0xff]  ;;  %v26_v6 = vld [vmem:[%s10036_s0 + $0x28] sm:$0x3f] }
   0x3   :  { %5418 = vmatpush1.msk.msra.mxu0 %vm94_vm0, %v21_v2  ;;  %5426 = vmatpush1.msk.msra.mxu1 %vm94_vm0, %v23_v3  ;;  %v28_v7 = vld [vmem:[%s10036_s0 + $0x38] sm:$0x3f]  ;;  %v25_v8 = vld [vmem:[%s10036_s0 + $0x20] sm:$0x3f]  ;;  %v27_v9 = vld [vmem:[%s10036_s0 + $0x30] sm:$0x3f] }
   0x4   :  { %5419 = vmatmul.mubr.msk.f32.vlgmr.msra.gmra.mrb[0].mxu0 %vm75_vm1, %v6206_v4  ;;  %5427 = vmatmul.mubr.msk.f32.vlgmr.msra.gmra.mrb[0].mxu1 %vm75_vm1, %v6206_v4  ;;  %v6233_v10 = vld [vmem:[%s10037_s1 + $0x8] sm:$0xff]  ;;  %v32_v12 = vld [vmem:[%s10036_s0 + $0x58] sm:$0x3f]  ;;  %v6254_v13 = vld [vmem:[%s10037_s1 + $0x10] sm:$0xff] }
   0x5   :  { %201 = vmatprep.mubr.f32.mxu0 %v10042_v5  ;;  %302 = vmatprep.mubr.f32.mxu1 %v10042_v5  ;;  %v30_v11 = vld [vmem:[%s10036_s0 + $0x48] sm:$0x3f] }
   0x6   :  { %5433 = vmatprep.subr.msk.mxu0 %vm94_vm0, %v26_v6  ;;  %5441 = vmatprep.subr.msk.mxu1 %vm94_vm0, %v28_v7 }
   0x7   :  { %5434 = vmatpush1.msk.msra.mxu0 %vm94_vm0, %v25_v8  ;;  %5442 = vmatpush1.msk.msra.mxu1 %vm94_vm0, %v27_v9 }
   0x8   :  { %5420 = vmatmul.mubr.msk.f32.gmra.mrb[2].mxu0 %vm75_vm1, %v6233_v10  ;;  %5428 = vmatmul.mubr.msk.f32.gmra.mrb[2].mxu1 %vm75_vm1, %v6233_v10 }
   0x9   :  { %207 = vmatprep.mubr.f32.mxu0 %v10042_v5  ;;  %308 = vmatprep.mubr.f32.mxu1 %v10042_v5 }
   0xa   :  { %5449 = vmatprep.subr.msk.mxu0 %vm94_vm0, %v30_v11  ;;  %5457 = vmatprep.subr.msk.mxu1 %vm94_vm0, %v32_v12 }
   0xb   :  { %10 = vsyncpa [#allocation3], 0  ;;  %v6156_v14 = vmov 0   ;;  %v33_v15 = vld [vmem:[%s10040_s4] sm:$0xff]  ;;  %v35_v16 = vld [vmem:[%s10040_s4 + $0x10] sm:$0xff] }
   0xc   :  { %5625 = vset.pattern.permute.xlu0 %v6156_v14  ;;  %5626 = vset.pattern.permute.xlu1 %v6156_v14  ;;  %v6273_v17 = vld [vmem:[%s10037_s1 + $0x18] sm:$0xff]  ;;  %v34_v18 = vld [vmem:[%s10040_s4 + $0x8] sm:$0xff]  ;;  %v6290_v20 = vld [vmem:[%s10037_s1 + $0x20] sm:$0xff] }
   0xd   :  { %5421 = vmatmul.mubr.msk.f32.gmra.mrb[4].mxu0 %vm75_vm1, %v6254_v13  ;;  %5429 = vmatmul.mubr.msk.f32.gmra.mrb[4].mxu1 %vm75_vm1, %v6254_v13  ;;  %v36_v19 = vld [vmem:[%s10040_s4 + $0x18] sm:$0xff]  ;;  %v37_v21 = vld [vmem:[%s10040_s4 + $0x20] sm:$0xff]  ;;  %v2746_v22 = vld [vmem:[%s10040_s4 + $0x30] sm:$0xff] }
   0xe   :  { %213 = vmatprep.mubr.f32.mxu0 %v10042_v5  ;;  %314 = vmatprep.mubr.f32.mxu1 %v10042_v5  ;;  %v6307_v23 = vld [vmem:[%s10037_s1 + $0x28] sm:$0x1]  ;;  %v2747_v24 = vld [vmem:[%s10040_s4 + $0x38] sm:$0xff]  ;;  %v2748_v25 = vld [vmem:[%s10040_s4 + $0x40] sm:$0xff] }
   0xf   :  { %47 = vperm.xlu0 %5625, %v33_v15   ;;  %57 = vperm.xlu1 %5626, %v35_v16   ;;  %v29_v26 = vld [vmem:[%s10036_s0 + $0x40] sm:$0x3f]  ;;  %v31_v27 = vld [vmem:[%s10036_s0 + $0x50] sm:$0x3f]  ;;  %v2749_v28 = vld [vmem:[%s10040_s4 + $0x48] sm:$0xff] }
  0x10   :  { %v2750_v29 = vld [vmem:[%s10040_s4 + $0x50] sm:$0xff]  ;;  %v38_v30 = vld [vmem:[%s10040_s4 + $0x28] sm:$0x1]  ;;  %v5292_v31 = vld [vmem:[%s10040_s4 + $0x60] sm:$0x1] }
  0x11   :  { %5422 = vmatmul.mubr.msk.f32.gmra.mrb[6].mxu0 %vm75_vm1, %v6273_v17  ;;  %5430 = vmatmul.mubr.msk.f32.gmra.mrb[6].mxu1 %vm75_vm1, %v6273_v17 }
  0x12   :  { %219 = vmatprep.mubr.f32.mxu0 %v10042_v5  ;;  %320 = vmatprep.mubr.f32.mxu1 %v10042_v5 }
  0x13   :  { %52 = vperm.xlu0 %5625, %v34_v18   ;;  %62 = vperm.xlu1 %5626, %v36_v19  }
  0x15   :  { %5423 = vmatmul.mubr.msk.f32.gmra.mrb[8].mxu0 %vm75_vm1, %v6290_v20  ;;  %5431 = vmatmul.mubr.msk.f32.gmra.mrb[8].mxu1 %vm75_vm1, %v6290_v20 }
  0x16   :  { %225 = vmatprep.mubr.f32.mxu0 %v10042_v5  ;;  %326 = vmatprep.mubr.f32.mxu1 %v10042_v5 }
  0x17   :  { %67 = vperm.xlu0 %5625, %v37_v21   ;;  %2753 = vperm.xlu1 %5626, %v2746_v22  }
  0x19   :  { %5424 = vmatmul.mubr.msk.f32.gmra.mrb[10].mxu0 %vm75_vm1, %v6307_v23  ;;  %5432 = vmatmul.mubr.msk.f32.gmra.mrb[10].mxu1 %vm75_vm1, %v6307_v23 }
  0x1a   :  { %397 = vmatprep.mubr.f32.mxu0 %v10042_v5  ;;  %498 = vmatprep.mubr.f32.mxu1 %v10042_v5 }
  0x1b   :  { %2758 = vperm.xlu0 %5625, %v2747_v24   ;;  %2763 = vperm.xlu1 %5626, %v2748_v25  }
  0x1d   :  { %5435 = vmatmul.mubr.msk.f32.vlgmr.msra.gmra.mrb[12].mxu0 %vm75_vm1, %v6206_v4  ;;  %5443 = vmatmul.mubr.msk.f32.vlgmr.msra.gmra.mrb[12].mxu1 %vm75_vm1, %v6206_v4 }
  0x1e   :  { %403 = vmatprep.mubr.f32.mxu0 %v10042_v5  ;;  %504 = vmatprep.mubr.f32.mxu1 %v10042_v5 }
  0x1f   :  { %5450 = vmatpush1.msk.msra.mxu0 %vm94_vm0, %v29_v26  ;;  %5458 = vmatpush1.msk.msra.mxu1 %vm94_vm0, %v31_v27 }
  0x20   :  { %2768 = vperm.xlu0 %5625, %v2749_v28   ;;  %2773 = vperm.xlu1 %5626, %v2750_v29  }
  0x21   :  { %5436 = vmatmul.mubr.msk.f32.gmra.mrb[14].mxu0 %vm75_vm1, %v6233_v10  ;;  %5444 = vmatmul.mubr.msk.f32.gmra.mrb[14].mxu1 %vm75_vm1, %v6233_v10 }
  0x22   :  { %409 = vmatprep.mubr.f32.mxu0 %v10042_v5  ;;  %510 = vmatprep.mubr.f32.mxu1 %v10042_v5 }
  0x24   :  { %72 = vperm.xlu0 %5625, %v38_v30   ;;  %5295 = vperm.xlu1 %5626, %v5292_v31  }
  0x25   :  { %5437 = vmatmul.mubr.msk.f32.gmra.mrb[16].mxu0 %vm75_vm1, %v6254_v13  ;;  %5445 = vmatmul.mubr.msk.f32.gmra.mrb[16].mxu1 %vm75_vm1, %v6254_v13 }
  0x26   :  { %415 = vmatprep.mubr.f32.mxu0 %v10042_v5  ;;  %516 = vmatprep.mubr.f32.mxu1 %v10042_v5 }
  0x29   :  { %5438 = vmatmul.mubr.msk.f32.gmra.mrb[18].mxu0 %vm75_vm1, %v6273_v17  ;;  %5446 = vmatmul.mubr.msk.f32.gmra.mrb[18].mxu1 %vm75_vm1, %v6273_v17 }
  0x2a   :  { %421 = vmatprep.mubr.f32.mxu0 %v10042_v5  ;;  %522 = vmatprep.mubr.f32.mxu1 %v10042_v5 }
  0x2d   :  { %5439 = vmatmul.mubr.msk.f32.gmra.mrb[20].mxu0 %vm75_vm1, %v6290_v20  ;;  %5447 = vmatmul.mubr.msk.f32.gmra.mrb[20].mxu1 %vm75_vm1, %v6290_v20 }
  0x2e   :  { %427 = vmatprep.mubr.f32.mxu0 %v10042_v5  ;;  %528 = vmatprep.mubr.f32.mxu1 %v10042_v5 }
  0x31   :  { %5440 = vmatmul.mubr.msk.f32.gmra.mrb[22].mxu0 %vm75_vm1, %v6307_v23  ;;  %5448 = vmatmul.mubr.msk.f32.gmra.mrb[22].mxu1 %vm75_vm1, %v6307_v23 }
  0x32   :  { %599 = vmatprep.mubr.f32.mxu0 %v10042_v5  ;;  %700 = vmatprep.mubr.f32.mxu1 %v10042_v5 }
  0x35   :  { %5451 = vmatmul.mubr.msk.f32.vlgmr.msra.gmra.mrb[24].mxu0 %vm75_vm1, %v6206_v4  ;;  %5459 = vmatmul.mubr.msk.f32.vlgmr.msra.gmra.mrb[24].mxu1 %vm75_vm1, %v6206_v4 }
  0x36   :  { %605 = vmatprep.mubr.f32.mxu0 %v10042_v5  ;;  %706 = vmatprep.mubr.f32.mxu1 %v10042_v5 }
  0x39   :  { %5452 = vmatmul.mubr.msk.f32.gmra.mrb[26].mxu0 %vm75_vm1, %v6233_v10  ;;  %5460 = vmatmul.mubr.msk.f32.gmra.mrb[26].mxu1 %vm75_vm1, %v6233_v10 }
  0x3a   :  { %611 = vmatprep.mubr.f32.mxu0 %v10042_v5  ;;  %712 = vmatprep.mubr.f32.mxu1 %v10042_v5 }
  0x3d   :  { %5453 = vmatmul.mubr.msk.f32.gmra.mrb[28].mxu0 %vm75_vm1, %v6254_v13  ;;  %5461 = vmatmul.mubr.msk.f32.gmra.mrb[28].mxu1 %vm75_vm1, %v6254_v13 }
  0x3e   :  { %617 = vmatprep.mubr.f32.mxu0 %v10042_v5  ;;  %718 = vmatprep.mubr.f32.mxu1 %v10042_v5 }
  0x41   :  { %5454 = vmatmul.mubr.msk.f32.gmra.mrb[30].mxu0 %vm75_vm1, %v6273_v17  ;;  %5462 = vmatmul.mubr.msk.f32.gmra.mrb[30].mxu1 %vm75_vm1, %v6273_v17 }
  0x42   :  { %623 = vmatprep.mubr.f32.mxu0 %v10042_v5  ;;  %724 = vmatprep.mubr.f32.mxu1 %v10042_v5 }
  0x45   :  { %5455 = vmatmul.mubr.msk.f32.gmra.mrb[32].mxu0 %vm75_vm1, %v6290_v20  ;;  %5463 = vmatmul.mubr.msk.f32.gmra.mrb[32].mxu1 %vm75_vm1, %v6290_v20 }
  0x46   :  { %629 = vmatprep.mubr.f32.mxu0 %v10042_v5  ;;  %730 = vmatprep.mubr.f32.mxu1 %v10042_v5 }
  0x49   :  { %5456 = vmatmul.mubr.msk.f32.gmra.mrb[34].mxu0 %vm75_vm1, %v6307_v23  ;;  %5464 = vmatmul.mubr.msk.f32.gmra.mrb[34].mxu1 %vm75_vm1, %v6307_v23 }
  0x4a   :  { %2856 = vmatprep.mubr.f32.mxu0 %v10042_v5  ;;  %2951 = vmatprep.mubr.f32.mxu1 %v10042_v5 }
  0x8e   :  { %v6413_v32 = vpop.permute.xlu0 %47  ;;  %v6461_v28 = vpop.permute.xlu1 %57 }
  0x92   :  { %v6429_v43 = vpop.permute.xlu0 %52 }
  0xd7   :  { %v197_v33 = vpop.f32.mrb[0].mxu0  ;;  %v298_v34 = vpop.f32.mrb[0].mxu1 }
  0xd8   :  { %v6416_v35 = vadd.f32 %v197_v33, %v6413_v32  ;;  %v6419_v36 = vadd.f32 %v298_v34, %v6413_v32  ;;  %v199_v37 = vpop.f32.mrb[1].mxu0  ;;  %v300_v38 = vpop.f32.mrb[1].mxu1 }
  0xd9   :  { %v6422_v39 = vadd.f32 %v199_v37, %v6413_v32  ;;  %v6425_v40 = vadd.f32 %v300_v38, %v6413_v32 }
  0xda   :  { %v737_v41 = vmul.f32 0.70710677, %v6416_v35  ;;  %v739_v42 = vmul.f32 0.70710677, %v6419_v36  ;;  %vm1937_vm2 = vcmp.ge.f32.partialorder %v6416_v35, 0.0  ;;  %vm1939_vm3 = vcmp.ge.f32.partialorder %v6419_v36, 0.0 }
  0xdb   :  { %v738_v44 = vmul.f32 0.70710677, %v6422_v39  ;;  %v740_v45 = vmul.f32 0.70710677, %v6425_v40  ;;  %v203_v48 = vpop.f32.mrb[2].mxu0  ;;  %v304_v49 = vpop.f32.mrb[2].mxu1 }
  0xdc   :  { %v797_v46 = vand.u32 2147483647, %v737_v41  ;;  %v799_v47 = vand.u32 2147483647, %v739_v42  ;;  %v6434_v52 = vadd.f32 %v203_v48, %v6429_v43  ;;  %v205_v53 = vpop.f32.mrb[3].mxu0  ;;  %v306_v54 = vpop.f32.mrb[3].mxu1  ;;  %v6437_v62 = vadd.f32 %v304_v49, %v6429_v43 }
  0xdd   :  { %v798_v50 = vand.u32 2147483647, %v738_v44  ;;  %v800_v51 = vand.u32 2147483647, %v740_v45  ;;  %v6452_v21 = vadd.f32 %v205_v53, %v6429_v43  ;;  %v6455_v22 = vadd.f32 %v306_v54, %v6429_v43 }
  0xde   :  { %v857_v55 = vmul.f32 0.3275911, %v797_v46  ;;  %v1637_v56 = vmul.f32 %v797_v46, %v797_v46  ;;  %v859_v57 = vmul.f32 0.3275911, %v799_v47  ;;  %v1639_v58 = vmul.f32 %v799_v47, %v799_v47 }
  0xdf   :  { %v858_v59 = vmul.f32 0.3275911, %v798_v50  ;;  %v1638_v60 = vmul.f32 %v798_v50, %v798_v50  ;;  %v860_v61 = vmul.f32 0.3275911, %v800_v51  ;;  %v1640_v4 = vmul.f32 %v800_v51, %v800_v51 }
  0xe0   :  { %v209_v63 = vpop.f32.mrb[4].mxu0  ;;  %v6439_v0 = vpop.f32.mrb[4].mxu1  ;;  %v917_v1 = vadd.f32 1.0, %v857_v55  ;;  %v1697_v2 = vsub.f32 0.0, %v1637_v56  ;;  %v919_v3 = vadd.f32 1.0, %v859_v57  ;;  %v1699_v8 = vsub.f32 0.0, %v1639_v58 }
  0xe1   :  { %v6441_v6 = vpop.f32.mrb[5].mxu0  ;;  %v6443_v7 = vpop.f32.mrb[5].mxu1  ;;  %v1698_v9 = vsub.f32 0.0, %v1638_v60  ;;  %v918_v10 = vadd.f32 1.0, %v858_v59  ;;  %v749_v11 = vmul.f32 0.70710677, %v6434_v52  ;;  %v6468_v37 = vadd.f32 %v209_v63, %v6461_v28 }
  0xe2   :  { %5627 = vrcp.f32 %v917_v1  ;;  %v1757_v12 = vmul.f32 1.442695, %v1697_v2  ;;  %v920_v13 = vadd.f32 1.0, %v860_v61  ;;  %v1700_v15 = vsub.f32 0.0, %v1640_v4 }
  0xe3   :  { %5629 = vrcp.f32 %v919_v3  ;;  %v809_v16 = vand.u32 2147483647, %v749_v11  ;;  %v751_v17 = vmul.f32 0.70710677, %v6437_v62  ;;  %v1761_v19 = vmul.f32 1.442695, %v1699_v8 }
  0xe4   :  { %v6446_v14 = vpop.f32.mrb[6].mxu0  ;;  %v6449_v18 = vpop.f32.mrb[6].mxu1  ;;  %v1759_v20 = vmul.f32 1.442695, %v1698_v9  ;;  %5631 = vrcp.f32 %v918_v10  ;;  %v750_v29 = vmul.f32 0.70710677, %v6452_v21  ;;  %v6485_v9 = vadd.f32 %v6439_v0, %v6461_v28 }
  0xe5   :  { %v6457_v23 = vpop.f32.mrb[7].mxu0  ;;  %v6459_v24 = vpop.f32.mrb[7].mxu1  ;;  %v869_v25 = vmul.f32 0.3275911, %v809_v16  ;;  %v1649_v26 = vmul.f32 %v809_v16, %v809_v16  ;;  %v811_v27 = vand.u32 2147483647, %v751_v17  ;;  %5633 = vpow2.f32 %v1757_v12 }
  0xe6   :  { %v752_v30 = vmul.f32 0.70710677, %v6455_v22  ;;  %5635 = vrcp.f32 %v920_v13  ;;  %v810_v45 = vand.u32 2147483647, %v750_v29  ;;  %v1763_v48 = vmul.f32 1.442695, %v1700_v15 }
  0xe7   :  { %v929_v33 = vadd.f32 1.0, %v869_v25  ;;  %v871_v34 = vmul.f32 0.3275911, %v811_v27  ;;  %v1709_v42 = vsub.f32 0.0, %v1649_v26  ;;  %v1651_v44 = vmul.f32 %v811_v27, %v811_v27 }
  0xe8   :  { %v6465_v31 = vpop.f32.mrb[8].mxu0  ;;  %v6470_v38 = vpop.f32.mrb[8].mxu1  ;;  %v812_v46 = vand.u32 2147483647, %v752_v30  ;;  %v870_v50 = vmul.f32 0.3275911, %v810_v45  ;;  %v1650_v51 = vmul.f32 %v810_v45, %v810_v45 }
  0xe9   :  { %v6472_v41 = vpop.f32.mrb[9].mxu0  ;;  %v6474_v47 = vpop.f32.mrb[9].mxu1  ;;  %5637 = vrcp.f32 %v929_v33  ;;  %v931_v49 = vadd.f32 1.0, %v871_v34  ;;  %v1711_v55 = vsub.f32 0.0, %v1651_v44  ;;  %v761_v57 = vmul.f32 0.70710677, %v6468_v37 }
  0xea   :  { %5639 = vpow2.f32 %v1761_v19  ;;  %v872_v53 = vmul.f32 0.3275911, %v812_v46  ;;  %v1652_v56 = vmul.f32 %v812_v46, %v812_v46  ;;  %v1781_v60 = vmul.f32 1.442695, %v1709_v42 }
  0xeb   :  { %5641 = vpow2.f32 %v1759_v20  ;;  %v930_v61 = vadd.f32 1.0, %v870_v50  ;;  %v1710_v1 = vsub.f32 0.0, %v1650_v51  ;;  %v821_v8 = vand.u32 2147483647, %v761_v57 }
  0xec   :  { %v6476_v54 = vpop.eup %5627  ;;  %5643 = vrcp.f32 %v931_v49  ;;  %v932_v2 = vadd.f32 1.0, %v872_v53  ;;  %v1712_v3 = vsub.f32 0.0, %v1652_v56  ;;  %v1785_v15 = vmul.f32 1.442695, %v1711_v55 }
  0xed   :  { %v6479_v58 = vpop.eup %5629  ;;  %v1097_v59 = vmul.f32 1.0614054, %v6476_v54  ;;  %5645 = vpow2.f32 %v1763_v48  ;;  %v1783_v16 = vmul.f32 1.442695, %v1710_v1  ;;  %v881_v25 = vmul.f32 0.3275911, %v821_v8 }
  0xee   :  { %v1099_v63 = vmul.f32 1.0614054, %v6479_v58  ;;  %v6491_v12 = vpop.eup %5631  ;;  %5647 = vrcp.f32 %v930_v61  ;;  %v6504_v30 = vmul.f32 1.442695, %v1712_v3  ;;  %v1661_v33 = vmul.f32 %v821_v8, %v821_v8 }
  0xef   :  { %v1157_v4 = vadd.f32 -1.4531521, %v1097_v59  ;;  %v6493_v17 = vpop.eup %5633  ;;  %v1098_v20 = vmul.f32 1.0614054, %v6491_v12  ;;  %5649 = vrcp.f32 %v932_v2  ;;  %v763_v34 = vmul.f32 0.70710677, %v6485_v9 }
  0xf0   :  { %v6487_v10 = vpop.f32.mrb[12].mxu0  ;;  %v6489_v11 = vpop.f32.mrb[12].mxu1  ;;  %v1159_v13 = vadd.f32 -1.4531521, %v1099_v63  ;;  %5651 = vpow2.f32 %v1781_v60  ;;  %v941_v49 = vadd.f32 1.0, %v881_v25  ;;  %v1721_v60 = vsub.f32 0.0, %v1661_v33 }
  0xf1   :  { %v1217_v19 = vmul.f32 %v6476_v54, %v1157_v4  ;;  %v6497_v0 = vpop.f32.mrb[13].mxu0  ;;  %v6499_v26 = vpop.f32.mrb[13].mxu1  ;;  %v1158_v44 = vadd.f32 -1.4531521, %v1098_v20  ;;  %5653 = vpow2.f32 %v1785_v15  ;;  %v6510_v50 = vand.u32 2147483647, %v763_v34 }
  0xf2   :  { %v6501_v27 = vpop.eup %5635  ;;  %v1219_v29 = vmul.f32 %v6479_v58, %v1159_v13  ;;  %5655 = vpow2.f32 %v1783_v16  ;;  %vm1938_vm4 = vcmp.ge.f32.partialorder %v6422_v39, 0.0  ;;  %vm1949_vm5 = vcmp.ge.f32.partialorder %v6434_v52, 0.0 }
  0xf3   :  { %v1277_v42 = vadd.f32 1.4214138, %v1217_v19  ;;  %v1100_v45 = vmul.f32 1.0614054, %v6501_v27  ;;  %v6508_v46 = vpop.eup %5637  ;;  %v1218_v55 = vmul.f32 %v6491_v12, %v1158_v44  ;;  %v883_v63 = vmul.f32 0.3275911, %v6510_v50 }
  0xf4   :  { %v1279_v48 = vadd.f32 1.4214138, %v1219_v29  ;;  %v5640_v51 = vpop.eup %5639  ;;  %v1109_v57 = vmul.f32 1.0614054, %v6508_v46  ;;  %5657 = vrcp.f32 %v941_v49  ;;  %v6549_v5 = vpop.f32.mrb[14].mxu1  ;;  %vm1940_vm6 = vcmp.ge.f32.partialorder %v6425_v40, 0.0 }
  0xf5   :  { %v1337_v53 = vmul.f32 %v6476_v54, %v1277_v42  ;;  %v1160_v56 = vadd.f32 -1.4531521, %v1100_v45  ;;  %v6515_v59 = vpop.eup %5641  ;;  %v1278_v3 = vadd.f32 1.4214138, %v1218_v55  ;;  %v943_v19 = vadd.f32 1.0, %v883_v63 }
  0xf6   :  { %v1339_v61 = vmul.f32 %v6479_v58, %v1279_v48  ;;  %v6519_v1 = vpop.eup %5643  ;;  %v1169_v8 = vadd.f32 -1.4531521, %v1109_v57  ;;  %v6531_v45 = vmul.f32 1.442695, %v1721_v60  ;;  %vm1951_vm7 = vcmp.ge.f32.partialorder %v6437_v62, 0.0 }
  0xf7   :  { %v1397_v2 = vadd.f32 -0.28449672, %v1337_v53  ;;  %v1220_v4 = vmul.f32 %v6501_v27, %v1160_v56  ;;  %v1111_v15 = vmul.f32 1.0614054, %v6519_v1  ;;  %v6523_v20 = vpop.eup %5645  ;;  %v1338_v16 = vmul.f32 %v6491_v12, %v1278_v3 }
  0xf8   :  { %v1399_v13 = vadd.f32 -0.28449672, %v1339_v61  ;;  %v1229_v33 = vmul.f32 %v6508_v46, %v1169_v8  ;;  %v6528_v34 = vpop.eup %5647  ;;  %5659 = vrcp.f32 %v943_v19  ;;  %vm1950_vm8 = vcmp.ge.f32.partialorder %v6452_v21, 0.0 }
  0xf9   :  { %v1457_v25 = vmul.f32 %v6476_v54, %v1397_v2  ;;  %v1280_v29 = vadd.f32 1.4214138, %v1220_v4  ;;  %v1171_v44 = vadd.f32 -1.4531521, %v1111_v15  ;;  %v6533_v48 = vpop.eup %5649  ;;  %v1398_v53 = vadd.f32 -0.28449672, %v1338_v16 }
  0xfa   :  { %v1459_v42 = vmul.f32 %v6479_v58, %v1399_v13  ;;  %v1289_v56 = vadd.f32 1.4214138, %v1229_v33  ;;  %v1110_v63 = vmul.f32 1.0614054, %v6528_v34  ;;  %v1112_v2 = vmul.f32 1.0614054, %v6533_v48  ;;  %v5652_v3 = vpop.eup %5651 }
  0xfb   :  { %v1517_v49 = vadd.f32 0.2548296, %v1457_v25  ;;  %v1340_v55 = vmul.f32 %v6501_v27, %v1280_v29  ;;  %v1231_v61 = vmul.f32 %v6519_v1, %v1171_v44  ;;  %v1458_v4 = vmul.f32 %v6491_v12, %v1398_v53  ;;  %v6544_v15 = vpop.f32.mrb[14].mxu0  ;;  %v5654_v19 = vpop.eup %5653 }
  0xfc   :  { %v1519_v57 = vadd.f32 0.2548296, %v1459_v42  ;;  %v1349_v13 = vmul.f32 %v6508_v46, %v1289_v56  ;;  %v1170_v29 = vadd.f32 -1.4531521, %v1110_v63  ;;  %v1172_v33 = vadd.f32 -1.4531521, %v1112_v2  ;;  %v6551_v53 = vpop.eup %5655 }
  0xfd   :  { %v1577_v60 = vmul.f32 %v6476_v54, %v1517_v49  ;;  %v1400_v8 = vadd.f32 -0.28449672, %v1340_v55  ;;  %v1291_v16 = vadd.f32 1.4214138, %v1231_v61  ;;  %v1518_v44 = vadd.f32 0.2548296, %v1458_v4 }
  0xfe   :  { %v1579_v25 = vmul.f32 %v6479_v58, %v1519_v57  ;;  %v1409_v49 = vadd.f32 -0.28449672, %v1349_v13  ;;  %v1230_v58 = vmul.f32 %v6528_v34, %v1170_v29  ;;  %v1232_v57 = vmul.f32 %v6533_v48, %v1172_v33 }
  0xff   :  { %v1877_v42 = vmul.f32 %v6493_v17, %v1577_v60  ;;  %v1460_v54 = vmul.f32 %v6501_v27, %v1400_v8  ;;  %v1351_v56 = vmul.f32 %v6519_v1, %v1291_v16  ;;  %v1578_v17 = vmul.f32 %v6491_v12, %v1518_v44  ;;  %v6559_v60 = vpop.eup %5657 }
 0x100   :  { %v1879_v55 = vmul.f32 %v5640_v51, %v1579_v25  ;;  %v1469_v2 = vmul.f32 %v6508_v46, %v1409_v49  ;;  %v1290_v13 = vadd.f32 1.4214138, %v1230_v58  ;;  %v1663_v51 = vmul.f32 %v6510_v50, %v6510_v50 }
 0x101   :  { %v1997_v61 = vmul.f32 0.5, %v1877_v42  ;;  %v1520_v63 = vadd.f32 0.2548296, %v1460_v54  ;;  %v1411_v8 = vadd.f32 -0.28449672, %v1351_v56  ;;  %v1878_v16 = vmul.f32 %v6515_v59, %v1578_v17 }
 0x102   :  { %v1999_v4 = vmul.f32 0.5, %v1879_v55  ;;  %v1529_v33 = vadd.f32 0.2548296, %v1469_v2  ;;  %v6565_v42 = vpop.eup %5659  ;;  %v1350_v54 = vmul.f32 %v6528_v34, %v1290_v13  ;;  %v1292_v49 = vadd.f32 1.4214138, %v1232_v57 }
 0x103   :  { %v2057_v25 = vsub.f32 1.0, %v1997_v61  ;;  %v1580_v29 = vmul.f32 %v6501_v27, %v1520_v63  ;;  %v1471_v44 = vmul.f32 %v6519_v1, %v1411_v8  ;;  %v1998_v50 = vmul.f32 0.5, %v1878_v16  ;;  %v6578_v63 = vpop.f32.mrb[15].mxu0 }
 0x104   :  { %v2059_v12 = vsub.f32 1.0, %v1999_v4  ;;  %v1589_v27 = vmul.f32 %v6508_v46, %v1529_v33  ;;  %v1410_v17 = vadd.f32 -0.28449672, %v1350_v54  ;;  %5661 = vpow2.f32 %v6504_v30 }
 0x105   :  { %v2117_v55 = vsel %vm1937_vm2, %v2057_v25, %v1997_v61  ;;  %v1880_v56 = vmul.f32 %v6523_v20, %v1580_v29  ;;  %v1531_v58 = vadd.f32 0.2548296, %v1471_v44  ;;  %v2058_v61 = vsub.f32 1.0, %v1998_v50 }
 0x106   :  { %v2119_v59 = vsel %vm1939_vm3, %v2059_v12, %v1999_v4  ;;  %v6581_v57 = vmul.f32 %v2117_v55, %v6416_v35  ;;  %v1889_v8 = vmul.f32 %v5652_v3, %v1589_v27  ;;  %v1470_v4 = vmul.f32 %v6528_v34, %v1410_v17  ;;  %v6613_v17 = vpop.f32.mrb[15].mxu1 }
 0x107   :  { %v2000_v2 = vmul.f32 0.5, %v1880_v56  ;;  %v6585_v20 = vmul.f32 %v2119_v59, %v6419_v36  ;;  %v1591_v46 = vmul.f32 %v6519_v1, %v1531_v58  ;;  %v1352_v13 = vmul.f32 %v6533_v48, %v1292_v49 }
 0x108   :  { %10149 = vst [vmem:[#allocation5_spill] sm:$0xff] %v6581_v57  ;;  %v2118_v30 = vsel %vm1938_vm4, %v2058_v61, %v1998_v50  ;;  %v2009_v25 = vmul.f32 0.5, %v1889_v8  ;;  %5663 = vpow2.f32 %v6531_v45  ;;  %v1723_v35 = vsub.f32 0.0, %v1663_v51 }
 0x109   :  { %10150 = vst [vmem:[#allocation6_spill] sm:$0xff] %v6585_v20  ;;  %v2060_v16 = vsub.f32 1.0, %v2000_v2  ;;  %v1891_v3 = vmul.f32 %v5654_v19, %v1591_v46  ;;  %v1530_v29 = vadd.f32 0.2548296, %v1470_v4  ;;  %v1412_v33 = vadd.f32 -0.28449672, %v1352_v13 }
 0x10a   :  { %v2369_v36 = vmul.f32 %v6581_v57, %v6581_v57  ;;  %v2069_v12 = vsub.f32 1.0, %v2009_v25  ;;  %v1121_v1 = vmul.f32 1.0614054, %v6559_v60  ;;  %v1123_v44 = vmul.f32 1.0614054, %v6565_v42 }
 0x10b   :  { %v2371_v54 = vmul.f32 %v6585_v20, %v6585_v20  ;;  %v6601_v45 = vmul.f32 %v2118_v30, %v6422_v39  ;;  %v2011_v51 = vmul.f32 0.5, %v1891_v3  ;;  %v1590_v19 = vmul.f32 %v6528_v34, %v1530_v29 }
 0x10c   :  { %v2129_v49 = vsel %vm1949_vm5, %v2069_v12, %v2009_v25  ;;  %v1472_v55 = vmul.f32 %v6533_v48, %v1412_v33  ;;  %v1181_v50 = vadd.f32 -1.4531521, %v1121_v1  ;;  %v1183_v56 = vadd.f32 -1.4531521, %v1123_v44 }
 0x10d   :  { %10151 = vst [vmem:[#allocation7_spill] sm:$0xff] %v6601_v45  ;;  %v2120_v27 = vsel %vm1940_vm6, %v2060_v16, %v2000_v2  ;;  %v6610_v59 = vmul.f32 %v2129_v49, %v6434_v52  ;;  %v2071_v58 = vsub.f32 1.0, %v2011_v51  ;;  %v1890_v39 = vmul.f32 %v6551_v53, %v1590_v19  ;;  %v6652_v49 = vpop.f32.mrb[16].mxu0 }
 0x10e   :  { %v1532_v61 = vadd.f32 0.2548296, %v1472_v55  ;;  %v1241_v34 = vmul.f32 %v6559_v60, %v1181_v50  ;;  %v1243_v8 = vmul.f32 %v6565_v42, %v1183_v56  ;;  %v1809_v46 = vmul.f32 1.442695, %v1723_v35  ;;  %v5662_v4 = vpop.eup %5661  ;;  %v6654_v55 = vpop.f32.mrb[16].mxu1 }
 0x10f   :  { %10152 = vst [vmem:[#allocation8_spill] sm:$0xff] %v6610_v59  ;;  %v6619_v13 = vadd.f32 %v6610_v59, %v6581_v57  ;;  %v2381_v52 = vmul.f32 %v6610_v59, %v6610_v59  ;;  %v2131_v2 = vsel %vm1951_vm7, %v2071_v58, %v2011_v51  ;;  %v2010_v53 = vmul.f32 0.5, %v1890_v39 }
 0x110   :  { %v6626_v30 = vmul.f32 %v2131_v2, %v6437_v62  ;;  %v1592_v25 = vmul.f32 %v6533_v48, %v1532_v61  ;;  %v1301_v16 = vadd.f32 1.4214138, %v1241_v34  ;;  %v1303_v3 = vadd.f32 1.4214138, %v1243_v8  ;;  %v6665_v61 = vpop.permute.xlu1 %62 }
 0x111   :  { %v6630_v35 = vmul.f32 %v2120_v27, %v6425_v40  ;;  %v6632_v29 = vadd.f32 %v2381_v52, %v2369_v36  ;;  %v2070_v33 = vsub.f32 1.0, %v2010_v53  ;;  %5665 = vpow2.f32 %v1809_v46  ;;  %10156 = vst [vmem:[#allocation12_spill] sm:$0xff] %v6665_v61 }
 0x112   :  { %10153 = vst [vmem:[#allocation9_spill] sm:$0xff] %v6626_v30  ;;  %v5664_v12 = vpop.eup %5663  ;;  %v6636_v1 = vadd.f32 %v6626_v30, %v6585_v20  ;;  %v2383_v62 = vmul.f32 %v6626_v30, %v6626_v30  ;;  %v1892_v44 = vmul.f32 %v5662_v4, %v1592_v25  ;;  %v1361_v48 = vmul.f32 %v6559_v60, %v1301_v16 }
 0x113   :  { %10154 = vst [vmem:[#allocation10_spill] sm:$0xff] %v6630_v35  ;;  %v2130_v51 = vsel %vm1950_vm8, %v2070_v33, %v2010_v53  ;;  %v1363_v40 = vmul.f32 %v6565_v42, %v1303_v3  ;;  %v6646_v36 = vadd.f32 %v6441_v6, %v6461_v28  ;;  %v6650_v19 = vadd.f32 %v6443_v7, %v6461_v28 }
 0x114   :  { %v6656_v50 = vadd.f32 %v2383_v62, %v2371_v54  ;;  %v6659_v56 = vmul.f32 %v2130_v51, %v6452_v21  ;;  %v2012_v27 = vmul.f32 0.5, %v1892_v44  ;;  %v1421_v58 = vadd.f32 -0.28449672, %v1361_v48 }
 0x115   :  { %v2370_v39 = vmul.f32 %v6601_v45, %v6601_v45  ;;  %vm1952_vm9 = vcmp.ge.f32.partialorder %v6455_v22, 0.0  ;;  %v1423_v6 = vadd.f32 -0.28449672, %v1363_v40  ;;  %v762_v7 = vmul.f32 0.70710677, %v6646_v36 }
 0x116   :  { %10155 = vst [vmem:[#allocation11_spill] sm:$0xff] %v6659_v56  ;;  %v6669_v34 = vadd.f32 %v6659_v56, %v6601_v45  ;;  %v2382_v21 = vmul.f32 %v6659_v56, %v6659_v56  ;;  %v2072_v54 = vsub.f32 1.0, %v2012_v27  ;;  %v1481_v8 = vmul.f32 %v6559_v60, %v1421_v58 }
 0x117   :  { %v1483_v46 = vmul.f32 %v6565_v42, %v1423_v6  ;;  %v822_v4 = vand.u32 2147483647, %v762_v7  ;;  %v764_v52 = vmul.f32 0.70710677, %v6650_v19  ;;  %v6678_v2 = vadd.f32 %v6446_v14, %v6665_v61 }
 0x118   :  { %v2372_v53 = vmul.f32 %v6630_v35, %v6630_v35  ;;  %v6682_v25 = vadd.f32 %v2382_v21, %v2370_v39  ;;  %v2132_v16 = vsel %vm1952_vm9, %v2072_v54, %v2012_v27  ;;  %v1541_v3 = vadd.f32 0.2548296, %v1481_v8 }
 0x119   :  { %v6685_v33 = vmul.f32 %v2132_v16, %v6455_v22  ;;  %v1543_v62 = vadd.f32 0.2548296, %v1483_v46  ;;  %v882_v44 = vmul.f32 0.3275911, %v822_v4  ;;  %v6689_v48 = vadd.f32 %v6449_v18, %v6665_v61 }
 0x11a   :  { %v1601_v51 = vmul.f32 %v6559_v60, %v1541_v3  ;;  %v1662_v14 = vmul.f32 %v822_v4, %v822_v4  ;;  %v824_v40 = vand.u32 2147483647, %v764_v52  ;;  %v773_v58 = vmul.f32 0.70710677, %v6678_v2  ;;  %v6702_v3 = vpop.f32.mrb[17].mxu0 }
 0x11b   :  { %10157 = vst [vmem:[#allocation13_spill] sm:$0xff] %v6685_v33  ;;  %v5666_v6 = vpop.eup %5665  ;;  %v6695_v27 = vadd.f32 %v6685_v33, %v6630_v35  ;;  %v2384_v22 = vmul.f32 %v6685_v33, %v6685_v33  ;;  %v1603_v39 = vmul.f32 %v6565_v42, %v1543_v62  ;;  %v942_v7 = vadd.f32 1.0, %v882_v44 }
 0x11c   :  { %v1901_v21 = vmul.f32 %v5664_v12, %v1601_v51  ;;  %v884_v18 = vmul.f32 0.3275911, %v824_v40  ;;  %v1664_v54 = vmul.f32 %v824_v40, %v824_v40  ;;  %v833_v46 = vand.u32 2147483647, %v773_v58  ;;  %v6711_v58 = vpop.f32.mrb[17].mxu1 }
 0x11d   :  { %v6700_v8 = vadd.f32 %v2384_v22, %v2372_v53  ;;  %v1903_v60 = vmul.f32 %v5666_v6, %v1603_v39  ;;  %5667 = vrcp.f32 %v942_v7  ;;  %v1722_v52 = vsub.f32 0.0, %v1662_v14 }
 0x11e   :  { %v2021_v4 = vmul.f32 0.5, %v1901_v21  ;;  %v944_v16 = vadd.f32 1.0, %v884_v18  ;;  %v893_v20 = vmul.f32 0.3275911, %v833_v46  ;;  %v1673_v59 = vmul.f32 %v833_v46, %v833_v46 }
 0x11f   :  { %v2023_v30 = vmul.f32 0.5, %v1903_v60  ;;  %v775_v57 = vmul.f32 0.70710677, %v6689_v48  ;;  %vm1961_vm10 = vcmp.ge.f32.partialorder %v6468_v37, 0.0  ;;  %v1724_v12 = vsub.f32 0.0, %v1664_v54  ;;  %v6726_v54 = vpop.permute.xlu0 %67 }
 0x120   :  { %v2081_v42 = vsub.f32 1.0, %v2021_v4  ;;  %5669 = vrcp.f32 %v944_v16  ;;  %v953_v53 = vadd.f32 1.0, %v893_v20  ;;  %v1733_v44 = vsub.f32 0.0, %v1673_v59 }
 0x121   :  { %v2083_v62 = vsub.f32 1.0, %v2023_v30  ;;  %vm1963_vm11 = vcmp.ge.f32.partialorder %v6485_v9, 0.0  ;;  %v835_v14 = vand.u32 2147483647, %v775_v57  ;;  %v6709_v40 = vadd.f32 %v6457_v23, %v6665_v61 }
 0x122   :  { %v2141_v51 = vsel %vm1961_vm10, %v2081_v42, %v2021_v4  ;;  %v1807_v39 = vmul.f32 1.442695, %v1722_v52  ;;  %5671 = vrcp.f32 %v953_v53  ;;  %v1811_v18 = vmul.f32 1.442695, %v1724_v12 }
 0x123   :  { %v6714_v6 = vmul.f32 %v2141_v51, %v6468_v37  ;;  %v2143_v22 = vsel %vm1963_vm11, %v2083_v62, %v2023_v30  ;;  %v895_v20 = vmul.f32 0.3275911, %v835_v14  ;;  %v1675_v59 = vmul.f32 %v835_v14, %v835_v14 }
 0x124   :  { %v6717_v7 = vmul.f32 %v2143_v22, %v6485_v9  ;;  %v774_v21 = vmul.f32 0.70710677, %v6709_v40  ;;  %v1829_v37 = vmul.f32 1.442695, %v1733_v44  ;;  %v6741_v16 = vadd.f32 %v6459_v24, %v6665_v61 }
 0x125   :  { %10158 = vst [vmem:[#allocation14_spill] sm:$0xff] %v6714_v6  ;;  %v6722_v57 = vadd.f32 %v6619_v13, %v6714_v6  ;;  %v2393_v23 = vmul.f32 %v6714_v6, %v6714_v6  ;;  %v955_v60 = vadd.f32 1.0, %v895_v20  ;;  %v1735_v46 = vsub.f32 0.0, %v1675_v59 }
 0x126   :  { %10159 = vst [vmem:[#allocation15_spill] sm:$0xff] %v6717_v7  ;;  %v6730_v30 = vadd.f32 %v6636_v1, %v6717_v7  ;;  %v2395_v9 = vmul.f32 %v6717_v7, %v6717_v7  ;;  %v834_v52 = vand.u32 2147483647, %v774_v21  ;;  %v6745_v42 = vadd.f32 %v6465_v31, %v6726_v54 }
 0x127   :  { %v6734_v4 = vpop.eup %5667  ;;  %v6737_v13 = vadd.f32 %v6632_v29, %v2393_v23  ;;  %5673 = vrcp.f32 %v955_v60  ;;  %v1833_v62 = vmul.f32 1.442695, %v1735_v46  ;;  %v776_v44 = vmul.f32 0.70710677, %v6741_v16 }
 0x128   :  { %v6748_v1 = vadd.f32 %v6656_v50, %v2395_v9  ;;  %v1122_v12 = vmul.f32 1.0614054, %v6734_v4  ;;  %5675 = vpow2.f32 %v1807_v39  ;;  %v894_v53 = vmul.f32 0.3275911, %v834_v52 }
 0x129   :  { %v1674_v29 = vmul.f32 %v834_v52, %v834_v52  ;;  %5677 = vpow2.f32 %v1811_v18  ;;  %v785_v24 = vmul.f32 0.70710677, %v6745_v42  ;;  %v836_v50 = vand.u32 2147483647, %v776_v44 }
 0x12a   :  { %v1182_v51 = vadd.f32 -1.4531521, %v1122_v12  ;;  %v6753_v14 = vpop.eup %5669  ;;  %5679 = vpow2.f32 %v1829_v37  ;;  %v954_v31 = vadd.f32 1.0, %v894_v53  ;;  %v6761_v18 = vadd.f32 %v6470_v38, %v6726_v54 }
 0x12b   :  { %v1734_v22 = vsub.f32 0.0, %v1674_v29  ;;  %v1124_v59 = vmul.f32 1.0614054, %v6753_v14  ;;  %5681 = vpow2.f32 %v1833_v62  ;;  %v845_v39 = vand.u32 2147483647, %v785_v24 }
 0x12c   :  { %v1242_v20 = vmul.f32 %v6734_v4, %v1182_v51  ;;  %v6757_v21 = vpop.eup %5671  ;;  %5683 = vrcp.f32 %v954_v31  ;;  %v896_v23 = vmul.f32 0.3275911, %v836_v50  ;;  %v1676_v9 = vmul.f32 %v836_v50, %v836_v50 }
 0x12d   :  { %v1184_v37 = vadd.f32 -1.4531521, %v1124_v59  ;;  %v1133_v46 = vmul.f32 1.0614054, %v6757_v21  ;;  %v1685_v52 = vmul.f32 %v845_v39, %v845_v39  ;;  %v1831_v12 = vmul.f32 1.442695, %v1734_v22 }
 0x12e   :  { %v1302_v60 = vadd.f32 1.4214138, %v1242_v20  ;;  %v956_v53 = vadd.f32 1.0, %v896_v23  ;;  %v1736_v29 = vsub.f32 0.0, %v1676_v9  ;;  %v905_v44 = vmul.f32 0.3275911, %v845_v39 }
 0x12f   :  { %v1244_v51 = vmul.f32 %v6753_v14, %v1184_v37  ;;  %v1193_v24 = vadd.f32 -1.4531521, %v1133_v46  ;;  %v1745_v31 = vsub.f32 0.0, %v1685_v52  ;;  %v787_v38 = vmul.f32 0.70710677, %v6761_v18  ;;  %v6767_v20 = vpop.f32.mrb[18].mxu0 }
 0x130   :  { %v1362_v62 = vmul.f32 %v6734_v4, %v1302_v60  ;;  %5685 = vrcp.f32 %v956_v53  ;;  %v1835_v50 = vmul.f32 1.442695, %v1736_v29  ;;  %v965_v7 = vadd.f32 1.0, %v905_v44  ;;  %10160 = vst [vmem:[#allocation16_spill] sm:$0xff] %v6767_v20 }
 0x131   :  { %v6769_v59 = vpop.eup %5673  ;;  %v1304_v22 = vadd.f32 1.4214138, %v1244_v51  ;;  %v1253_v23 = vmul.f32 %v6757_v21, %v1193_v24  ;;  %v6774_v39 = vadd.f32 %v6472_v41, %v6726_v54  ;;  %5687 = vpow2.f32 %v1831_v12 }
 0x132   :  { %v1422_v6 = vadd.f32 -0.28449672, %v1362_v62  ;;  %v5676_v9 = vpop.eup %5675  ;;  %v1135_v60 = vmul.f32 1.0614054, %v6769_v59  ;;  %v1853_v37 = vmul.f32 1.442695, %v1745_v31  ;;  %5689 = vrcp.f32 %v965_v7 }
 0x133   :  { %v847_v46 = vand.u32 2147483647, %v787_v38  ;;  %v5678_v52 = vpop.eup %5677  ;;  %v1364_v29 = vmul.f32 %v6753_v14, %v1304_v22  ;;  %v1313_v44 = vadd.f32 1.4214138, %v1253_v23  ;;  %5691 = vpow2.f32 %v1835_v50  ;;  %v6787_v50 = vpop.f32.mrb[18].mxu1 }
 0x134   :  { %v1482_v53 = vmul.f32 %v6734_v4, %v1422_v6  ;;  %v5680_v62 = vpop.eup %5679  ;;  %v1195_v51 = vadd.f32 -1.4531521, %v1135_v60  ;;  %v786_v31 = vmul.f32 0.70710677, %v6774_v39  ;;  %vm1962_vm12 = vcmp.ge.f32.partialorder %v6646_v36, 0.0  ;;  %10161 = vst [vmem:[#allocation17_spill] sm:$0xff] %v6787_v50 }
 0x135   :  { %v907_v24 = vmul.f32 0.3275911, %v847_v46  ;;  %v1687_v33 = vmul.f32 %v847_v46, %v847_v46  ;;  %v6779_v41 = vpop.eup %5681  ;;  %v1424_v56 = vadd.f32 -0.28449672, %v1364_v29  ;;  %v1373_v12 = vmul.f32 %v6757_v21, %v1313_v44 }
 0x136   :  { %v1542_v35 = vadd.f32 0.2548296, %v1482_v53  ;;  %v6783_v38 = vpop.eup %5683  ;;  %v1255_v6 = vmul.f32 %v6769_v59, %v1195_v51  ;;  %5693 = vpow2.f32 %v1853_v37  ;;  %v846_v45 = vand.u32 2147483647, %v786_v31 }
 0x137   :  { %v967_v7 = vadd.f32 1.0, %v907_v24  ;;  %v1747_v22 = vsub.f32 0.0, %v1687_v33  ;;  %v1484_v60 = vmul.f32 %v6753_v14, %v1424_v56  ;;  %v1433_v46 = vadd.f32 -0.28449672, %v1373_v12  ;;  %v6793_v24 = vpop.f32.mrb[19].mxu0 }
 0x138   :  { %v1602_v23 = vmul.f32 %v6734_v4, %v1542_v35  ;;  %v1134_v53 = vmul.f32 1.0614054, %v6783_v38  ;;  %v1315_v29 = vadd.f32 1.4214138, %v1255_v6  ;;  %10162 = vst [vmem:[#allocation18_spill] sm:$0xff] %v6793_v24  ;;  %vm1964_vm13 = vcmp.ge.f32.partialorder %v6650_v19, 0.0 }
 0x139   :  { %5695 = vrcp.f32 %v967_v7  ;;  %v1857_v44 = vmul.f32 1.442695, %v1747_v22  ;;  %v1544_v61 = vadd.f32 0.2548296, %v1484_v60  ;;  %v1493_v51 = vmul.f32 %v6757_v21, %v1433_v46 }
 0x13a   :  { %v1902_v20 = vmul.f32 %v5676_v9, %v1602_v23  ;;  %v1194_v37 = vadd.f32 -1.4531521, %v1134_v53  ;;  %v6795_v33 = vpop.eup %5685  ;;  %v1375_v35 = vmul.f32 %v6769_v59, %v1315_v29  ;;  %v906_v56 = vmul.f32 0.3275911, %v846_v45 }
 0x13b   :  { %5697 = vpow2.f32 %v1857_v44  ;;  %v1604_v12 = vmul.f32 %v6753_v14, %v1544_v61  ;;  %v1553_v6 = vadd.f32 0.2548296, %v1493_v51  ;;  %v6801_v31 = vpop.eup %5687  ;;  %vm1973_vm14 = vcmp.ge.f32.partialorder %v6678_v2, 0.0 }
 0x13c   :  { %v2022_v4 = vmul.f32 0.5, %v1902_v20  ;;  %v1254_v9 = vmul.f32 %v6783_v38, %v1194_v37  ;;  %v1435_v7 = vadd.f32 -0.28449672, %v1375_v35  ;;  %v1136_v22 = vmul.f32 1.0614054, %v6795_v33  ;;  %v6807_v46 = vpop.eup %5689 }
 0x13d   :  { %v966_v23 = vadd.f32 1.0, %v906_v56  ;;  %v6805_v60 = vmul.f32 %v846_v45, %v846_v45  ;;  %v1904_v29 = vmul.f32 %v5678_v52, %v1604_v12  ;;  %v1613_v20 = vmul.f32 %v6757_v21, %v1553_v6  ;;  %v6810_v14 = vpop.eup %5691 }
 0x13e   :  { %v2082_v53 = vsub.f32 1.0, %v2022_v4  ;;  %v1314_v61 = vadd.f32 1.4214138, %v1254_v9  ;;  %v1495_v44 = vmul.f32 %v6769_v59, %v1435_v7  ;;  %v1196_v51 = vadd.f32 -1.4531521, %v1136_v22 }
 0x13f   :  { %v1145_v37 = vmul.f32 1.0614054, %v6807_v46  ;;  %5699 = vrcp.f32 %v966_v23  ;;  %v2024_v45 = vmul.f32 0.5, %v1904_v29  ;;  %v1913_v56 = vmul.f32 %v5680_v62, %v1613_v20 }
 0x140   :  { %v2142_v35 = vsel %vm1962_vm12, %v2082_v53, %v2022_v4  ;;  %v1374_v24 = vmul.f32 %v6783_v38, %v1314_v61  ;;  %v6817_v50 = vpop.eup %5693  ;;  %v1555_v52 = vadd.f32 0.2548296, %v1495_v44  ;;  %v1256_v12 = vmul.f32 %v6795_v33, %v1196_v51  ;;  %v6838_v44 = vpop.f32.mrb[19].mxu1 }
 0x141   :  { %v6820_v21 = vmul.f32 %v2142_v35, %v6646_v36  ;;  %v1205_v6 = vadd.f32 -1.4531521, %v1145_v37  ;;  %v2084_v9 = vsub.f32 1.0, %v2024_v45  ;;  %v2033_v7 = vmul.f32 0.5, %v1913_v56 }
 0x142   :  { %vm1975_vm15 = vcmp.ge.f32.partialorder %v6689_v48, 0.0  ;;  %v1434_v22 = vadd.f32 -0.28449672, %v1374_v24  ;;  %v1746_v4 = vsub.f32 0.0, %v6805_v60  ;;  %v1615_v53 = vmul.f32 %v6769_v59, %v1555_v52 }
 0x143   :  { %10163 = vst [vmem:[#allocation19_spill] sm:$0xff] %v6820_v21  ;;  %v6825_v23 = vpop.eup %5695  ;;  %v6829_v62 = vadd.f32 %v6669_v34, %v6820_v21  ;;  %v2394_v36 = vmul.f32 %v6820_v21, %v6820_v21  ;;  %v1316_v29 = vadd.f32 1.4214138, %v1256_v12  ;;  %v2144_v20 = vsel %vm1964_vm13, %v2084_v9, %v2024_v45 }
 0x144   :  { %v2093_v61 = vsub.f32 1.0, %v2033_v7  ;;  %v1494_v24 = vmul.f32 %v6783_v38, %v1434_v22  ;;  %v1265_v60 = vmul.f32 %v6807_v46, %v1205_v6  ;;  %v6846_v37 = vmul.f32 %v2144_v20, %v6650_v19 }
 0x145   :  { %v6840_v51 = vpop.eup %5697  ;;  %v6843_v34 = vadd.f32 %v6682_v25, %v2394_v36  ;;  %v1915_v59 = vmul.f32 %v6779_v41, %v1615_v53  ;;  %v1376_v35 = vmul.f32 %v6795_v33, %v1316_v29  ;;  %v1147_v12 = vmul.f32 1.0614054, %v6825_v23  ;;  %v6865_v53 = vpop.f32.mrb[20].mxu0 }
 0x146   :  { %10164 = vst [vmem:[#allocation20_spill] sm:$0xff] %v6846_v37  ;;  %v2153_v45 = vsel %vm1973_vm14, %v2093_v61, %v2033_v7  ;;  %v1554_v56 = vadd.f32 0.2548296, %v1494_v24  ;;  %v1325_v52 = vadd.f32 1.4214138, %v1265_v60  ;;  %v6855_v6 = vadd.f32 %v6695_v27, %v6846_v37 }
 0x147   :  { %v2396_v25 = vmul.f32 %v6846_v37, %v6846_v37  ;;  %v6860_v19 = vmul.f32 %v2153_v45, %v6678_v2  ;;  %v2035_v41 = vmul.f32 0.5, %v1915_v59  ;;  %vm1974_vm0 = vcmp.ge.f32.partialorder %v6709_v40, 0.0 }
 0x148   :  { %v1614_v9 = vmul.f32 %v6783_v38, %v1554_v56  ;;  %v1436_v7 = vadd.f32 -0.28449672, %v1376_v35  ;;  %v1385_v22 = vmul.f32 %v6807_v46, %v1325_v52  ;;  %v1207_v36 = vadd.f32 -1.4531521, %v1147_v12 }
 0x149   :  { %10165 = vst [vmem:[#allocation21_spill] sm:$0xff] %v6860_v19  ;;  %v6867_v29 = vpop.eup %5699  ;;  %v6870_v27 = vadd.f32 %v6700_v8, %v2396_v25  ;;  %v6874_v2 = vadd.f32 %v6722_v57, %v6860_v19  ;;  %v2405_v20 = vmul.f32 %v6860_v19, %v6860_v19  ;;  %v2095_v61 = vsub.f32 1.0, %v2035_v41 }
 0x14a   :  { %v1914_v38 = vmul.f32 %v6801_v31, %v1614_v9  ;;  %v1496_v24 = vmul.f32 %v6795_v33, %v1436_v7  ;;  %v1445_v60 = vadd.f32 -0.28449672, %v1385_v22  ;;  %v1267_v59 = vmul.f32 %v6825_v23, %v1207_v36 }
 0x14b   :  { %v6882_v35 = vadd.f32 %v6737_v13, %v2405_v20  ;;  %v2155_v8 = vsel %vm1975_vm15, %v2095_v61, %v2035_v41  ;;  %v1146_v57 = vmul.f32 1.0614054, %v6867_v29  ;;  %v1855_v45 = vmul.f32 1.442695, %v1746_v4 }
 0x14c   :  { %v6888_v56 = vmul.f32 %v2155_v8, %v6689_v48  ;;  %v2034_v52 = vmul.f32 0.5, %v1914_v38  ;;  %v1556_v12 = vadd.f32 0.2548296, %v1496_v24  ;;  %v1505_v31 = vmul.f32 %v6807_v46, %v1445_v60  ;;  %v6909_v38 = vpop.f32.mrb[20].mxu1 }
 0x14d   :  { %v1327_v25 = vadd.f32 1.4214138, %v1267_v59  ;;  %v1206_v9 = vadd.f32 -1.4531521, %v1146_v57  ;;  %v6893_v7 = vadd.f32 %v6474_v47, %v6726_v54  ;;  %v6897_v13 = vadd.f32 %v6487_v10, %v6413_v32 }
 0x14e   :  { %10166 = vst [vmem:[#allocation22_spill] sm:$0xff] %v6888_v56  ;;  %v6901_v4 = vadd.f32 %v6730_v30, %v6888_v56  ;;  %v2407_v48 = vmul.f32 %v6888_v56, %v6888_v56  ;;  %v2094_v41 = vsub.f32 1.0, %v2034_v52  ;;  %v1616_v22 = vmul.f32 %v6795_v33, %v1556_v12 }
 0x14f   :  { %v1565_v36 = vadd.f32 0.2548296, %v1505_v31  ;;  %v1387_v20 = vmul.f32 %v6825_v23, %v1327_v25  ;;  %v1266_v47 = vmul.f32 %v6867_v29, %v1206_v9  ;;  %v788_v61 = vmul.f32 0.70710677, %v6893_v7 }
 0x150   :  { %v6912_v10 = vadd.f32 %v6748_v1, %v2407_v48  ;;  %v2154_v30 = vsel %vm1974_vm0, %v2094_v41, %v2034_v52  ;;  %v1916_v24 = vmul.f32 %v6810_v14, %v1616_v22  ;;  %vm1976_vm1 = vcmp.ge.f32.partialorder %v6741_v16, 0.0 }
 0x151   :  { %v6919_v33 = vmul.f32 %v2154_v30, %v6709_v40  ;;  %v1625_v60 = vmul.f32 %v6807_v46, %v1565_v36  ;;  %v1447_v59 = vadd.f32 -0.28449672, %v1387_v20  ;;  %v1326_v8 = vadd.f32 1.4214138, %v1266_v47 }
 0x152   :  { %v2036_v57 = vmul.f32 0.5, %v1916_v24  ;;  %5701 = vpow2.f32 %v1855_v45  ;;  %v848_v12 = vand.u32 2147483647, %v788_v61  ;;  %v741_v1 = vmul.f32 0.70710677, %v6897_v13 }
 0x153   :  { %10167 = vst [vmem:[#allocation23_spill] sm:$0xff] %v6919_v33  ;;  %v6925_v31 = vadd.f32 %v6829_v62, %v6919_v33  ;;  %v2406_v14 = vmul.f32 %v6919_v33, %v6919_v33  ;;  %v1925_v52 = vmul.f32 %v6817_v50, %v1625_v60  ;;  %v1507_v40 = vmul.f32 %v6825_v23, %v1447_v59  ;;  %v6935_v62 = vpop.f32.mrb[21].mxu0 }
 0x154   :  { %v2096_v25 = vsub.f32 1.0, %v2036_v57  ;;  %v1386_v46 = vmul.f32 %v6867_v29, %v1326_v8  ;;  %v908_v9 = vmul.f32 0.3275911, %v848_v12  ;;  %v1688_v48 = vmul.f32 %v848_v12, %v848_v12 }
 0x155   :  { %v6933_v45 = vadd.f32 %v6843_v34, %v2406_v14  ;;  %v2045_v41 = vmul.f32 0.5, %v1925_v52  ;;  %v1567_v22 = vadd.f32 0.2548296, %v1507_v40  ;;  %v801_v36 = vand.u32 2147483647, %v741_v1 }
 0x156   :  { %v2156_v20 = vsel %vm1976_vm1, %v2096_v25, %v2036_v57  ;;  %v1446_v47 = vadd.f32 -0.28449672, %v1386_v46  ;;  %v968_v50 = vadd.f32 1.0, %v908_v9  ;;  %v1748_v61 = vsub.f32 0.0, %v1688_v48  ;;  %v6955_v25 = vpop.f32.mrb[21].mxu1 }
 0x157   :  { %v6940_v30 = vmul.f32 %v2156_v20, %v6741_v16  ;;  %v2105_v24 = vsub.f32 1.0, %v2045_v41  ;;  %v1627_v60 = vmul.f32 %v6825_v23, %v1567_v22  ;;  %v861_v59 = vmul.f32 0.3275911, %v801_v36 }
 0x158   :  { %vm1985_vm2 = vcmp.ge.f32.partialorder %v6745_v42, 0.0  ;;  %v1506_v34 = vmul.f32 %v6867_v29, %v1446_v47  ;;  %5703 = vrcp.f32 %v968_v50  ;;  %v1641_v8 = vmul.f32 %v801_v36, %v801_v36 }
 0x159   :  { %10168 = vst [vmem:[#allocation24_spill] sm:$0xff] %v6940_v30  ;;  %v6947_v12 = vadd.f32 %v6855_v6, %v6940_v30  ;;  %v2408_v57 = vmul.f32 %v6940_v30, %v6940_v30  ;;  %v2165_v1 = vsel %vm1985_vm2, %v2105_v24, %v2045_v41  ;;  %v1927_v16 = vmul.f32 %v6840_v51, %v1627_v60 }
 0x15a   :  { %v6953_v14 = vmul.f32 %v2165_v1, %v6745_v42  ;;  %v1566_v23 = vadd.f32 0.2548296, %v1506_v34  ;;  %v1859_v52 = vmul.f32 1.442695, %v1748_v61  ;;  %v921_v40 = vadd.f32 1.0, %v861_v59 }
 0x15b   :  { %v6958_v46 = vadd.f32 %v6870_v27, %v2408_v57  ;;  %v2047_v9 = vmul.f32 0.5, %v1927_v16  ;;  %v1701_v6 = vsub.f32 0.0, %v1641_v8  ;;  %v6962_v48 = vadd.f32 %v6489_v11, %v6413_v32 }
 0x15c   :  { %10169 = vst [vmem:[#allocation25_spill] sm:$0xff] %v6953_v14  ;;  %v5702_v41 = vpop.eup %5701  ;;  %v2240_v51 = vadd.f32 %v6874_v2, %v6953_v14  ;;  %v2417_v42 = vmul.f32 %v6953_v14, %v6953_v14  ;;  %v1626_v22 = vmul.f32 %v6867_v29, %v1566_v23  ;;  %5705 = vrcp.f32 %v921_v40 }
 0x15d   :  { %v2107_v36 = vsub.f32 1.0, %v2047_v9  ;;  %v1765_v20 = vmul.f32 1.442695, %v1701_v6  ;;  %v743_v27 = vmul.f32 0.70710677, %v6962_v48  ;;  %vm1987_vm3 = vcmp.ge.f32.partialorder %v6761_v18, 0.0 }
 0x15e   :  { %v2241_v47 = vrot.slane %v2240_v51, 4  ;;  %v2432_v50 = vadd.f32 %v6882_v35, %v2417_v42  ;;  %v1926_v11 = vmul.f32 %v5702_v41, %v1626_v22  ;;  %vm1986_vm4 = vcmp.ge.f32.partialorder %v6774_v39, 0.0 }
 0x15f   :  { %v2167_v61 = vsel %vm1987_vm3, %v2107_v36, %v2047_v9  ;;  %5707 = vpow2.f32 %v1859_v52  ;;  %v803_v2 = vand.u32 2147483647, %v743_v27  ;;  %v6978_v35 = vadd.f32 %v6497_v0, %v6413_v32 }
 0x160   :  { %v2242_v24 = vadd.f32 %v2241_v47, %v2240_v51  ;;  %v2433_v60 = vrot.slane %v2432_v50, 4  ;;  %v6974_v29 = vmul.f32 %v2167_v61, %v6761_v18  ;;  %v2046_v59 = vmul.f32 0.5, %v1926_v11 }
 0x161   :  { %5709 = vpow2.f32 %v1765_v20  ;;  %v863_v34 = vmul.f32 0.3275911, %v803_v2  ;;  %v1643_v8 = vmul.f32 %v803_v2, %v803_v2  ;;  %vm1988_vm5 = vcmp.ge.f32.partialorder %v6893_v7, 0.0 }
 0x162   :  { %10170 = vst [vmem:[#allocation26_spill] sm:$0xff] %v6974_v29  ;;  %v6980_v57 = vpop.eup %5703  ;;  %v2243_v1 = vrot.slane %v2242_v24, 2  ;;  %v2434_v16 = vadd.f32 %v2433_v60, %v2432_v50  ;;  %v2260_v23 = vadd.f32 %v6901_v4, %v6974_v29  ;;  %v2419_v52 = vmul.f32 %v6974_v29, %v6974_v29 }
 0x163   :  { %v2106_v18 = vsub.f32 1.0, %v2046_v59  ;;  %v1148_v40 = vmul.f32 1.0614054, %v6980_v57  ;;  %v923_v9 = vadd.f32 1.0, %v863_v34  ;;  %v1703_v6 = vsub.f32 0.0, %v1643_v8 }
 0x164   :  { %v2244_v41 = vadd.f32 %v2243_v1, %v2242_v24  ;;  %v2435_v51 = vrot.slane %v2434_v16, 2  ;;  %v2261_v42 = vrot.slane %v2260_v23, 4  ;;  %v2452_v0 = vadd.f32 %v6912_v10, %v2419_v52 }
 0x165   :  { %v2166_v22 = vsel %vm1986_vm4, %v2106_v18, %v2046_v59  ;;  %v1208_v36 = vadd.f32 -1.4531521, %v1148_v40  ;;  %5711 = vrcp.f32 %v923_v9  ;;  %v742_v4 = vmul.f32 0.70710677, %v6978_v35 }
 0x166   :  { %v6991_v20 = vpop.eup %5705  ;;  %v2245_v27 = vrot.slane %v2244_v41, 1  ;;  %v2436_v47 = vadd.f32 %v2435_v51, %v2434_v16  ;;  %v2262_v50 = vadd.f32 %v2261_v42, %v2260_v23  ;;  %v2453_v11 = vrot.slane %v2452_v0, 4 }
 0x167   :  { %v6994_v61 = vmul.f32 %v2166_v22, %v6774_v39  ;;  %v1268_v2 = vmul.f32 %v6980_v57, %v1208_v36  ;;  %v1101_v10 = vmul.f32 1.0614054, %v6991_v20  ;;  %v6998_v24 = vmul.f32 1.442695, %v1703_v6  ;;  %v7013_v36 = vpop.f32.mrb[24].mxu1 }
 0x168   :  { %v2246_v60 = vadd.f32 %v2245_v27, %v2244_v41  ;;  %v2437_v59 = vrot.slane %v2436_v47, 1  ;;  %v2263_v34 = vrot.slane %v2262_v50, 2  ;;  %v2454_v8 = vadd.f32 %v2453_v11, %v2452_v0 }
 0x169   :  { %10171 = vst [vmem:[#allocation27_spill] sm:$0xff] %v6994_v61  ;;  %v5708_v1 = vpop.eup %5707  ;;  %v2250_v52 = vadd.f32 %v6925_v31, %v6994_v61  ;;  %v2418_v16 = vmul.f32 %v6994_v61, %v6994_v61  ;;  %v1328_v23 = vadd.f32 1.4214138, %v1268_v2  ;;  %v1161_v39 = vadd.f32 -1.4531521, %v1101_v10  ;;  %v7011_v31 = vpop.f32.mrb[24].mxu0 }
 0x16a   :  { %v7004_v18 = vmul.f32 0.025, %v2246_v60  ;;  %v2438_v40 = vadd.f32 %v2437_v59, %v2436_v47  ;;  %v2264_v9 = vadd.f32 %v2263_v34, %v2262_v50  ;;  %v2455_v51 = vrot.slane %v2454_v8, 2 }
 0x16b   :  { %v7006_v6 = vpop.eup %5709  ;;  %v2251_v41 = vrot.slane %v2250_v52, 4  ;;  %v2442_v42 = vadd.f32 %v6933_v45, %v2418_v16  ;;  %v1388_v0 = vmul.f32 %v6980_v57, %v1328_v23  ;;  %v1221_v22 = vmul.f32 %v6991_v20, %v1161_v39 }
 0x16c   :  { %v2549_v27 = vmul.f32 0.025, %v2438_v40  ;;  %v2561_v11 = vmul.f32 %v7004_v18, %v7004_v18  ;;  %v2265_v47 = vrot.slane %v2264_v9, 1  ;;  %v2456_v50 = vadd.f32 %v2455_v51, %v2454_v8 }
 0x16d   :  { %v2252_v2 = vadd.f32 %v2251_v41, %v2250_v52  ;;  %v2443_v10 = vrot.slane %v2442_v42, 4  ;;  %v1448_v60 = vadd.f32 -0.28449672, %v1388_v0  ;;  %v1281_v59 = vadd.f32 1.4214138, %v1221_v22 }
 0x16e   :  { %v2573_v34 = vsub.f32 %v2549_v27, %v2561_v11  ;;  %v2266_v45 = vadd.f32 %v2265_v47, %v2264_v9  ;;  %v2457_v16 = vrot.slane %v2456_v50, 1  ;;  %v802_v23 = vand.u32 2147483647, %v742_v4 }
 0x16f   :  { %v7017_v29 = vpop.eup %5711  ;;  %v2253_v39 = vrot.slane %v2252_v2, 2  ;;  %v2444_v14 = vadd.f32 %v2443_v10, %v2442_v42  ;;  %v1508_v61 = vmul.f32 %v6980_v57, %v1448_v60  ;;  %v1341_v40 = vmul.f32 %v6991_v20, %v1281_v59 }
 0x170   :  { %v2585_v56 = vadd.f32 1e-05, %v2573_v34  ;;  %v7021_v19 = vmul.f32 0.025, %v2266_v45  ;;  %v2458_v8 = vadd.f32 %v2457_v16, %v2456_v50  ;;  %v1103_v52 = vmul.f32 1.0614054, %v7017_v29 }
 0x171   :  { %v2254_v51 = vadd.f32 %v2253_v39, %v2252_v2  ;;  %v2445_v41 = vrot.slane %v2444_v14, 2  ;;  %v1568_v0 = vadd.f32 0.2548296, %v1508_v61  ;;  %v1401_v9 = vadd.f32 -0.28449672, %v1341_v40 }
 0x172   :  { %5713 = vrsqrt.f32 %v2585_v56  ;;  %v2551_v4 = vmul.f32 0.025, %v2458_v8  ;;  %v2563_v22 = vmul.f32 %v7021_v19, %v7021_v19  ;;  %v1163_v42 = vadd.f32 -1.4531521, %v1103_v52 }
 0x173   :  { %v2255_v27 = vrot.slane %v2254_v51, 1  ;;  %v2446_v11 = vadd.f32 %v2445_v41, %v2444_v14  ;;  %v1628_v47 = vmul.f32 %v6980_v57, %v1568_v0  ;;  %v1461_v10 = vmul.f32 %v6991_v20, %v1401_v9 }
 0x174   :  { %v2575_v60 = vsub.f32 %v2551_v4, %v2563_v22  ;;  %v1223_v50 = vmul.f32 %v7017_v29, %v1163_v42  ;;  %v862_v59 = vmul.f32 0.3275911, %v802_v23  ;;  %v7031_v61 = vadd.f32 %v6499_v26, %v6413_v32 }
 0x175   :  { %v2256_v56 = vadd.f32 %v2255_v27, %v2254_v51  ;;  %v2447_v2 = vrot.slane %v2446_v11, 1  ;;  %v1928_v34 = vmul.f32 %v5708_v1, %v1628_v47  ;;  %v1521_v45 = vadd.f32 0.2548296, %v1461_v10  ;;  %v7042_v27 = vpop.f32.mrb[25].mxu0 }
 0x176   :  { %v2587_v16 = vadd.f32 1e-05, %v2575_v60  ;;  %v1283_v39 = vadd.f32 1.4214138, %v1223_v50  ;;  %v922_v40 = vadd.f32 1.0, %v862_v59  ;;  %5715 = vpow2.f32 %v6998_v24 }
 0x177   :  { %v7033_v14 = vmul.f32 0.025, %v2256_v56  ;;  %v2448_v57 = vadd.f32 %v2447_v2, %v2446_v11  ;;  %v2048_v8 = vmul.f32 0.5, %v1928_v34  ;;  %v1581_v52 = vmul.f32 %v6991_v20, %v1521_v45 }
 0x178   :  { %5717 = vrsqrt.f32 %v2587_v16  ;;  %v1343_v41 = vmul.f32 %v7017_v29, %v1283_v39  ;;  %v744_v26 = vmul.f32 0.70710677, %v7031_v61  ;;  %v1642_v9 = vmul.f32 %v802_v23, %v802_v23 }
 0x179   :  { %v2550_v51 = vmul.f32 0.025, %v2448_v57  ;;  %v2562_v1 = vmul.f32 %v7033_v14, %v7033_v14  ;;  %v2108_v0 = vsub.f32 1.0, %v2048_v8  ;;  %5719 = vrcp.f32 %v922_v40 }
 0x17a   :  { %v1403_v4 = vadd.f32 -0.28449672, %v1343_v41  ;;  %v804_v22 = vand.u32 2147483647, %v744_v26  ;;  %v1881_v47 = vmul.f32 %v7006_v6, %v1581_v52  ;;  %v1702_v59 = vsub.f32 0.0, %v1642_v9 }
 0x17b   :  { %v2574_v42 = vsub.f32 %v2550_v51, %v2562_v1  ;;  %v2168_v24 = vsel %vm1988_vm5, %v2108_v0, %v2048_v8  ;;  %v7057_v56 = vadd.f32 %v6544_v15, %v6429_v43  ;;  %vm1941_vm6 = vcmp.ge.f32.partialorder %v6897_v13, 0.0 }
 0x17c   :  { %v7044_v20 = vpop.eup %5713  ;;  %v7047_v11 = vmul.f32 %v2168_v24, %v6893_v7  ;;  %v1463_v10 = vmul.f32 %v7017_v29, %v1403_v4  ;;  %v864_v60 = vmul.f32 0.3275911, %v804_v22  ;;  %v2001_v39 = vmul.f32 0.5, %v1881_v47 }
 0x17d   :  { %10172 = vst [vmem:[#allocation28_spill] sm:$0xff] %v7044_v20  ;;  %v7053_v23 = vmul.f32 %v7044_v20, %v7004_v18  ;;  %v2586_v50 = vadd.f32 1e-05, %v2574_v42  ;;  %v753_v45 = vmul.f32 0.70710677, %v7057_v56  ;;  %v7081_v47 = vadd.f32 %v6578_v63, %v6429_v43 }
 0x17e   :  { %10173 = vst [vmem:[#allocation29_spill] sm:$0xff] %v7047_v11  ;;  %v2270_v2 = vadd.f32 %v6947_v12, %v7047_v11  ;;  %v2420_v7 = vmul.f32 %v7047_v11, %v7047_v11  ;;  %v1523_v6 = vadd.f32 0.2548296, %v1463_v10  ;;  %v924_v34 = vadd.f32 1.0, %v864_v60 }
 0x17f   :  { %10174 = vst [vmem:[#allocation30_spill] sm:$0xff] %v7053_v23  ;;  %5721 = vrsqrt.f32 %v2586_v50  ;;  %v813_v15 = vand.u32 2147483647, %v753_v45  ;;  %v1767_v41 = vmul.f32 1.442695, %v1702_v59  ;;  %v2061_v9 = vsub.f32 1.0, %v2001_v39 }
 0x180   :  { %v2271_v16 = vrot.slane %v2270_v2, 4  ;;  %v2462_v18 = vadd.f32 %v6958_v46, %v2420_v7  ;;  %v5716_v40 = vpop.eup %5715  ;;  %v1583_v57 = vmul.f32 %v7017_v29, %v1523_v6  ;;  %5723 = vrcp.f32 %v924_v34  ;;  %v10188_v23 = vld [vmem:[#allocation16_spill] sm:$0xff] }
 0x181   :  { %v873_v51 = vmul.f32 0.3275911, %v813_v15  ;;  %v7076_v29 = vadd.f32 %v6549_v5, %v6429_v43  ;;  %5725 = vpow2.f32 %v1767_v41  ;;  %v1644_v59 = vmul.f32 %v804_v22, %v804_v22 }
 0x182   :  { %v7066_v8 = vpop.eup %5717  ;;  %v2272_v12 = vadd.f32 %v2271_v16, %v2270_v2  ;;  %v2463_v52 = vrot.slane %v2462_v18, 4  ;;  %v1883_v4 = vmul.f32 %v5716_v40, %v1583_v57  ;;  %v2121_v7 = vsel %vm1941_vm6, %v2061_v9, %v2001_v39 }
 0x183   :  { %10175 = vst [vmem:[#allocation31_spill] sm:$0xff] %v7066_v8  ;;  %v7070_v26 = vmul.f32 %v7066_v8, %v7021_v19  ;;  %v7072_v1 = vpop.eup %5719  ;;  %v933_v24 = vadd.f32 1.0, %v873_v51  ;;  %v755_v60 = vmul.f32 0.70710677, %v7076_v29  ;;  %vm1943_vm7 = vcmp.ge.f32.partialorder %v6962_v48, 0.0 }
 0x184   :  { %v2273_v0 = vrot.slane %v2272_v12, 2  ;;  %v2464_v46 = vadd.f32 %v2463_v52, %v2462_v18  ;;  %v1102_v42 = vmul.f32 1.0614054, %v7072_v1  ;;  %v2003_v63 = vmul.f32 0.5, %v1883_v4 }
 0x185   :  { %10176 = vst [vmem:[#allocation32_spill] sm:$0xff] %v7070_v26  ;;  %5727 = vrcp.f32 %v933_v24  ;;  %v815_v6 = vand.u32 2147483647, %v755_v60  ;;  %v1653_v16 = vmul.f32 %v813_v15, %v813_v15  ;;  %v754_v18 = vmul.f32 0.70710677, %v7081_v47 }
 0x186   :  { %v2274_v19 = vadd.f32 %v2273_v0, %v2272_v12  ;;  %v2465_v10 = vrot.slane %v2464_v46, 2  ;;  %v1162_v50 = vadd.f32 -1.4531521, %v1102_v42  ;;  %v7097_v39 = vmul.f32 %v2121_v7, %v6897_v13 }
 0x187   :  { %v875_v12 = vmul.f32 0.3275911, %v815_v6  ;;  %v1704_v51 = vsub.f32 0.0, %v1644_v59  ;;  %v814_v0 = vand.u32 2147483647, %v754_v18  ;;  %v2063_v42 = vsub.f32 1.0, %v2003_v63 }
 0x188   :  { %v2275_v5 = vrot.slane %v2274_v19, 1  ;;  %v2466_v2 = vadd.f32 %v2465_v10, %v2464_v46  ;;  %v1222_v45 = vmul.f32 %v7072_v1, %v1162_v50  ;;  %10179 = vst [vmem:[#allocation35_spill] sm:$0xff] %v7097_v39  ;;  %v1713_v24 = vsub.f32 0.0, %v1653_v16 }
 0x189   :  { %v7086_v34 = vpop.eup %5721  ;;  %v935_v4 = vadd.f32 1.0, %v875_v12  ;;  %v1771_v59 = vmul.f32 1.442695, %v1704_v51  ;;  %v7107_v18 = vmul.f32 %v7097_v39, %v7097_v39  ;;  %v7112_v16 = vadd.f32 %v6613_v17, %v6429_v43 }
 0x18a   :  { %10177 = vst [vmem:[#allocation33_spill] sm:$0xff] %v7086_v34  ;;  %v7092_v40 = vmul.f32 %v7086_v34, %v7033_v14  ;;  %v2276_v22 = vadd.f32 %v2275_v5, %v2274_v19  ;;  %v2467_v57 = vrot.slane %v2466_v2, 1  ;;  %v7094_v52 = vpop.eup %5723  ;;  %v1282_v41 = vadd.f32 1.4214138, %v1222_v45 }
 0x18b   :  { %v1104_v9 = vmul.f32 1.0614054, %v7094_v52  ;;  %v874_v19 = vmul.f32 0.3275911, %v814_v0  ;;  %5729 = vrcp.f32 %v935_v4  ;;  %v1655_v5 = vmul.f32 %v815_v6, %v815_v6  ;;  %v5726_v45 = vpop.eup %5725 }
 0x18c   :  { %10178 = vst [vmem:[#allocation34_spill] sm:$0xff] %v7092_v40  ;;  %v7099_v46 = vmul.f32 0.025, %v2276_v22  ;;  %v2468_v15 = vadd.f32 %v2467_v57, %v2466_v2  ;;  %v1342_v14 = vmul.f32 %v7072_v1, %v1282_v41  ;;  %v2123_v12 = vsel %vm1943_vm7, %v2063_v42, %v2003_v63 }
 0x18d   :  { %v1164_v13 = vadd.f32 -1.4531521, %v1104_v9  ;;  %v934_v7 = vadd.f32 1.0, %v874_v19  ;;  %v1789_v41 = vmul.f32 1.442695, %v1713_v24  ;;  %v7121_v51 = vadd.f32 %v6652_v49, %v6461_v28 }
 0x18e   :  { %v2552_v10 = vmul.f32 0.025, %v2468_v15  ;;  %v2564_v60 = vmul.f32 %v7099_v46, %v7099_v46  ;;  %v1402_v50 = vadd.f32 -0.28449672, %v1342_v14  ;;  %v7123_v15 = vpop.f32.mrb[25].mxu1  ;;  %v1715_v19 = vsub.f32 0.0, %v1655_v5 }
 0x18f   :  { %v1224_v22 = vmul.f32 %v7094_v52, %v1164_v13  ;;  %v7114_v57 = vpop.eup %5727  ;;  %5731 = vrcp.f32 %v934_v7  ;;  %v765_v24 = vmul.f32 0.70710677, %v7121_v51  ;;  %v7130_v49 = vmul.f32 %v2123_v12, %v6962_v48 }
 0x190   :  { %v2576_v2 = vsub.f32 %v2552_v10, %v2564_v60  ;;  %v1462_v6 = vmul.f32 %v7072_v1, %v1402_v50  ;;  %v1113_v14 = vmul.f32 1.0614054, %v7114_v57  ;;  %5733 = vpow2.f32 %v1771_v59 }
 0x191   :  { %v1284_v4 = vadd.f32 1.4214138, %v1224_v22  ;;  %v756_v10 = vmul.f32 0.70710677, %v7112_v16  ;;  %10180 = vst [vmem:[#allocation36_spill] sm:$0xff] %v7130_v49  ;;  %v1654_v13 = vmul.f32 %v814_v0, %v814_v0  ;;  %vm1942_vm8 = vcmp.ge.f32.partialorder %v6978_v35, 0.0 }
 0x192   :  { %v2588_v9 = vadd.f32 1e-05, %v2576_v2  ;;  %v1522_v17 = vadd.f32 0.2548296, %v1462_v6  ;;  %v1173_v42 = vadd.f32 -1.4531521, %v1113_v14 }
 0x193   :  { %v1344_v63 = vmul.f32 %v7094_v52, %v1284_v4  ;;  %v816_v50 = vand.u32 2147483647, %v756_v10  ;;  %v825_v59 = vand.u32 2147483647, %v765_v24  ;;  %v1793_v12 = vmul.f32 1.442695, %v1715_v19 }
 0x194   :  { %5735 = vrsqrt.f32 %v2588_v9  ;;  %v1582_v60 = vmul.f32 %v7072_v1, %v1522_v17  ;;  %v1233_v7 = vmul.f32 %v7114_v57, %v1173_v42  ;;  %v7137_v9 = vadd.f32 %v6654_v55, %v6461_v28 }
 0x195   :  { %v1404_v2 = vadd.f32 -0.28449672, %v1344_v63  ;;  %5737 = vpow2.f32 %v1789_v41  ;;  %v876_v22 = vmul.f32 0.3275911, %v816_v50  ;;  %v1656_v6 = vmul.f32 %v816_v50, %v816_v50  ;;  %v7139_v48 = vpop.eup %5729 }
 0x196   :  { %v1882_v5 = vmul.f32 %v5726_v45, %v1582_v60  ;;  %v1293_v0 = vadd.f32 1.4214138, %v1233_v7  ;;  %v885_v4 = vmul.f32 0.3275911, %v825_v59  ;;  %v1115_v41 = vmul.f32 1.0614054, %v7139_v48 }
 0x197   :  { %v1464_v1 = vmul.f32 %v7094_v52, %v1404_v2  ;;  %v1714_v17 = vsub.f32 0.0, %v1654_v13  ;;  %v936_v45 = vadd.f32 1.0, %v876_v22  ;;  %v1665_v24 = vmul.f32 %v825_v59, %v825_v59 }
 0x198   :  { %v2002_v14 = vmul.f32 0.5, %v1882_v5  ;;  %v1353_v63 = vmul.f32 %v7114_v57, %v1293_v0  ;;  %v945_v42 = vadd.f32 1.0, %v885_v4  ;;  %v1175_v60 = vadd.f32 -1.4531521, %v1115_v41 }
 0x199   :  { %v1524_v10 = vadd.f32 0.2548296, %v1464_v1  ;;  %5739 = vrcp.f32 %v936_v45  ;;  %v1716_v55 = vsub.f32 0.0, %v1656_v6  ;;  %v767_v50 = vmul.f32 0.70710677, %v7137_v9  ;;  %v7145_v11 = vpop.eup %5731  ;;  %v7154_v6 = vpop.f32.mrb[26].mxu0 }
 0x19a   :  { %v2062_v2 = vsub.f32 1.0, %v2002_v14  ;;  %v1413_v7 = vadd.f32 -0.28449672, %v1353_v63  ;;  %5741 = vrcp.f32 %v945_v42  ;;  %v5734_v5 = vpop.eup %5733  ;;  %v7150_v13 = vmul.f32 %v7130_v49, %v7130_v49 }
 0x19b   :  { %v1584_v19 = vmul.f32 %v7094_v52, %v1524_v10  ;;  %v1235_v22 = vmul.f32 %v7139_v48, %v1175_v60  ;;  %v1114_v59 = vmul.f32 1.0614054, %v7145_v11  ;;  %v1791_v1 = vmul.f32 1.442695, %v1714_v17 }
 0x19c   :  { %v1473_v41 = vmul.f32 %v7114_v57, %v1413_v7  ;;  %v1725_v52 = vsub.f32 0.0, %v1665_v24  ;;  %v7161_v45 = vadd.f32 %v6702_v3, %v6461_v28  ;;  %v827_v60 = vand.u32 2147483647, %v767_v50 }
 0x19d   :  { %v1884_v4 = vmul.f32 %v5734_v5, %v1584_v19  ;;  %v1295_v63 = vadd.f32 1.4214138, %v1235_v22  ;;  %v1174_v42 = vadd.f32 -1.4531521, %v1114_v59  ;;  %v2122_v30 = vsel %vm1942_vm8, %v2062_v2, %v2002_v14  ;;  %v7173_v22 = vpop.f32.mrb[26].mxu1 }
 0x19e   :  { %v7156_v0 = vpop.eup %5735  ;;  %vm1944_vm9 = vcmp.ge.f32.partialorder %v7031_v61, 0.0  ;;  %v1533_v19 = vadd.f32 0.2548296, %v1473_v41  ;;  %5743 = vpow2.f32 %v1793_v12  ;;  %v1795_v24 = vmul.f32 1.442695, %v1716_v55 }
 0x19f   :  { %10181 = vst [vmem:[#allocation37_spill] sm:$0xff] %v7156_v0  ;;  %v7165_v10 = vmul.f32 %v7156_v0, %v7099_v46  ;;  %v5738_v17 = vpop.eup %5737  ;;  %v2004_v7 = vmul.f32 0.5, %v1884_v4  ;;  %vm1953_vm10 = vcmp.ge.f32.partialorder %v7057_v56, 0.0  ;;  %v1355_v3 = vmul.f32 %v7139_v48, %v1295_v63 }
 0x1a0   :  { %v1234_v46 = vmul.f32 %v7145_v11, %v1174_v42  ;;  %v887_v5 = vmul.f32 0.3275911, %v827_v60  ;;  %v1593_v50 = vmul.f32 %v7114_v57, %v1533_v19  ;;  %5745 = vpow2.f32 %v1791_v1  ;;  %v7184_v1 = vpop.f32.mrb[27].mxu0 }
 0x1a1   :  { %10182 = vst [vmem:[#allocation38_spill] sm:$0xff] %v7165_v10  ;;  %v1813_v59 = vmul.f32 1.442695, %v1725_v52  ;;  %v766_v14 = vmul.f32 0.70710677, %v7161_v45  ;;  %v7178_v2 = vmul.f32 %v2122_v30, %v6978_v35  ;;  %5747 = vpow2.f32 %v1795_v24 }
 0x1a2   :  { %v1415_v12 = vadd.f32 -0.28449672, %v1355_v3  ;;  %v1294_v55 = vadd.f32 1.4214138, %v1234_v46  ;;  %v947_v4 = vadd.f32 1.0, %v887_v5  ;;  %v1893_v41 = vmul.f32 %v5738_v17, %v1593_v50 }
 0x1a3   :  { %10183 = vst [vmem:[#allocation39_spill] sm:$0xff] %v7178_v2  ;;  %v1667_v63 = vmul.f32 %v827_v60, %v827_v60  ;;  %v826_v37 = vand.u32 2147483647, %v766_v14  ;;  %v7180_v42 = vpop.eup %5739  ;;  %v2064_v33 = vsub.f32 1.0, %v2004_v7  ;;  %v7191_v60 = vadd.f32 %v6711_v58, %v6461_v28 }
 0x1a4   :  { %v1475_v21 = vmul.f32 %v7139_v48, %v1415_v12  ;;  %v1354_v57 = vmul.f32 %v7145_v11, %v1294_v55  ;;  %5749 = vrcp.f32 %v947_v4  ;;  %v7186_v52 = vpop.eup %5741  ;;  %v2013_v30 = vmul.f32 0.5, %v1893_v41  ;;  %v7203_v4 = vpop.f32.mrb[27].mxu1 }
 0x1a5   :  { %v1116_v35 = vmul.f32 1.0614054, %v7180_v42  ;;  %5751 = vpow2.f32 %v1813_v59  ;;  %v7195_v17 = vmul.f32 %v7178_v2, %v7178_v2  ;;  %v1125_v3 = vmul.f32 1.0614054, %v7186_v52 }
 0x1a6   :  { %v1535_v19 = vadd.f32 0.2548296, %v1475_v21  ;;  %v1414_v24 = vadd.f32 -0.28449672, %v1354_v57  ;;  %v2073_v46 = vsub.f32 1.0, %v2013_v30  ;;  %vm1955_vm11 = vcmp.ge.f32.partialorder %v7076_v29, 0.0 }
 0x1a7   :  { %v1176_v5 = vadd.f32 -1.4531521, %v1116_v35  ;;  %v1727_v50 = vsub.f32 0.0, %v1667_v63  ;;  %v886_v14 = vmul.f32 0.3275911, %v826_v37  ;;  %v2124_v59 = vsel %vm1944_vm9, %v2064_v33, %v2004_v7 }
 0x1a8   :  { %v1595_v58 = vmul.f32 %v7139_v48, %v1535_v19  ;;  %v1474_v12 = vmul.f32 %v7145_v11, %v1414_v24  ;;  %v1185_v55 = vadd.f32 -1.4531521, %v1125_v3  ;;  %v5744_v21 = vpop.eup %5743  ;;  %v2133_v41 = vsel %vm1953_vm10, %v2073_v46, %v2013_v30 }
 0x1a9   :  { %v1236_v57 = vmul.f32 %v7180_v42, %v1176_v5  ;;  %v946_v26 = vadd.f32 1.0, %v886_v14  ;;  %v768_v63 = vmul.f32 0.70710677, %v7191_v60  ;;  %v7210_v35 = vmul.f32 %v2133_v41, %v7057_v56 }
 0x1aa   :  { %v1895_v33 = vmul.f32 %v5744_v21, %v1595_v58  ;;  %v1534_v7 = vadd.f32 0.2548296, %v1474_v12  ;;  %v1245_v48 = vmul.f32 %v7186_v52, %v1185_v55  ;;  %v5746_v19 = vpop.eup %5745  ;;  %vm1954_vm12 = vcmp.ge.f32.partialorder %v7081_v47, 0.0 }
 0x1ab   :  { %10184 = vst [vmem:[#allocation40_spill] sm:$0xff] %v7210_v35  ;;  %v1296_v24 = vadd.f32 1.4214138, %v1236_v57  ;;  %v1817_v3 = vmul.f32 1.442695, %v1727_v50  ;;  %5753 = vrcp.f32 %v946_v26  ;;  %v7216_v30 = vadd.f32 %v7210_v35, %v7097_v39  ;;  %v5748_v14 = vpop.eup %5747 }
 0x1ac   :  { %v828_v8 = vand.u32 2147483647, %v768_v63  ;;  %v2385_v46 = vmul.f32 %v7210_v35, %v7210_v35  ;;  %v2015_v56 = vmul.f32 0.5, %v1895_v33  ;;  %v1594_v5 = vmul.f32 %v7145_v11, %v1534_v7 }
 0x1ad   :  { %v7222_v58 = vmul.f32 %v2124_v59, %v7031_v61  ;;  %v1356_v12 = vmul.f32 %v7180_v42, %v1296_v24  ;;  %v1305_v55 = vadd.f32 1.4214138, %v1245_v48  ;;  %v1666_v63 = vmul.f32 %v826_v37, %v826_v37  ;;  %v7232_v59 = vpop.f32.mrb[28].mxu0 }
 0x1ae   :  { %v888_v50 = vmul.f32 0.3275911, %v828_v8  ;;  %v7225_v26 = vpop.eup %5749  ;;  %v7228_v21 = vadd.f32 %v2385_v46, %v7107_v18  ;;  %v2075_v41 = vsub.f32 1.0, %v2015_v56  ;;  %v1894_v57 = vmul.f32 %v5746_v19, %v1594_v5  ;;  %v7236_v18 = vpop.f32.mrb[28].mxu1 }
 0x1af   :  { %10185 = vst [vmem:[#allocation41_spill] sm:$0xff] %v7222_v58  ;;  %v5752_v35 = vpop.eup %5751  ;;  %v1416_v33 = vadd.f32 -0.28449672, %v1356_v12  ;;  %v1365_v11 = vmul.f32 %v7186_v52, %v1305_v55  ;;  %v1127_v7 = vmul.f32 1.0614054, %v7225_v26  ;;  %5755 = vpow2.f32 %v1817_v3 }
 0x1b0   :  { %v948_v61 = vadd.f32 1.0, %v888_v50  ;;  %v2135_v48 = vsel %vm1955_vm11, %v2075_v41, %v2015_v56  ;;  %v2014_v24 = vmul.f32 0.5, %v1894_v57  ;;  %v1668_v39 = vmul.f32 %v828_v8, %v828_v8  ;;  %v10187_v50 = vld [vmem:[#allocation12_spill] sm:$0xff]  ;;  %v7253_v41 = vpop.f32.mrb[29].mxu0 }
 0x1b1   :  { %v7239_v19 = vmul.f32 %v2135_v48, %v7076_v29  ;;  %v1476_v37 = vmul.f32 %v7180_v42, %v1416_v33  ;;  %v1425_v46 = vadd.f32 -0.28449672, %v1365_v11  ;;  %v1187_v5 = vadd.f32 -1.4531521, %v1127_v7 }
 0x1b2   :  { %v2074_v12 = vsub.f32 1.0, %v2014_v24  ;;  %v1726_v55 = vsub.f32 0.0, %v1666_v63  ;;  %5757 = vrcp.f32 %v948_v61  ;;  %v7244_v20 = vadd.f32 %v10188_v23, %v10187_v50 }
 0x1b3   :  { %10186 = vst [vmem:[#allocation42_spill] sm:$0xff] %v7239_v19  ;;  %v7248_v3 = vadd.f32 %v7239_v19, %v7130_v49  ;;  %v2387_v8 = vmul.f32 %v7239_v19, %v7239_v19  ;;  %v1536_v29 = vadd.f32 0.2548296, %v1476_v37  ;;  %v1485_v56 = vmul.f32 %v7186_v52, %v1425_v46 }
 0x1b4   :  { %v2134_v57 = vsel %vm1954_vm12, %v2074_v12, %v2014_v24  ;;  %vm1956_vm13 = vcmp.ge.f32.partialorder %v7112_v16, 0.0  ;;  %v1247_v23 = vmul.f32 %v7225_v26, %v1187_v5  ;;  %v1728_v63 = vsub.f32 0.0, %v1668_v39  ;;  %v10190_v39 = vld [vmem:[#allocation17_spill] sm:$0xff] }
 0x1b5   :  { %v777_v33 = vmul.f32 0.70710677, %v7244_v20  ;;  %v7260_v11 = vpop.eup %5753  ;;  %v7263_v7 = vadd.f32 %v2387_v8, %v7150_v13  ;;  %v7266_v61 = vmul.f32 %v2134_v57, %v7081_v47  ;;  %v1596_v48 = vmul.f32 %v7180_v42, %v1536_v29 }
 0x1b6   :  { %v1545_v37 = vadd.f32 0.2548296, %v1485_v56  ;;  %vm1965_vm14 = vcmp.ge.f32.partialorder %v7121_v51, 0.0  ;;  %v1307_v24 = vadd.f32 1.4214138, %v1247_v23  ;;  %v7273_v12 = vadd.f32 %v10190_v39, %v10187_v50 }
 0x1b7   :  { %10189 = vst [vmem:[#allocation12_spill] sm:$0xff] %v7266_v61  ;;  %v1126_v46 = vmul.f32 1.0614054, %v7260_v11  ;;  %v837_v5 = vand.u32 2147483647, %v777_v33  ;;  %v7277_v13 = vadd.f32 %v7266_v61, %v7178_v2  ;;  %v2386_v47 = vmul.f32 %v7266_v61, %v7266_v61  ;;  %v7283_v33 = vpop.f32.mrb[29].mxu1 }
 0x1b8   :  { %v1896_v8 = vmul.f32 %v5748_v14, %v1596_v48  ;;  %v1605_v42 = vmul.f32 %v7186_v52, %v1545_v37  ;;  %v1367_v29 = vmul.f32 %v7225_v26, %v1307_v24  ;;  %v2376_v39 = vmul.f32 %v7222_v58, %v7222_v58 }
 0x1b9   :  { %v1186_v56 = vadd.f32 -1.4531521, %v1126_v46  ;;  %v897_v57 = vmul.f32 0.3275911, %v837_v5  ;;  %v1677_v23 = vmul.f32 %v837_v5, %v837_v5  ;;  %v7288_v19 = vadd.f32 %v2386_v47, %v7195_v17  ;;  %v5756_v10 = vpop.eup %5755 }
 0x1ba   :  { %v2016_v49 = vmul.f32 0.5, %v1896_v8  ;;  %v1905_v2 = vmul.f32 %v5752_v35, %v1605_v42  ;;  %v1427_v61 = vadd.f32 -0.28449672, %v1367_v29  ;;  %v1815_v52 = vmul.f32 1.442695, %v1726_v55 }
 0x1bb   :  { %v1246_v14 = vmul.f32 %v7260_v11, %v1186_v56  ;;  %v957_v48 = vadd.f32 1.0, %v897_v57  ;;  %v1819_v46 = vmul.f32 1.442695, %v1728_v63  ;;  %v779_v5 = vmul.f32 0.70710677, %v7273_v12 }
 0x1bc   :  { %v2076_v37 = vsub.f32 1.0, %v2016_v49  ;;  %v2025_v24 = vmul.f32 0.5, %v1905_v2  ;;  %v7292_v0 = vpop.eup %5757  ;;  %v1487_v40 = vmul.f32 %v7225_v26, %v1427_v61  ;;  %v1737_v17 = vsub.f32 0.0, %v1677_v23 }
 0x1bd   :  { %v1306_v34 = vadd.f32 1.4214138, %v1246_v14  ;;  %5759 = vrcp.f32 %v957_v48  ;;  %v1128_v8 = vmul.f32 1.0614054, %v7292_v0  ;;  %v839_v55 = vand.u32 2147483647, %v779_v5 }
 0x1be   :  { %v2136_v35 = vsel %vm1956_vm13, %v2076_v37, %v2016_v49  ;;  %v2085_v47 = vsub.f32 1.0, %v2025_v24  ;;  %v1547_v2 = vadd.f32 0.2548296, %v1487_v40  ;;  %5761 = vpow2.f32 %v1815_v52 }
 0x1bf   :  { %v7299_v42 = vmul.f32 %v2136_v35, %v7112_v16  ;;  %v1366_v63 = vmul.f32 %v7260_v11, %v1306_v34  ;;  %v1188_v29 = vadd.f32 -1.4531521, %v1128_v8  ;;  %5763 = vpow2.f32 %v1819_v46 }
 0x1c0   :  { %v2145_v61 = vsel %vm1965_vm14, %v2085_v47, %v2025_v24  ;;  %v899_v56 = vmul.f32 0.3275911, %v839_v55  ;;  %v1607_v40 = vmul.f32 %v7225_v26, %v1547_v2  ;;  %v1837_v14 = vmul.f32 1.442695, %v1737_v17 }
 0x1c1   :  { %10191 = vst [vmem:[#allocation16_spill] sm:$0xff] %v7299_v42  ;;  %v7306_v49 = vadd.f32 %v7299_v42, %v7222_v58  ;;  %v2388_v57 = vmul.f32 %v7299_v42, %v7299_v42  ;;  %v7311_v16 = vmul.f32 %v2145_v61, %v7121_v51  ;;  %v1426_v34 = vadd.f32 -0.28449672, %v1366_v63 }
 0x1c2   :  { %v1248_v23 = vmul.f32 %v7292_v0, %v1188_v29  ;;  %v959_v52 = vadd.f32 1.0, %v899_v56  ;;  %v1907_v46 = vmul.f32 %v5756_v10, %v1607_v40  ;;  %v1679_v26 = vmul.f32 %v839_v55, %v839_v55 }
 0x1c3   :  { %10192 = vst [vmem:[#allocation17_spill] sm:$0xff] %v7311_v16  ;;  %v7315_v48 = vadd.f32 %v2388_v57, %v2376_v39  ;;  %v7319_v37 = vadd.f32 %v7216_v30, %v7311_v16  ;;  %v2397_v24 = vmul.f32 %v7311_v16, %v7311_v16  ;;  %v1486_v51 = vmul.f32 %v7260_v11, %v1426_v34  ;;  %v10193_v39 = vld [vmem:[#allocation18_spill] sm:$0xff] }
 0x1c4   :  { %v1308_v5 = vadd.f32 1.4214138, %v1248_v23  ;;  %5765 = vrcp.f32 %v959_v52  ;;  %v2027_v17 = vmul.f32 0.5, %v1907_v46  ;;  %v7329_v47 = vadd.f32 %v10193_v39, %v10187_v50 }
 0x1c5   :  { %v7325_v35 = vadd.f32 %v7228_v21, %v2397_v24  ;;  %v7333_v30 = vadd.f32 %v6838_v44, %v10187_v50  ;;  %vm1967_vm15 = vcmp.ge.f32.partialorder %v7137_v9, 0.0  ;;  %v1546_v10 = vadd.f32 0.2548296, %v1486_v51 }
 0x1c6   :  { %v1368_v8 = vmul.f32 %v7292_v0, %v1308_v5  ;;  %v2087_v55 = vsub.f32 1.0, %v2027_v17  ;;  %v778_v21 = vmul.f32 0.70710677, %v7329_v47  ;;  %v7343_v61 = vadd.f32 %v6865_v53, %v6726_v54 }
 0x1c7   :  { %v7337_v2 = vpop.eup %5759  ;;  %v780_v63 = vmul.f32 0.70710677, %v7333_v30  ;;  %v1606_v29 = vmul.f32 %v7260_v11, %v1546_v10  ;;  %5767 = vpow2.f32 %v1837_v14  ;;  %v1739_v34 = vsub.f32 0.0, %v1679_v26 }
 0x1c8   :  { %v1428_v44 = vadd.f32 -0.28449672, %v1368_v8  ;;  %v1137_v56 = vmul.f32 1.0614054, %v7337_v2  ;;  %v5762_v57 = vpop.eup %5761  ;;  %v2147_v40 = vsel %vm1967_vm15, %v2087_v55, %v2027_v17  ;;  %v838_v23 = vand.u32 2147483647, %v778_v21 }
 0x1c9   :  { %v840_v52 = vand.u32 2147483647, %v780_v63  ;;  %v5764_v24 = vpop.eup %5763  ;;  %v7348_v46 = vmul.f32 %v2147_v40, %v7137_v9  ;;  %v1906_v51 = vmul.f32 %v5762_v57, %v1606_v29  ;;  %v789_v10 = vmul.f32 0.70710677, %v7343_v61  ;;  %v7358_v9 = vpop.f32.mrb[30].mxu0 }
 0x1ca   :  { %v1488_v5 = vmul.f32 %v7292_v0, %v1428_v44  ;;  %v1197_v53 = vadd.f32 -1.4531521, %v1137_v56  ;;  %v898_v39 = vmul.f32 0.3275911, %v838_v23  ;;  %v1678_v16 = vmul.f32 %v838_v23, %v838_v23 }
 0x1cb   :  { %10194 = vst [vmem:[#allocation18_spill] sm:$0xff] %v7348_v46  ;;  %v900_v11 = vmul.f32 0.3275911, %v840_v52  ;;  %v7354_v14 = vadd.f32 %v7248_v3, %v7348_v46  ;;  %v2399_v26 = vmul.f32 %v7348_v46, %v7348_v46  ;;  %v2026_v17 = vmul.f32 0.5, %v1906_v51 }
 0x1cc   :  { %v1548_v8 = vadd.f32 0.2548296, %v1488_v5  ;;  %v1257_v55 = vmul.f32 %v7337_v2, %v1197_v53  ;;  %v958_v21 = vadd.f32 1.0, %v898_v39  ;;  %v1680_v29 = vmul.f32 %v840_v52, %v840_v52 }
 0x1cd   :  { %v960_v63 = vadd.f32 1.0, %v900_v11  ;;  %v7364_v56 = vadd.f32 %v7263_v7, %v2399_v26  ;;  %v2086_v57 = vsub.f32 1.0, %v2026_v17  ;;  %v1738_v40 = vsub.f32 0.0, %v1678_v16 }
 0x1ce   :  { %v7361_v44 = vpop.eup %5765  ;;  %v1608_v3 = vmul.f32 %v7292_v0, %v1548_v8  ;;  %vm1966_vm0 = vcmp.ge.f32.partialorder %v7161_v45, 0.0  ;;  %v1317_v23 = vadd.f32 1.4214138, %v1257_v55  ;;  %5769 = vrcp.f32 %v958_v21 }
 0x1cf   :  { %v1139_v51 = vmul.f32 1.0614054, %v7361_v44  ;;  %v2146_v5 = vsel %vm1966_vm0, %v2086_v57, %v2026_v17  ;;  %v1841_v39 = vmul.f32 1.442695, %v1739_v34  ;;  %5771 = vrcp.f32 %v960_v63 }
 0x1d0   :  { %v1908_v53 = vmul.f32 %v5764_v24, %v1608_v3  ;;  %v7370_v52 = vmul.f32 %v2146_v5, %v7161_v45  ;;  %vm1968_vm1 = vcmp.ge.f32.partialorder %v7191_v60, 0.0  ;;  %v1377_v7 = vmul.f32 %v7337_v2, %v1317_v23 }
 0x1d1   :  { %v1199_v11 = vadd.f32 -1.4531521, %v1139_v51  ;;  %v5768_v0 = vpop.eup %5767  ;;  %v1839_v26 = vmul.f32 1.442695, %v1738_v40  ;;  %v1740_v8 = vsub.f32 0.0, %v1680_v29  ;;  %5773 = vpow2.f32 %v1841_v39 }
 0x1d2   :  { %10195 = vst [vmem:[#allocation43_spill] sm:$0xff] %v7370_v52  ;;  %v2028_v16 = vmul.f32 0.5, %v1908_v53  ;;  %v849_v55 = vand.u32 2147483647, %v789_v10  ;;  %v7376_v21 = vadd.f32 %v7277_v13, %v7370_v52  ;;  %v2398_v34 = vmul.f32 %v7370_v52, %v7370_v52 }
 0x1d3   :  { %v1437_v24 = vadd.f32 -0.28449672, %v1377_v7  ;;  %v1259_v45 = vmul.f32 %v7361_v44, %v1199_v11  ;;  %v7383_v57 = vadd.f32 %v6909_v38, %v6726_v54  ;;  %v7391_v3 = vadd.f32 %v6935_v62, %v6726_v54 }
 0x1d4   :  { %v2088_v17 = vsub.f32 1.0, %v2028_v16  ;;  %v909_v63 = vmul.f32 0.3275911, %v849_v55  ;;  %v7386_v29 = vadd.f32 %v7288_v19, %v2398_v34  ;;  %v1843_v23 = vmul.f32 1.442695, %v1740_v8 }
 0x1d5   :  { %v1497_v10 = vmul.f32 %v7337_v2, %v1437_v24  ;;  %v1319_v13 = vadd.f32 1.4214138, %v1259_v45  ;;  %v791_v5 = vmul.f32 0.70710677, %v7383_v57  ;;  %5775 = vpow2.f32 %v1839_v26  ;;  %v7410_v24 = vpop.f32.mrb[30].mxu1 }
 0x1d6   :  { %v2148_v40 = vsel %vm1968_vm1, %v2088_v17, %v2028_v16  ;;  %v969_v51 = vadd.f32 1.0, %v909_v63  ;;  %v1689_v39 = vmul.f32 %v849_v55, %v849_v55  ;;  %v790_v62 = vmul.f32 0.70710677, %v7391_v3 }
 0x1d7   :  { %v7397_v38 = vmul.f32 %v2148_v40, %v7191_v60  ;;  %v1557_v53 = vadd.f32 0.2548296, %v1497_v10  ;;  %v1379_v19 = vmul.f32 %v7361_v44, %v1319_v13  ;;  %v851_v7 = vand.u32 2147483647, %v791_v5 }
 0x1d8   :  { %5777 = vrcp.f32 %v969_v51  ;;  %v7401_v11 = vpop.eup %5769  ;;  %v1749_v40 = vsub.f32 0.0, %v1689_v39  ;;  %v850_v51 = vand.u32 2147483647, %v790_v62  ;;  %vm1977_vm2 = vcmp.ge.f32.partialorder %v7244_v20, 0.0 }
 0x1d9   :  { %10196 = vst [vmem:[#allocation44_spill] sm:$0xff] %v7397_v38  ;;  %v7405_v16 = vadd.f32 %v7306_v49, %v7397_v38  ;;  %v2400_v8 = vmul.f32 %v7397_v38, %v7397_v38  ;;  %v1617_v60 = vmul.f32 %v7337_v2, %v1557_v53  ;;  %v1439_v34 = vadd.f32 -0.28449672, %v1379_v19  ;;  %v7412_v26 = vpop.eup %5771 }
 0x1da   :  { %v1138_v55 = vmul.f32 1.0614054, %v7401_v11  ;;  %5779 = vpow2.f32 %v1843_v23  ;;  %v911_v45 = vmul.f32 0.3275911, %v851_v7  ;;  %v1140_v10 = vmul.f32 1.0614054, %v7412_v26 }
 0x1db   :  { %v7416_v17 = vadd.f32 %v7315_v48, %v2400_v8  ;;  %v1917_v63 = vmul.f32 %v5768_v0, %v1617_v60  ;;  %v1499_v49 = vmul.f32 %v7361_v44, %v1439_v34  ;;  %v1691_v46 = vmul.f32 %v851_v7, %v851_v7  ;;  %v5774_v38 = vpop.eup %5773  ;;  %v7428_v7 = vpop.f32.mrb[31].mxu0 }
 0x1dc   :  { %v1198_v13 = vadd.f32 -1.4531521, %v1138_v55  ;;  %v971_v2 = vadd.f32 1.0, %v911_v45  ;;  %v1200_v19 = vadd.f32 -1.4531521, %v1140_v10  ;;  %v1690_v34 = vmul.f32 %v850_v51, %v850_v51 }
 0x1dd   :  { %v2037_v5 = vmul.f32 0.5, %v1917_v63  ;;  %v1559_v53 = vadd.f32 0.2548296, %v1499_v49  ;;  %v910_v48 = vmul.f32 0.3275911, %v850_v51  ;;  %v7426_v45 = vadd.f32 %v6955_v25, %v6726_v54 }
 0x1de   :  { %v1258_v23 = vmul.f32 %v7401_v11, %v1198_v13  ;;  %5781 = vrcp.f32 %v971_v2  ;;  %v1260_v60 = vmul.f32 %v7412_v26, %v1200_v19  ;;  %v1861_v55 = vmul.f32 1.442695, %v1749_v40 }
 0x1df   :  { %v2097_v0 = vsub.f32 1.0, %v2037_v5  ;;  %v1619_v8 = vmul.f32 %v7361_v44, %v1559_v53  ;;  %v970_v62 = vadd.f32 1.0, %v910_v48  ;;  %v5776_v63 = vpop.eup %5775  ;;  %v1751_v2 = vsub.f32 0.0, %v1691_v46 }
 0x1e0   :  { %v1318_v39 = vadd.f32 1.4214138, %v1258_v23  ;;  %v1320_v13 = vadd.f32 1.4214138, %v1260_v60  ;;  %v792_v40 = vmul.f32 0.70710677, %v7426_v45 }
 0x1e1   :  { %v2157_v49 = vsel %vm1977_vm2, %v2097_v0, %v2037_v5  ;;  %v1919_v10 = vmul.f32 %v5774_v38, %v1619_v8  ;;  %5783 = vrcp.f32 %v970_v62  ;;  %v1750_v23 = vsub.f32 0.0, %v1690_v34  ;;  %v7445_v0 = vpop.f32.mrb[31].mxu1 }
 0x1e2   :  { %v7430_v52 = vpop.eup %5777  ;;  %v7433_v44 = vmul.f32 %v2157_v49, %v7244_v20  ;;  %v1378_v51 = vmul.f32 %v7401_v11, %v1318_v39  ;;  %v1380_v25 = vmul.f32 %v7412_v26, %v1320_v13  ;;  %v852_v48 = vand.u32 2147483647, %v792_v40 }
 0x1e3   :  { %v2039_v53 = vmul.f32 0.5, %v1919_v10  ;;  %v1149_v19 = vmul.f32 1.0614054, %v7430_v52  ;;  %vm1979_vm3 = vcmp.ge.f32.partialorder %v7273_v12, 0.0  ;;  %5785 = vpow2.f32 %v1861_v55 }
 0x1e4   :  { %10197 = vst [vmem:[#allocation45_spill] sm:$0xff] %v7433_v44  ;;  %v5780_v5 = vpop.eup %5779  ;;  %v7441_v46 = vadd.f32 %v7319_v37, %v7433_v44  ;;  %v2409_v20 = vmul.f32 %v7433_v44, %v7433_v44  ;;  %v1438_v38 = vadd.f32 -0.28449672, %v1378_v51  ;;  %v1440_v60 = vadd.f32 -0.28449672, %v1380_v25 }
 0x1e5   :  { %v2099_v8 = vsub.f32 1.0, %v2039_v53  ;;  %v1209_v39 = vadd.f32 -1.4531521, %v1149_v19  ;;  %v912_v37 = vmul.f32 0.3275911, %v852_v48  ;;  %vm1978_vm4 = vcmp.ge.f32.partialorder %v7329_v47, 0.0 }
 0x1e6   :  { %v7449_v62 = vadd.f32 %v7325_v35, %v2409_v20  ;;  %v1498_v34 = vmul.f32 %v7401_v11, %v1438_v38  ;;  %v1500_v10 = vmul.f32 %v7412_v26, %v1440_v60  ;;  %v1865_v51 = vmul.f32 1.442695, %v1751_v2  ;;  %v7459_v35 = vpop.f32.mrb[32].mxu0 }
 0x1e7   :  { %v2159_v49 = vsel %vm1979_vm3, %v2099_v8, %v2039_v53  ;;  %v1269_v13 = vmul.f32 %v7430_v52, %v1209_v39  ;;  %v1863_v19 = vmul.f32 1.442695, %v1750_v23  ;;  %v972_v42 = vadd.f32 1.0, %v912_v37 }
 0x1e8   :  { %v7454_v40 = vpop.eup %5781  ;;  %v7457_v44 = vmul.f32 %v2159_v49, %v7273_v12  ;;  %v1558_v25 = vadd.f32 0.2548296, %v1498_v34  ;;  %v1560_v55 = vadd.f32 0.2548296, %v1500_v10  ;;  %v7465_v38 = vadd.f32 %v7011_v31, %v6413_v32  ;;  %v7483_v49 = vpop.f32.mrb[32].mxu1 }
 0x1e9   :  { %v1329_v20 = vadd.f32 1.4214138, %v1269_v13  ;;  %v1151_v53 = vmul.f32 1.0614054, %v7454_v40  ;;  %vm1980_vm5 = vcmp.ge.f32.partialorder %v7333_v30, 0.0  ;;  %5787 = vrcp.f32 %v972_v42 }
 0x1ea   :  { %10198 = vst [vmem:[#allocation46_spill] sm:$0xff] %v7457_v44  ;;  %v7469_v2 = vadd.f32 %v7354_v14, %v7457_v44  ;;  %v2411_v12 = vmul.f32 %v7457_v44, %v7457_v44  ;;  %v1618_v23 = vmul.f32 %v7401_v11, %v1558_v25  ;;  %v1620_v8 = vmul.f32 %v7412_v26, %v1560_v55 }
 0x1eb   :  { %v1389_v60 = vmul.f32 %v7430_v52, %v1329_v20  ;;  %v1211_v39 = vadd.f32 -1.4531521, %v1151_v53  ;;  %5789 = vpow2.f32 %v1865_v51  ;;  %v7477_v31 = vpop.eup %5783  ;;  %v745_v37 = vmul.f32 0.70710677, %v7465_v38 }
 0x1ec   :  { %v7480_v34 = vadd.f32 %v7364_v56, %v2411_v12  ;;  %v1918_v14 = vmul.f32 %v5776_v63, %v1618_v23  ;;  %5791 = vpow2.f32 %v1863_v19  ;;  %v1920_v11 = vmul.f32 %v5780_v5, %v1620_v8 }
 0x1ed   :  { %v1449_v10 = vadd.f32 -0.28449672, %v1389_v60  ;;  %v1271_v42 = vmul.f32 %v7454_v40, %v1211_v39  ;;  %v1150_v26 = vmul.f32 1.0614054, %v7477_v31  ;;  %v1692_v25 = vmul.f32 %v852_v48, %v852_v48  ;;  %v5786_v53 = vpop.eup %5785  ;;  %v7493_v60 = vpop.f32.mrb[33].mxu0 }
 0x1ee   :  { %v2038_v13 = vmul.f32 0.5, %v1918_v14  ;;  %v805_v51 = vand.u32 2147483647, %v745_v37  ;;  %v7489_v55 = vadd.f32 %v7013_v36, %v6413_v32  ;;  %v2040_v56 = vmul.f32 0.5, %v1920_v11 }
 0x1ef   :  { %v1509_v63 = vmul.f32 %v7430_v52, %v1449_v10  ;;  %v1331_v19 = vadd.f32 1.4214138, %v1271_v42  ;;  %v1210_v20 = vadd.f32 -1.4531521, %v1150_v26  ;;  %v1752_v11 = vsub.f32 0.0, %v1692_v25 }
 0x1f0   :  { %v2098_v12 = vsub.f32 1.0, %v2038_v13  ;;  %v865_v5 = vmul.f32 0.3275911, %v805_v51  ;;  %v1645_v23 = vmul.f32 %v805_v51, %v805_v51  ;;  %v747_v8 = vmul.f32 0.70710677, %v7489_v55 }
 0x1f1   :  { %v2100_v39 = vsub.f32 1.0, %v2040_v56  ;;  %v1569_v48 = vadd.f32 0.2548296, %v1509_v63  ;;  %v1391_v14 = vmul.f32 %v7454_v40, %v1331_v19  ;;  %v1270_v36 = vmul.f32 %v7477_v31, %v1210_v20  ;;  %v7505_v63 = vpop.f32.mrb[33].mxu1 }
 0x1f2   :  { %v2158_v37 = vsel %vm1978_vm4, %v2098_v12, %v2038_v13  ;;  %v925_v10 = vadd.f32 1.0, %v865_v5  ;;  %v1705_v42 = vsub.f32 0.0, %v1645_v23  ;;  %v807_v25 = vand.u32 2147483647, %v747_v8 }
 0x1f3   :  { %v7500_v26 = vmul.f32 %v2158_v37, %v7329_v47  ;;  %v2160_v51 = vsel %vm1980_vm5, %v2100_v39, %v2040_v56  ;;  %v1629_v44 = vmul.f32 %v7430_v52, %v1569_v48  ;;  %v1451_v58 = vadd.f32 -0.28449672, %v1391_v14  ;;  %v7507_v19 = vpop.eup %5787 }
 0x1f4   :  { %v7510_v20 = vmul.f32 %v2160_v51, %v7333_v30  ;;  %v1330_v13 = vadd.f32 1.4214138, %v1270_v36  ;;  %5793 = vrcp.f32 %v925_v10  ;;  %v1152_v48 = vmul.f32 1.0614054, %v7507_v19 }
 0x1f5   :  { %v5790_v12 = vpop.eup %5789  ;;  %v7514_v47 = vadd.f32 %v7376_v21, %v7500_v26  ;;  %v2410_v56 = vmul.f32 %v7500_v26, %v7500_v26  ;;  %v1929_v52 = vmul.f32 %v5786_v53, %v1629_v44  ;;  %v1511_v5 = vmul.f32 %v7454_v40, %v1451_v58 }
 0x1f6   :  { %10199 = vst [vmem:[#allocation47_spill] sm:$0xff] %v7510_v20  ;;  %v5792_v23 = vpop.eup %5791  ;;  %v7521_v39 = vadd.f32 %v7405_v16, %v7510_v20  ;;  %v2412_v30 = vmul.f32 %v7510_v20, %v7510_v20  ;;  %v1390_v8 = vmul.f32 %v7477_v31, %v1330_v13  ;;  %v1867_v44 = vmul.f32 1.442695, %v1752_v11 }
 0x1f7   :  { %v7528_v21 = vadd.f32 %v7386_v29, %v2410_v56  ;;  %v2049_v14 = vmul.f32 0.5, %v1929_v52  ;;  %v1571_v36 = vadd.f32 0.2548296, %v1511_v5  ;;  %v1212_v37 = vadd.f32 -1.4531521, %v1152_v48 }
 0x1f8   :  { %v7531_v58 = vadd.f32 %v7416_v17, %v2412_v30  ;;  %v1450_v53 = vadd.f32 -0.28449672, %v1390_v8  ;;  %v867_v16 = vmul.f32 0.3275911, %v807_v25  ;;  %vm1989_vm6 = vcmp.ge.f32.partialorder %v7343_v61, 0.0 }
 0x1f9   :  { %v2109_v10 = vsub.f32 1.0, %v2049_v14  ;;  %v1631_v51 = vmul.f32 %v7454_v40, %v1571_v36  ;;  %v1773_v13 = vmul.f32 1.442695, %v1705_v42  ;;  %v1272_v29 = vmul.f32 %v7507_v19, %v1212_v37 }
 0x1fa   :  { %v1510_v20 = vmul.f32 %v7477_v31, %v1450_v53  ;;  %v927_v56 = vadd.f32 1.0, %v867_v16  ;;  %v7539_v11 = vadd.f32 %v7042_v27, %v6413_v32  ;;  %5795 = vpow2.f32 %v1867_v44 }
 0x1fb   :  { %v2169_v17 = vsel %vm1989_vm6, %v2109_v10, %v2049_v14  ;;  %v1931_v52 = vmul.f32 %v5790_v12, %v1631_v51  ;;  %v1647_v5 = vmul.f32 %v807_v25, %v807_v25  ;;  %v1332_v48 = vadd.f32 1.4214138, %v1272_v29 }
 0x1fc   :  { %v7542_v30 = vmul.f32 %v2169_v17, %v7343_v61  ;;  %v1570_v8 = vadd.f32 0.2548296, %v1510_v20  ;;  %5797 = vrcp.f32 %v927_v56  ;;  %vm1991_vm7 = vcmp.ge.f32.partialorder %v7383_v57, 0.0 }
 0x1fd   :  { %v2051_v40 = vmul.f32 0.5, %v1931_v52  ;;  %5799 = vpow2.f32 %v1773_v13  ;;  %v746_v42 = vmul.f32 0.70710677, %v7539_v11  ;;  %vm1990_vm8 = vcmp.ge.f32.partialorder %v7391_v3, 0.0 }
 0x1fe   :  { %10200 = vst [vmem:[#allocation48_spill] sm:$0xff] %v7542_v30  ;;  %v7546_v36 = vpop.eup %5793  ;;  %v2280_v27 = vadd.f32 %v7441_v46, %v7542_v30  ;;  %v2421_v25 = vmul.f32 %v7542_v30, %v7542_v30  ;;  %v1630_v61 = vmul.f32 %v7477_v31, %v1570_v8  ;;  %v1392_v20 = vmul.f32 %v7507_v19, %v1332_v48 }
 0x1ff   :  { %v2111_v12 = vsub.f32 1.0, %v2051_v40  ;;  %v1105_v14 = vmul.f32 1.0614054, %v7546_v36  ;;  %v1707_v44 = vsub.f32 0.0, %v1647_v5  ;;  %v7556_v53 = vand.u32 2147483647, %v746_v42 }
 0x200   :  { %v2281_v37 = vrot.slane %v2280_v27, 4  ;;  %v2472_v16 = vadd.f32 %v7449_v62, %v2421_v25  ;;  %v1930_v10 = vmul.f32 %v5792_v23, %v1630_v61  ;;  %v1452_v46 = vadd.f32 -0.28449672, %v1392_v20 }
 0x201   :  { %v2171_v51 = vsel %vm1991_vm7, %v2111_v12, %v2051_v40  ;;  %v1165_v13 = vadd.f32 -1.4531521, %v1105_v14  ;;  %v866_v31 = vmul.f32 0.3275911, %v7556_v53  ;;  %v7564_v29 = vadd.f32 %v7123_v15, %v6413_v32 }
 0x202   :  { %v2282_v56 = vadd.f32 %v2281_v37, %v2280_v27  ;;  %v2473_v17 = vrot.slane %v2472_v16, 4  ;;  %v7567_v52 = vmul.f32 %v2171_v51, %v7383_v57  ;;  %v2050_v5 = vmul.f32 0.5, %v1930_v10 }
 0x203   :  { %v1512_v62 = vmul.f32 %v7507_v19, %v1452_v46  ;;  %v1225_v23 = vmul.f32 %v7546_v36, %v1165_v13  ;;  %v7571_v8 = vmul.f32 1.442695, %v1707_v44  ;;  %v926_v48 = vadd.f32 1.0, %v866_v31 }
 0x204   :  { %10201 = vst [vmem:[#allocation49_spill] sm:$0xff] %v7567_v52  ;;  %v2283_v40 = vrot.slane %v2282_v56, 2  ;;  %v2474_v42 = vadd.f32 %v2473_v17, %v2472_v16  ;;  %v2300_v25 = vadd.f32 %v7469_v2, %v7567_v52  ;;  %v2423_v32 = vmul.f32 %v7567_v52, %v7567_v52  ;;  %v5796_v15 = vpop.eup %5795 }
 0x205   :  { %v2110_v27 = vsub.f32 1.0, %v2050_v5  ;;  %v1572_v57 = vadd.f32 0.2548296, %v1512_v62  ;;  %v1285_v61 = vadd.f32 1.4214138, %v1225_v23  ;;  %5801 = vrcp.f32 %v926_v48 }
 0x206   :  { %v7577_v20 = vpop.eup %5797  ;;  %v2284_v12 = vadd.f32 %v2283_v40, %v2282_v56  ;;  %v2475_v14 = vrot.slane %v2474_v42, 2  ;;  %v2301_v44 = vrot.slane %v2300_v25, 4  ;;  %v2492_v37 = vadd.f32 %v7480_v34, %v2423_v32 }
 0x207   :  { %vm1992_vm9 = vcmp.ge.f32.partialorder %v7426_v45, 0.0  ;;  %v5800_v16 = vpop.eup %5799  ;;  %v2170_v2 = vsel %vm1990_vm8, %v2110_v27, %v2050_v5  ;;  %v1632_v10 = vmul.f32 %v7507_v19, %v1572_v57  ;;  %v1345_v46 = vmul.f32 %v7546_v36, %v1285_v61 }
 0x208   :  { %v1107_v51 = vmul.f32 1.0614054, %v7577_v20  ;;  %v2285_v13 = vrot.slane %v2284_v12, 1  ;;  %v2476_v31 = vadd.f32 %v2475_v14, %v2474_v42  ;;  %v2302_v17 = vadd.f32 %v2301_v44, %v2300_v25 }
 0x209   :  { %v2493_v56 = vrot.slane %v2492_v37, 4  ;;  %v7587_v62 = vmul.f32 %v2170_v2, %v7391_v3  ;;  %v1932_v34 = vmul.f32 %v5796_v15, %v1632_v10  ;;  %v1405_v23 = vadd.f32 -0.28449672, %v1345_v46 }
 0x20a   :  { %v1167_v48 = vadd.f32 -1.4531521, %v1107_v51  ;;  %v2286_v40 = vadd.f32 %v2285_v13, %v2284_v12  ;;  %v2477_v32 = vrot.slane %v2476_v31, 1  ;;  %v2303_v52 = vrot.slane %v2302_v17, 2 }
 0x20b   :  { %10202 = vst [vmem:[#allocation50_spill] sm:$0xff] %v7587_v62  ;;  %v2494_v5 = vadd.f32 %v2493_v56, %v2492_v37  ;;  %v2290_v19 = vadd.f32 %v7514_v47, %v7587_v62  ;;  %v2422_v27 = vmul.f32 %v7587_v62, %v7587_v62  ;;  %v2052_v57 = vmul.f32 0.5, %v1932_v34 }
 0x20c   :  { %v1465_v42 = vmul.f32 %v7546_v36, %v1405_v23  ;;  %v7594_v25 = vmul.f32 0.025, %v2286_v40  ;;  %v2478_v3 = vadd.f32 %v2477_v32, %v2476_v31  ;;  %v2304_v61 = vadd.f32 %v2303_v52, %v2302_v17 }
 0x20d   :  { %v2495_v15 = vrot.slane %v2494_v5, 2  ;;  %v2291_v14 = vrot.slane %v2290_v19, 4  ;;  %v2482_v12 = vadd.f32 %v7528_v21, %v2422_v27  ;;  %v2112_v44 = vsub.f32 1.0, %v2052_v57 }
 0x20e   :  { %v1525_v2 = vadd.f32 0.2548296, %v1465_v42  ;;  %v2553_v37 = vmul.f32 0.025, %v2478_v3  ;;  %v2565_v47 = vmul.f32 %v7594_v25, %v7594_v25  ;;  %v2305_v10 = vrot.slane %v2304_v61, 1 }
 0x20f   :  { %v2496_v46 = vadd.f32 %v2495_v15, %v2494_v5  ;;  %v7599_v51 = vpop.eup %5801  ;;  %v2292_v13 = vadd.f32 %v2291_v14, %v2290_v19  ;;  %v2483_v56 = vrot.slane %v2482_v12, 4  ;;  %v2172_v31 = vsel %vm1992_vm9, %v2112_v44, %v2052_v57 }
 0x210   :  { %v1585_v52 = vmul.f32 %v7546_v36, %v1525_v2  ;;  %v2577_v17 = vsub.f32 %v2553_v37, %v2565_v47  ;;  %v2306_v34 = vadd.f32 %v2305_v10, %v2304_v61  ;;  %v7605_v23 = vmul.f32 %v2172_v31, %v7426_v45 }
 0x211   :  { %v2497_v21 = vrot.slane %v2496_v46, 1  ;;  %v2293_v40 = vrot.slane %v2292_v13, 2  ;;  %v2484_v32 = vadd.f32 %v2483_v56, %v2482_v12  ;;  %v1227_v27 = vmul.f32 %v7577_v20, %v1167_v48 }
 0x212   :  { %10203 = vst [vmem:[#allocation51_spill] sm:$0xff] %v7605_v23  ;;  %v1646_v5 = vmul.f32 %v7556_v53, %v7556_v53  ;;  %v2589_v19 = vadd.f32 1e-05, %v2577_v17  ;;  %v7610_v42 = vmul.f32 0.025, %v2306_v34  ;;  %v2310_v36 = vadd.f32 %v7521_v39, %v7605_v23 }
 0x213   :  { %v2498_v3 = vadd.f32 %v2497_v21, %v2496_v46  ;;  %v2294_v57 = vadd.f32 %v2293_v40, %v2292_v13  ;;  %v2485_v61 = vrot.slane %v2484_v32, 2  ;;  %v2424_v45 = vmul.f32 %v7605_v23, %v7605_v23 }
 0x214   :  { %v1885_v15 = vmul.f32 %v5800_v16, %v1585_v52  ;;  %5803 = vrsqrt.f32 %v2589_v19  ;;  %v2567_v48 = vmul.f32 %v7610_v42, %v7610_v42  ;;  %v2311_v12 = vrot.slane %v2310_v36, 4 }
 0x215   :  { %v2555_v14 = vmul.f32 0.025, %v2498_v3  ;;  %v2295_v53 = vrot.slane %v2294_v57, 1  ;;  %v2486_v44 = vadd.f32 %v2485_v61, %v2484_v32  ;;  %v2502_v2 = vadd.f32 %v7531_v58, %v2424_v45 }
 0x216   :  { %5805 = vpow2.f32 %v7571_v8  ;;  %v2312_v39 = vadd.f32 %v2311_v12, %v2310_v36  ;;  %v1287_v47 = vadd.f32 1.4214138, %v1227_v27  ;;  %v1106_v10 = vmul.f32 1.0614054, %v7599_v51 }
 0x217   :  { %v2579_v37 = vsub.f32 %v2555_v14, %v2567_v48  ;;  %v2296_v46 = vadd.f32 %v2295_v53, %v2294_v57  ;;  %v2487_v13 = vrot.slane %v2486_v44, 1  ;;  %v2503_v16 = vrot.slane %v2502_v2, 4 }
 0x218   :  { %v1706_v56 = vsub.f32 0.0, %v1646_v5  ;;  %v2313_v52 = vrot.slane %v2312_v39, 2  ;;  %v2005_v17 = vmul.f32 0.5, %v1885_v15  ;;  %v1347_v34 = vmul.f32 %v7577_v20, %v1287_v47 }
 0x219   :  { %v2591_v31 = vadd.f32 1e-05, %v2579_v37  ;;  %v7622_v21 = vmul.f32 0.025, %v2296_v46  ;;  %v2488_v40 = vadd.f32 %v2487_v13, %v2486_v44  ;;  %v2504_v58 = vadd.f32 %v2503_v16, %v2502_v2 }
 0x21a   :  { %v1166_v32 = vadd.f32 -1.4531521, %v1106_v10  ;;  %v2314_v8 = vadd.f32 %v2313_v52, %v2312_v39  ;;  %v1407_v19 = vadd.f32 -0.28449672, %v1347_v34  ;;  %v1775_v45 = vmul.f32 1.442695, %v1706_v56 }
 0x21b   :  { %5807 = vrsqrt.f32 %v2591_v31  ;;  %v2554_v27 = vmul.f32 0.025, %v2488_v40  ;;  %v2566_v3 = vmul.f32 %v7622_v21, %v7622_v21  ;;  %v2505_v36 = vrot.slane %v2504_v58, 2 }
 0x21c   :  { %v1226_v5 = vmul.f32 %v7599_v51, %v1166_v32  ;;  %v2315_v57 = vrot.slane %v2314_v8, 1  ;;  %v1467_v61 = vmul.f32 %v7577_v20, %v1407_v19  ;;  %v748_v15 = vmul.f32 0.70710677, %v7564_v29 }
 0x21d   :  { %v2578_v14 = vsub.f32 %v2554_v27, %v2566_v3  ;;  %v2506_v48 = vadd.f32 %v2505_v36, %v2504_v58  ;;  %v2065_v12 = vsub.f32 1.0, %v2005_v17  ;;  %5809 = vpow2.f32 %v1775_v45 }
 0x21e   :  { %v1286_v53 = vadd.f32 1.4214138, %v1226_v5  ;;  %v7629_v44 = vpop.eup %5803  ;;  %v2316_v2 = vadd.f32 %v2315_v57, %v2314_v8  ;;  %v1527_v37 = vadd.f32 0.2548296, %v1467_v61  ;;  %v808_v39 = vand.u32 2147483647, %v748_v15 }
 0x21f   :  { %v7633_v10 = vmul.f32 %v7629_v44, %v7594_v25  ;;  %v2590_v46 = vadd.f32 1e-05, %v2578_v14  ;;  %v2507_v13 = vrot.slane %v2506_v48, 1  ;;  %v7641_v32 = vadd.f32 %v7154_v6, %v6429_v43 }
 0x220   :  { %v5806_v47 = vpop.eup %5805  ;;  %v1346_v16 = vmul.f32 %v7599_v51, %v1286_v53  ;;  %v7636_v56 = vmul.f32 0.025, %v2316_v2  ;;  %v1587_v31 = vmul.f32 %v7577_v20, %v1527_v37  ;;  %v868_v52 = vmul.f32 0.3275911, %v808_v39 }
 0x221   :  { %v1648_v34 = vmul.f32 %v808_v39, %v808_v39  ;;  %5811 = vrsqrt.f32 %v2590_v46  ;;  %v2508_v40 = vadd.f32 %v2507_v13, %v2506_v48  ;;  %vm1945_vm10 = vcmp.ge.f32.partialorder %v7465_v38, 0.0 }
 0x222   :  { %v1406_v58 = vadd.f32 -0.28449672, %v1346_v16  ;;  %v2568_v25 = vmul.f32 %v7636_v56, %v7636_v56  ;;  %v1887_v8 = vmul.f32 %v5806_v47, %v1587_v31  ;;  %v928_v19 = vadd.f32 1.0, %v868_v52 }
 0x223   :  { %v2556_v27 = vmul.f32 0.025, %v2508_v40  ;;  %v2125_v3 = vsel %vm1945_vm10, %v2065_v12, %v2005_v17  ;;  %v757_v36 = vmul.f32 0.70710677, %v7641_v32  ;;  %v1708_v61 = vsub.f32 0.0, %v1648_v34 }
 0x224   :  { %v1466_v20 = vmul.f32 %v7599_v51, %v1406_v58  ;;  %v2007_v57 = vmul.f32 0.5, %v1887_v8  ;;  %5813 = vrcp.f32 %v928_v19  ;;  %v7652_v6 = vadd.f32 %v7173_v22, %v6429_v43 }
 0x225   :  { %v7648_v5 = vpop.eup %5807  ;;  %v2580_v15 = vsub.f32 %v2556_v27, %v2568_v25  ;;  %v817_v17 = vand.u32 2147483647, %v757_v36  ;;  %v7659_v48 = vmul.f32 %v2125_v3, %v7465_v38  ;;  %v1779_v46 = vmul.f32 1.442695, %v1708_v61 }
 0x226   :  { %v7656_v45 = vmul.f32 %v7648_v5, %v7610_v42  ;;  %v1526_v14 = vadd.f32 0.2548296, %v1466_v20  ;;  %v759_v12 = vmul.f32 0.70710677, %v7652_v6  ;;  %v2067_v22 = vsub.f32 1.0, %v2007_v57 }
 0x227   :  { %v2592_v53 = vadd.f32 1e-05, %v2580_v15  ;;  %v877_v37 = vmul.f32 0.3275911, %v817_v17  ;;  %v1657_v39 = vmul.f32 %v817_v17, %v817_v17  ;;  %v5810_v47 = vpop.eup %5809  ;;  %v7665_v42 = vadd.f32 %v7184_v1, %v6429_v43 }
 0x228   :  { %10204 = vst [vmem:[#allocation52_spill] sm:$0xff] %v7656_v45  ;;  %v1586_v2 = vmul.f32 %v7599_v51, %v1526_v14  ;;  %v819_v13 = vand.u32 2147483647, %v759_v12  ;;  %v7669_v38 = vadd.f32 %v7203_v4, %v6429_v43  ;;  %vm1947_vm11 = vcmp.ge.f32.partialorder %v7489_v55, 0.0 }
 0x229   :  { %5815 = vrsqrt.f32 %v2592_v53  ;;  %v937_v31 = vadd.f32 1.0, %v877_v37  ;;  %v1717_v52 = vsub.f32 0.0, %v1657_v39  ;;  %v758_v40 = vmul.f32 0.70710677, %v7665_v42 }
 0x22a   :  { %v1886_v16 = vmul.f32 %v5810_v47, %v1586_v2  ;;  %v879_v34 = vmul.f32 0.3275911, %v819_v13  ;;  %v1659_v51 = vmul.f32 %v819_v13, %v819_v13  ;;  %vm1946_vm12 = vcmp.ge.f32.partialorder %v7539_v11, 0.0 }
 0x22b   :  { %v7672_v58 = vpop.eup %5811  ;;  %5817 = vrcp.f32 %v937_v31  ;;  %v2127_v4 = vsel %vm1947_vm11, %v2067_v22, %v2007_v57  ;;  %v1797_v19 = vmul.f32 1.442695, %v1717_v52  ;;  %v818_v27 = vand.u32 2147483647, %v758_v40 }
 0x22c   :  { %v2006_v25 = vmul.f32 0.5, %v1886_v16  ;;  %v7677_v1 = vmul.f32 %v7672_v58, %v7622_v21  ;;  %v939_v8 = vadd.f32 1.0, %v879_v34  ;;  %v1719_v43 = vsub.f32 0.0, %v1659_v51 }
 0x22d   :  { %v760_v3 = vmul.f32 0.70710677, %v7669_v38  ;;  %v7685_v36 = vmul.f32 %v7659_v48, %v7659_v48  ;;  %5819 = vpow2.f32 %v1779_v46  ;;  %v7689_v21 = vadd.f32 %v7232_v59, %v6461_v28 }
 0x22e   :  { %v7681_v20 = vpop.eup %5813  ;;  %v2066_v61 = vsub.f32 1.0, %v2006_v25  ;;  %5821 = vrcp.f32 %v939_v8  ;;  %v878_v57 = vmul.f32 0.3275911, %v818_v27  ;;  %v7694_v14 = vadd.f32 %v7236_v18, %v6461_v28 }
 0x22f   :  { %v1108_v15 = vmul.f32 1.0614054, %v7681_v20  ;;  %v7697_v17 = vmul.f32 %v2127_v4, %v7489_v55  ;;  %v1801_v12 = vmul.f32 1.442695, %v1719_v43  ;;  %v1658_v53 = vmul.f32 %v818_v27, %v818_v27 }
 0x230   :  { %v820_v2 = vand.u32 2147483647, %v760_v3  ;;  %5823 = vpow2.f32 %v1797_v19  ;;  %v938_v39 = vadd.f32 1.0, %v878_v57  ;;  %v769_v59 = vmul.f32 0.70710677, %v7689_v21 }
 0x231   :  { %v1168_v37 = vadd.f32 -1.4531521, %v1108_v15  ;;  %v2126_v47 = vsel %vm1946_vm12, %v2066_v61, %v2006_v25  ;;  %v1718_v22 = vsub.f32 0.0, %v1658_v53  ;;  %v771_v31 = vmul.f32 0.70710677, %v7694_v14 }
 0x232   :  { %v880_v46 = vmul.f32 0.3275911, %v820_v2  ;;  %v1660_v13 = vmul.f32 %v820_v2, %v820_v2  ;;  %5825 = vrcp.f32 %v938_v39  ;;  %v829_v55 = vand.u32 2147483647, %v769_v59 }
 0x233   :  { %v7702_v16 = vpop.eup %5815  ;;  %v1228_v18 = vmul.f32 %v7681_v20, %v1168_v37  ;;  %v1799_v34 = vmul.f32 1.442695, %v1718_v22  ;;  %v831_v19 = vand.u32 2147483647, %v771_v31  ;;  %v7713_v27 = vmul.f32 %v2126_v47, %v7539_v11 }
 0x234   :  { %v7708_v52 = vmul.f32 %v7702_v16, %v7636_v56  ;;  %v940_v51 = vadd.f32 1.0, %v880_v46  ;;  %v1720_v40 = vsub.f32 0.0, %v1660_v13  ;;  %v889_v43 = vmul.f32 0.3275911, %v829_v55 }
 0x235   :  { %v7710_v8 = vpop.eup %5817  ;;  %v1288_v25 = vadd.f32 1.4214138, %v1228_v18  ;;  %v1669_v4 = vmul.f32 %v829_v55, %v829_v55  ;;  %5827 = vpow2.f32 %v1801_v12  ;;  %v891_v37 = vmul.f32 0.3275911, %v831_v19 }
 0x236   :  { %v1117_v3 = vmul.f32 1.0614054, %v7710_v8  ;;  %v1803_v61 = vmul.f32 1.442695, %v1720_v40  ;;  %5829 = vrcp.f32 %v940_v51  ;;  %v949_v56 = vadd.f32 1.0, %v889_v43 }
 0x237   :  { %v1348_v15 = vmul.f32 %v7681_v20, %v1288_v25  ;;  %v1729_v57 = vsub.f32 0.0, %v1669_v4  ;;  %v5820_v53 = vpop.eup %5819  ;;  %5831 = vpow2.f32 %v1799_v34  ;;  %v1671_v39 = vmul.f32 %v831_v19, %v831_v19 }
 0x238   :  { %v1177_v2 = vadd.f32 -1.4531521, %v1117_v3  ;;  %v7717_v59 = vpop.eup %5821  ;;  %5833 = vrcp.f32 %v949_v56  ;;  %v7721_v47 = vadd.f32 %v7253_v41, %v6461_v28  ;;  %v951_v13 = vadd.f32 1.0, %v891_v37 }
 0x239   :  { %v1408_v22 = vadd.f32 -0.28449672, %v1348_v15  ;;  %v1821_v11 = vmul.f32 1.442695, %v1729_v57  ;;  %v1119_v46 = vmul.f32 1.0614054, %v7717_v59  ;;  %v7729_v31 = vmul.f32 %v7697_v17, %v7697_v17 }
 0x23a   :  { %v1237_v12 = vmul.f32 %v7710_v8, %v1177_v2  ;;  %v1731_v18 = vsub.f32 0.0, %v1671_v39  ;;  %v7725_v55 = vpop.eup %5823  ;;  %5835 = vpow2.f32 %v1803_v61  ;;  %v770_v51 = vmul.f32 0.70710677, %v7721_v47 }
 0x23b   :  { %v1468_v34 = vmul.f32 %v7681_v20, %v1408_v22  ;;  %v7735_v41 = vmul.f32 %v7713_v27, %v7713_v27  ;;  %v1179_v25 = vadd.f32 -1.4531521, %v1119_v46  ;;  %5837 = vrcp.f32 %v951_v13 }
 0x23c   :  { %v1297_v40 = vadd.f32 1.4214138, %v1237_v12  ;;  %v7737_v43 = vpop.eup %5825  ;;  %5839 = vpow2.f32 %v1821_v11  ;;  %v830_v19 = vand.u32 2147483647, %v770_v51  ;;  %v7741_v3 = vadd.f32 %v7283_v33, %v6461_v28 }
 0x23d   :  { %v1528_v4 = vadd.f32 0.2548296, %v1468_v34  ;;  %vm1948_vm13 = vcmp.ge.f32.partialorder %v7564_v29, 0.0  ;;  %v1239_v15 = vmul.f32 %v7717_v59, %v1179_v25  ;;  %v1118_v56 = vmul.f32 1.0614054, %v7737_v43 }
 0x23e   :  { %v1357_v61 = vmul.f32 %v7710_v8, %v1297_v40  ;;  %v1825_v57 = vmul.f32 1.442695, %v1731_v18  ;;  %v890_v37 = vmul.f32 0.3275911, %v830_v19  ;;  %v1670_v39 = vmul.f32 %v830_v19, %v830_v19 }
 0x23f   :  { %v1588_v2 = vmul.f32 %v7681_v20, %v1528_v4  ;;  %v772_v22 = vmul.f32 0.70710677, %v7741_v3  ;;  %v5828_v11 = vpop.eup %5827  ;;  %v1299_v46 = vadd.f32 1.4214138, %v1239_v15  ;;  %v1178_v28 = vadd.f32 -1.4531521, %v1118_v56 }
 0x240   :  { %v1417_v12 = vadd.f32 -0.28449672, %v1357_v61  ;;  %v7751_v33 = vadd.f32 %v7358_v9, %v10187_v50  ;;  %v7753_v13 = vpop.eup %5829  ;;  %v950_v51 = vadd.f32 1.0, %v890_v37  ;;  %v1730_v40 = vsub.f32 0.0, %v1670_v39 }
 0x241   :  { %v1888_v34 = vmul.f32 %v5820_v53, %v1588_v2  ;;  %v832_v18 = vand.u32 2147483647, %v772_v22  ;;  %v7755_v25 = vpop.eup %5831  ;;  %v1359_v4 = vmul.f32 %v7717_v59, %v1299_v46  ;;  %v1238_v19 = vmul.f32 %v7737_v43, %v1178_v28 }
 0x242   :  { %v1477_v20 = vmul.f32 %v7710_v8, %v1417_v12  ;;  %v1120_v61 = vmul.f32 1.0614054, %v7753_v13  ;;  %v7761_v15 = vpop.eup %5833  ;;  %5841 = vrcp.f32 %v950_v51  ;;  %v1823_v56 = vmul.f32 1.442695, %v1730_v40 }
 0x243   :  { %v2008_v9 = vmul.f32 0.5, %v1888_v34  ;;  %v892_v30 = vmul.f32 0.3275911, %v832_v18  ;;  %v1419_v2 = vadd.f32 -0.28449672, %v1359_v4  ;;  %5843 = vpow2.f32 %v1825_v57 }
 0x244   :  { %v1537_v53 = vadd.f32 0.2548296, %v1477_v20  ;;  %v1298_v37 = vadd.f32 1.4214138, %v1238_v19  ;;  %v7763_v39 = vpop.eup %5835  ;;  %vm1957_vm14 = vcmp.ge.f32.partialorder %v7641_v32, 0.0  ;;  %v1672_v28 = vmul.f32 %v832_v18, %v832_v18 }
 0x245   :  { %v2068_v22 = vsub.f32 1.0, %v2008_v9  ;;  %v1180_v12 = vadd.f32 -1.4531521, %v1120_v61  ;;  %v1129_v46 = vmul.f32 1.0614054, %v7761_v15  ;;  %v7767_v23 = vpop.eup %5837  ;;  %v1479_v51 = vmul.f32 %v7717_v59, %v1419_v2 }
 0x246   :  { %v1597_v34 = vmul.f32 %v7710_v8, %v1537_v53  ;;  %v1358_v40 = vmul.f32 %v7737_v43, %v1298_v37  ;;  %v952_v20 = vadd.f32 1.0, %v892_v30  ;;  %v7772_v4 = vpop.eup %5839  ;;  %v1131_v62 = vmul.f32 1.0614054, %v7767_v23 }
 0x247   :  { %v2128_v57 = vsel %vm1948_vm13, %v2068_v22, %v2008_v9  ;;  %v1240_v19 = vmul.f32 %v7753_v13, %v1180_v12  ;;  %v1189_v61 = vadd.f32 -1.4531521, %v1129_v46  ;;  %v1539_v53 = vadd.f32 0.2548296, %v1479_v51 }
 0x248   :  { %v7779_v18 = vmul.f32 %v2128_v57, %v7564_v29  ;;  %v1897_v8 = vmul.f32 %v7725_v55, %v1597_v34  ;;  %v1418_v2 = vadd.f32 -0.28449672, %v1358_v40  ;;  %vm1959_vm15 = vcmp.ge.f32.partialorder %v7652_v6, 0.0 }
 0x249   :  { %v1300_v30 = vadd.f32 1.4214138, %v1240_v19  ;;  %v1249_v37 = vmul.f32 %v7761_v15, %v1189_v61  ;;  %v1191_v45 = vadd.f32 -1.4531521, %v1131_v62  ;;  %5845 = vrcp.f32 %v952_v20 }
 0x24a   :  { %v2017_v9 = vmul.f32 0.5, %v1897_v8  ;;  %v1599_v22 = vmul.f32 %v7717_v59, %v1539_v53  ;;  %v1478_v12 = vmul.f32 %v7737_v43, %v1418_v2  ;;  %v7788_v29 = vadd.f32 %v7410_v24, %v10187_v50 }
 0x24b   :  { %v1360_v55 = vmul.f32 %v7753_v13, %v1300_v30  ;;  %v1309_v46 = vadd.f32 1.4214138, %v1249_v37  ;;  %v1251_v34 = vmul.f32 %v7767_v23, %v1191_v45  ;;  %5847 = vpow2.f32 %v1823_v56 }
 0x24c   :  { %v2077_v51 = vsub.f32 1.0, %v2017_v9  ;;  %v1899_v40 = vmul.f32 %v5828_v11, %v1599_v22  ;;  %v1538_v57 = vadd.f32 0.2548296, %v1478_v12  ;;  %v1732_v62 = vsub.f32 0.0, %v1672_v28  ;;  %v7792_v20 = vpop.eup %5841 }
 0x24d   :  { %v7796_v59 = vmul.f32 %v7779_v18, %v7779_v18  ;;  %vm1958_vm0 = vcmp.ge.f32.partialorder %v7665_v42, 0.0  ;;  %v1420_v24 = vadd.f32 -0.28449672, %v1360_v55  ;;  %v1369_v19 = vmul.f32 %v7761_v15, %v1309_v46  ;;  %v5844_v8 = vpop.eup %5843 }
 0x24e   :  { %v1311_v61 = vadd.f32 1.4214138, %v1251_v34  ;;  %v2137_v45 = vsel %vm1957_vm14, %v2077_v51, %v2017_v9  ;;  %v2019_v56 = vmul.f32 0.5, %v1899_v40  ;;  %v1598_v11 = vmul.f32 %v7737_v43, %v1538_v57 }
 0x24f   :  { %v1130_v28 = vmul.f32 1.0614054, %v7792_v20  ;;  %v7805_v53 = vmul.f32 %v2137_v45, %v7641_v32  ;;  %v1480_v2 = vmul.f32 %v7753_v13, %v1420_v24  ;;  %v1429_v30 = vadd.f32 -0.28449672, %v1369_v19 }
 0x250   :  { %v1371_v37 = vmul.f32 %v7767_v23, %v1311_v61  ;;  %v2079_v22 = vsub.f32 1.0, %v2019_v56  ;;  %v1898_v12 = vmul.f32 %v7755_v25, %v1598_v11  ;;  %v1827_v46 = vmul.f32 1.442695, %v1732_v62 }
 0x251   :  { %v1190_v55 = vadd.f32 -1.4531521, %v1130_v28  ;;  %v7812_v9 = vadd.f32 %v7805_v53, %v7659_v48  ;;  %v2389_v43 = vmul.f32 %v7805_v53, %v7805_v53  ;;  %v1540_v34 = vadd.f32 0.2548296, %v1480_v2 }
 0x252   :  { %v1489_v32 = vmul.f32 %v7761_v15, %v1429_v30  ;;  %v2139_v51 = vsel %vm1959_vm15, %v2079_v22, %v2019_v56  ;;  %v2018_v40 = vmul.f32 0.5, %v1898_v12  ;;  %vm1960_vm1 = vcmp.ge.f32.partialorder %v7669_v38, 0.0 }
 0x253   :  { %v1431_v57 = vadd.f32 -0.28449672, %v1371_v37  ;;  %v1250_v25 = vmul.f32 %v7792_v20, %v1190_v55  ;;  %v7821_v62 = vpop.eup %5845  ;;  %v7824_v24 = vadd.f32 %v2389_v43, %v7685_v36  ;;  %v7827_v19 = vmul.f32 %v2139_v51, %v7652_v6 }
 0x254   :  { %v1600_v61 = vmul.f32 %v7753_v13, %v1540_v34  ;;  %v1549_v45 = vadd.f32 0.2548296, %v1489_v32  ;;  %v2078_v11 = vsub.f32 1.0, %v2018_v40  ;;  %vm1969_vm2 = vcmp.ge.f32.partialorder %v7689_v21, 0.0 }
 0x255   :  { %10205 = vst [vmem:[#allocation53_spill] sm:$0xff] %v7827_v19  ;;  %v1491_v56 = vmul.f32 %v7767_v23, %v1431_v57  ;;  %v1310_v28 = vadd.f32 1.4214138, %v1250_v25  ;;  %v1132_v2 = vmul.f32 1.0614054, %v7821_v62  ;;  %v5848_v30 = vpop.eup %5847  ;;  %v2337_v37 = vadd.f32 %v7827_v19, %v7697_v17 }
 0x256   :  { %v2391_v36 = vmul.f32 %v7827_v19, %v7827_v19  ;;  %v1900_v6 = vmul.f32 %v7763_v39, %v1600_v61  ;;  %v1609_v13 = vmul.f32 %v7761_v15, %v1549_v45  ;;  %v2138_v22 = vsel %vm1958_vm0, %v2078_v11, %v2018_v40 }
 0x257   :  { %v1551_v12 = vadd.f32 0.2548296, %v1491_v56  ;;  %v1370_v55 = vmul.f32 %v7792_v20, %v1310_v28  ;;  %v1192_v43 = vadd.f32 -1.4531521, %v1132_v2  ;;  %v7844_v32 = vmul.f32 %v2138_v22, %v7665_v42 }
 0x258   :  { %v2529_v34 = vadd.f32 %v2391_v36, %v7729_v31  ;;  %v2020_v51 = vmul.f32 0.5, %v1900_v6  ;;  %v1909_v57 = vmul.f32 %v7772_v4, %v1609_v13  ;;  %vm1971_vm3 = vcmp.ge.f32.partialorder %v7694_v14, 0.0 }
 0x259   :  { %v1611_v39 = vmul.f32 %v7767_v23, %v1551_v12  ;;  %v1430_v15 = vadd.f32 -0.28449672, %v1370_v55  ;;  %v1252_v25 = vmul.f32 %v7821_v62, %v1192_v43  ;;  %v781_v40 = vmul.f32 0.70710677, %v7751_v33 }
 0x25a   :  { %v7853_v61 = vadd.f32 %v7844_v32, %v7713_v27  ;;  %v2390_v42 = vmul.f32 %v7844_v32, %v7844_v32  ;;  %v2080_v31 = vsub.f32 1.0, %v2020_v51  ;;  %v2029_v45 = vmul.f32 0.5, %v1909_v57 }
 0x25b   :  { %v1911_v11 = vmul.f32 %v5844_v8, %v1611_v39  ;;  %v1490_v4 = vmul.f32 %v7792_v20, %v1430_v15  ;;  %v1312_v56 = vadd.f32 1.4214138, %v1252_v25  ;;  %v841_v28 = vand.u32 2147483647, %v781_v40 }
 0x25c   :  { %v7859_v23 = vadd.f32 %v2390_v42, %v7735_v41  ;;  %v2140_v2 = vsel %vm1960_vm1, %v2080_v31, %v2020_v51  ;;  %v2089_v36 = vsub.f32 1.0, %v2029_v45  ;;  %5849 = vpow2.f32 %v1827_v46 }
 0x25d   :  { %v7864_v6 = vmul.f32 %v2140_v2, %v7669_v38  ;;  %v2031_v13 = vmul.f32 0.5, %v1911_v11  ;;  %v1550_v22 = vadd.f32 0.2548296, %v1490_v4  ;;  %v1372_v12 = vmul.f32 %v7821_v62, %v1312_v56 }
 0x25e   :  { %v2149_v8 = vsel %vm1969_vm2, %v2089_v36, %v2029_v45  ;;  %v901_v55 = vmul.f32 0.3275911, %v841_v28  ;;  %v1681_v43 = vmul.f32 %v841_v28, %v841_v28  ;;  %v783_v41 = vmul.f32 0.70710677, %v7788_v29 }
 0x25f   :  { %v7872_v57 = vadd.f32 %v7864_v6, %v7779_v18  ;;  %v2392_v46 = vmul.f32 %v7864_v6, %v7864_v6  ;;  %v7877_v38 = vmul.f32 %v2149_v8, %v7689_v21  ;;  %v2091_v51 = vsub.f32 1.0, %v2031_v13 }
 0x260   :  { %v1610_v39 = vmul.f32 %v7792_v20, %v1550_v22  ;;  %v1432_v15 = vadd.f32 -0.28449672, %v1372_v12  ;;  %v961_v25 = vadd.f32 1.0, %v901_v55  ;;  %v1741_v40 = vsub.f32 0.0, %v1681_v43 }
 0x261   :  { %10206 = vst [vmem:[#allocation54_spill] sm:$0xff] %v7877_v38  ;;  %v7881_v42 = vadd.f32 %v2392_v46, %v7796_v59  ;;  %v7885_v31 = vadd.f32 %v7812_v9, %v7877_v38  ;;  %v2401_v45 = vmul.f32 %v7877_v38, %v7877_v38  ;;  %v2151_v21 = vsel %vm1971_vm3, %v2091_v51, %v2031_v13 }
 0x262   :  { %v7892_v11 = vmul.f32 %v2151_v21, %v7694_v14  ;;  %v1910_v20 = vmul.f32 %v5848_v30, %v1610_v39  ;;  %v1492_v4 = vmul.f32 %v7821_v62, %v1432_v15  ;;  %5851 = vrcp.f32 %v961_v25 }
 0x263   :  { %v7896_v59 = vadd.f32 %v7824_v24, %v2401_v45  ;;  %v1845_v56 = vmul.f32 1.442695, %v1741_v40  ;;  %v843_v28 = vand.u32 2147483647, %v783_v41  ;;  %v7905_v30 = vadd.f32 %v7428_v7, %v10187_v50 }
 0x264   :  { %10207 = vst [vmem:[#allocation55_spill] sm:$0xff] %v7892_v11  ;;  %v7899_v9 = vadd.f32 %v2337_v37, %v7892_v11  ;;  %v2403_v2 = vmul.f32 %v7892_v11, %v7892_v11  ;;  %v2030_v36 = vmul.f32 0.5, %v1910_v20  ;;  %v1552_v13 = vadd.f32 0.2548296, %v1492_v4 }
 0x265   :  { %v903_v22 = vmul.f32 0.3275911, %v843_v28  ;;  %v1683_v14 = vmul.f32 %v843_v28, %v843_v28  ;;  %v7912_v37 = vadd.f32 %v7445_v0, %v10187_v50  ;;  %vm1970_vm4 = vcmp.ge.f32.partialorder %v7721_v47, 0.0 }
 0x266   :  { %v5850_v12 = vpop.eup %5849  ;;  %v7907_v8 = vadd.f32 %v2529_v34, %v2403_v2  ;;  %v2090_v24 = vsub.f32 1.0, %v2030_v36  ;;  %v1612_v55 = vmul.f32 %v7821_v62, %v1552_v13  ;;  %v782_v46 = vmul.f32 0.70710677, %v7905_v30 }
 0x267   :  { %v963_v43 = vadd.f32 1.0, %v903_v22  ;;  %v1743_v41 = vsub.f32 0.0, %v1683_v14  ;;  %5853 = vpow2.f32 %v1845_v56  ;;  %v784_v7 = vmul.f32 0.70710677, %v7912_v37 }
 0x268   :  { %v2150_v51 = vsel %vm1970_vm4, %v2090_v24, %v2030_v36  ;;  %v1912_v39 = vmul.f32 %v5850_v12, %v1612_v55  ;;  %vm1972_vm5 = vcmp.ge.f32.partialorder %v7741_v3, 0.0  ;;  %v842_v62 = vand.u32 2147483647, %v782_v46 }
 0x269   :  { %v7918_v34 = vmul.f32 %v2150_v51, %v7721_v47  ;;  %5855 = vrcp.f32 %v963_v43  ;;  %v1849_v0 = vmul.f32 1.442695, %v1743_v41  ;;  %v844_v15 = vand.u32 2147483647, %v784_v7 }
 0x26a   :  { %v2032_v50 = vmul.f32 0.5, %v1912_v39  ;;  %v7923_v25 = vadd.f32 %v7459_v35, %v6726_v54  ;;  %v902_v47 = vmul.f32 0.3275911, %v842_v62  ;;  %v7933_v21 = vadd.f32 %v7483_v49, %v6726_v54 }
 0x26b   :  { %10208 = vst [vmem:[#allocation56_spill] sm:$0xff] %v7918_v34  ;;  %v7927_v40 = vadd.f32 %v7853_v61, %v7918_v34  ;;  %v2402_v45 = vmul.f32 %v7918_v34, %v7918_v34  ;;  %v1682_v56 = vmul.f32 %v842_v62, %v842_v62  ;;  %v904_v28 = vmul.f32 0.3275911, %v844_v15  ;;  %v10216_v34 = vld [vmem:[#allocation37_spill] sm:$0xff] }
 0x26c   :  { %v7935_v20 = vpop.eup %5851  ;;  %v2092_v4 = vsub.f32 1.0, %v2032_v50  ;;  %v1684_v2 = vmul.f32 %v844_v15, %v844_v15  ;;  %v962_v36 = vadd.f32 1.0, %v902_v47  ;;  %v793_v13 = vmul.f32 0.70710677, %v7923_v25 }
 0x26d   :  { %v7938_v35 = vadd.f32 %v7859_v23, %v2402_v45  ;;  %v1141_v61 = vmul.f32 1.0614054, %v7935_v20  ;;  %v1742_v14 = vsub.f32 0.0, %v1682_v56  ;;  %v964_v49 = vadd.f32 1.0, %v904_v28 }
 0x26e   :  { %v2152_v22 = vsel %vm1972_vm5, %v2092_v4, %v2032_v50  ;;  %v1744_v12 = vsub.f32 0.0, %v1684_v2  ;;  %5857 = vrcp.f32 %v962_v36  ;;  %v853_v43 = vand.u32 2147483647, %v793_v13  ;;  %v10211_v36 = vld [vmem:[#allocation33_spill] sm:$0xff] }
 0x26f   :  { %v7945_v24 = vmul.f32 %v2152_v22, %v7741_v3  ;;  %v1201_v55 = vadd.f32 -1.4531521, %v1141_v61  ;;  %v1847_v41 = vmul.f32 1.442695, %v1742_v14  ;;  %5859 = vrcp.f32 %v964_v49 }
 0x270   :  { %v913_v39 = vmul.f32 0.3275911, %v853_v43  ;;  %5861 = vpow2.f32 %v1849_v0  ;;  %v1851_v62 = vmul.f32 1.442695, %v1744_v12  ;;  %v1693_v3 = vmul.f32 %v853_v43, %v853_v43 }
 0x271   :  { %10209 = vst [vmem:[#allocation57_spill] sm:$0xff] %v7945_v24  ;;  %v7949_v23 = vadd.f32 %v7872_v57, %v7945_v24  ;;  %v2404_v46 = vmul.f32 %v7945_v24, %v7945_v24  ;;  %v1261_v51 = vmul.f32 %v7935_v20, %v1201_v55  ;;  %v5854_v7 = vpop.eup %5853  ;;  %v795_v50 = vmul.f32 0.70710677, %v7933_v21 }
 0x272   :  { %5863 = vpow2.f32 %v1847_v41  ;;  %v973_v57 = vadd.f32 1.0, %v913_v39  ;;  %v1753_v56 = vsub.f32 0.0, %v1693_v3  ;;  %v7963_v2 = vadd.f32 %v7493_v60, %v6726_v54  ;;  %v10212_v3 = vld [vmem:[#allocation11_spill] sm:$0xff] }
 0x273   :  { %v7955_v15 = vpop.eup %5855  ;;  %v7958_v45 = vadd.f32 %v7881_v42, %v2404_v46  ;;  %v1321_v47 = vadd.f32 1.4214138, %v1261_v51  ;;  %v855_v28 = vand.u32 2147483647, %v795_v50  ;;  %v7968_v61 = vadd.f32 %v7505_v63, %v6726_v54  ;;  %v10210_v42 = vld [vmem:[#allocation7_spill] sm:$0xff] }
 0x274   :  { %v1143_v4 = vmul.f32 1.0614054, %v7955_v15  ;;  %5865 = vrcp.f32 %v973_v57  ;;  %v7972_v13 = vmul.f32 %v10211_v36, %v10210_v42  ;;  %v1869_v14 = vmul.f32 1.442695, %v1753_v56 }
 0x275   :  { %v1381_v0 = vmul.f32 %v7935_v20, %v1321_v47  ;;  %v915_v49 = vmul.f32 0.3275911, %v855_v28  ;;  %v1695_v12 = vmul.f32 %v855_v28, %v855_v28  ;;  %5867 = vpow2.f32 %v1851_v62 }
 0x276   :  { %v1203_v22 = vadd.f32 -1.4531521, %v1143_v4  ;;  %v794_v60 = vmul.f32 0.70710677, %v7963_v2  ;;  %5869 = vpow2.f32 %v1869_v14  ;;  %v796_v39 = vmul.f32 0.70710677, %v7968_v61 }
 0x277   :  { %v1441_v55 = vadd.f32 -0.28449672, %v1381_v0  ;;  %v975_v41 = vadd.f32 1.0, %v915_v49  ;;  %v1755_v46 = vsub.f32 0.0, %v1695_v12  ;;  %v7982_v50 = vmul.f32 %v10211_v36, %v10212_v3 }
 0x278   :  { %v1263_v43 = vmul.f32 %v7955_v15, %v1203_v22  ;;  %v7976_v51 = vpop.eup %5857  ;;  %v854_v63 = vand.u32 2147483647, %v794_v60  ;;  %vm1981_vm6 = vcmp.ge.f32.partialorder %v7751_v33, 0.0  ;;  %v856_v12 = vand.u32 2147483647, %v796_v39 }
 0x279   :  { %v1501_v54 = vmul.f32 %v7935_v20, %v1441_v55  ;;  %v7984_v47 = vpop.eup %5859  ;;  %v1142_v57 = vmul.f32 1.0614054, %v7976_v51  ;;  %5871 = vrcp.f32 %v975_v41  ;;  %v1873_v4 = vmul.f32 1.442695, %v1755_v46 }
 0x27a   :  { %v1323_v62 = vadd.f32 1.4214138, %v1263_v43  ;;  %v1144_v28 = vmul.f32 1.0614054, %v7984_v47  ;;  %v914_v0 = vmul.f32 0.3275911, %v854_v63  ;;  %v1694_v42 = vmul.f32 %v854_v63, %v854_v63  ;;  %v5862_v22 = vpop.eup %5861 }
 0x27b   :  { %v1561_v56 = vadd.f32 0.2548296, %v1501_v54  ;;  %v1202_v49 = vadd.f32 -1.4531521, %v1142_v57  ;;  %5873 = vpow2.f32 %v1873_v4  ;;  %v916_v11 = vmul.f32 0.3275911, %v856_v12 }
 0x27c   :  { %v1383_v14 = vmul.f32 %v7955_v15, %v1323_v62  ;;  %v7990_v55 = vpop.eup %5863  ;;  %v1204_v43 = vadd.f32 -1.4531521, %v1144_v28  ;;  %v974_v41 = vadd.f32 1.0, %v914_v0  ;;  %v1754_v46 = vsub.f32 0.0, %v1694_v42 }
 0x27d   :  { %v1621_v60 = vmul.f32 %v7935_v20, %v1561_v56  ;;  %v1262_v3 = vmul.f32 %v7976_v51, %v1202_v49  ;;  %v1696_v63 = vmul.f32 %v856_v12, %v856_v12  ;;  %v976_v56 = vadd.f32 1.0, %v916_v11 }
 0x27e   :  { %v1443_v54 = vadd.f32 -0.28449672, %v1383_v14  ;;  %v7994_v38 = vpop.eup %5865  ;;  %v1264_v62 = vmul.f32 %v7984_v47, %v1204_v43  ;;  %5875 = vrcp.f32 %v974_v41  ;;  %v1871_v57 = vmul.f32 1.442695, %v1754_v46 }
 0x27f   :  { %v1921_v24 = vmul.f32 %v5854_v7, %v1621_v60  ;;  %v1322_v4 = vadd.f32 1.4214138, %v1262_v3  ;;  %v1153_v20 = vmul.f32 1.0614054, %v7994_v38  ;;  %v5868_v28 = vpop.eup %5867  ;;  %v1756_v14 = vsub.f32 0.0, %v1696_v63 }
 0x280   :  { %v1503_v39 = vmul.f32 %v7955_v15, %v1443_v54  ;;  %v1324_v42 = vadd.f32 1.4214138, %v1264_v62  ;;  %5877 = vpow2.f32 %v1871_v57  ;;  %v7999_v49 = vpop.eup %5869  ;;  %vm1983_vm7 = vcmp.ge.f32.partialorder %v7788_v29, 0.0  ;;  %v10213_v54 = vld [vmem:[#allocation34_spill] sm:$0xff] }
 0x281   :  { %v2041_v0 = vmul.f32 0.5, %v1921_v24  ;;  %v1382_v7 = vmul.f32 %v7976_v51, %v1322_v4  ;;  %v1213_v60 = vadd.f32 -1.4531521, %v1153_v20  ;;  %5879 = vrcp.f32 %v976_v56 }
 0x282   :  { %v1563_v12 = vadd.f32 0.2548296, %v1503_v39  ;;  %v1384_v41 = vmul.f32 %v7984_v47, %v1324_v42  ;;  %v1875_v46 = vmul.f32 1.442695, %v1756_v14  ;;  %v2682_v11 = vsub.f32 %v7972_v13, %v10213_v54 }
 0x283   :  { %v2101_v43 = vsub.f32 1.0, %v2041_v0  ;;  %v8006_v24 = vpop.eup %5871  ;;  %v1442_v63 = vadd.f32 -0.28449672, %v1382_v7  ;;  %v1273_v62 = vmul.f32 %v7994_v38, %v1213_v60  ;;  %v2694_v57 = vsub.f32 %v7982_v50, %v10213_v54  ;;  %v10215_v60 = vld [vmem:[#allocation10_spill] sm:$0xff] }
 0x284   :  { %v1623_v3 = vmul.f32 %v7955_v15, %v1563_v12  ;;  %v1444_v4 = vadd.f32 -0.28449672, %v1384_v41  ;;  %v1155_v20 = vmul.f32 1.0614054, %v8006_v24  ;;  %5881 = vpow2.f32 %v1875_v46 }
 0x285   :  { %v2161_v39 = vsel %vm1981_vm6, %v2101_v43, %v2041_v0  ;;  %v8015_v56 = vpop.eup %5873  ;;  %v1502_v15 = vmul.f32 %v7976_v51, %v1442_v63  ;;  %v1333_v14 = vadd.f32 1.4214138, %v1273_v62  ;;  %v5501_v50 = vpack.c.bf16 %v2694_v57, %v2682_v11  ;;  %v10217_v62 = vld [vmem:[#allocation13_spill] sm:$0xff] }
 0x286   :  { %v8018_v13 = vmul.f32 %v2161_v39, %v7751_v33  ;;  %v1923_v42 = vmul.f32 %v5862_v22, %v1623_v3  ;;  %v1504_v12 = vmul.f32 %v7984_v47, %v1444_v4  ;;  %v1215_v7 = vadd.f32 -1.4531521, %v1155_v20 }
 0x287   :  { %v2612_v0 = vmul.f32 %v10216_v34, %v10215_v60  ;;  %v1562_v46 = vadd.f32 0.2548296, %v1502_v15  ;;  %vm1982_vm8 = vcmp.ge.f32.partialorder %v7905_v30, 0.0  ;;  %v1393_v63 = vmul.f32 %v7994_v38, %v1333_v14  ;;  %5502 = vmatprep.subr.bf16.mxu0 %v5501_v50 }
 0x288   :  { %10214 = vst [vmem:[#allocation7_spill] sm:$0xff] %v8018_v13  ;;  %v8026_v43 = vadd.f32 %v7885_v31, %v8018_v13  ;;  %v2413_v41 = vmul.f32 %v8018_v13, %v8018_v13  ;;  %v2043_v33 = vmul.f32 0.5, %v1923_v42  ;;  %v8030_v22 = vpop.eup %5875  ;;  %v1564_v3 = vadd.f32 0.2548296, %v1504_v12 }
 0x289   :  { %v1275_v11 = vmul.f32 %v8006_v24, %v1215_v7  ;;  %v2624_v57 = vmul.f32 %v10216_v34, %v10217_v62  ;;  %v1622_v4 = vmul.f32 %v7976_v51, %v1562_v46  ;;  %vm1984_vm9 = vcmp.ge.f32.partialorder %v7912_v37, 0.0  ;;  %v10218_v7 = vld [vmem:[#allocation38_spill] sm:$0xff] }
 0x28a   :  { %v8038_v31 = vadd.f32 %v7896_v59, %v2413_v41  ;;  %v2103_v39 = vsub.f32 1.0, %v2043_v33  ;;  %v1154_v20 = vmul.f32 1.0614054, %v8030_v22  ;;  %v8043_v42 = vpop.eup %5877  ;;  %v1624_v15 = vmul.f32 %v7984_v47, %v1564_v3 }
 0x28b   :  { %v1453_v14 = vadd.f32 -0.28449672, %v1393_v63  ;;  %v1335_v12 = vadd.f32 1.4214138, %v1275_v11  ;;  %v2684_v50 = vsub.f32 %v2612_v0, %v10218_v7  ;;  %v8047_v60 = vpop.eup %5879  ;;  %v1922_v41 = vmul.f32 %v7990_v55, %v1622_v4 }
 0x28c   :  { %v2163_v59 = vsel %vm1983_vm7, %v2103_v39, %v2043_v33  ;;  %v1214_v51 = vadd.f32 -1.4531521, %v1154_v20  ;;  %v2696_v46 = vsub.f32 %v2624_v57, %v10218_v7  ;;  %v1924_v13 = vmul.f32 %v5868_v28, %v1624_v15  ;;  %v10219_v15 = vld [vmem:[#allocation5_spill] sm:$0xff] }
 0x28d   :  { %v8054_v62 = vmul.f32 %v2163_v59, %v7788_v29  ;;  %v1513_v47 = vmul.f32 %v7994_v38, %v1453_v14  ;;  %v1395_v3 = vmul.f32 %v8006_v24, %v1335_v12  ;;  %v2042_v63 = vmul.f32 0.5, %v1922_v41  ;;  %v10220_v14 = vld [vmem:[#allocation28_spill] sm:$0xff] }
 0x28e   :  { %v1274_v0 = vmul.f32 %v8030_v22, %v1214_v51  ;;  %v1156_v11 = vmul.f32 1.0614054, %v8047_v60  ;;  %v5509_v19 = vpack.c.bf16 %v2696_v46, %v2684_v50  ;;  %v8060_v33 = vpop.eup %5881  ;;  %v2044_v28 = vmul.f32 0.5, %v1924_v13 }
 0x28f   :  { %v8064_v55 = vadd.f32 %v7899_v9, %v8054_v62  ;;  %v2415_v29 = vmul.f32 %v8054_v62, %v8054_v62  ;;  %v1573_v57 = vadd.f32 0.2548296, %v1513_v47  ;;  %v2102_v39 = vsub.f32 1.0, %v2042_v63  ;;  %v10221_v47 = vld [vmem:[#allocation8_spill] sm:$0xff] }
 0x290   :  { %vm1993_vm10 = vcmp.ge.f32.partialorder %v7923_v25, 0.0  ;;  %v1455_v4 = vadd.f32 -0.28449672, %v1395_v3  ;;  %v1334_v20 = vadd.f32 1.4214138, %v1274_v0  ;;  %5510 = vmatprep.subr.bf16.mxu1 %v5509_v19  ;;  %v2609_v12 = vmul.f32 %v10220_v14, %v10219_v15 }
 0x291   :  { %v8072_v50 = vadd.f32 %v7907_v8, %v2415_v29  ;;  %v2104_v59 = vsub.f32 1.0, %v2044_v28  ;;  %v1633_v9 = vmul.f32 %v7994_v38, %v1573_v57  ;;  %v1216_v41 = vadd.f32 -1.4531521, %v1156_v11  ;;  %v10222_v57 = vld [vmem:[#allocation30_spill] sm:$0xff] }
 0x292   :  { %v2162_v13 = vsel %vm1982_vm8, %v2102_v39, %v2042_v63  ;;  %v1515_v51 = vmul.f32 %v8006_v24, %v1455_v4  ;;  %v1394_v46 = vmul.f32 %v8030_v22, %v1334_v20  ;;  %v2621_v19 = vmul.f32 %v10220_v14, %v10221_v47  ;;  %v10224_v47 = vld [vmem:[#allocation31_spill] sm:$0xff] }
 0x293   :  { %v8082_v3 = vmul.f32 %v2162_v13, %v7905_v30  ;;  %v2164_v8 = vsel %vm1984_vm9, %v2104_v59, %v2044_v28  ;;  %v1933_v0 = vmul.f32 %v7999_v49, %v1633_v9  ;;  %v1276_v38 = vmul.f32 %v8047_v60, %v1216_v41 }
 0x294   :  { %v8089_v11 = vmul.f32 %v2164_v8, %v7912_v37  ;;  %v1575_v63 = vadd.f32 0.2548296, %v1515_v51  ;;  %v1454_v29 = vadd.f32 -0.28449672, %v1394_v46  ;;  %v2681_v39 = vsub.f32 %v2609_v12, %v10222_v57  ;;  %v10223_v46 = vld [vmem:[#allocation6_spill] sm:$0xff] }
 0x295   :  { %v8094_v4 = vadd.f32 %v7927_v40, %v8082_v3  ;;  %v2414_v30 = vmul.f32 %v8082_v3, %v8082_v3  ;;  %v2053_v20 = vmul.f32 0.5, %v1933_v0  ;;  %vm1995_vm11 = vcmp.ge.f32.partialorder %v7933_v21, 0.0 }
 0x296   :  { %v1336_v49 = vadd.f32 1.4214138, %v1276_v38  ;;  %v8101_v28 = vadd.f32 %v7949_v23, %v8089_v11  ;;  %v2416_v37 = vmul.f32 %v8089_v11, %v8089_v11  ;;  %v1635_v15 = vmul.f32 %v8006_v24, %v1575_v63  ;;  %v10225_v38 = vld [vmem:[#allocation9_spill] sm:$0xff] }
 0x297   :  { %v1514_v12 = vmul.f32 %v8030_v22, %v1454_v29  ;;  %v8108_v40 = vadd.f32 %v7938_v35, %v2414_v30  ;;  %v2113_v59 = vsub.f32 1.0, %v2053_v20  ;;  %v2693_v41 = vsub.f32 %v2621_v19, %v10222_v57  ;;  %v10226_v29 = vld [vmem:[#allocation32_spill] sm:$0xff] }
 0x298   :  { %v1396_v9 = vmul.f32 %v8047_v60, %v1336_v49  ;;  %v8113_v13 = vadd.f32 %v7958_v45, %v2416_v37  ;;  %v1935_v23 = vmul.f32 %v8015_v56, %v1635_v15  ;;  %v2611_v8 = vmul.f32 %v10224_v47, %v10223_v46  ;;  %v10227_v37 = vld [vmem:[#allocation19_spill] sm:$0xff] }
 0x299   :  { %v1574_v51 = vadd.f32 0.2548296, %v1514_v12  ;;  %v2173_v24 = vsel %vm1993_vm10, %v2113_v59, %v2053_v20  ;;  %vm1994_vm12 = vcmp.ge.f32.partialorder %v7963_v2, 0.0  ;;  %v5503_v0 = vpack.c.bf16 %v2693_v41, %v2681_v39  ;;  %v10228_v39 = vld [vmem:[#allocation23_spill] sm:$0xff] }
 0x29a   :  { %v1456_v35 = vadd.f32 -0.28449672, %v1396_v9  ;;  %v2623_v63 = vmul.f32 %v10224_v47, %v10225_v38  ;;  %v8124_v19 = vmul.f32 %v2173_v24, %v7923_v25  ;;  %v2055_v45 = vmul.f32 0.5, %v1935_v23 }
 0x29b   :  { %v1634_v56 = vmul.f32 %v8030_v22, %v1574_v51  ;;  %v2683_v30 = vsub.f32 %v2611_v8, %v10226_v29  ;;  %5504 = vmatpush1.bf16.msra.mxu0 %v5503_v0  ;;  %v2634_v15 = vmul.f32 %v10211_v36, %v10227_v37  ;;  %v2646_v12 = vmul.f32 %v10211_v36, %v10228_v39 }
 0x29c   :  { %v1516_v49 = vmul.f32 %v8047_v60, %v1456_v35  ;;  %v2695_v20 = vsub.f32 %v2623_v63, %v10226_v29  ;;  %v2320_v25 = vadd.f32 %v8026_v43, %v8124_v19  ;;  %v2425_v59 = vmul.f32 %v8124_v19, %v8124_v19  ;;  %v10229_v63 = vld [vmem:[#allocation20_spill] sm:$0xff] }
 0x29d   :  { %v2115_v22 = vsub.f32 1.0, %v2055_v45  ;;  %v1934_v9 = vmul.f32 %v8043_v42, %v1634_v56  ;;  %v2706_v51 = vsub.f32 %v2634_v15, %v10213_v54  ;;  %v2718_v46 = vsub.f32 %v2646_v12, %v10213_v54 }
 0x29e   :  { %v1576_v41 = vadd.f32 0.2548296, %v1516_v49  ;;  %v5511_v23 = vpack.c.bf16 %v2695_v20, %v2683_v30  ;;  %v2321_v8 = vrot.slane %v2320_v25, 4  ;;  %v2512_v24 = vadd.f32 %v8038_v31, %v2425_v59  ;;  %v10230_v31 = vld [vmem:[#allocation24_spill] sm:$0xff] }
 0x29f   :  { %v2175_v35 = vsel %vm1995_vm11, %v2115_v22, %v2055_v45  ;;  %v2054_v0 = vmul.f32 0.5, %v1934_v9  ;;  %vm1996_vm13 = vcmp.ge.f32.partialorder %v7968_v61, 0.0  ;;  %v5505_v42 = vpack.c.bf16 %v2718_v46, %v2706_v51  ;;  %v10231_v46 = vld [vmem:[#allocation14_spill] sm:$0xff] }
 0x2a0   :  { %v8145_v43 = vmul.f32 %v2175_v35, %v7933_v21  ;;  %v1636_v38 = vmul.f32 %v8047_v60, %v1576_v41  ;;  %5512 = vmatpush1.bf16.msra.mxu1 %v5511_v23  ;;  %v2636_v56 = vmul.f32 %v10216_v34, %v10229_v63  ;;  %v2322_v30 = vadd.f32 %v2321_v8, %v2320_v25 }
 0x2a1   :  { %v2513_v49 = vrot.slane %v2512_v24, 4  ;;  %v2114_v20 = vsub.f32 1.0, %v2054_v0  ;;  %v2648_v37 = vmul.f32 %v10216_v34, %v10230_v31  ;;  %5506 = vmatprep.subr.bf16.mxu0 %v5505_v42  ;;  %v2633_v8 = vmul.f32 %v10220_v14, %v10231_v46 }
 0x2a2   :  { %v2340_v45 = vadd.f32 %v8064_v55, %v8145_v43  ;;  %v2427_v21 = vmul.f32 %v8145_v43, %v8145_v43  ;;  %v1936_v60 = vmul.f32 %v8060_v33, %v1636_v38  ;;  %v2708_v15 = vsub.f32 %v2636_v56, %v10218_v7 }
 0x2a3   :  { %v2323_v39 = vrot.slane %v2322_v30, 2  ;;  %v2514_v12 = vadd.f32 %v2513_v49, %v2512_v24  ;;  %v2174_v25 = vsel %vm1994_vm12, %v2114_v20, %v2054_v0  ;;  %v2720_v59 = vsub.f32 %v2648_v37, %v10218_v7 }
 0x2a4   :  { %v2341_v22 = vrot.slane %v2340_v45, 4  ;;  %v2532_v9 = vadd.f32 %v8072_v50, %v2427_v21  ;;  %v8164_v55 = vmul.f32 %v2174_v25, %v7963_v2  ;;  %v2056_v41 = vmul.f32 0.5, %v1936_v60  ;;  %v10232_v2 = vld [vmem:[#allocation21_spill] sm:$0xff] }
 0x2a5   :  { %v2324_v23 = vadd.f32 %v2323_v39, %v2322_v30  ;;  %v2515_v51 = vrot.slane %v2514_v12, 2  ;;  %v5513_v33 = vpack.c.bf16 %v2720_v59, %v2708_v15  ;;  %v2645_v56 = vmul.f32 %v10220_v14, %v10232_v2 }
 0x2a6   :  { %v2342_v35 = vadd.f32 %v2341_v22, %v2340_v45  ;;  %v2533_v24 = vrot.slane %v2532_v9, 4  ;;  %v2330_v0 = vadd.f32 %v8094_v4, %v8164_v55  ;;  %v2426_v38 = vmul.f32 %v8164_v55, %v8164_v55 }
 0x2a7   :  { %v2325_v42 = vrot.slane %v2324_v23, 1  ;;  %v2516_v50 = vadd.f32 %v2515_v51, %v2514_v12  ;;  %v2116_v63 = vsub.f32 1.0, %v2056_v41  ;;  %5514 = vmatprep.subr.bf16.mxu1 %v5513_v33  ;;  %v2705_v21 = vsub.f32 %v2633_v8, %v10222_v57 }
 0x2a8   :  { %v2343_v30 = vrot.slane %v2342_v35, 2  ;;  %v2534_v49 = vadd.f32 %v2533_v24, %v2532_v9  ;;  %v2331_v20 = vrot.slane %v2330_v0, 4  ;;  %v2522_v31 = vadd.f32 %v8108_v40, %v2426_v38 }
 0x2a9   :  { %v2326_v37 = vadd.f32 %v2325_v42, %v2324_v23  ;;  %v2517_v45 = vrot.slane %v2516_v50, 1  ;;  %v2176_v4 = vsel %vm1996_vm13, %v2116_v63, %v2056_v41  ;;  %v2717_v9 = vsub.f32 %v2645_v56, %v10222_v57 }
 0x2aa   :  { %v2344_v60 = vadd.f32 %v2343_v30, %v2342_v35  ;;  %v2535_v15 = vrot.slane %v2534_v49, 2  ;;  %v2332_v39 = vadd.f32 %v2331_v20, %v2330_v0  ;;  %v2523_v12 = vrot.slane %v2522_v31, 4 }
 0x2ab   :  { %v8178_v25 = vmul.f32 0.025, %v2326_v37  ;;  %v2518_v59 = vadd.f32 %v2517_v45, %v2516_v50  ;;  %v8181_v22 = vmul.f32 %v2176_v4, %v7968_v61  ;;  %v5507_v2 = vpack.c.bf16 %v2717_v9, %v2705_v21  ;;  %v10233_v45 = vld [vmem:[#allocation15_spill] sm:$0xff] }
 0x2ac   :  { %v2345_v40 = vrot.slane %v2344_v60, 1  ;;  %v2536_v23 = vadd.f32 %v2535_v15, %v2534_v49  ;;  %v2333_v51 = vrot.slane %v2332_v39, 2  ;;  %v2524_v33 = vadd.f32 %v2523_v12, %v2522_v31 }
 0x2ad   :  { %v2557_v46 = vmul.f32 0.025, %v2518_v59  ;;  %v2569_v41 = vmul.f32 %v8178_v25, %v8178_v25  ;;  %v2350_v8 = vadd.f32 %v8101_v28, %v8181_v22  ;;  %v2428_v35 = vmul.f32 %v8181_v22, %v8181_v22  ;;  %5508 = vmatpush1.bf16.msra.mxu0 %v5507_v2  ;;  %v10234_v59 = vld [vmem:[#allocation22_spill] sm:$0xff] }
 0x2ae   :  { %v2346_v24 = vadd.f32 %v2345_v40, %v2344_v60  ;;  %v2537_v0 = vrot.slane %v2536_v23, 1  ;;  %v2334_v61 = vadd.f32 %v2333_v51, %v2332_v39  ;;  %v2525_v38 = vrot.slane %v2524_v33, 2 }
 0x2af   :  { %v2581_v42 = vsub.f32 %v2557_v46, %v2569_v41  ;;  %v2351_v50 = vrot.slane %v2350_v8, 4  ;;  %v2542_v63 = vadd.f32 %v8113_v13, %v2428_v35  ;;  %v2635_v4 = vmul.f32 %v10224_v47, %v10233_v45  ;;  %v10235_v35 = vld [vmem:[#allocation27_spill] sm:$0xff] }
 0x2b0   :  { %v8191_v56 = vmul.f32 0.025, %v2346_v24  ;;  %v2538_v30 = vadd.f32 %v2537_v0, %v2536_v23  ;;  %v2335_v49 = vrot.slane %v2334_v61, 1  ;;  %v2526_v20 = vadd.f32 %v2525_v38, %v2524_v33 }
 0x2b1   :  { %v2593_v31 = vadd.f32 1e-05, %v2581_v42  ;;  %v2352_v37 = vadd.f32 %v2351_v50, %v2350_v8  ;;  %v2543_v28 = vrot.slane %v2542_v63, 4  ;;  %v2647_v9 = vmul.f32 %v10224_v47, %v10234_v59  ;;  %v10236_v42 = vld [vmem:[#allocation29_spill] sm:$0xff] }
 0x2b2   :  { %v2559_v60 = vmul.f32 0.025, %v2538_v30  ;;  %v2571_v15 = vmul.f32 %v8191_v56, %v8191_v56  ;;  %v2336_v39 = vadd.f32 %v2335_v49, %v2334_v61  ;;  %v2527_v12 = vrot.slane %v2526_v20, 1  ;;  %v10241_v59 = vld [vmem:[#allocation41_spill] sm:$0xff] }
 0x2b3   :  { %5883 = vrsqrt.f32 %v2593_v31  ;;  %v2353_v13 = vrot.slane %v2352_v37, 2  ;;  %v2544_v21 = vadd.f32 %v2543_v28, %v2542_v63  ;;  %v2707_v33 = vsub.f32 %v2635_v4, %v10226_v29  ;;  %v10238_v4 = vld [vmem:[#allocation26_spill] sm:$0xff] }
 0x2b4   :  { %v2583_v40 = vsub.f32 %v2559_v60, %v2571_v15  ;;  %v8199_v23 = vmul.f32 0.025, %v2336_v39  ;;  %v2528_v51 = vadd.f32 %v2527_v12, %v2526_v20  ;;  %v2719_v8 = vsub.f32 %v2647_v9, %v10226_v29  ;;  %v10240_v39 = vld [vmem:[#allocation12_spill] sm:$0xff] }
 0x2b5   :  { %v2354_v46 = vadd.f32 %v2353_v13, %v2352_v37  ;;  %v2545_v41 = vrot.slane %v2544_v21, 2  ;;  %v2658_v24 = vmul.f32 %v10211_v36, %v10235_v35  ;;  %v2660_v50 = vmul.f32 %v10216_v34, %v10236_v42  ;;  %v10237_v37 = vld [vmem:[#allocation25_spill] sm:$0xff]  ;;  %v10243_v35 = vld [vmem:[#allocation35_spill] sm:$0xff] }
 0x2b6   :  { %v2595_v0 = vadd.f32 1e-05, %v2583_v40  ;;  %v2558_v61 = vmul.f32 0.025, %v2528_v51  ;;  %v2570_v38 = vmul.f32 %v8199_v23, %v8199_v23  ;;  %v5515_v30 = vpack.c.bf16 %v2719_v8, %v2707_v33  ;;  %v10242_v51 = vld [vmem:[#allocation16_spill] sm:$0xff] }
 0x2b7   :  { %v2355_v63 = vrot.slane %v2354_v46, 1  ;;  %v2546_v2 = vadd.f32 %v2545_v41, %v2544_v21  ;;  %v2730_v49 = vsub.f32 %v2658_v24, %v10213_v54  ;;  %v2732_v31 = vsub.f32 %v2660_v50, %v10218_v7  ;;  %v8219_v54 = vld [vmem:[%s10038_s2] sm:$0xff] }
 0x2b8   :  { %5885 = vrsqrt.f32 %v2595_v0  ;;  %v2582_v20 = vsub.f32 %v2558_v61, %v2570_v38  ;;  %v2657_v36 = vmul.f32 %v10220_v14, %v10237_v37  ;;  %5516 = vmatpush1.bf16.msra.mxu1 %v5515_v30  ;;  %v2659_v60 = vmul.f32 %v10224_v47, %v10238_v4  ;;  %v10239_v7 = vld [vmem:[#allocation39_spill] sm:$0xff]  ;;  %v8253_v38 = vld [vmem:[%s10038_s2 + $0x8] sm:$0xff]  ;;  %v10247_v37 = vld [vmem:[#allocation42_spill] sm:$0xff] }
 0x2b9   :  { %v2356_v28 = vadd.f32 %v2355_v63, %v2354_v46  ;;  %v2547_v45 = vrot.slane %v2546_v2, 1  ;;  %2800 = vmatprep.subr.mxu0 %v2730_v49  ;;  %vm2776_vm14 = vcmask 326656   ;;  %2895 = vmatprep.subr.mxu1 %v2732_v31  ;;  %v2614_v14 = vmul.f32 %v7672_v58, %v10239_v7  ;;  %v10246_v49 = vld [vmem:[#allocation36_spill] sm:$0xff] }
 0x2ba   :  { %v2594_v34 = vadd.f32 1e-05, %v2582_v20  ;;  %v2729_v15 = vsub.f32 %v2657_v36, %v10222_v57  ;;  %v2626_v12 = vmul.f32 %v7672_v58, %v10240_v39  ;;  %v2731_v47 = vsub.f32 %v2659_v60, %v10226_v29 }
 0x2bb   :  { %v8225_v13 = vmul.f32 0.025, %v2356_v28  ;;  %v2548_v21 = vadd.f32 %v2547_v45, %v2546_v2  ;;  %v2616_v9 = vmul.f32 %v7702_v16, %v10241_v59  ;;  %v2686_v57 = vsub.f32 %v2614_v14, %v7677_v1  ;;  %v10245_v2 = vld [vmem:[#allocation40_spill] sm:$0xff]  ;;  %v10248_v28 = vld [vmem:[#allocation43_spill] sm:$0xff] }
 0x2bc   :  { %5887 = vrsqrt.f32 %v2594_v34  ;;  %2801 = vmatpush1.msra.mxu0 %v2729_v15  ;;  %v2698_v40 = vsub.f32 %v2626_v12, %v7677_v1  ;;  %v2628_v33 = vmul.f32 %v7702_v16, %v10242_v51  ;;  %2896 = vmatpush1.msra.mxu1 %v2731_v47  ;;  %v2613_v24 = vmul.f32 %v7629_v44, %v10243_v35  ;;  %v10249_v15 = vld [vmem:[#allocation52_spill] sm:$0xff] }
 0x2bd   :  { %v8234_v46 = vpop.eup %5883  ;;  %v2560_v41 = vmul.f32 0.025, %v2548_v21  ;;  %v2572_v8 = vmul.f32 %v8225_v13, %v8225_v13  ;;  %5465 = vmatmul.mubr.msk.f32.vlgmr.msra.gmra.mrb[36].mxu0 %vm2776_vm14, %v8219_v54  ;;  %v2688_v29 = vsub.f32 %v2616_v9, %v7708_v52  ;;  %5470 = vmatmul.mubr.msk.f32.vlgmr.msra.gmra.mrb[36].mxu1 %vm2776_vm14, %v8219_v54  ;;  %v10244_v61 = vmov 0.0   ;;  %v10250_v14 = vld [vmem:[#allocation44_spill] sm:$0xff] }
 0x2be   :  { %v8245_v0 = vmul.f32 %v8234_v46, %v8178_v25  ;;  %2862 = vmatprep.mubr.f32.mxu0 %v10244_v61  ;;  %v5517_v42 = vpack.c.bf16 %v2698_v40, %v2686_v57  ;;  %v2700_v50 = vsub.f32 %v2628_v33, %v7708_v52  ;;  %2957 = vmatprep.mubr.f32.mxu1 %v10244_v61  ;;  %v10251_v40 = vld [vmem:[#allocation47_spill] sm:$0xff] }
 0x2bf   :  { %v2584_v63 = vsub.f32 %v2560_v41, %v2572_v8  ;;  %v2625_v25 = vmul.f32 %v7629_v44, %v10245_v2  ;;  %v2685_v30 = vsub.f32 %v2613_v24, %v7633_v10  ;;  %v2615_v20 = vmul.f32 %v7648_v5, %v10246_v49  ;;  %v10253_v24 = vld [vmem:[#allocation45_spill] sm:$0xff]  ;;  %v10255_v2 = vld [vmem:[#allocation46_spill] sm:$0xff] }
 0x2c0   :  { %5518 = vmatprep.subr.bf16.mxu0 %v5517_v42  ;;  %v5525_v31 = vpack.c.bf16 %v2700_v50, %v2688_v29  ;;  %v2627_v36 = vmul.f32 %v7648_v5, %v10247_v37  ;;  %v2638_v45 = vmul.f32 %v7672_v58, %v10248_v28  ;;  %v2650_v4 = vmul.f32 %v7672_v58, %v7500_v26  ;;  %v8282_v26 = vld [vmem:[%s10038_s2 + $0x10] sm:$0xff]  ;;  %v8314_v49 = vld [vmem:[%s10038_s2 + $0x18] sm:$0xff] }
 0x2c1   :  { %v2596_v60 = vadd.f32 1e-05, %v2584_v63  ;;  %5466 = vmatmul.mubr.msk.f32.gmra.mrb[38].mxu0 %vm2776_vm14, %v8253_v38  ;;  %v2697_v34 = vsub.f32 %v2625_v25, %v7633_v10  ;;  %v2687_v7 = vsub.f32 %v2615_v20, %v10249_v15  ;;  %v2640_v39 = vmul.f32 %v7702_v16, %v10250_v14  ;;  %5471 = vmatmul.mubr.msk.f32.gmra.mrb[38].mxu1 %vm2776_vm14, %v8253_v38  ;;  %v10252_v29 = vld [vmem:[#allocation17_spill] sm:$0xff]  ;;  %v10254_v50 = vld [vmem:[#allocation18_spill] sm:$0xff]  ;;  %v10258_v14 = vld [vmem:[#allocation48_spill] sm:$0xff] }
 0x2c2   :  { %v8274_v12 = vpop.eup %5885  ;;  %2868 = vmatprep.mubr.f32.mxu0 %v10244_v61  ;;  %v2699_v21 = vsub.f32 %v2627_v36, %v10249_v15  ;;  %v2710_v47 = vsub.f32 %v2638_v45, %v7677_v1  ;;  %v2722_v59 = vsub.f32 %v2650_v4, %v7677_v1  ;;  %2963 = vmatprep.mubr.f32.mxu1 %v10244_v61  ;;  %v10257_v36 = vld [vmem:[#allocation51_spill] sm:$0xff] }
 0x2c3   :  { %v8289_v9 = vmul.f32 %v8274_v12, %v8191_v56  ;;  %5889 = vrsqrt.f32 %v2596_v60  ;;  %5526 = vmatprep.subr.bf16.mxu1 %v5525_v31  ;;  %v5519_v57 = vpack.c.bf16 %v2697_v34, %v2685_v30  ;;  %v2652_v51 = vmul.f32 %v7702_v16, %v10251_v40  ;;  %v10256_v31 = vld [vmem:[#allocation50_spill] sm:$0xff] }
 0x2c4   :  { %v5527_v33 = vpack.c.bf16 %v2699_v21, %v2687_v7  ;;  %v5521_v41 = vpack.c.bf16 %v2722_v59, %v2710_v47  ;;  %v2712_v8 = vsub.f32 %v2640_v39, %v7708_v52  ;;  %v2637_v35 = vmul.f32 %v7629_v44, %v10252_v29  ;;  %v8341_v21 = vld [vmem:[%s10038_s2 + $0x20] sm:$0xff]  ;;  %v10259_v47 = vld [vmem:[#allocation49_spill] sm:$0xff] }
 0x2c5   :  { %5467 = vmatmul.mubr.msk.f32.gmra.mrb[40].mxu0 %vm2776_vm14, %v8282_v26  ;;  %v2724_v56 = vsub.f32 %v2652_v51, %v7708_v52  ;;  %v2649_v42 = vmul.f32 %v7629_v44, %v10253_v24  ;;  %v2639_v63 = vmul.f32 %v7648_v5, %v10254_v50  ;;  %v2651_v25 = vmul.f32 %v7648_v5, %v10255_v2 }
 0x2c6   :  { %v8306_v30 = vpop.eup %5887  ;;  %5472 = vmatmul.mubr.msk.f32.gmra.mrb[40].mxu1 %vm2776_vm14, %v8282_v26  ;;  %2874 = vmatprep.mubr.f32.mxu0 %v10244_v61  ;;  %v2709_v20 = vsub.f32 %v2637_v35, %v7633_v10  ;;  %v2662_v37 = vmul.f32 %v7672_v58, %v10256_v31  ;;  %v2664_v28 = vmul.f32 %v7702_v16, %v10257_v36  ;;  %v10260_v35 = vld [vmem:[#allocation53_spill] sm:$0xff] }
 0x2c7   :  { %v8323_v45 = vmul.f32 %v8306_v30, %v8199_v23  ;;  %2969 = vmatprep.mubr.f32.mxu1 %v10244_v61  ;;  %5520 = vmatpush1.bf16.msra.mxu0 %v5519_v57  ;;  %v5529_v4 = vpack.c.bf16 %v2724_v56, %v2712_v8  ;;  %v2721_v60 = vsub.f32 %v2649_v42, %v7633_v10  ;;  %v10261_v42 = vld [vmem:[#allocation56_spill] sm:$0xff] }
 0x2c8   :  { %5528 = vmatpush1.bf16.msra.mxu1 %v5527_v33  ;;  %5522 = vmatprep.subr.bf16.mxu0 %v5521_v41  ;;  %v2711_v34 = vsub.f32 %v2639_v63, %v10249_v15  ;;  %v2723_v7 = vsub.f32 %v2651_v25, %v10249_v15  ;;  %v2734_v58 = vsub.f32 %v2662_v37, %v7677_v1 }
 0x2c9   :  { %5468 = vmatmul.mubr.msk.f32.gmra.mrb[42].mxu0 %vm2776_vm14, %v8314_v49  ;;  %5530 = vmatprep.subr.bf16.mxu1 %v5529_v4  ;;  %v5523_v16 = vpack.c.bf16 %v2721_v60, %v2709_v20  ;;  %v2736_v23 = vsub.f32 %v2664_v28, %v7708_v52  ;;  %v2661_v39 = vmul.f32 %v7629_v44, %v10258_v14  ;;  %v10262_v20 = vld [vmem:[#allocation57_spill] sm:$0xff]  ;;  %v10263_v4 = vld [vmem:[#allocation54_spill] sm:$0xff] }
 0x2ca   :  { %5473 = vmatmul.mubr.msk.f32.gmra.mrb[42].mxu1 %vm2776_vm14, %v8314_v49  ;;  %2880 = vmatprep.mubr.f32.mxu0 %v10244_v61  ;;  %v5531_v1 = vpack.c.bf16 %v2723_v7, %v2711_v34  ;;  %v2663_v59 = vmul.f32 %v7648_v5, %v10259_v47  ;;  %v2618_v52 = vmul.f32 %v8306_v30, %v7713_v27  ;;  %v10264_v34 = vld [vmem:[#allocation7_spill] sm:$0xff] }
 0x2cb   :  { %2975 = vmatprep.mubr.f32.mxu1 %v10244_v61  ;;  %5524 = vmatpush1.bf16.msra.mxu0 %v5523_v16  ;;  %v2733_v44 = vsub.f32 %v2661_v39, %v7633_v10  ;;  %v2630_v57 = vmul.f32 %v8306_v30, %v7844_v32  ;;  %v2617_v40 = vmul.f32 %v8234_v46, %v7659_v48 }
 0x2cc   :  { %5532 = vmatpush1.bf16.msra.mxu1 %v5531_v1  ;;  %2990 = vmatprep.subr.mxu0 %v2734_v58  ;;  %v2735_v51 = vsub.f32 %v2663_v59, %v10249_v15  ;;  %v2690_v5 = vsub.f32 %v2618_v52, %v8323_v45  ;;  %v2629_v27 = vmul.f32 %v8234_v46, %v7805_v53  ;;  %v10265_v58 = vld [vmem:[#allocation55_spill] sm:$0xff] }
 0x2cd   :  { %v5890_v33 = vpop.eup %5889  ;;  %5469 = vmatmul.mubr.msk.f32.gmra.mrb[44].mxu0 %vm2776_vm14, %v8341_v21  ;;  %3085 = vmatprep.subr.mxu1 %v2736_v23  ;;  %v2702_v10 = vsub.f32 %v2630_v57, %v8323_v45  ;;  %v2689_v32 = vsub.f32 %v2617_v40, %v8245_v0  ;;  %v2619_v48 = vmul.f32 %v8274_v12, %v7697_v17 }
 0x2ce   :  { %v8364_v41 = vmul.f32 %v5890_v33, %v8225_v13  ;;  %5474 = vmatmul.mubr.msk.f32.gmra.mrb[44].mxu1 %vm2776_vm14, %v8341_v21  ;;  %3046 = vmatprep.mubr.f32.mxu0 %v10244_v61  ;;  %v2620_v53 = vmul.f32 %v5890_v33, %v7779_v18  ;;  %v2632_v15 = vmul.f32 %v5890_v33, %v7864_v6 }
 0x2cf   :  { %2991 = vmatpush1.msra.mxu0 %v2733_v44  ;;  %3141 = vmatprep.mubr.f32.mxu1 %v10244_v61  ;;  %v5533_v8 = vpack.c.bf16 %v2702_v10, %v2690_v5  ;;  %v2701_v29 = vsub.f32 %v2629_v27, %v8245_v0  ;;  %v2631_v17 = vmul.f32 %v8274_v12, %v10260_v35 }
 0x2d0   :  { %3086 = vmatpush1.msra.mxu1 %v2735_v51  ;;  %v2692_v13 = vsub.f32 %v2620_v53, %v8364_v41  ;;  %v2704_v56 = vsub.f32 %v2632_v15, %v8364_v41  ;;  %v2691_v24 = vsub.f32 %v2619_v48, %v8289_v9  ;;  %v2642_v18 = vmul.f32 %v8306_v30, %v10261_v42  ;;  %v8485_v48 = vpop.permute.xlu0 %2758 }
 0x2d1   :  { %5475 = vmatmul.mubr.msk.f32.vlgmr.msra.gmra.mrb[46].mxu0 %vm2776_vm14, %v8219_v54  ;;  %5534 = vmatprep.subr.bf16.mxu0 %v5533_v8  ;;  %v5535_v6 = vpack.c.bf16 %v2701_v29, %v2689_v32  ;;  %v2703_v50 = vsub.f32 %v2631_v17, %v8289_v9  ;;  %v2654_v63 = vmul.f32 %v8306_v30, %v8082_v3 }
 0x2d2   :  { %5480 = vmatmul.mubr.msk.f32.vlgmr.msra.gmra.mrb[46].mxu1 %vm2776_vm14, %v8219_v54  ;;  %3052 = vmatprep.mubr.f32.mxu0 %v10244_v61  ;;  %v5541_v2 = vpack.c.bf16 %v2704_v56, %v2692_v13  ;;  %v2714_v25 = vsub.f32 %v2642_v18, %v8323_v45  ;;  %v2644_v31 = vmul.f32 %v5890_v33, %v10262_v20 }
 0x2d3   :  { %3147 = vmatprep.mubr.f32.mxu1 %v10244_v61  ;;  %5536 = vmatpush1.bf16.msra.mxu0 %v5535_v6  ;;  %v5543_v37 = vpack.c.bf16 %v2703_v50, %v2691_v24  ;;  %v2726_v36 = vsub.f32 %v2654_v63, %v8323_v45  ;;  %v2656_v28 = vmul.f32 %v5890_v33, %v8089_v11 }
 0x2d4   :  { %5542 = vmatprep.subr.bf16.mxu1 %v5541_v2  ;;  %v2716_v3 = vsub.f32 %v2644_v31, %v8364_v41  ;;  %v2641_v60 = vmul.f32 %v8234_v46, %v10263_v4  ;;  %v2653_v7 = vmul.f32 %v8234_v46, %v10264_v34  ;;  %v2643_v16 = vmul.f32 %v8274_v12, %v10265_v58 }
 0x2d5   :  { %5476 = vmatmul.mubr.msk.f32.gmra.mrb[48].mxu0 %vm2776_vm14, %v8253_v38  ;;  %5544 = vmatpush1.bf16.msra.mxu1 %v5543_v37  ;;  %v5537_v23 = vpack.c.bf16 %v2726_v36, %v2714_v25  ;;  %v2728_v14 = vsub.f32 %v2656_v28, %v8364_v41  ;;  %v2655_v11 = vmul.f32 %v8274_v12, %v8054_v62 }
 0x2d6   :  { %5481 = vmatmul.mubr.msk.f32.gmra.mrb[48].mxu1 %vm2776_vm14, %v8253_v38  ;;  %3058 = vmatprep.mubr.f32.mxu0 %v10244_v61  ;;  %v2713_v39 = vsub.f32 %v2641_v60, %v8245_v0  ;;  %v2725_v1 = vsub.f32 %v2653_v7, %v8245_v0  ;;  %v2715_v47 = vsub.f32 %v2643_v16, %v8289_v9 }
 0x2d7   :  { %3153 = vmatprep.mubr.f32.mxu1 %v10244_v61  ;;  %5538 = vmatprep.subr.bf16.mxu0 %v5537_v23  ;;  %v5545_v59 = vpack.c.bf16 %v2728_v14, %v2716_v3  ;;  %v2727_v52 = vsub.f32 %v2655_v11, %v8289_v9  ;;  %v2666_v62 = vmul.f32 %v8306_v30, %v8164_v55 }
 0x2d8   :  { %v5539_v44 = vpack.c.bf16 %v2725_v1, %v2713_v39  ;;  %v2668_v57 = vmul.f32 %v5890_v33, %v8181_v22  ;;  %v2665_v40 = vmul.f32 %v8234_v46, %v8124_v19  ;;  %v2667_v51 = vmul.f32 %v8274_v12, %v8145_v43  ;;  %v8472_v43 = vpop.permute.xlu1 %2753 }
 0x2d9   :  { %5477 = vmatmul.mubr.msk.f32.gmra.mrb[50].mxu0 %vm2776_vm14, %v8282_v26  ;;  %5546 = vmatprep.subr.bf16.mxu1 %v5545_v59  ;;  %v5547_v5 = vpack.c.bf16 %v2727_v52, %v2715_v47  ;;  %v2738_v27 = vsub.f32 %v2666_v62, %v8323_v45 }
 0x2da   :  { %5482 = vmatmul.mubr.msk.f32.gmra.mrb[50].mxu1 %vm2776_vm14, %v8282_v26  ;;  %3064 = vmatprep.mubr.f32.mxu0 %v10244_v61  ;;  %v2740_v55 = vsub.f32 %v2668_v57, %v8364_v41  ;;  %v2737_v22 = vsub.f32 %v2665_v40, %v8245_v0  ;;  %v2739_v19 = vsub.f32 %v2667_v51, %v8289_v9 }
 0x2db   :  { %3159 = vmatprep.mubr.f32.mxu1 %v10244_v61  ;;  %5540 = vmatpush1.bf16.msra.mxu0 %v5539_v44 }
 0x2dc   :  { %5548 = vmatpush1.bf16.msra.mxu1 %v5547_v5  ;;  %3180 = vmatprep.subr.mxu0 %v2738_v27  ;;  %v8536_v40 = vpop.permute.xlu1 %2763 }
 0x2dd   :  { %5478 = vmatmul.mubr.msk.f32.gmra.mrb[52].mxu0 %vm2776_vm14, %v8314_v49  ;;  %3275 = vmatprep.subr.mxu1 %v2740_v55  ;;  %10266 = vst [vmem:[#allocation33_spill] sm:$0xff] %v8536_v40 }
 0x2de   :  { %5483 = vmatmul.mubr.msk.f32.gmra.mrb[52].mxu1 %vm2776_vm14, %v8314_v49  ;;  %3070 = vmatprep.mubr.f32.mxu0 %v10244_v61 }
 0x2df   :  { %3165 = vmatprep.mubr.f32.mxu1 %v10244_v61  ;;  %3181 = vmatpush1.msra.mxu0 %v2737_v22 }
 0x2e0   :  { %3276 = vmatpush1.msra.mxu1 %v2739_v19 }
 0x2e1   :  { %5479 = vmatmul.mubr.msk.f32.gmra.mrb[54].mxu0 %vm2776_vm14, %v8341_v21 }
 0x2e2   :  { %5484 = vmatmul.mubr.msk.f32.gmra.mrb[54].mxu1 %vm2776_vm14, %v8341_v21  ;;  %3236 = vmatprep.mubr.f32.mxu0 %v10244_v61 }
 0x2e3   :  { %3331 = vmatprep.mubr.f32.mxu1 %v10244_v61 }
 0x2e5   :  { %5485 = vmatmul.mubr.msk.f32.vlgmr.msra.gmra.mrb[56].mxu0 %vm2776_vm14, %v8219_v54 }
 0x2e6   :  { %5490 = vmatmul.mubr.msk.f32.vlgmr.msra.gmra.mrb[56].mxu1 %vm2776_vm14, %v8219_v54  ;;  %3242 = vmatprep.mubr.f32.mxu0 %v10244_v61 }
 0x2e7   :  { %3337 = vmatprep.mubr.f32.mxu1 %v10244_v61 }
 0x2e9   :  { %5486 = vmatmul.mubr.msk.f32.gmra.mrb[58].mxu0 %vm2776_vm14, %v8253_v38 }
 0x2ea   :  { %5491 = vmatmul.mubr.msk.f32.gmra.mrb[58].mxu1 %vm2776_vm14, %v8253_v38  ;;  %3248 = vmatprep.mubr.f32.mxu0 %v10244_v61 }
 0x2eb   :  { %3343 = vmatprep.mubr.f32.mxu1 %v10244_v61 }
 0x2ed   :  { %5487 = vmatmul.mubr.msk.f32.gmra.mrb[60].mxu0 %vm2776_vm14, %v8282_v26 }
 0x2ee   :  { %5492 = vmatmul.mubr.msk.f32.gmra.mrb[60].mxu1 %vm2776_vm14, %v8282_v26  ;;  %3254 = vmatprep.mubr.f32.mxu0 %v10244_v61 }
 0x2ef   :  { %3349 = vmatprep.mubr.f32.mxu1 %v10244_v61 }
 0x2f1   :  { %5488 = vmatmul.mubr.msk.f32.gmra.mrb[62].mxu0 %vm2776_vm14, %v8314_v49 }
 0x2f2   :  { %5493 = vmatmul.mubr.msk.f32.gmra.mrb[62].mxu1 %vm2776_vm14, %v8314_v49  ;;  %3260 = vmatprep.mubr.f32.mxu0 %v10244_v61 }
 0x2f3   :  { %3355 = vmatprep.mubr.f32.mxu1 %v10244_v61 }
 0x2f5   :  { %5489 = vmatmul.mubr.msk.f32.gmra.mrb[64].mxu0 %vm2776_vm14, %v8341_v21 }
 0x2f6   :  { %5494 = vmatmul.mubr.msk.f32.gmra.mrb[64].mxu1 %vm2776_vm14, %v8341_v21  ;;  %4930 = vmatprep.mubr.f32.mxu0 %v10244_v61 }
 0x2f7   :  { %5001 = vmatprep.mubr.f32.mxu1 %v10244_v61 }
 0x390   :  { %v2858_v54 = vpop.f32.mrb[36].mxu0  ;;  %v2953_v0 = vpop.f32.mrb[36].mxu1 }
 0x391   :  { %v8475_v46 = vadd.f32 %v2858_v54, %v8472_v43  ;;  %v2860_v38 = vpop.f32.mrb[37].mxu0  ;;  %v8478_v12 = vadd.f32 %v2953_v0, %v8472_v43  ;;  %v2955_v26 = vpop.f32.mrb[37].mxu1 }
 0x392   :  { %v8483_v49 = vadd.f32 %v2860_v38, %v8472_v43  ;;  %v8494_v13 = vadd.f32 %v2955_v26, %v8472_v43 }
 0x393   :  { %v3362_v9 = vmul.f32 0.70710677, %v8475_v46  ;;  %v3364_v30 = vmul.f32 0.70710677, %v8478_v12  ;;  %vm4562_vm15 = vcmp.ge.f32.partialorder %v8475_v46, 0.0  ;;  %vm4564_vm0 = vcmp.ge.f32.partialorder %v8478_v12, 0.0 }
 0x394   :  { %v2864_v21 = vpop.f32.mrb[38].mxu0  ;;  %v2959_v10 = vpop.f32.mrb[38].mxu1  ;;  %v3363_v8 = vmul.f32 0.70710677, %v8483_v49  ;;  %v3365_v2 = vmul.f32 0.70710677, %v8494_v13 }
 0x395   :  { %v3422_v45 = vand.u32 2147483647, %v3362_v9  ;;  %v3424_v33 = vand.u32 2147483647, %v3364_v30  ;;  %v2866_v32 = vpop.f32.mrb[39].mxu0  ;;  %v8487_v53 = vpop.f32.mrb[39].mxu1  ;;  %v8491_v29 = vadd.f32 %v2864_v21, %v8485_v48  ;;  %v8497_v56 = vadd.f32 %v2959_v10, %v8485_v48 }
 0x396   :  { %v8505_v50 = vand.u32 2147483647, %v3363_v8  ;;  %v8521_v16 = vand.u32 2147483647, %v3365_v2  ;;  %v8528_v1 = vadd.f32 %v2866_v32, %v8485_v48  ;;  %vm4563_vm3 = vcmp.ge.f32.partialorder %v8483_v49, 0.0 }
 0x397   :  { %v3482_v41 = vmul.f32 0.3275911, %v3422_v45  ;;  %v3484_v15 = vmul.f32 0.3275911, %v3424_v33  ;;  %v3374_v63 = vmul.f32 0.70710677, %v8491_v29  ;;  %v4262_v4 = vmul.f32 %v3422_v45, %v3422_v45 }
 0x398   :  { %v2870_v35 = vpop.f32.mrb[40].mxu0  ;;  %v3376_v25 = vmul.f32 0.70710677, %v8497_v56  ;;  %v3483_v60 = vmul.f32 0.3275911, %v8505_v50  ;;  %v4264_v58 = vmul.f32 %v3424_v33, %v3424_v33  ;;  %vm4574_vm1 = vcmp.ge.f32.partialorder %v8491_v29, 0.0 }
 0x399   :  { %v3542_v17 = vadd.f32 1.0, %v3482_v41  ;;  %v8499_v24 = vpop.f32.mrb[40].mxu1  ;;  %v8501_v42 = vpop.f32.mrb[41].mxu0  ;;  %v3544_v18 = vadd.f32 1.0, %v3484_v15  ;;  %v3434_v31 = vand.u32 2147483647, %v3374_v63  ;;  %v8549_v38 = vadd.f32 %v2870_v35, %v8536_v40 }
 0x39a   :  { %v8503_v6 = vpop.f32.mrb[41].mxu1  ;;  %v3436_v28 = vand.u32 2147483647, %v3376_v25  ;;  %v4322_v52 = vsub.f32 0.0, %v4262_v4  ;;  %v3543_v62 = vadd.f32 1.0, %v3483_v60  ;;  %v4324_v51 = vsub.f32 0.0, %v4264_v58 }
 0x39b   :  { %5891 = vrcp.f32 %v3542_v17  ;;  %v3494_v34 = vmul.f32 0.3275911, %v3434_v31  ;;  %v3485_v5 = vmul.f32 0.3275911, %v8521_v16  ;;  %v3375_v22 = vmul.f32 0.70710677, %v8528_v1 }
 0x39c   :  { %5893 = vrcp.f32 %v3544_v18  ;;  %v8510_v20 = vpop.f32.mrb[42].mxu0  ;;  %v3496_v23 = vmul.f32 0.3275911, %v3436_v28  ;;  %v4382_v30 = vmul.f32 1.442695, %v4322_v52  ;;  %v4274_v33 = vmul.f32 %v3434_v31, %v3434_v31 }
 0x39d   :  { %v8512_v37 = vpop.f32.mrb[42].mxu1  ;;  %v8514_v36 = vpop.f32.mrb[43].mxu0  ;;  %v3554_v39 = vadd.f32 1.0, %v3494_v34  ;;  %v4386_v21 = vmul.f32 1.442695, %v4324_v51  ;;  %v3545_v41 = vadd.f32 1.0, %v3485_v5  ;;  %v4276_v18 = vmul.f32 %v3436_v28, %v3436_v28 }
 0x39e   :  { %v8516_v3 = vpop.f32.mrb[43].mxu1  ;;  %v3556_v59 = vadd.f32 1.0, %v3496_v23  ;;  %v8556_v15 = vand.u32 2147483647, %v3375_v22  ;;  %v3386_v63 = vmul.f32 0.70710677, %v8549_v38  ;;  %v8568_v31 = vadd.f32 %v8487_v53, %v8485_v48 }
 0x39f   :  { %5895 = vrcp.f32 %v3554_v39  ;;  %v4334_v60 = vsub.f32 0.0, %v4274_v33  ;;  %v4336_v51 = vsub.f32 0.0, %v4276_v18  ;;  %vm4576_vm2 = vcmp.ge.f32.partialorder %v8497_v56, 0.0 }
 0x3a0   :  { %v8519_v7 = vpop.f32.mrb[44].mxu0  ;;  %5897 = vrcp.f32 %v3556_v59  ;;  %v3495_v39 = vmul.f32 0.3275911, %v8556_v15  ;;  %v8580_v59 = vadd.f32 %v8499_v24, %v8536_v40  ;;  %v8586_v5 = vand.u32 2147483647, %v3386_v63 }
 0x3a1   :  { %v8523_v14 = vpop.f32.mrb[44].mxu1  ;;  %v8525_v11 = vpop.f32.mrb[45].mxu0  ;;  %5899 = vrcp.f32 %v3543_v62  ;;  %v4410_v63 = vmul.f32 1.442695, %v4336_v51  ;;  %vm4565_vm4 = vcmp.ge.f32.partialorder %v8494_v13, 0.0  ;;  %vm4575_vm5 = vcmp.ge.f32.partialorder %v8528_v1, 0.0 }
 0x3a2   :  { %v8530_v47 = vpop.f32.mrb[45].mxu1  ;;  %5901 = vpow2.f32 %v4382_v30  ;;  %vm4586_vm6 = vcmp.ge.f32.partialorder %v8549_v38, 0.0  ;;  %vm4588_vm7 = vcmp.ge.f32.partialorder %v8580_v59, 0.0  ;;  %vm4577_vm10 = vcmp.ge.f32.partialorder %v8568_v31, 0.0 }
 0x3a3   :  { %5903 = vpow2.f32 %v4386_v21 }
 0x3a4   :  { %v8532_v44 = vpop.f32.mrb[46].mxu0  ;;  %5905 = vrcp.f32 %v3545_v41  ;;  %v3388_v41 = vmul.f32 0.70710677, %v8580_v59 }
 0x3a5   :  { %v8534_v57 = vpop.eup %5891  ;;  %v8543_v19 = vpop.f32.mrb[46].mxu1 }
 0x3a6   :  { %v8539_v27 = vpop.eup %5893  ;;  %v3722_v55 = vmul.f32 1.0614054, %v8534_v57  ;;  %v8545_v54 = vpop.f32.mrb[47].mxu0 }
 0x3a7   :  { %v3724_v0 = vmul.f32 1.0614054, %v8539_v27  ;;  %v8551_v26 = vpop.f32.mrb[47].mxu1 }
 0x3a8   :  { %v3782_v9 = vadd.f32 -1.4531521, %v3722_v55  ;;  %v8553_v10 = vpop.f32.mrb[48].mxu0 }
 0x3a9   :  { %v3784_v45 = vadd.f32 -1.4531521, %v3724_v0  ;;  %v8558_v8 = vpop.f32.mrb[48].mxu1  ;;  %v8560_v17 = vpop.f32.mrb[49].mxu0  ;;  %v3377_v0 = vmul.f32 0.70710677, %v8568_v31 }
 0x3aa   :  { %v3842_v32 = vmul.f32 %v8534_v57, %v3782_v9  ;;  %v8564_v2 = vpop.f32.mrb[49].mxu1  ;;  %v8574_v23 = vpop.eup %5895 }
 0x3ab   :  { %v3844_v35 = vmul.f32 %v8539_v27, %v3784_v45  ;;  %v8582_v53 = vpop.eup %5897  ;;  %v3734_v62 = vmul.f32 1.0614054, %v8574_v23  ;;  %v4406_v45 = vmul.f32 1.442695, %v4334_v60 }
 0x3ac   :  { %v3902_v25 = vadd.f32 1.4214138, %v3842_v32  ;;  %v8570_v34 = vpop.f32.mrb[50].mxu0  ;;  %v3736_v22 = vmul.f32 1.0614054, %v8582_v53  ;;  %v8590_v21 = vpop.eup %5899  ;;  %v3555_v32 = vadd.f32 1.0, %v3495_v39 }
 0x3ad   :  { %v3904_v4 = vadd.f32 1.4214138, %v3844_v35  ;;  %10267 = vst [vmem:[#allocation11_spill] sm:$0xff] %v8570_v34  ;;  %v8572_v58 = vpop.f32.mrb[50].mxu1  ;;  %v3794_v30 = vadd.f32 -1.4531521, %v3734_v62  ;;  %5907 = vpow2.f32 %v4406_v45  ;;  %v5902_v39 = vpop.eup %5901 }
 0x3ae   :  { %10268 = vst [vmem:[#allocation34_spill] sm:$0xff] %v8572_v58  ;;  %v3962_v28 = vmul.f32 %v8534_v57, %v3902_v25  ;;  %v3796_v33 = vadd.f32 -1.4531521, %v3736_v22  ;;  %v3506_v25 = vmul.f32 0.3275911, %v8586_v5  ;;  %5909 = vrcp.f32 %v3555_v32  ;;  %v5904_v51 = vpop.eup %5903 }
 0x3af   :  { %v3964_v52 = vmul.f32 %v8539_v27, %v3904_v4  ;;  %v3854_v18 = vmul.f32 %v8574_v23, %v3794_v30  ;;  %v3723_v62 = vmul.f32 1.0614054, %v8590_v21  ;;  %5911 = vpow2.f32 %v4410_v63 }
 0x3b0   :  { %v4022_v55 = vadd.f32 -0.28449672, %v3962_v28  ;;  %v3856_v28 = vmul.f32 %v8582_v53, %v3796_v33  ;;  %v8606_v33 = vpop.eup %5905 }
 0x3b1   :  { %v4024_v9 = vadd.f32 -0.28449672, %v3964_v52  ;;  %v8598_v52 = vand.u32 2147483647, %v3377_v0  ;;  %v3566_v0 = vadd.f32 1.0, %v3506_v25 }
 0x3b2   :  { %v4082_v24 = vmul.f32 %v8534_v57, %v4022_v55  ;;  %v3914_v55 = vadd.f32 1.4214138, %v3854_v18  ;;  %v3916_v61 = vadd.f32 1.4214138, %v3856_v28  ;;  %v3783_v45 = vadd.f32 -1.4531521, %v3723_v62 }
 0x3b3   :  { %v4084_v35 = vmul.f32 %v8539_v27, %v4024_v9  ;;  %v8602_v9 = vand.u32 2147483647, %v3388_v41  ;;  %v8611_v28 = vpop.f32.mrb[51].mxu0  ;;  %5913 = vrcp.f32 %v3566_v0 }
 0x3b4   :  { %v4142_v4 = vadd.f32 0.2548296, %v4082_v24  ;;  %v3974_v24 = vmul.f32 %v8574_v23, %v3914_v55  ;;  %10269 = vst [vmem:[#allocation10_spill] sm:$0xff] %v8611_v28 }
 0x3b5   :  { %v4144_v60 = vadd.f32 0.2548296, %v4084_v35  ;;  %v3976_v35 = vmul.f32 %v8582_v53, %v3916_v61  ;;  %v3508_v41 = vmul.f32 0.3275911, %v8602_v9 }
 0x3b6   :  { %v4202_v22 = vmul.f32 %v8534_v57, %v4142_v4  ;;  %v4034_v58 = vadd.f32 -0.28449672, %v3974_v24  ;;  %v3497_v57 = vmul.f32 0.3275911, %v8598_v52 }
 0x3b7   :  { %v4204_v30 = vmul.f32 %v8539_v27, %v4144_v60  ;;  %v4036_v32 = vadd.f32 -0.28449672, %v3976_v35  ;;  %v3725_v27 = vmul.f32 1.0614054, %v8606_v33  ;;  %v5908_v24 = vpop.eup %5907 }
 0x3b8   :  { %v4502_v18 = vmul.f32 %v5902_v39, %v4202_v22  ;;  %v4094_v63 = vmul.f32 %v8574_v23, %v4034_v58  ;;  %v3557_v55 = vadd.f32 1.0, %v3497_v57  ;;  %v3843_v39 = vmul.f32 %v8590_v21, %v3783_v45  ;;  %v8620_v34 = vpop.eup %5909 }
 0x3b9   :  { %v4504_v4 = vmul.f32 %v5904_v51, %v4204_v30  ;;  %v4096_v25 = vmul.f32 %v8582_v53, %v4036_v32  ;;  %v3568_v51 = vadd.f32 1.0, %v3508_v41  ;;  %v8617_v30 = vpop.f32.mrb[51].mxu1  ;;  %v3785_v35 = vadd.f32 -1.4531521, %v3725_v27  ;;  %v5912_v0 = vpop.eup %5911 }
 0x3ba   :  { %v4622_v60 = vmul.f32 0.5, %v4502_v18  ;;  %v4154_v61 = vadd.f32 0.2548296, %v4094_v63  ;;  %10270 = vst [vmem:[#allocation37_spill] sm:$0xff] %v8617_v30  ;;  %v4263_v18 = vmul.f32 %v8505_v50, %v8505_v50  ;;  %5915 = vrcp.f32 %v3557_v55 }
 0x3bb   :  { %v4624_v62 = vmul.f32 0.5, %v4504_v4  ;;  %v4156_v22 = vadd.f32 0.2548296, %v4096_v25  ;;  %v3903_v4 = vadd.f32 1.4214138, %v3843_v39  ;;  %5917 = vrcp.f32 %v3568_v51  ;;  %v8634_v39 = vpop.f32.mrb[52].mxu0 }
 0x3bc   :  { %v4214_v28 = vmul.f32 %v8574_v23, %v4154_v61  ;;  %v4682_v32 = vsub.f32 1.0, %v4622_v60  ;;  %v3845_v63 = vmul.f32 %v8606_v33, %v3785_v35  ;;  %v3735_v23 = vmul.f32 1.0614054, %v8620_v34  ;;  %10271 = vst [vmem:[#allocation13_spill] sm:$0xff] %v8634_v39 }
 0x3bd   :  { %v4216_v58 = vmul.f32 %v8582_v53, %v4156_v22  ;;  %v4684_v45 = vsub.f32 1.0, %v4624_v62  ;;  %v4265_v53 = vmul.f32 %v8521_v16, %v8521_v16  ;;  %v8631_v50 = vpop.eup %5913  ;;  %v4323_v61 = vsub.f32 0.0, %v4263_v18 }
 0x3be   :  { %v4514_v57 = vmul.f32 %v5908_v24, %v4214_v28  ;;  %v4742_v28 = vsel %vm4562_vm15, %v4682_v32, %v4622_v60  ;;  %v3963_v51 = vmul.f32 %v8590_v21, %v3903_v4  ;;  %v3905_v35 = vadd.f32 1.4214138, %v3845_v63  ;;  %v8642_v60 = vpop.f32.mrb[52].mxu1 }
 0x3bf   :  { %v4516_v41 = vmul.f32 %v5912_v0, %v4216_v58  ;;  %v4744_v22 = vsel %vm4564_vm0, %v4684_v45, %v4624_v62  ;;  %v3795_v0 = vadd.f32 -1.4531521, %v3735_v23  ;;  %v8640_v16 = vadd.f32 %v8501_v42, %v8536_v40  ;;  %10272 = vst [vmem:[#allocation38_spill] sm:$0xff] %v8642_v60 }
 0x3c0   :  { %v4634_v27 = vmul.f32 0.5, %v4514_v57  ;;  %v8645_v32 = vmul.f32 %v4742_v28, %v8475_v46  ;;  %v3746_v57 = vmul.f32 1.0614054, %v8631_v50  ;;  %v8652_v45 = vmul.f32 %v4744_v22, %v8478_v12  ;;  %v8673_v28 = vpop.f32.mrb[53].mxu0 }
 0x3c1   :  { %v4636_v25 = vmul.f32 0.5, %v4516_v41  ;;  %v4325_v4 = vsub.f32 0.0, %v4265_v53  ;;  %v3387_v42 = vmul.f32 0.70710677, %v8640_v16  ;;  %v4023_v63 = vadd.f32 -0.28449672, %v3963_v51 }
 0x3c2   :  { %v4694_v55 = vsub.f32 1.0, %v4634_v27  ;;  %10273 = vst [vmem:[#allocation5_spill] sm:$0xff] %v8645_v32  ;;  %10275 = vst [vmem:[#allocation8_spill] sm:$0xff] %v8652_v45  ;;  %v3965_v12 = vmul.f32 %v8606_v33, %v3905_v35  ;;  %v8679_v51 = vpop.f32.mrb[53].mxu1  ;;  %vm4587_vm11 = vcmp.ge.f32.partialorder %v8640_v16, 0.0 }
 0x3c3   :  { %v4696_v24 = vsub.f32 1.0, %v4636_v25  ;;  %10277 = vst [vmem:[#allocation6_spill] sm:$0xff] %v8673_v28  ;;  %10278 = vst [vmem:[#allocation31_spill] sm:$0xff] %v8679_v51  ;;  %v4388_v35 = vmul.f32 1.442695, %v4325_v4 }
 0x3c4   :  { %v4754_v58 = vsel %vm4574_vm1, %v4694_v55, %v4634_v27  ;;  %v4384_v27 = vmul.f32 1.442695, %v4323_v61  ;;  %v8664_v23 = vpop.eup %5915  ;;  %v3855_v55 = vmul.f32 %v8620_v34, %v3795_v0 }
 0x3c5   :  { %v8648_v18 = vmul.f32 %v4754_v58, %v8491_v29  ;;  %v4756_v62 = vsel %vm4576_vm2, %v4696_v24, %v4636_v25  ;;  %v8662_v29 = vadd.f32 %v8503_v6, %v8536_v40  ;;  %v8671_v25 = vand.u32 2147483647, %v3387_v42  ;;  %v8675_v61 = vpop.eup %5917  ;;  %v8681_v24 = vpop.permute.xlu0 %2768 }
 0x3c6   :  { %v8655_v41 = vmul.f32 %v4756_v62, %v8497_v56  ;;  %v4275_v56 = vmul.f32 %v8556_v15, %v8556_v15  ;;  %v3806_v6 = vadd.f32 -1.4531521, %v3746_v57  ;;  %10279 = vst [vmem:[#allocation9_spill] sm:$0xff] %v8681_v24  ;;  %v3748_v58 = vmul.f32 1.0614054, %v8675_v61 }
 0x3c7   :  { %10274 = vst [vmem:[#allocation28_spill] sm:$0xff] %v8648_v18  ;;  %v3389_v22 = vmul.f32 0.70710677, %v8662_v29  ;;  %v3507_v15 = vmul.f32 0.3275911, %v8671_v25  ;;  %v4083_v62 = vmul.f32 %v8590_v21, %v4023_v63  ;;  %5919 = vpow2.f32 %v4384_v27 }
 0x3c8   :  { %10276 = vst [vmem:[#allocation30_spill] sm:$0xff] %v8655_v41  ;;  %v8690_v0 = vadd.f32 %v8510_v20, %v8681_v24  ;;  %v4025_v57 = vadd.f32 -0.28449672, %v3965_v12  ;;  %v4335_v53 = vsub.f32 0.0, %v4275_v56  ;;  %v3737_v46 = vmul.f32 1.0614054, %v8664_v23 }
 0x3c9   :  { %v8686_v42 = vand.u32 2147483647, %v3389_v22  ;;  %v3567_v45 = vadd.f32 1.0, %v3507_v15  ;;  %v3915_v41 = vadd.f32 1.4214138, %v3855_v55  ;;  %v3866_v4 = vmul.f32 %v8631_v50, %v3806_v6 }
 0x3ca   :  { %v3398_v18 = vmul.f32 0.70710677, %v8690_v0  ;;  %v3808_v63 = vadd.f32 -1.4531521, %v3748_v58  ;;  %v8698_v27 = vadd.f32 %v8512_v37, %v8681_v24  ;;  %v4143_v20 = vadd.f32 0.2548296, %v4083_v62 }
 0x3cb   :  { %v3509_v32 = vmul.f32 0.3275911, %v8686_v42  ;;  %5921 = vrcp.f32 %v3567_v45  ;;  %v4277_v12 = vmul.f32 %v8598_v52, %v8598_v52  ;;  %v4085_v55 = vmul.f32 %v8606_v33, %v4025_v57  ;;  %v8704_v58 = vpop.f32.mrb[54].mxu0 }
 0x3cc   :  { %v3458_v22 = vand.u32 2147483647, %v3398_v18  ;;  %v3797_v15 = vadd.f32 -1.4531521, %v3737_v46  ;;  %5923 = vpow2.f32 %v4388_v35  ;;  %v3975_v6 = vmul.f32 %v8620_v34, %v3915_v41  ;;  %10280 = vst [vmem:[#allocation32_spill] sm:$0xff] %v8704_v58  ;;  %v8715_v41 = vpop.f32.mrb[54].mxu1 }
 0x3cd   :  { %v3569_v56 = vadd.f32 1.0, %v3509_v32  ;;  %v4408_v51 = vmul.f32 1.442695, %v4335_v53  ;;  %v3926_v28 = vadd.f32 1.4214138, %v3866_v4  ;;  %v3868_v45 = vmul.f32 %v8675_v61, %v3808_v63  ;;  %10281 = vst [vmem:[#allocation19_spill] sm:$0xff] %v8715_v41 }
 0x3ce   :  { %v3518_v37 = vmul.f32 0.3275911, %v3458_v22  ;;  %v3400_v62 = vmul.f32 0.70710677, %v8698_v27  ;;  %v4203_v52 = vmul.f32 %v8590_v21, %v4143_v20  ;;  %v4337_v32 = vsub.f32 0.0, %v4277_v12 }
 0x3cf   :  { %5925 = vrcp.f32 %v3569_v56  ;;  %v4286_v18 = vmul.f32 %v8586_v5, %v8586_v5  ;;  %v8713_v46 = vadd.f32 %v8514_v36, %v8681_v24  ;;  %v4145_v53 = vadd.f32 0.2548296, %v4085_v55 }
 0x3d0   :  { %v3857_v35 = vmul.f32 %v8664_v23, %v3797_v15  ;;  %v3578_v57 = vadd.f32 1.0, %v3518_v37  ;;  %v3460_v4 = vand.u32 2147483647, %v3400_v62  ;;  %v4035_v56 = vadd.f32 -0.28449672, %v3975_v6 }
 0x3d1   :  { %v5920_v63 = vpop.eup %5919  ;;  %v3986_v58 = vmul.f32 %v8631_v50, %v3926_v28  ;;  %v3399_v21 = vmul.f32 0.70710677, %v8713_v46  ;;  %v8722_v5 = vadd.f32 %v8516_v3, %v8681_v24  ;;  %v3928_v20 = vadd.f32 1.4214138, %v3868_v45 }
 0x3d2   :  { %5927 = vrcp.f32 %v3578_v57  ;;  %v3520_v36 = vmul.f32 0.3275911, %v3460_v4  ;;  %v4346_v12 = vsub.f32 0.0, %v4286_v18  ;;  %v4288_v55 = vmul.f32 %v8602_v9, %v8602_v9 }
 0x3d3   :  { %10282 = vst [vmem:[#allocation23_spill] sm:$0xff] %v8722_v5  ;;  %v8726_v15 = vand.u32 2147483647, %v3399_v21  ;;  %v3401_v37 = vmul.f32 0.70710677, %v8722_v5  ;;  %v4205_v28 = vmul.f32 %v8606_v33, %v4145_v53  ;;  %5929 = vpow2.f32 %v4408_v51 }
 0x3d4   :  { %v4412_v62 = vmul.f32 1.442695, %v4337_v32  ;;  %v3580_v41 = vadd.f32 1.0, %v3520_v36  ;;  %v4503_v3 = vmul.f32 %v5920_v63, %v4203_v52  ;;  %v4095_v45 = vmul.f32 %v8620_v34, %v4035_v56  ;;  %v8740_v32 = vpop.f32.mrb[55].mxu0  ;;  %v8746_v36 = vpop.permute.xlu1 %2773 }
 0x3d5   :  { %v8729_v6 = vpop.eup %5921  ;;  %v3917_v57 = vadd.f32 1.4214138, %v3857_v35  ;;  %v4046_v60 = vadd.f32 -0.28449672, %v3986_v58  ;;  %v3988_v18 = vmul.f32 %v8675_v61, %v3928_v20  ;;  %v3519_v21 = vmul.f32 0.3275911, %v8726_v15 }
 0x3d6   :  { %v3747_v9 = vmul.f32 1.0614054, %v8729_v6  ;;  %5931 = vrcp.f32 %v3580_v41  ;;  %v5924_v39 = vpop.eup %5923  ;;  %v4430_v24 = vmul.f32 1.442695, %v4346_v12  ;;  %v4348_v30 = vsub.f32 0.0, %v4288_v55  ;;  %10283 = vst [vmem:[#allocation20_spill] sm:$0xff] %v8740_v32 }
 0x3d7   :  { %v8736_v5 = vand.u32 2147483647, %v3401_v37  ;;  %v4505_v51 = vmul.f32 %v5924_v39, %v4205_v28  ;;  %v4298_v52 = vmul.f32 %v3458_v22, %v3458_v22  ;;  %v8742_v53 = vmul.f32 0.5, %v4503_v3 }
 0x3d8   :  { %v4155_v58 = vadd.f32 0.2548296, %v4095_v45  ;;  %v3977_v35 = vmul.f32 %v8664_v23, %v3917_v57  ;;  %5933 = vpow2.f32 %v4412_v62  ;;  %v4106_v41 = vmul.f32 %v8631_v50, %v4046_v60 }
 0x3d9   :  { %v8738_v33 = vpop.eup %5925  ;;  %v4048_v63 = vadd.f32 -0.28449672, %v3988_v18  ;;  %v3807_v56 = vadd.f32 -1.4531521, %v3747_v9  ;;  %v3579_v20 = vadd.f32 1.0, %v3519_v21  ;;  %5935 = vpow2.f32 %v4430_v24 }
 0x3da   :  { %v4434_v12 = vmul.f32 1.442695, %v4348_v30  ;;  %v3749_v39 = vmul.f32 1.0614054, %v8738_v33  ;;  %v3521_v22 = vmul.f32 0.3275911, %v8736_v5  ;;  %v4300_v3 = vmul.f32 %v3460_v4, %v3460_v4 }
 0x3db   :  { %v8752_v37 = vmul.f32 0.5, %v4505_v51  ;;  %v4358_v28 = vsub.f32 0.0, %v4298_v52  ;;  %v8756_v60 = vadd.f32 %v8519_v7, %v8746_v36  ;;  %v4683_v62 = vsub.f32 1.0, %v8742_v53 }
 0x3dc   :  { %v8750_v55 = vpop.eup %5927  ;;  %v4215_v45 = vmul.f32 %v8620_v34, %v4155_v58  ;;  %v4037_v24 = vadd.f32 -0.28449672, %v3977_v35  ;;  %v4166_v18 = vadd.f32 0.2548296, %v4106_v41  ;;  %v4108_v9 = vmul.f32 %v8675_v61, %v4048_v63 }
 0x3dd   :  { %v3758_v30 = vmul.f32 1.0614054, %v8750_v55  ;;  %v5930_v57 = vpop.eup %5929  ;;  %v3867_v21 = vmul.f32 %v8729_v6, %v3807_v56  ;;  %5937 = vrcp.f32 %v3579_v20  ;;  %v3809_v4 = vadd.f32 -1.4531521, %v3749_v39 }
 0x3de   :  { %5939 = vpow2.f32 %v4434_v12  ;;  %v3581_v51 = vadd.f32 1.0, %v3521_v22  ;;  %v4685_v34 = vsub.f32 1.0, %v8752_v37  ;;  %v4454_v58 = vmul.f32 1.442695, %v4358_v28 }
 0x3df   :  { %v3818_v7 = vadd.f32 -1.4531521, %v3758_v30  ;;  %v4360_v35 = vsub.f32 0.0, %v4300_v3  ;;  %v3410_v32 = vmul.f32 0.70710677, %v8756_v60  ;;  %v4515_v40 = vmul.f32 %v5930_v57, %v4215_v45 }
 0x3e0   :  { %v8764_v52 = vpop.eup %5931  ;;  %v4097_v41 = vmul.f32 %v8664_v23, %v4037_v24  ;;  %v4226_v20 = vmul.f32 %v8631_v50, %v4166_v18  ;;  %v4168_v12 = vadd.f32 0.2548296, %v4108_v9  ;;  %v3927_v39 = vadd.f32 1.4214138, %v3867_v21 }
 0x3e1   :  { %v3878_v63 = vmul.f32 %v8750_v55, %v3818_v7  ;;  %v3760_v56 = vmul.f32 1.0614054, %v8764_v52  ;;  %v4287_v22 = vmul.f32 %v8671_v25, %v8671_v25  ;;  %v3869_v28 = vmul.f32 %v8738_v33, %v3809_v4 }
 0x3e2   :  { %v5934_v30 = vpop.eup %5933  ;;  %5941 = vrcp.f32 %v3581_v51  ;;  %v4458_v24 = vmul.f32 1.442695, %v4360_v35  ;;  %v8777_v57 = vand.u32 2147483647, %v3410_v32  ;;  %v8781_v50 = vadd.f32 %v8523_v14, %v8746_v36 }
 0x3e3   :  { %v3938_v3 = vadd.f32 1.4214138, %v3878_v63  ;;  %v3820_v45 = vadd.f32 -1.4531521, %v3760_v56  ;;  %5943 = vpow2.f32 %v4454_v58  ;;  %v5936_v18 = vpop.eup %5935  ;;  %v4635_v25 = vmul.f32 0.5, %v4515_v40 }
 0x3e4   :  { %10284 = vst [vmem:[#allocation24_spill] sm:$0xff] %v8781_v50  ;;  %v4157_v9 = vadd.f32 0.2548296, %v4097_v41  ;;  %v4526_v7 = vmul.f32 %v5936_v18, %v4226_v20  ;;  %v4228_v51 = vmul.f32 %v8675_v61, %v4168_v12  ;;  %v3987_v63 = vmul.f32 %v8729_v6, %v3927_v39 }
 0x3e5   :  { %v3998_v21 = vmul.f32 %v8750_v55, %v3938_v3  ;;  %v3880_v4 = vmul.f32 %v8764_v52, %v3820_v45  ;;  %v4347_v58 = vsub.f32 0.0, %v4287_v22  ;;  %v8790_v32 = vsel %vm4563_vm3, %v4683_v62, %v8742_v53 }
 0x3e6   :  { %v3929_v14 = vadd.f32 1.4214138, %v3869_v28  ;;  %v4289_v41 = vmul.f32 %v8686_v42, %v8686_v42  ;;  %5945 = vpow2.f32 %v4458_v24  ;;  %v3530_v20 = vmul.f32 0.3275911, %v8777_v57  ;;  %v8802_v28 = vpop.f32.mrb[55].mxu1 }
 0x3e7   :  { %v4058_v35 = vadd.f32 -0.28449672, %v3998_v21  ;;  %v3940_v56 = vadd.f32 1.4214138, %v3880_v4  ;;  %v8792_v40 = vpop.eup %5937  ;;  %v3412_v61 = vmul.f32 0.70710677, %v8781_v50  ;;  %v4217_v22 = vmul.f32 %v8664_v23, %v4157_v9 }
 0x3e8   :  { %v5940_v12 = vpop.eup %5939  ;;  %v4695_v39 = vsub.f32 1.0, %v4635_v25  ;;  %10285 = vst [vmem:[#allocation14_spill] sm:$0xff] %v8802_v28  ;;  %v4646_v3 = vmul.f32 0.5, %v4526_v7  ;;  %v4047_v42 = vadd.f32 -0.28449672, %v3987_v63  ;;  %v3989_v18 = vmul.f32 %v8738_v33, %v3929_v14 }
 0x3e9   :  { %v4118_v53 = vmul.f32 %v8750_v55, %v4058_v35  ;;  %v4000_v62 = vmul.f32 %v8764_v52, %v3940_v56  ;;  %v4528_v45 = vmul.f32 %v5940_v12, %v4228_v51  ;;  %v4432_v24 = vmul.f32 1.442695, %v4347_v58 }
 0x3ea   :  { %v3759_v50 = vmul.f32 1.0614054, %v8792_v40  ;;  %v8809_v23 = vsel %vm4565_vm4, %v4685_v34, %v8752_v37  ;;  %v4349_v9 = vsub.f32 0.0, %v4289_v41  ;;  %v3590_v35 = vadd.f32 1.0, %v3530_v20 }
 0x3eb   :  { %v4178_v21 = vadd.f32 0.2548296, %v4118_v53  ;;  %v4060_v4 = vadd.f32 -0.28449672, %v4000_v62  ;;  %v8811_v56 = vand.u32 2147483647, %v3412_v61  ;;  %v8817_v7 = vsel %vm4575_vm5, %v4695_v39, %v4635_v25 }
 0x3ec   :  { %v8813_v28 = vpop.eup %5941  ;;  %v4517_v51 = vmul.f32 %v5934_v30, %v4217_v22  ;;  %v4706_v37 = vsub.f32 1.0, %v4646_v3  ;;  %v4648_v34 = vmul.f32 0.5, %v4528_v45  ;;  %v4107_v41 = vmul.f32 %v8729_v6, %v4047_v42 }
 0x3ed   :  { %v4238_v63 = vmul.f32 %v8750_v55, %v4178_v21  ;;  %v4120_v58 = vmul.f32 %v8764_v52, %v4060_v4  ;;  %v5944_v14 = vpop.eup %5943  ;;  %5947 = vpow2.f32 %v4432_v24  ;;  %v4049_v20 = vadd.f32 -0.28449672, %v3989_v18 }
 0x3ee   :  { %v3819_v53 = vadd.f32 -1.4531521, %v3759_v50  ;;  %v4436_v62 = vmul.f32 1.442695, %v4349_v9  ;;  %v3761_v25 = vmul.f32 1.0614054, %v8813_v28  ;;  %5949 = vrcp.f32 %v3590_v35 }
 0x3ef   :  { %v4538_v61 = vmul.f32 %v5944_v14, %v4238_v63  ;;  %v4180_v12 = vadd.f32 0.2548296, %v4120_v58  ;;  %v3532_v30 = vmul.f32 0.3275911, %v8811_v56  ;;  %v4637_v39 = vmul.f32 0.5, %v4517_v51  ;;  %v8833_v51 = vpop.f32.mrb[56].mxu0 }
 0x3f0   :  { %vm4598_vm8 = vcmp.ge.f32.partialorder %v8690_v0, 0.0  ;;  %v5946_v45 = vpop.eup %5945  ;;  %v4766_v42 = vsel %vm4586_vm6, %v4706_v37, %v4646_v3  ;;  %v4708_v24 = vsub.f32 1.0, %v4648_v34  ;;  %v4167_v18 = vadd.f32 0.2548296, %v4107_v41  ;;  %v8835_v63 = vpop.f32.mrb[56].mxu1 }
 0x3f1   :  { %v4658_v55 = vmul.f32 0.5, %v4538_v61  ;;  %v4240_v22 = vmul.f32 %v8764_v52, %v4180_v12  ;;  %v4299_v50 = vmul.f32 %v8726_v15, %v8726_v15  ;;  %v4109_v21 = vmul.f32 %v8738_v33, %v4049_v20 }
 0x3f2   :  { %v3879_v35 = vmul.f32 %v8792_v40, %v3819_v53  ;;  %5951 = vpow2.f32 %v4436_v62  ;;  %vm4600_vm9 = vcmp.ge.f32.partialorder %v8698_v27, 0.0  ;;  %v3821_v52 = vadd.f32 -1.4531521, %v3761_v25 }
 0x3f3   :  { %v4718_v4 = vsub.f32 1.0, %v4658_v55  ;;  %v4540_v9 = vmul.f32 %v5946_v45, %v4240_v22  ;;  %v3592_v3 = vadd.f32 1.0, %v3532_v30  ;;  %v8840_v58 = vmul.f32 %v4766_v42, %v8549_v38 }
 0x3f4   :  { %v4301_v37 = vmul.f32 %v8736_v5, %v8736_v5  ;;  %v4768_v41 = vsel %vm4588_vm7, %v4708_v24, %v4648_v34  ;;  %v4359_v61 = vsub.f32 0.0, %v4299_v50  ;;  %v4310_v12 = vmul.f32 %v8777_v57, %v8777_v57  ;;  %v8861_v34 = vpop.f32.mrb[57].mxu0 }
 0x3f5   :  { %10286 = vst [vmem:[#allocation21_spill] sm:$0xff] %v8840_v58  ;;  %v4778_v15 = vsel %vm4598_vm8, %v4718_v4, %v4658_v55  ;;  %v4660_v14 = vmul.f32 0.5, %v4540_v9  ;;  %v4227_v38 = vmul.f32 %v8729_v6, %v4167_v18  ;;  %v4169_v53 = vadd.f32 0.2548296, %v4109_v21  ;;  %v8879_v21 = vpop.f32.mrb[57].mxu1  ;;  %v10300_v58 = vld [vmem:[#allocation33_spill] sm:$0xff] }
 0x3f6   :  { %v8849_v20 = vmul.f32 %v4778_v15, %v8690_v0  ;;  %v3939_v25 = vadd.f32 1.4214138, %v3879_v35  ;;  %v3881_v5 = vmul.f32 %v8813_v28, %v3821_v52  ;;  %5953 = vrcp.f32 %v3592_v3 }
 0x3f7   :  { %v4720_v62 = vsub.f32 1.0, %v4660_v14  ;;  %v5948_v30 = vpop.eup %5947  ;;  %v8859_v0 = vadd.f32 %v8525_v11, %v8746_v36  ;;  %v4697_v22 = vsub.f32 1.0, %v4637_v39  ;;  %v8864_v57 = vmul.f32 %v4768_v41, %v8580_v59 }
 0x3f8   :  { %10287 = vst [vmem:[#allocation15_spill] sm:$0xff] %v8849_v20  ;;  %v4361_v45 = vsub.f32 0.0, %v4301_v37  ;;  %v8868_v42 = vpop.eup %5949  ;;  %v4370_v18 = vsub.f32 0.0, %v4310_v12  ;;  %v4312_v11 = vmul.f32 %v8811_v56, %v8811_v56  ;;  %v8877_v50 = vadd.f32 %v8532_v44, %v8472_v43  ;;  %v10301_v20 = vld [vmem:[#allocation11_spill] sm:$0xff] }
 0x3f9   :  { %10288 = vst [vmem:[#allocation22_spill] sm:$0xff] %v8859_v0  ;;  %10289 = vst [vmem:[#allocation27_spill] sm:$0xff] %v8864_v57  ;;  %v4780_v6 = vsel %vm4600_vm9, %v4720_v62, %v4660_v14  ;;  %v4527_v59 = vmul.f32 %v5948_v30, %v4227_v38  ;;  %v4229_v4 = vmul.f32 %v8738_v33, %v4169_v53  ;;  %v4456_v35 = vmul.f32 1.442695, %v4359_v61  ;;  %v8905_v53 = vpop.f32.mrb[58].mxu0  ;;  %v8907_v62 = vpop.f32.mrb[58].mxu1 }
 0x3fa   :  { %v8871_v24 = vmul.f32 %v4780_v6, %v8698_v27  ;;  %v3999_v9 = vmul.f32 %v8792_v40, %v3939_v25  ;;  %v3941_v52 = vadd.f32 1.4214138, %v3881_v5  ;;  %v3411_v3 = vmul.f32 0.70710677, %v8859_v0 }
 0x3fb   :  { %v3366_v56 = vmul.f32 0.70710677, %v8877_v50  ;;  %v8889_v44 = vmul.f32 %v8790_v32, %v8483_v49  ;;  %v8893_v15 = vmul.f32 %v8809_v23, %v8494_v13  ;;  %v4460_v33 = vmul.f32 1.442695, %v4361_v45 }
 0x3fc   :  { %10290 = vst [vmem:[#allocation29_spill] sm:$0xff] %v8871_v24  ;;  %v3770_v14 = vmul.f32 1.0614054, %v8868_v42  ;;  %v5952_v37 = vpop.eup %5951  ;;  %v4757_v41 = vsel %vm4577_vm10, %v4697_v22, %v4637_v39  ;;  %v4478_v61 = vmul.f32 1.442695, %v4370_v18  ;;  %v4372_v12 = vsub.f32 0.0, %v4312_v11 }
 0x3fd   :  { %10291 = vst [vmem:[#allocation25_spill] sm:$0xff] %v8889_v44  ;;  %10292 = vst [vmem:[#allocation26_spill] sm:$0xff] %v8893_v15  ;;  %v8899_v38 = vand.u32 2147483647, %v3366_v56  ;;  %v8903_v49 = vmul.f32 %v8817_v7, %v8528_v1  ;;  %v4647_v32 = vmul.f32 0.5, %v4527_v59  ;;  %v4529_v13 = vmul.f32 %v5952_v37, %v4229_v4  ;;  %v10303_v15 = vld [vmem:[#allocation23_spill] sm:$0xff] }
 0x3fe   :  { %v4059_v23 = vadd.f32 -0.28449672, %v3999_v9  ;;  %5955 = vpow2.f32 %v4456_v35  ;;  %v4001_v39 = vmul.f32 %v8813_v28, %v3941_v52  ;;  %v3471_v25 = vand.u32 2147483647, %v3411_v3 }
 0x3ff   :  { %10293 = vst [vmem:[#allocation39_spill] sm:$0xff] %v8903_v49  ;;  %v3486_v30 = vmul.f32 0.3275911, %v8899_v38  ;;  %v8912_v5 = vmul.f32 %v4757_v41, %v8568_v31  ;;  %5957 = vpow2.f32 %v4460_v33  ;;  %v3830_v22 = vadd.f32 -1.4531521, %v3770_v14  ;;  %v8936_v33 = vpop.f32.mrb[59].mxu0 }
 0x400   :  { %v8916_v1 = vadd.f32 %v8543_v19, %v8472_v43  ;;  %v8918_v7 = vpop.eup %5953  ;;  %vm4589_vm12 = vcmp.ge.f32.partialorder %v8662_v29, 0.0  ;;  %5959 = vpow2.f32 %v4478_v61  ;;  %v4482_v6 = vmul.f32 1.442695, %v4372_v12 }
 0x401   :  { %10294 = vst [vmem:[#allocation12_spill] sm:$0xff] %v8912_v5  ;;  %v3546_v45 = vadd.f32 1.0, %v3486_v30  ;;  %v8923_v18 = vadd.f32 %v8545_v54, %v8472_v43  ;;  %v4707_v11 = vsub.f32 1.0, %v4647_v32  ;;  %v4649_v31 = vmul.f32 0.5, %v4529_v13 }
 0x402   :  { %v4119_v59 = vmul.f32 %v8792_v40, %v4059_v23  ;;  %v3368_v4 = vmul.f32 0.70710677, %v8916_v1  ;;  %v4061_v9 = vadd.f32 -0.28449672, %v4001_v39  ;;  %v4311_v19 = vmul.f32 %v3471_v25, %v3471_v25 }
 0x403   :  { %5961 = vrcp.f32 %v3546_v45  ;;  %v3367_v35 = vmul.f32 0.70710677, %v8923_v18  ;;  %v3890_v52 = vmul.f32 %v8868_v42, %v3830_v22  ;;  %v3772_v3 = vmul.f32 1.0614054, %v8918_v7  ;;  %v8950_v22 = vpop.f32.mrb[59].mxu1 }
 0x404   :  { %v8930_v56 = vand.u32 2147483647, %v3368_v4  ;;  %v8934_v54 = vadd.f32 %v8551_v26, %v8472_v43  ;;  %5963 = vpow2.f32 %v4482_v6  ;;  %v3531_v14 = vmul.f32 0.3275911, %v3471_v25 }
 0x405   :  { %v8938_v37 = vand.u32 2147483647, %v3367_v35  ;;  %v8942_v41 = vadd.f32 %v8553_v10, %v8485_v48  ;;  %v4767_v61 = vsel %vm4587_vm11, %v4707_v11, %v4647_v32  ;;  %v4709_v12 = vsub.f32 1.0, %v4649_v31 }
 0x406   :  { %v4179_v13 = vadd.f32 0.2548296, %v4119_v59  ;;  %v3488_v23 = vmul.f32 0.3275911, %v8930_v56  ;;  %v4121_v26 = vmul.f32 %v8813_v28, %v4061_v9  ;;  %v4371_v39 = vsub.f32 0.0, %v4311_v19 }
 0x407   :  { %v3487_v30 = vmul.f32 0.3275911, %v8938_v37  ;;  %v3369_v25 = vmul.f32 0.70710677, %v8934_v54  ;;  %v3950_v6 = vadd.f32 1.4214138, %v3890_v52  ;;  %v8954_v4 = vadd.f32 %v8558_v8, %v8485_v48 }
 0x408   :  { %v3832_v45 = vadd.f32 -1.4531521, %v3772_v3  ;;  %v3548_v10 = vadd.f32 1.0, %v3488_v23  ;;  %v5956_v32 = vpop.eup %5955  ;;  %v3591_v11 = vadd.f32 1.0, %v3531_v14  ;;  %v3378_v9 = vmul.f32 0.70710677, %v8942_v41 }
 0x409   :  { %v3547_v59 = vadd.f32 1.0, %v3487_v30  ;;  %v8956_v35 = vand.u32 2147483647, %v3369_v25  ;;  %v5958_v19 = vpop.eup %5957  ;;  %v4769_v27 = vsel %vm4589_vm12, %v4709_v12, %v4649_v31  ;;  %v4239_v55 = vmul.f32 %v8792_v40, %v4179_v13 }
 0x40a   :  { %v8964_v52 = vadd.f32 %v8530_v47, %v8746_v36  ;;  %5965 = vrcp.f32 %v3548_v10  ;;  %v8966_v8 = vpop.eup %5959  ;;  %v8969_v3 = vmul.f32 %v4767_v61, %v8640_v16  ;;  %v4181_v14 = vadd.f32 0.2548296, %v4121_v26  ;;  %v8986_v61 = vpop.f32.mrb[60].mxu0 }
 0x40b   :  { %v4480_v23 = vmul.f32 1.442695, %v4371_v39  ;;  %5967 = vrcp.f32 %v3547_v59  ;;  %v4010_v30 = vmul.f32 %v8868_v42, %v3950_v6  ;;  %v3489_v25 = vmul.f32 0.3275911, %v8956_v35 }
 0x40c   :  { %10295 = vst [vmem:[#allocation41_spill] sm:$0xff] %v8964_v52  ;;  %10296 = vst [vmem:[#allocation16_spill] sm:$0xff] %v8969_v3  ;;  %v8973_v31 = vand.u32 2147483647, %v3378_v9  ;;  %v3380_v40 = vmul.f32 0.70710677, %v8954_v4  ;;  %v8979_v47 = vmul.f32 %v4769_v27, %v8662_v29  ;;  %v3892_v13 = vmul.f32 %v8918_v7, %v3832_v45 }
 0x40d   :  { %v8976_v12 = vpop.eup %5961  ;;  %5969 = vrcp.f32 %v3591_v11  ;;  %v8984_v16 = vadd.f32 %v8560_v17, %v8485_v48  ;;  %v4539_v26 = vmul.f32 %v5956_v32, %v4239_v55  ;;  %v3413_v39 = vmul.f32 0.70710677, %v8964_v52 }
 0x40e   :  { %10297 = vst [vmem:[#allocation35_spill] sm:$0xff] %v8979_v47  ;;  %v3726_v6 = vmul.f32 1.0614054, %v8976_v12  ;;  %v3498_v10 = vmul.f32 0.3275911, %v8973_v31  ;;  %v8991_v59 = vpop.eup %5963  ;;  %v4241_v29 = vmul.f32 %v8813_v28, %v4181_v14  ;;  %5971 = vpow2.f32 %v4480_v23 }
 0x40f   :  { %v3440_v27 = vand.u32 2147483647, %v3380_v40  ;;  %v3379_v45 = vmul.f32 0.70710677, %v8984_v16  ;;  %v4070_v11 = vadd.f32 -0.28449672, %v4010_v30  ;;  %v4266_v55 = vmul.f32 %v8899_v38, %v8899_v38 }
 0x410   :  { %v3786_v17 = vadd.f32 -1.4531521, %v3726_v6  ;;  %v3549_v9 = vadd.f32 1.0, %v3489_v25  ;;  %v3558_v0 = vadd.f32 1.0, %v3498_v10  ;;  %v9001_v57 = vadd.f32 %v8564_v2, %v8485_v48  ;;  %v9007_v6 = vpop.f32.mrb[60].mxu1 }
 0x411   :  { %v3500_v32 = vmul.f32 0.3275911, %v3440_v27  ;;  %v8997_v52 = vand.u32 2147483647, %v3379_v45  ;;  %vm4599_vm13 = vcmp.ge.f32.partialorder %v8713_v46, 0.0  ;;  %v4659_v28 = vmul.f32 0.5, %v4539_v26 }
 0x412   :  { %v3952_v14 = vadd.f32 1.4214138, %v3892_v13  ;;  %v3473_v23 = vand.u32 2147483647, %v3413_v39  ;;  %v3846_v30 = vmul.f32 %v8976_v12, %v3786_v17  ;;  %v4541_v40 = vmul.f32 %v5958_v19, %v4241_v29  ;;  %10298 = vst [vmem:[#allocation40_spill] sm:$0xff] %v9007_v6 }
 0x413   :  { %v4268_v25 = vmul.f32 %v8930_v56, %v8930_v56  ;;  %5973 = vrcp.f32 %v3558_v0  ;;  %v3560_v38 = vadd.f32 1.0, %v3500_v32  ;;  %v3499_v2 = vmul.f32 0.3275911, %v8997_v52 }
 0x414   :  { %v9009_v10 = vpop.eup %5965  ;;  %v3906_v45 = vadd.f32 1.4214138, %v3846_v30  ;;  %5975 = vrcp.f32 %v3549_v9  ;;  %v3381_v26 = vmul.f32 0.70710677, %v9001_v57  ;;  %v4130_v39 = vmul.f32 %v8868_v42, %v4070_v11 }
 0x415   :  { %v9013_v13 = vpop.eup %5967  ;;  %v4326_v19 = vsub.f32 0.0, %v4266_v55  ;;  %v3728_v29 = vmul.f32 1.0614054, %v9009_v10  ;;  %5977 = vrcp.f32 %v3560_v38  ;;  %v4012_v0 = vmul.f32 %v8918_v7, %v3952_v14 }
 0x416   :  { %v3533_v56 = vmul.f32 0.3275911, %v3473_v23  ;;  %v3966_v17 = vmul.f32 %v8976_v12, %v3906_v45  ;;  %v9019_v32 = vand.u32 2147483647, %v3381_v26  ;;  %v4719_v30 = vsub.f32 1.0, %v4659_v28 }
 0x417   :  { %v9021_v9 = vpop.eup %5969  ;;  %v3788_v24 = vadd.f32 -1.4531521, %v3728_v29  ;;  %v4328_v47 = vsub.f32 0.0, %v4268_v25  ;;  %v9025_v3 = vadd.f32 %v10301_v20, %v10300_v58  ;;  %v4313_v11 = vmul.f32 %v3473_v23, %v3473_v23 }
 0x418   :  { %10299 = vst [vmem:[#allocation36_spill] sm:$0xff] %v9021_v9  ;;  %v4026_v55 = vadd.f32 -0.28449672, %v3966_v17  ;;  %v3727_v38 = vmul.f32 1.0614054, %v9013_v13  ;;  %v3559_v5 = vadd.f32 1.0, %v3499_v2  ;;  %v9028_v14 = vpop.eup %5971  ;;  %v4278_v20 = vmul.f32 %v8973_v31, %v8973_v31 }
 0x419   :  { %10302 = vst [vmem:[#allocation42_spill] sm:$0xff] %v9028_v14  ;;  %vm4601_vm15 = vcmp.ge.f32.partialorder %v10303_v15, 0.0  ;;  %v4661_v45 = vmul.f32 0.5, %v4541_v40  ;;  %v4390_v26 = vmul.f32 1.442695, %v4326_v19  ;;  %v3848_v9 = vmul.f32 %v9009_v10, %v3788_v24 }
 0x41a   :  { %v3501_v29 = vmul.f32 0.3275911, %v9019_v32  ;;  %v4190_v25 = vadd.f32 0.2548296, %v4130_v39  ;;  %v4072_v49 = vadd.f32 -0.28449672, %v4012_v0  ;;  %v4779_v23 = vsel %vm4599_vm13, %v4719_v30, %v4659_v28 }
 0x41b   :  { %v3593_v44 = vadd.f32 1.0, %v3533_v56  ;;  %v3908_v2 = vadd.f32 1.4214138, %v3848_v9  ;;  %v4394_v17 = vmul.f32 1.442695, %v4328_v47  ;;  %v4086_v40 = vmul.f32 %v8976_v12, %v4026_v55 }
 0x41c   :  { %v3390_v14 = vmul.f32 0.70710677, %v9025_v3  ;;  %v3787_v19 = vadd.f32 -1.4531521, %v3727_v38  ;;  %v4280_v6 = vmul.f32 %v3440_v27, %v3440_v27  ;;  %5979 = vrcp.f32 %v3559_v5 }
 0x41d   :  { %v9039_v24 = vpop.eup %5973  ;;  %v4373_v39 = vsub.f32 0.0, %v4313_v11  ;;  %5981 = vpow2.f32 %v4390_v26  ;;  %v3968_v0 = vmul.f32 %v9009_v10, %v3908_v2  ;;  %v3561_v56 = vadd.f32 1.0, %v3501_v29 }
 0x41e   :  { %v9042_v31 = vpop.eup %5975  ;;  %v9045_v28 = vmul.f32 %v4779_v23, %v8713_v46  ;;  %v4721_v47 = vsub.f32 1.0, %v4661_v45  ;;  %v3738_v9 = vmul.f32 1.0614054, %v9039_v24  ;;  %v4338_v30 = vsub.f32 0.0, %v4278_v20 }
 0x41f   :  { %v9048_v55 = vpop.eup %5977  ;;  %v4250_v5 = vmul.f32 %v8868_v42, %v4190_v25  ;;  %v4028_v27 = vadd.f32 -0.28449672, %v3968_v0  ;;  %5983 = vpow2.f32 %v4394_v17  ;;  %v9051_v11 = vand.u32 2147483647, %v3390_v14 }
 0x420   :  { %10304 = vst [vmem:[#allocation43_spill] sm:$0xff] %v9045_v28  ;;  %v4146_v38 = vadd.f32 0.2548296, %v4086_v40  ;;  %v3847_v26 = vmul.f32 %v9013_v13, %v3787_v19  ;;  %v3798_v29 = vadd.f32 -1.4531521, %v3738_v9  ;;  %v4340_v2 = vsub.f32 0.0, %v4280_v6 }
 0x421   :  { %v4132_v46 = vmul.f32 %v8918_v7, %v4072_v49  ;;  %v4088_v23 = vmul.f32 %v9009_v10, %v4028_v27  ;;  %v3740_v28 = vmul.f32 1.0614054, %v9048_v55  ;;  %5985 = vrcp.f32 %v3561_v56  ;;  %v10305_v9 = vld [vmem:[#allocation34_spill] sm:$0xff] }
 0x422   :  { %v4781_v20 = vsel %vm4601_vm15, %v4721_v47, %v4661_v45  ;;  %v3729_v42 = vmul.f32 1.0614054, %v9042_v31  ;;  %v3858_v14 = vmul.f32 %v9039_v24, %v3798_v29  ;;  %v4414_v25 = vmul.f32 1.442695, %v4338_v30 }
 0x423   :  { %5987 = vrcp.f32 %v3593_v44  ;;  %v4148_v17 = vadd.f32 0.2548296, %v4088_v23  ;;  %v3800_v40 = vadd.f32 -1.4531521, %v3740_v28  ;;  %v3510_v6 = vmul.f32 0.3275911, %v9051_v11 }
 0x424   :  { %v4206_v49 = vmul.f32 %v8976_v12, %v4146_v38  ;;  %v3907_v19 = vadd.f32 1.4214138, %v3847_v26  ;;  %v4418_v0 = vmul.f32 1.442695, %v4340_v2  ;;  %v9065_v56 = vadd.f32 %v10305_v9, %v10300_v58 }
 0x425   :  { %v9068_v45 = vmul.f32 %v4781_v20, %v10303_v15  ;;  %v4484_v47 = vmul.f32 1.442695, %v4373_v39  ;;  %v3918_v27 = vadd.f32 1.4214138, %v3858_v14  ;;  %v3860_v30 = vmul.f32 %v9048_v55, %v3800_v40 }
 0x426   :  { %v9071_v44 = vpop.eup %5979  ;;  %v4208_v28 = vmul.f32 %v9009_v10, %v4148_v17  ;;  %v3789_v29 = vadd.f32 -1.4531521, %v3729_v42  ;;  %5989 = vpow2.f32 %v4414_v25  ;;  %v3392_v12 = vmul.f32 0.70710677, %v9065_v56 }
 0x427   :  { %10306 = vst [vmem:[#allocation52_spill] sm:$0xff] %v9068_v45  ;;  %v5982_v38 = vpop.eup %5981  ;;  %v4267_v26 = vmul.f32 %v8938_v37, %v8938_v37  ;;  %v3978_v2 = vmul.f32 %v9039_v24, %v3918_v27  ;;  %v3920_v15 = vadd.f32 1.4214138, %v3860_v30  ;;  %v3570_v23 = vadd.f32 1.0, %v3510_v6 }
 0x428   :  { %v4192_v39 = vadd.f32 0.2548296, %v4132_v46  ;;  %v4506_v20 = vmul.f32 %v5982_v38, %v4206_v49  ;;  %v3967_v14 = vmul.f32 %v9013_v13, %v3907_v19  ;;  %5991 = vpow2.f32 %v4418_v0 }
 0x429   :  { %v5984_v40 = vpop.eup %5983  ;;  %v4038_v9 = vadd.f32 -0.28449672, %v3978_v2  ;;  %v3980_v10 = vmul.f32 %v9048_v55, %v3920_v15  ;;  %v3739_v42 = vmul.f32 1.0614054, %v9071_v44  ;;  %v9081_v25 = vand.u32 2147483647, %v3392_v12 }
 0x42a   :  { %v4550_v17 = vmul.f32 %v8966_v8, %v4250_v5  ;;  %5993 = vpow2.f32 %v4484_v47  ;;  %v4508_v37 = vmul.f32 %v5984_v40, %v4208_v28  ;;  %v3849_v27 = vmul.f32 %v9042_v31, %v3789_v29 }
 0x42b   :  { %v9085_v6 = vpop.eup %5985  ;;  %vm4566_vm0 = vcmp.ge.f32.partialorder %v8877_v50, 0.0  ;;  %v4327_v46 = vsub.f32 0.0, %v4267_v26  ;;  %v4098_v49 = vmul.f32 %v9039_v24, %v4038_v9  ;;  %v4040_v19 = vadd.f32 -0.28449672, %v3980_v10 }
 0x42c   :  { %5995 = vrcp.f32 %v3570_v23  ;;  %v4252_v0 = vmul.f32 %v8918_v7, %v4192_v39  ;;  %v4626_v30 = vmul.f32 0.5, %v4506_v20  ;;  %v4269_v12 = vmul.f32 %v8956_v35, %v8956_v35 }
 0x42d   :  { %v3512_v8 = vmul.f32 0.3275911, %v9081_v25  ;;  %v9093_v5 = vpop.eup %5987  ;;  %v4027_v47 = vadd.f32 -0.28449672, %v3967_v14  ;;  %v4158_v28 = vadd.f32 0.2548296, %v4098_v49  ;;  %v4100_v29 = vmul.f32 %v9048_v55, %v4040_v19 }
 0x42e   :  { %10307 = vst [vmem:[#allocation44_spill] sm:$0xff] %v9093_v5  ;;  %v3799_v38 = vadd.f32 -1.4531521, %v3739_v42  ;;  %v9096_v26 = vmul.f32 0.5, %v4550_v17  ;;  %v4628_v2 = vmul.f32 0.5, %v4508_v37  ;;  %vm4568_vm1 = vcmp.ge.f32.partialorder %v8916_v1, 0.0 }
 0x42f   :  { %v3909_v15 = vadd.f32 1.4214138, %v3849_v27  ;;  %v3741_v23 = vmul.f32 1.0614054, %v9085_v6  ;;  %v4392_v7 = vmul.f32 1.442695, %v4327_v46  ;;  %v4218_v35 = vmul.f32 %v9039_v24, %v4158_v28 }
 0x430   :  { %v4160_v39 = vadd.f32 0.2548296, %v4100_v29  ;;  %v5990_v20 = vpop.eup %5989  ;;  %v4552_v40 = vmul.f32 %v8991_v59, %v4252_v0  ;;  %v4686_v14 = vsub.f32 1.0, %v4626_v30  ;;  %v4329_v9 = vsub.f32 0.0, %v4269_v12  ;;  %v9102_v49 = vpop.f32.mrb[61].mxu0  ;;  %v10320_v5 = vld [vmem:[#allocation13_spill] sm:$0xff] }
 0x431   :  { %v3572_v10 = vadd.f32 1.0, %v3512_v8  ;;  %v9104_v42 = vpop.f32.mrb[61].mxu1  ;;  %v4087_v17 = vmul.f32 %v9013_v13, %v4027_v47  ;;  %v4518_v37 = vmul.f32 %v5990_v20, %v4218_v35  ;;  %v3859_v46 = vmul.f32 %v9071_v44, %v3799_v38  ;;  %v9118_v38 = vpop.f32.mrb[62].mxu0  ;;  %v10311_v20 = vld [vmem:[#allocation10_spill] sm:$0xff] }
 0x432   :  { %v4220_v27 = vmul.f32 %v9048_v55, %v4160_v39  ;;  %v5992_v19 = vpop.eup %5991  ;;  %v4688_v24 = vsub.f32 1.0, %v4628_v2  ;;  %v3969_v28 = vmul.f32 %v9042_v31, %v3909_v15  ;;  %v3801_v29 = vadd.f32 -1.4531521, %v3741_v23  ;;  %10309 = vst [vmem:[#allocation17_spill] sm:$0xff] %v9118_v38  ;;  %v9120_v15 = vpop.f32.mrb[62].mxu1 }
 0x433   :  { %5997 = vrcp.f32 %v3572_v10  ;;  %vm4578_vm2 = vcmp.ge.f32.partialorder %v8942_v41, 0.0  ;;  %v4638_v59 = vmul.f32 0.5, %v4518_v37  ;;  %v4746_v8 = vsel %vm4566_vm0, %v4686_v14, %v4626_v30  ;;  %10310 = vst [vmem:[#allocation45_spill] sm:$0xff] %v9120_v15 }
 0x434   :  { %5999 = vpow2.f32 %v4392_v7  ;;  %v4520_v0 = vmul.f32 %v5992_v19, %v4220_v27  ;;  %v9111_v12 = vpop.eup %5993  ;;  %v4396_v47 = vmul.f32 1.442695, %v4329_v9  ;;  %vm4580_vm3 = vcmp.ge.f32.partialorder %v8954_v4, 0.0 }
 0x435   :  { %10308 = vst [vmem:[#allocation47_spill] sm:$0xff] %v9111_v12  ;;  %v4279_v55 = vmul.f32 %v8997_v52, %v8997_v52  ;;  %v4698_v7 = vsub.f32 1.0, %v4638_v59  ;;  %v3919_v39 = vadd.f32 1.4214138, %v3859_v46  ;;  %v9126_v10 = vadd.f32 %v10311_v20, %v10300_v58  ;;  %v10312_v46 = vld [vmem:[#allocation37_spill] sm:$0xff] }
 0x436   :  { %v9122_v23 = vpop.eup %5995  ;;  %v4640_v35 = vmul.f32 0.5, %v4520_v0  ;;  %v4748_v30 = vsel %vm4568_vm1, %v4688_v24, %v4628_v2  ;;  %v4147_v14 = vadd.f32 0.2548296, %v4087_v17  ;;  %v4029_v9 = vadd.f32 -0.28449672, %v3969_v28  ;;  %v10319_v12 = vld [vmem:[#allocation9_spill] sm:$0xff] }
 0x437   :  { %v3861_v52 = vmul.f32 %v9085_v6, %v3801_v29  ;;  %vm4610_vm4 = vcmp.ge.f32.partialorder %v8756_v60, 0.0  ;;  %v4758_v37 = vsel %vm4578_vm2, %v4698_v7, %v4638_v59  ;;  %v3391_v19 = vmul.f32 0.70710677, %v9126_v10 }
 0x438   :  { %v4700_v27 = vsub.f32 1.0, %v4640_v35  ;;  %v9137_v0 = vadd.f32 %v10312_v46, %v10300_v58  ;;  %v9140_v20 = vmul.f32 %v4746_v8, %v8877_v50  ;;  %v9143_v2 = vmul.f32 %v4758_v37, %v8942_v41 }
 0x439   :  { %v4339_v17 = vsub.f32 0.0, %v4279_v55  ;;  %v3750_v24 = vmul.f32 1.0614054, %v9122_v23  ;;  %v3979_v29 = vmul.f32 %v9071_v44, %v3919_v39  ;;  %v4281_v59 = vmul.f32 %v9019_v32, %v9019_v32  ;;  %v9161_v55 = vpop.f32.mrb[63].mxu0 }
 0x43a   :  { %10313 = vst [vmem:[#allocation18_spill] sm:$0xff] %v9140_v20  ;;  %10314 = vst [vmem:[#allocation46_spill] sm:$0xff] %v9143_v2  ;;  %v4760_v28 = vsel %vm4580_vm3, %v4700_v27, %v4640_v35  ;;  %v9151_v7 = vand.u32 2147483647, %v3391_v19  ;;  %v9154_v46 = vmul.f32 %v4748_v30, %v8916_v1  ;;  %v3921_v8 = vadd.f32 1.4214138, %v3861_v52 }
 0x43b   :  { %v9159_v41 = vmul.f32 %v4760_v28, %v8954_v4  ;;  %10317 = vst [vmem:[#allocation48_spill] sm:$0xff] %v9161_v55  ;;  %v4207_v35 = vmul.f32 %v9013_v13, %v4147_v14  ;;  %v4089_v39 = vmul.f32 %v9042_v31, %v4029_v9  ;;  %v3393_v37 = vmul.f32 0.70710677, %v9137_v0  ;;  %v10318_v30 = vld [vmem:[#allocation24_spill] sm:$0xff] }
 0x43c   :  { %10315 = vst [vmem:[#allocation50_spill] sm:$0xff] %v9154_v46  ;;  %v3511_v32 = vmul.f32 0.3275911, %v9151_v7  ;;  %v4730_v1 = vsub.f32 1.0, %v9096_v26  ;;  %vm4612_vm5 = vcmp.ge.f32.partialorder %v10318_v30, 0.0  ;;  %v4672_v19 = vmul.f32 0.5, %v4552_v40 }
 0x43d   :  { %10316 = vst [vmem:[#allocation51_spill] sm:$0xff] %v9159_v41  ;;  %v9167_v27 = vpop.eup %5997  ;;  %v3810_v52 = vadd.f32 -1.4531521, %v3750_v24  ;;  %6001 = vpow2.f32 %v4396_v47  ;;  %v4416_v13 = vmul.f32 1.442695, %v4339_v17  ;;  %v3981_v20 = vmul.f32 %v9085_v6, %v3921_v8  ;;  %v9181_v40 = vpop.f32.mrb[63].mxu1 }
 0x43e   :  { %v6000_v28 = vpop.eup %5999  ;;  %v3752_v14 = vmul.f32 1.0614054, %v9167_v27  ;;  %v3571_v9 = vadd.f32 1.0, %v3511_v32  ;;  %v4039_v50 = vadd.f32 -0.28449672, %v3979_v29  ;;  %v9179_v45 = vadd.f32 %v10320_v5, %v10319_v12  ;;  %10321 = vst [vmem:[#allocation49_spill] sm:$0xff] %v9181_v40 }
 0x43f   :  { %v9175_v2 = vand.u32 2147483647, %v3393_v37  ;;  %v4507_v55 = vmul.f32 %v6000_v28, %v4207_v35  ;;  %v4149_v4 = vadd.f32 0.2548296, %v4089_v39  ;;  %v4341_v24 = vsub.f32 0.0, %v4281_v59  ;;  %v10322_v8 = vld [vmem:[#allocation38_spill] sm:$0xff] }
 0x440   :  { %6003 = vrcp.f32 %v3571_v9  ;;  %v4790_v47 = vsel %vm4610_vm4, %v4730_v1, %v9096_v26  ;;  %v3870_v17 = vmul.f32 %v9122_v23, %v3810_v52  ;;  %v9190_v32 = vadd.f32 %v10322_v8, %v10319_v12  ;;  %v9196_v1 = vpop.f32.mrb[64].mxu0 }
 0x441   :  { %v3513_v29 = vmul.f32 0.3275911, %v9175_v2  ;;  %v4732_v5 = vsub.f32 1.0, %v4672_v19  ;;  %6005 = vpow2.f32 %v4416_v13  ;;  %v3812_v37 = vadd.f32 -1.4531521, %v3752_v14  ;;  %10323 = vst [vmem:[#allocation53_spill] sm:$0xff] %v9196_v1 }
 0x442   :  { %v3402_v35 = vmul.f32 0.70710677, %v9179_v45  ;;  %v4099_v59 = vmul.f32 %v9071_v44, %v4039_v50  ;;  %v4041_v39 = vadd.f32 -0.28449672, %v3981_v20  ;;  %v4290_v28 = vmul.f32 %v9051_v11, %v9051_v11  ;;  %v10324_v50 = vld [vmem:[#allocation6_spill] sm:$0xff] }
 0x443   :  { %v3573_v26 = vadd.f32 1.0, %v3513_v29  ;;  %vm4567_vm6 = vcmp.ge.f32.partialorder %v8923_v18, 0.0  ;;  %v4627_v52 = vmul.f32 0.5, %v4507_v55  ;;  %v4209_v9 = vmul.f32 %v9042_v31, %v4149_v4 }
 0x444   :  { %v4420_v8 = vmul.f32 1.442695, %v4341_v24  ;;  %v3462_v46 = vand.u32 2147483647, %v3402_v35  ;;  %v3930_v13 = vadd.f32 1.4214138, %v3870_v17  ;;  %v9203_v20 = vadd.f32 %v10324_v50, %v10319_v12 }
 0x445   :  { %6007 = vrcp.f32 %v3573_v26  ;;  %v3404_v14 = vmul.f32 0.70710677, %v9190_v32  ;;  %v9206_v11 = vmul.f32 %v4790_v47, %v8756_v60  ;;  %v4792_v29 = vsel %vm4612_vm5, %v4732_v5, %v4672_v19 }
 0x446   :  { %v3872_v55 = vmul.f32 %v9167_v27, %v3812_v37  ;;  %v3522_v41 = vmul.f32 0.3275911, %v3462_v46  ;;  %v4159_v31 = vadd.f32 0.2548296, %v4099_v59  ;;  %v4101_v4 = vmul.f32 %v9085_v6, %v4041_v39  ;;  %v10326_v59 = vld [vmem:[#allocation31_spill] sm:$0xff] }
 0x447   :  { %10325 = vst [vmem:[#allocation56_spill] sm:$0xff] %v9206_v11  ;;  %v3464_v24 = vand.u32 2147483647, %v3404_v14  ;;  %v3403_v17 = vmul.f32 0.70710677, %v9203_v20  ;;  %v6002_v35 = vpop.eup %6001  ;;  %v4687_v26 = vsub.f32 1.0, %v4627_v52  ;;  %6009 = vpow2.f32 %v4420_v8 }
 0x448   :  { %v4350_v50 = vsub.f32 0.0, %v4290_v28  ;;  %v3582_v1 = vadd.f32 1.0, %v3522_v41  ;;  %v4509_v40 = vmul.f32 %v6002_v35, %v4209_v9  ;;  %v3990_v60 = vmul.f32 %v9122_v23, %v3930_v13  ;;  %v9224_v8 = vpop.f32.mrb[64].mxu1  ;;  %v10328_v13 = vld [vmem:[#allocation32_spill] sm:$0xff] }
 0x449   :  { %v3524_v47 = vmul.f32 0.3275911, %v3464_v24  ;;  %v9214_v11 = vand.u32 2147483647, %v3403_v17  ;;  %v3932_v5 = vadd.f32 1.4214138, %v3872_v55  ;;  %v4292_v37 = vmul.f32 %v9081_v25, %v9081_v25 }
 0x44a   :  { %v9216_v19 = vpop.eup %6003  ;;  %6011 = vrcp.f32 %v3582_v1  ;;  %v9222_v39 = vadd.f32 %v10326_v59, %v10319_v12  ;;  %10327 = vst [vmem:[#allocation57_spill] sm:$0xff] %v9224_v8  ;;  %v4219_v41 = vmul.f32 %v9071_v44, %v4159_v31  ;;  %v4161_v28 = vadd.f32 0.2548296, %v4101_v4 }
 0x44b   :  { %v3584_v9 = vadd.f32 1.0, %v3524_v47  ;;  %v9229_v14 = vadd.f32 %v10328_v13, %v8746_v36  ;;  %v6006_v17 = vpop.eup %6005  ;;  %v9232_v55 = vmul.f32 %v4792_v29, %v10318_v30  ;;  %v3751_v25 = vmul.f32 1.0614054, %v9216_v19 }
 0x44c   :  { %v3523_v1 = vmul.f32 0.3275911, %v9214_v11  ;;  %v3405_v35 = vmul.f32 0.70710677, %v9222_v39  ;;  %v4747_v59 = vsel %vm4567_vm6, %v4687_v26, %v4627_v52  ;;  %vm4569_vm7 = vcmp.ge.f32.partialorder %v8934_v54, 0.0 }
 0x44d   :  { %10329 = vst [vmem:[#allocation54_spill] sm:$0xff] %v9229_v14  ;;  %10330 = vst [vmem:[#allocation7_spill] sm:$0xff] %v9232_v55  ;;  %v4629_v44 = vmul.f32 0.5, %v4509_v40  ;;  %v4050_v31 = vadd.f32 -0.28449672, %v3990_v60  ;;  %v3992_v47 = vmul.f32 %v9167_v27, %v3932_v5  ;;  %v4352_v13 = vsub.f32 0.0, %v4292_v37 }
 0x44e   :  { %v4438_v4 = vmul.f32 1.442695, %v4350_v50  ;;  %6013 = vrcp.f32 %v3584_v9  ;;  %v3583_v30 = vadd.f32 1.0, %v3523_v1  ;;  %v4519_v55 = vmul.f32 %v6006_v17, %v4219_v41 }
 0x44f   :  { %v9241_v29 = vpop.eup %6007  ;;  %v4302_v8 = vmul.f32 %v3462_v46, %v3462_v46  ;;  %v9243_v15 = vand.u32 2147483647, %v3405_v35  ;;  %v3414_v38 = vmul.f32 0.70710677, %v9229_v14  ;;  %v4221_v52 = vmul.f32 %v9085_v6, %v4161_v28 }
 0x450   :  { %v3811_v26 = vadd.f32 -1.4531521, %v3751_v25  ;;  %v3753_v40 = vmul.f32 1.0614054, %v9241_v29  ;;  %6015 = vrcp.f32 %v3583_v30  ;;  %v4110_v50 = vmul.f32 %v9122_v23, %v4050_v31 }
 0x451   :  { %6017 = vpow2.f32 %v4438_v4  ;;  %v3525_v60 = vmul.f32 0.3275911, %v9243_v15  ;;  %v9250_v5 = vand.u32 2147483647, %v3414_v38  ;;  %v6010_v37 = vpop.eup %6009  ;;  %v9253_v46 = vmul.f32 %v4747_v59, %v8923_v18  ;;  %v10332_v38 = vld [vmem:[#allocation19_spill] sm:$0xff] }
 0x452   :  { %v4689_v41 = vsub.f32 1.0, %v4629_v44  ;;  %v4052_v9 = vadd.f32 -0.28449672, %v3992_v47  ;;  %v3813_v17 = vadd.f32 -1.4531521, %v3753_v40  ;;  %v9255_v1 = vmul.f32 0.5, %v4519_v55 }
 0x453   :  { %10331 = vst [vmem:[#allocation55_spill] sm:$0xff] %v9253_v46  ;;  %v4442_v6 = vmul.f32 1.442695, %v4352_v13  ;;  %v4362_v28 = vsub.f32 0.0, %v4302_v8  ;;  %v3585_v25 = vadd.f32 1.0, %v3525_v60  ;;  %v4521_v31 = vmul.f32 %v6010_v37, %v4221_v52  ;;  %v9272_v52 = vpop.f32.mrb[65].mxu0 }
 0x454   :  { %v9257_v35 = vpop.eup %6011  ;;  %v3871_v4 = vmul.f32 %v9216_v19, %v3811_v26  ;;  %v4304_v30 = vmul.f32 %v3464_v24, %v3464_v24  ;;  %v9262_v14 = vadd.f32 %v10332_v38, %v8746_v36  ;;  %v4170_v18 = vadd.f32 0.2548296, %v4110_v50  ;;  %10334 = vst [vmem:[#allocation11_spill] sm:$0xff] %v9272_v52 }
 0x455   :  { %v3762_v59 = vmul.f32 1.0614054, %v9257_v35  ;;  %6019 = vrcp.f32 %v3585_v25  ;;  %v3534_v55 = vmul.f32 0.3275911, %v9250_v5  ;;  %v4749_v8 = vsel %vm4569_vm7, %v4689_v41, %v4629_v44 }
 0x456   :  { %10333 = vst [vmem:[#allocation33_spill] sm:$0xff] %v9262_v14  ;;  %v4112_v47 = vmul.f32 %v9167_v27, %v4052_v9  ;;  %v4291_v13 = vmul.f32 %v9151_v7, %v9151_v7  ;;  %v3873_v24 = vmul.f32 %v9241_v29, %v3813_v17  ;;  %v4699_v26 = vsub.f32 1.0, %v9255_v1 }
 0x457   :  { %6021 = vpow2.f32 %v4442_v6  ;;  %v3822_v40 = vadd.f32 -1.4531521, %v3762_v59  ;;  %v4462_v50 = vmul.f32 1.442695, %v4362_v28  ;;  %v9277_v37 = vmul.f32 0.5, %v4521_v31 }
 0x458   :  { %v9275_v60 = vpop.eup %6013  ;;  %v3931_v25 = vadd.f32 1.4214138, %v3871_v4  ;;  %v4364_v44 = vsub.f32 0.0, %v4304_v30  ;;  %v3416_v41 = vmul.f32 0.70710677, %v9262_v14  ;;  %v4230_v9 = vmul.f32 %v9122_v23, %v4170_v18 }
 0x459   :  { %v3882_v7 = vmul.f32 %v9257_v35, %v3822_v40  ;;  %v3764_v17 = vmul.f32 1.0614054, %v9275_v60  ;;  %v3594_v38 = vadd.f32 1.0, %v3534_v55  ;;  %vm4579_vm8 = vcmp.ge.f32.partialorder %v8984_v16, 0.0 }
 0x45a   :  { %v9283_v46 = vpop.eup %6015  ;;  %v4172_v6 = vadd.f32 0.2548296, %v4112_v47  ;;  %v4351_v28 = vsub.f32 0.0, %v4291_v13  ;;  %v3933_v59 = vadd.f32 1.4214138, %v3873_v24  ;;  %v4293_v31 = vmul.f32 %v9175_v2, %v9175_v2 }
 0x45b   :  { %v6018_v4 = vpop.eup %6017  ;;  %v9289_v30 = vmul.f32 %v4749_v8, %v8934_v54  ;;  %v3942_v23 = vadd.f32 1.4214138, %v3882_v7  ;;  %v3824_v18 = vadd.f32 -1.4531521, %v3764_v17  ;;  %v3763_v40 = vmul.f32 1.0614054, %v9283_v46 }
 0x45c   :  { %v3991_v55 = vmul.f32 %v9216_v19, %v3931_v25  ;;  %6023 = vpow2.f32 %v4462_v50  ;;  %v4466_v14 = vmul.f32 1.442695, %v4364_v44  ;;  %v9293_v52 = vand.u32 2147483647, %v3416_v41  ;;  %v9304_v41 = vpop.f32.mrb[65].mxu1 }
 0x45d   :  { %10335 = vst [vmem:[#allocation23_spill] sm:$0xff] %v9289_v30  ;;  %v4002_v47 = vmul.f32 %v9257_v35, %v3942_v23  ;;  %v3884_v13 = vmul.f32 %v9275_v60, %v3824_v18  ;;  %v3823_v24 = vadd.f32 -1.4531521, %v3763_v40  ;;  %6025 = vrcp.f32 %v3594_v38  ;;  %10336 = vst [vmem:[#allocation34_spill] sm:$0xff] %v9304_v41 }
 0x45e   :  { %v4530_v2 = vmul.f32 %v6018_v4, %v4230_v9  ;;  %v4232_v54 = vmul.f32 %v9167_v27, %v4172_v6  ;;  %v3993_v8 = vmul.f32 %v9241_v29, %v3933_v59  ;;  %v4353_v7 = vsub.f32 0.0, %v4293_v31 }
 0x45f   :  { %v9299_v17 = vpop.eup %6019  ;;  %v4062_v30 = vadd.f32 -0.28449672, %v4002_v47  ;;  %v3944_v25 = vadd.f32 1.4214138, %v3884_v13  ;;  %v3883_v50 = vmul.f32 %v9283_v46, %v3823_v24  ;;  %v4303_v44 = vmul.f32 %v9214_v11, %v9214_v11 }
 0x460   :  { %v4051_v23 = vadd.f32 -0.28449672, %v3991_v55  ;;  %6027 = vpow2.f32 %v4466_v14  ;;  %v3765_v9 = vmul.f32 1.0614054, %v9299_v17  ;;  %v3536_v27 = vmul.f32 0.3275911, %v9293_v52 }
 0x461   :  { %v6022_v38 = vpop.eup %6021  ;;  %vm4590_vm9 = vcmp.ge.f32.partialorder %v9025_v3, 0.0  ;;  %v4440_v6 = vmul.f32 1.442695, %v4351_v28  ;;  %v4122_v59 = vmul.f32 %v9257_v35, %v4062_v30  ;;  %v4004_v31 = vmul.f32 %v9275_v60, %v3944_v25 }
 0x462   :  { %v3943_v4 = vadd.f32 1.4214138, %v3883_v50  ;;  %v4650_v18 = vmul.f32 0.5, %v4530_v2  ;;  %v4532_v40 = vmul.f32 %v6022_v38, %v4232_v54  ;;  %v4053_v11 = vadd.f32 -0.28449672, %v3993_v8 }
 0x463   :  { %v4444_v47 = vmul.f32 1.442695, %v4353_v7  ;;  %v9314_v14 = vsel %vm4579_vm8, %v4699_v26, %v9255_v1  ;;  %v4182_v55 = vadd.f32 0.2548296, %v4122_v59  ;;  %v4064_v13 = vadd.f32 -0.28449672, %v4004_v31 }
 0x464   :  { %v3825_v24 = vadd.f32 -1.4531521, %v3765_v9  ;;  %v4111_v41 = vmul.f32 %v9216_v19, %v4051_v23  ;;  %v4003_v28 = vmul.f32 %v9283_v46, %v3943_v4  ;;  %v4363_v30 = vsub.f32 0.0, %v4303_v44  ;;  %v10337_v4 = vld [vmem:[#allocation20_spill] sm:$0xff] }
 0x465   :  { %v3596_v12 = vadd.f32 1.0, %v3536_v27  ;;  %v4701_v25 = vsub.f32 1.0, %v9277_v37  ;;  %6029 = vpow2.f32 %v4440_v6  ;;  %v4242_v2 = vmul.f32 %v9257_v35, %v4182_v55 }
 0x466   :  { %v4124_v54 = vmul.f32 %v9275_v60, %v4064_v13  ;;  %v6024_v8 = vpop.eup %6023  ;;  %v4710_v7 = vsub.f32 1.0, %v4650_v18  ;;  %vm4592_vm10 = vcmp.ge.f32.partialorder %v9065_v56, 0.0  ;;  %v4652_v1 = vmul.f32 0.5, %v4532_v40 }
 0x467   :  { %v4113_v26 = vmul.f32 %v9241_v29, %v4053_v11  ;;  %vm4602_vm11 = vcmp.ge.f32.partialorder %v9179_v45, 0.0  ;;  %v9324_v50 = vpop.eup %6025  ;;  %6031 = vpow2.f32 %v4444_v47  ;;  %v4542_v44 = vmul.f32 %v6024_v8, %v4242_v2 }
 0x468   :  { %v4184_v23 = vadd.f32 0.2548296, %v4124_v54  ;;  %v3885_v9 = vmul.f32 %v9299_v17, %v3825_v24  ;;  %v4171_v27 = vadd.f32 0.2548296, %v4111_v41  ;;  %v4063_v35 = vadd.f32 -0.28449672, %v4003_v28 }
 0x469   :  { %v4464_v38 = vmul.f32 1.442695, %v4363_v30  ;;  %6033 = vrcp.f32 %v3596_v12  ;;  %v4662_v6 = vmul.f32 0.5, %v4542_v44  ;;  %v4305_v31 = vmul.f32 %v9243_v15, %v9243_v15 }
 0x46a   :  { %v4244_v59 = vmul.f32 %v9275_v60, %v4184_v23  ;;  %v9332_v40 = vadd.f32 %v10337_v4, %v8746_v36  ;;  %v6028_v11 = vpop.eup %6027  ;;  %vm4581_vm12 = vcmp.ge.f32.partialorder %v9001_v57, 0.0  ;;  %v4770_v47 = vsel %vm4590_vm9, %v4710_v7, %v4650_v18 }
 0x46b   :  { %v4712_v41 = vsub.f32 1.0, %v4652_v1  ;;  %v4173_v55 = vadd.f32 0.2548296, %v4113_v26  ;;  %v3774_v12 = vmul.f32 1.0614054, %v9324_v50  ;;  %v4722_v13 = vsub.f32 1.0, %v4662_v6 }
 0x46c   :  { %v4544_v24 = vmul.f32 %v6028_v11, %v4244_v59  ;;  %v3945_v60 = vadd.f32 1.4214138, %v3885_v9  ;;  %v4314_v15 = vmul.f32 %v9250_v5, %v9250_v5  ;;  %v4231_v28 = vmul.f32 %v9216_v19, %v4171_v27 }
 0x46d   :  { %vm4604_vm13 = vcmp.ge.f32.partialorder %v9190_v32, 0.0  ;;  %v4123_v30 = vmul.f32 %v9283_v46, %v4063_v35  ;;  %6035 = vpow2.f32 %v4464_v38  ;;  %v4782_v18 = vsel %vm4602_vm11, %v4722_v13, %v4662_v6 }
 0x46e   :  { %v4664_v2 = vmul.f32 0.5, %v4544_v24  ;;  %v4365_v54 = vsub.f32 0.0, %v4305_v31  ;;  %v3415_v8 = vmul.f32 0.70710677, %v9332_v40  ;;  %v9347_v7 = vmul.f32 %v4770_v47, %v9025_v3 }
 0x46f   :  { %v4233_v26 = vmul.f32 %v9241_v29, %v4173_v55  ;;  %v9351_v5 = vmul.f32 %v4782_v18, %v9179_v45  ;;  %v3834_v19 = vadd.f32 -1.4531521, %v3774_v12  ;;  %v6030_v44 = vpop.eup %6029  ;;  %v4772_v23 = vsel %vm4592_vm10, %v4712_v41, %v4652_v1 }
 0x470   :  { %10338 = vst [vmem:[#allocation10_spill] sm:$0xff] %v9347_v7  ;;  %v4724_v9 = vsub.f32 1.0, %v4664_v2  ;;  %v4005_v27 = vmul.f32 %v9299_v17, %v3945_v60  ;;  %v4374_v35 = vsub.f32 0.0, %v4314_v15  ;;  %v4531_v38 = vmul.f32 %v6030_v44, %v4231_v28 }
 0x471   :  { %v4183_v3 = vadd.f32 0.2548296, %v4123_v30  ;;  %v4316_v29 = vmul.f32 %v9293_v52, %v9293_v52  ;;  %v6032_v59 = vpop.eup %6031  ;;  %v4468_v31 = vmul.f32 1.442695, %v4365_v54  ;;  %v3475_v4 = vand.u32 2147483647, %v3415_v8 }
 0x472   :  { %v4784_v45 = vsel %vm4604_vm13, %v4724_v9, %v4664_v2  ;;  %v9364_v1 = vadd.f32 %v8833_v51, %v8472_v43  ;;  %v9369_v47 = vmul.f32 %v4772_v23, %v9065_v56  ;;  %v4533_v41 = vmul.f32 %v6032_v59, %v4233_v26 }
 0x473   :  { %v9366_v11 = vpop.eup %6033  ;;  %v9372_v55 = vmul.f32 %v4784_v45, %v9190_v32  ;;  %v3894_v52 = vmul.f32 %v9324_v50, %v3834_v19  ;;  %v4761_v12 = vsel %vm4581_vm12, %v4701_v25, %v9277_v37  ;;  %vm4591_vm15 = vcmp.ge.f32.partialorder %v9126_v10, 0.0 }
 0x474   :  { %10339 = vst [vmem:[#allocation37_spill] sm:$0xff] %v9369_v47  ;;  %v4065_v51 = vadd.f32 -0.28449672, %v4005_v27  ;;  %v4486_v13 = vmul.f32 1.442695, %v4374_v35  ;;  %v4651_v56 = vmul.f32 0.5, %v4531_v38  ;;  %v4243_v32 = vmul.f32 %v9283_v46, %v4183_v3 }
 0x475   :  { %10340 = vst [vmem:[#allocation24_spill] sm:$0xff] %v9372_v55  ;;  %v3370_v24 = vmul.f32 0.70710677, %v9364_v1  ;;  %v4376_v15 = vsub.f32 0.0, %v4316_v29  ;;  %v9387_v28 = vmul.f32 %v9314_v14, %v8984_v16  ;;  %vm4593_vm0 = vcmp.ge.f32.partialorder %v9137_v0, 0.0  ;;  %v10341_v29 = vld [vmem:[#allocation14_spill] sm:$0xff] }
 0x476   :  { %v3776_v37 = vmul.f32 1.0614054, %v9366_v11  ;;  %v4315_v25 = vmul.f32 %v3475_v4, %v3475_v4  ;;  %v4653_v2 = vmul.f32 0.5, %v4533_v41  ;;  %6037 = vpow2.f32 %v4468_v31 }
 0x477   :  { %v3430_v30 = vand.u32 2147483647, %v3370_v24  ;;  %v6036_v18 = vpop.eup %6035  ;;  %v3954_v54 = vadd.f32 1.4214138, %v3894_v52  ;;  %v9393_v8 = vadd.f32 %v8835_v63, %v8472_v43  ;;  %v9396_v46 = vmul.f32 %v4761_v12, %v9001_v57 }
 0x478   :  { %v4125_v16 = vmul.f32 %v9299_v17, %v4065_v51  ;;  %6039 = vpow2.f32 %v4486_v13  ;;  %v4711_v26 = vsub.f32 1.0, %v4651_v56  ;;  %v4543_v19 = vmul.f32 %v6036_v18, %v4243_v32 }
 0x479   :  { %v3490_v14 = vmul.f32 0.3275911, %v3430_v30  ;;  %v4490_v44 = vmul.f32 1.442695, %v4376_v15  ;;  %v3372_v23 = vmul.f32 0.70710677, %v9393_v8  ;;  %v4014_v63 = vmul.f32 %v9324_v50, %v3954_v54 }
 0x47a   :  { %v3836_v9 = vadd.f32 -1.4531521, %v3776_v37  ;;  %v3535_v27 = vmul.f32 0.3275911, %v3475_v4  ;;  %v4375_v35 = vsub.f32 0.0, %v4315_v25  ;;  %v4713_v3 = vsub.f32 1.0, %v4653_v2 }
 0x47b   :  { %v3550_v38 = vadd.f32 1.0, %v3490_v14  ;;  %v9403_v57 = vadd.f32 %v10341_v29, %v8746_v36  ;;  %v3432_v59 = vand.u32 2147483647, %v3372_v23  ;;  %v4185_v45 = vadd.f32 0.2548296, %v4125_v16 }
 0x47c   :  { %v9407_v31 = vadd.f32 %v8861_v34, %v8472_v43  ;;  %v9411_v41 = vadd.f32 %v8879_v21, %v8472_v43  ;;  %v4771_v4 = vsel %vm4591_vm15, %v4711_v26, %v4651_v56  ;;  %vm4603_vm1 = vcmp.ge.f32.partialorder %v9203_v20, 0.0 }
 0x47d   :  { %6041 = vrcp.f32 %v3550_v38  ;;  %v4663_v52 = vmul.f32 0.5, %v4543_v19  ;;  %v3492_v12 = vmul.f32 0.3275911, %v3432_v59  ;;  %v3896_v51 = vmul.f32 %v9366_v11, %v3836_v9 }
 0x47e   :  { %6043 = vpow2.f32 %v4490_v44  ;;  %v3595_v13 = vadd.f32 1.0, %v3535_v27  ;;  %v4488_v24 = vmul.f32 1.442695, %v4375_v35  ;;  %v3371_v32 = vmul.f32 0.70710677, %v9407_v31 }
 0x47f   :  { %v4773_v34 = vsel %vm4593_vm0, %v4713_v3, %v4653_v2  ;;  %v4074_v15 = vadd.f32 -0.28449672, %v4014_v63  ;;  %v3552_v43 = vadd.f32 1.0, %v3492_v12  ;;  %v3373_v21 = vmul.f32 0.70710677, %v9411_v41 }
 0x480   :  { %v4245_v56 = vmul.f32 %v9299_v17, %v4185_v45  ;;  %v3417_v37 = vmul.f32 0.70710677, %v9403_v57  ;;  %v9423_v25 = vand.u32 2147483647, %v3371_v32  ;;  %v9427_v18 = vadd.f32 %v8905_v53, %v8485_v48  ;;  %v6038_v54 = vpop.eup %6037 }
 0x481   :  { %v4723_v16 = vsub.f32 1.0, %v4663_v52  ;;  %6045 = vrcp.f32 %v3552_v43  ;;  %v9429_v14 = vand.u32 2147483647, %v3373_v21  ;;  %v9433_v2 = vadd.f32 %v8907_v62, %v8485_v48 }
 0x482   :  { %v9435_v26 = vpop.eup %6039  ;;  %v9438_v17 = vmul.f32 %v4771_v4, %v9126_v10  ;;  %v3956_v19 = vadd.f32 1.4214138, %v3896_v51  ;;  %v3491_v44 = vmul.f32 0.3275911, %v9423_v25  ;;  %v3382_v53 = vmul.f32 0.70710677, %v9427_v18 }
 0x483   :  { %v9443_v23 = vmul.f32 %v4773_v34, %v9137_v0  ;;  %6047 = vrcp.f32 %v3595_v13  ;;  %v4270_v9 = vmul.f32 %v3430_v30, %v3430_v30  ;;  %v3493_v27 = vmul.f32 0.3275911, %v9429_v14 }
 0x484   :  { %v4134_v62 = vmul.f32 %v9324_v50, %v4074_v15  ;;  %v3477_v35 = vand.u32 2147483647, %v3417_v37  ;;  %v3551_v38 = vadd.f32 1.0, %v3491_v44  ;;  %v3442_v3 = vand.u32 2147483647, %v3382_v53 }
 0x485   :  { %v4545_v63 = vmul.f32 %v6038_v54, %v4245_v56  ;;  %6049 = vpow2.f32 %v4488_v24  ;;  %v3553_v10 = vadd.f32 1.0, %v3493_v27  ;;  %v3384_v29 = vmul.f32 0.70710677, %v9433_v2 }
 0x486   :  { %v4783_v0 = vsel %vm4603_vm1, %v4723_v16, %v4663_v52  ;;  %v4016_v4 = vmul.f32 %v9366_v11, %v3956_v19  ;;  %6051 = vrcp.f32 %v3551_v38  ;;  %v3502_v30 = vmul.f32 0.3275911, %v3442_v3 }
 0x487   :  { %v9448_v45 = vpop.eup %6041  ;;  %v4330_v13 = vsub.f32 0.0, %v4270_v9  ;;  %6053 = vrcp.f32 %v3553_v10  ;;  %v3444_v32 = vand.u32 2147483647, %v3384_v29  ;;  %v4194_v24 = vadd.f32 0.2548296, %v4134_v62 }
 0x488   :  { %v9453_v12 = vpop.eup %6043  ;;  %v3730_v51 = vmul.f32 1.0614054, %v9448_v45  ;;  %v3537_v34 = vmul.f32 0.3275911, %v3477_v35  ;;  %v4272_v15 = vmul.f32 %v3432_v59, %v3432_v59  ;;  %v3562_v43 = vadd.f32 1.0, %v3502_v30 }
 0x489   :  { %v9457_v21 = vmul.f32 %v4783_v0, %v9203_v20  ;;  %v9459_v56 = vmul.f32 %v3477_v35, %v3477_v35  ;;  %v3504_v37 = vmul.f32 0.3275911, %v3444_v32  ;;  %v9461_v54 = vmul.f32 0.5, %v4545_v63 }
 0x48a   :  { %v3790_v52 = vadd.f32 -1.4531521, %v3730_v51  ;;  %6055 = vrcp.f32 %v3562_v43  ;;  %v9465_v16 = vadd.f32 %v8936_v33, %v8485_v48  ;;  %v9469_v19 = vadd.f32 %v8950_v22, %v8485_v48 }
 0x48b   :  { %v9471_v59 = vpop.eup %6045  ;;  %v9473_v44 = vadd.f32 -0.28449672, %v4016_v4  ;;  %v4398_v53 = vmul.f32 1.442695, %v4330_v13  ;;  %v3564_v9 = vadd.f32 1.0, %v3504_v37  ;;  %v4332_v62 = vsub.f32 0.0, %v4272_v15 }
 0x48c   :  { %v3850_v20 = vmul.f32 %v9448_v45, %v3790_v52  ;;  %v3732_v27 = vmul.f32 1.0614054, %v9471_v59  ;;  %v4282_v35 = vmul.f32 %v3442_v3, %v3442_v3  ;;  %v3383_v38 = vmul.f32 0.70710677, %v9465_v16 }
 0x48d   :  { %v9478_v33 = vpop.eup %6047  ;;  %v9480_v63 = vadd.f32 1.0, %v3537_v34  ;;  %6057 = vrcp.f32 %v3564_v9  ;;  %v3385_v22 = vmul.f32 0.70710677, %v9469_v19  ;;  %v4377_v29 = vsub.f32 0.0, %v9459_v56 }
 0x48e   :  { %v3910_v48 = vadd.f32 1.4214138, %v3850_v20  ;;  %v3792_v0 = vadd.f32 -1.4531521, %v3732_v27  ;;  %v9485_v4 = vand.u32 2147483647, %v3383_v38  ;;  %6059 = vpow2.f32 %v4398_v53 }
 0x48f   :  { %v9487_v30 = vpop.eup %6049  ;;  %v9490_v51 = vand.u32 2147483647, %v3385_v22  ;;  %v9494_v13 = vadd.f32 %v8986_v61, %v10300_v58  ;;  %v4402_v43 = vmul.f32 1.442695, %v4332_v62  ;;  %v4342_v56 = vsub.f32 0.0, %v4282_v35 }
 0x490   :  { %v3970_v3 = vmul.f32 %v9448_v45, %v3910_v48  ;;  %v9496_v34 = vpop.eup %6051  ;;  %v3852_v15 = vmul.f32 %v9471_v59, %v3792_v0  ;;  %v3503_v52 = vmul.f32 0.3275911, %v9485_v4  ;;  %v9503_v20 = vmul.f32 %v9324_v50, %v4194_v24 }
 0x491   :  { %v9500_v37 = vpop.eup %6053  ;;  %v3731_v9 = vmul.f32 1.0614054, %v9496_v34  ;;  %v3505_v27 = vmul.f32 0.3275911, %v9490_v51  ;;  %v4284_v48 = vmul.f32 %v3444_v32, %v3444_v32  ;;  %v3394_v60 = vmul.f32 0.70710677, %v9494_v13 }
 0x492   :  { %v4030_v53 = vadd.f32 -0.28449672, %v3970_v3  ;;  %v3912_v61 = vadd.f32 1.4214138, %v3852_v15  ;;  %v3733_v38 = vmul.f32 1.0614054, %v9500_v37  ;;  %v4271_v24 = vmul.f32 %v9423_v25, %v9423_v25 }
 0x493   :  { %v3563_v22 = vadd.f32 1.0, %v3503_v52  ;;  %v3791_v35 = vadd.f32 -1.4531521, %v3731_v9  ;;  %v3565_v0 = vadd.f32 1.0, %v3505_v27  ;;  %v4422_v9 = vmul.f32 1.442695, %v4342_v56 }
 0x494   :  { %v4090_v62 = vmul.f32 %v9448_v45, %v4030_v53  ;;  %v9510_v6 = vpop.eup %6055  ;;  %v3972_v50 = vmul.f32 %v9471_v59, %v3912_v61  ;;  %v3793_v3 = vadd.f32 -1.4531521, %v3733_v38  ;;  %v4344_v55 = vsub.f32 0.0, %v4284_v48 }
 0x495   :  { %6061 = vrcp.f32 %v3563_v22  ;;  %v3851_v10 = vmul.f32 %v9496_v34, %v3791_v35  ;;  %v3742_v32 = vmul.f32 1.0614054, %v9510_v6  ;;  %v9521_v25 = vand.u32 2147483647, %v3394_v60 }
 0x496   :  { %v4150_v15 = vadd.f32 0.2548296, %v4090_v62  ;;  %6063 = vrcp.f32 %v3565_v0  ;;  %v4032_v52 = vadd.f32 -0.28449672, %v3972_v50  ;;  %v3853_v53 = vmul.f32 %v9500_v37, %v3793_v3 }
 0x497   :  { %6065 = vpow2.f32 %v4402_v43  ;;  %v9518_v27 = vpop.eup %6057  ;;  %v3802_v47 = vadd.f32 -1.4531521, %v3742_v32  ;;  %v3911_v22 = vadd.f32 1.4214138, %v3851_v10  ;;  %v4136_v43 = vmul.f32 %v9366_v11, %v9473_v44 }
 0x498   :  { %v4210_v61 = vmul.f32 %v9448_v45, %v4150_v15  ;;  %v4092_v38 = vmul.f32 %v9471_v59, %v4032_v52  ;;  %v3913_v62 = vadd.f32 1.4214138, %v3853_v53  ;;  %v3744_v35 = vmul.f32 1.0614054, %v9518_v27  ;;  %v6060_v0 = vpop.eup %6059 }
 0x499   :  { %v9527_v50 = vmul.f32 1.442695, %v4377_v29  ;;  %v3862_v56 = vmul.f32 %v9510_v6, %v3802_v47  ;;  %v3514_v45 = vmul.f32 0.3275911, %v9521_v25  ;;  %v4331_v48 = vsub.f32 0.0, %v4271_v24 }
 0x49a   :  { %v4152_v3 = vadd.f32 0.2548296, %v4092_v38  ;;  %v4273_v60 = vmul.f32 %v9429_v14, %v9429_v14  ;;  %v3804_v15 = vadd.f32 -1.4531521, %v3744_v35  ;;  %v4510_v10 = vmul.f32 %v6060_v0, %v4210_v61 }
 0x49b   :  { %v3922_v32 = vadd.f32 1.4214138, %v3862_v56  ;;  %v4426_v52 = vmul.f32 1.442695, %v4344_v55  ;;  %v3574_v53 = vadd.f32 1.0, %v3514_v45  ;;  %v3971_v7 = vmul.f32 %v9496_v34, %v3911_v22 }
 0x49c   :  { %v3973_v44 = vmul.f32 %v9500_v37, %v3913_v62  ;;  %6067 = vpow2.f32 %v4422_v9  ;;  %v3864_v29 = vmul.f32 %v9518_v27, %v3804_v15  ;;  %v9536_v47 = vadd.f32 0.2548296, %v4136_v43  ;;  %v10342_v15 = vld [vmem:[#allocation40_spill] sm:$0xff] }
 0x49d   :  { %v4212_v38 = vmul.f32 %v9471_v59, %v4152_v3  ;;  %v3982_v24 = vmul.f32 %v9510_v6, %v3922_v32  ;;  %6069 = vrcp.f32 %v3574_v53  ;;  %vm4570_vm2 = vcmp.ge.f32.partialorder %v9364_v1, 0.0 }
 0x49e   :  { %v4400_v55 = vmul.f32 1.442695, %v4331_v48  ;;  %v4333_v61 = vsub.f32 0.0, %v4273_v60  ;;  %v3924_v35 = vadd.f32 1.4214138, %v3864_v29  ;;  %v4283_v22 = vmul.f32 %v9485_v4, %v9485_v4 }
 0x49f   :  { %v9540_v14 = vpop.eup %6061  ;;  %v4630_v62 = vmul.f32 0.5, %v4510_v10  ;;  %v4042_v0 = vadd.f32 -0.28449672, %v3982_v24  ;;  %6071 = vpow2.f32 %v4426_v52  ;;  %v4031_v56 = vadd.f32 -0.28449672, %v3971_v7 }
 0x4a0   :  { %v9545_v9 = vpop.eup %6063  ;;  %v3743_v59 = vmul.f32 1.0614054, %v9540_v14  ;;  %v4033_v45 = vadd.f32 -0.28449672, %v3973_v44  ;;  %v3984_v3 = vmul.f32 %v9518_v27, %v3924_v35  ;;  %v9551_v48 = vadd.f32 %v10342_v15, %v10300_v58 }
 0x4a1   :  { %v6066_v43 = vpop.eup %6065  ;;  %v4102_v32 = vmul.f32 %v9510_v6, %v4042_v0  ;;  %v3745_v53 = vmul.f32 1.0614054, %v9545_v9  ;;  %6073 = vrcp.f32 %v9480_v63  ;;  %v4404_v10 = vmul.f32 1.442695, %v4333_v61 }
 0x4a2   :  { %v4512_v60 = vmul.f32 %v6066_v43, %v4212_v38  ;;  %v3803_v4 = vadd.f32 -1.4531521, %v3743_v59  ;;  %v4044_v52 = vadd.f32 -0.28449672, %v3984_v3  ;;  %v4343_v29 = vsub.f32 0.0, %v4283_v22 }
 0x4a3   :  { %v4690_v24 = vsub.f32 1.0, %v4630_v62  ;;  %v4162_v7 = vadd.f32 0.2548296, %v4102_v32  ;;  %v3805_v35 = vadd.f32 -1.4531521, %v3745_v53  ;;  %vm4572_vm3 = vcmp.ge.f32.partialorder %v9393_v8, 0.0 }
 0x4a4   :  { %v3863_v44 = vmul.f32 %v9540_v14, %v3803_v4  ;;  %v4091_v15 = vmul.f32 %v9496_v34, %v4031_v56  ;;  %v4093_v38 = vmul.f32 %v9500_v37, %v4033_v45  ;;  %vm4582_vm4 = vcmp.ge.f32.partialorder %v9427_v18, 0.0 }
 0x4a5   :  { %v4104_v0 = vmul.f32 %v9518_v27, %v4044_v52  ;;  %v3396_v63 = vmul.f32 0.70710677, %v9551_v48  ;;  %v4632_v61 = vmul.f32 0.5, %v4512_v60  ;;  %6075 = vpow2.f32 %v4400_v55 }
 0x4a6   :  { %v4222_v22 = vmul.f32 %v9510_v6, %v4162_v7  ;;  %v3923_v59 = vadd.f32 1.4214138, %v3863_v44  ;;  %v6068_v43 = vpop.eup %6067  ;;  %v4424_v32 = vmul.f32 1.442695, %v4343_v29  ;;  %v3865_v4 = vmul.f32 %v9545_v9, %v3805_v35 }
 0x4a7   :  { %v4164_v3 = vadd.f32 0.2548296, %v4104_v0  ;;  %v9565_v53 = vand.u32 2147483647, %v3396_v63  ;;  %v9567_v56 = vpop.eup %6069  ;;  %v4750_v45 = vsel %vm4570_vm2, %v4690_v24, %v4630_v62  ;;  %6077 = vpow2.f32 %v4404_v10 }
 0x4a8   :  { %v4522_v52 = vmul.f32 %v6068_v43, %v4222_v22  ;;  %vm4584_vm5 = vcmp.ge.f32.partialorder %v9433_v2, 0.0  ;;  %v3983_v55 = vmul.f32 %v9540_v14, %v3923_v59  ;;  %vm4605_vm6 = vcmp.ge.f32.partialorder %v9222_v39, 0.0 }
 0x4a9   :  { %v4151_v6 = vadd.f32 0.2548296, %v4091_v15  ;;  %v4153_v60 = vadd.f32 0.2548296, %v4093_v38  ;;  %v4224_v29 = vmul.f32 %v9518_v27, %v4164_v3  ;;  %v3754_v7 = vmul.f32 1.0614054, %v9567_v56  ;;  %v6072_v44 = vpop.eup %6071 }
 0x4aa   :  { %v4692_v35 = vsub.f32 1.0, %v4632_v61  ;;  %v4642_v0 = vmul.f32 0.5, %v4522_v52  ;;  %v4043_v63 = vadd.f32 -0.28449672, %v3983_v55  ;;  %v3516_v62 = vmul.f32 0.3275911, %v9565_v53 }
 0x4ab   :  { %v4524_v10 = vmul.f32 %v6072_v44, %v4224_v29  ;;  %6079 = vpow2.f32 %v4424_v32  ;;  %v3925_v24 = vadd.f32 1.4214138, %v3865_v4  ;;  %v4285_v22 = vmul.f32 %v9490_v51, %v9490_v51  ;;  %v9583_v43 = vpop.eup %6073  ;;  %v10344_v4 = vld [vmem:[#allocation25_spill] sm:$0xff] }
 0x4ac   :  { %v9580_v59 = vmul.f32 %v4750_v45, %v9364_v1  ;;  %v4702_v15 = vsub.f32 1.0, %v4642_v0  ;;  %v4103_v27 = vmul.f32 %v9540_v14, %v4043_v63  ;;  %v3814_v38 = vadd.f32 -1.4531521, %v3754_v7  ;;  %v10345_v45 = vld [vmem:[#allocation39_spill] sm:$0xff] }
 0x4ad   :  { %v4211_v3 = vmul.f32 %v9496_v34, %v4151_v6  ;;  %v4213_v52 = vmul.f32 %v9500_v37, %v4153_v60  ;;  %v4644_v55 = vmul.f32 0.5, %v4524_v10  ;;  %v3576_v29 = vadd.f32 1.0, %v3516_v62 }
 0x4ae   :  { %10343 = vst [vmem:[#allocation13_spill] sm:$0xff] %v9580_v59  ;;  %v4752_v32 = vsel %vm4572_vm3, %v4692_v35, %v4632_v61  ;;  %v4762_v51 = vsel %vm4582_vm4, %v4702_v15, %v4642_v0  ;;  %v3874_v1 = vmul.f32 %v9567_v56, %v3814_v38  ;;  %v5549_v44 = vpack.c.bf16 %v10345_v45, %v10344_v4  ;;  %v10347_v35 = vld [vmem:[#allocation26_spill] sm:$0xff]  ;;  %v10348_v0 = vld [vmem:[#allocation12_spill] sm:$0xff] }
 0x4af   :  { %v9595_v7 = vmul.f32 %v4762_v51, %v9427_v18  ;;  %v4704_v63 = vsub.f32 1.0, %v4644_v55  ;;  %v3985_v34 = vmul.f32 %v9545_v9, %v3925_v24  ;;  %6081 = vrcp.f32 %v3576_v29  ;;  %v6076_v37 = vpop.eup %6075 }
 0x4b0   :  { %v4163_v6 = vadd.f32 0.2548296, %v4103_v27  ;;  %v4345_v60 = vsub.f32 0.0, %v4285_v22  ;;  %v4294_v61 = vmul.f32 %v9521_v25, %v9521_v25  ;;  %5550 = vmatprep.subr.bf16.mxu0 %v5549_v44  ;;  %v5557_v62 = vpack.c.bf16 %v10348_v0, %v10347_v35  ;;  %v10349_v27 = vld [vmem:[#allocation28_spill] sm:$0xff]  ;;  %v10350_v22 = vld [vmem:[#allocation5_spill] sm:$0xff]  ;;  %v10355_v35 = vld [vmem:[#allocation30_spill] sm:$0xff] }
 0x4b1   :  { %10346 = vst [vmem:[#allocation38_spill] sm:$0xff] %v9595_v7  ;;  %v4764_v18 = vsel %vm4584_vm5, %v4704_v63, %v4644_v55  ;;  %v3934_v15 = vadd.f32 1.4214138, %v3874_v1  ;;  %v9608_v24 = vadd.f32 %v9102_v49, %v10300_v58  ;;  %v10351_v38 = vpack.c.bf16 %v10349_v27, %v10350_v22  ;;  %v6078_v25 = vpop.eup %6077  ;;  %v10356_v0 = vld [vmem:[#allocation8_spill] sm:$0xff] }
 0x4b2   :  { %v10352_v29 = vsub.f32 1.0, %v9461_v54  ;;  %v9619_v4 = vmul.f32 %v4752_v32, %v9393_v8  ;;  %v4511_v55 = vmul.f32 %v6076_v37, %v4211_v3  ;;  %v9622_v1 = vmul.f32 %v4764_v18, %v9433_v2  ;;  %5558 = vmatprep.subr.bf16.mxu1 %v5557_v62  ;;  %v10359_v62 = vld [vmem:[#allocation17_spill] sm:$0xff] }
 0x4b3   :  { %5552 = vmatpush1.bf16.msra.mxu0 %v10351_v38  ;;  %v4513_v49 = vmul.f32 %v6078_v25, %v4213_v52  ;;  %v4045_v45 = vadd.f32 -0.28449672, %v3985_v34  ;;  %v3395_v44 = vmul.f32 0.70710677, %v9608_v24  ;;  %v9627_v63 = vadd.f32 %v9104_v42, %v10300_v58 }
 0x4b4   :  { %v4785_v51 = vsel %vm4605_vm6, %v10352_v29, %v9461_v54  ;;  %10353 = vst [vmem:[#allocation6_spill] sm:$0xff] %v9619_v4  ;;  %10354 = vst [vmem:[#allocation31_spill] sm:$0xff] %v9622_v1  ;;  %v10357_v27 = vpack.c.bf16 %v10355_v35, %v10356_v0  ;;  %v4256_v8 = vmul.f32 %v9366_v11, %v9536_v47  ;;  %v4428_v54 = vmul.f32 1.442695, %v4345_v60  ;;  %v10358_v47 = vld [vmem:[#allocation9_spill] sm:$0xff] }
 0x4b5   :  { %v4354_v3 = vsub.f32 0.0, %v4294_v61  ;;  %v6080_v52 = vpop.eup %6079  ;;  %v4223_v32 = vmul.f32 %v9540_v14, %v4163_v6  ;;  %v3994_v34 = vmul.f32 %v9567_v56, %v3934_v15  ;;  %v3455_v37 = vand.u32 2147483647, %v3395_v44  ;;  %v10360_v44 = vld [vmem:[#allocation45_spill] sm:$0xff] }
 0x4b6   :  { %5560 = vmatpush1.bf16.msra.mxu1 %v10357_v27  ;;  %v3397_v58 = vmul.f32 0.70710677, %v9627_v63  ;;  %v9641_v42 = vmul.f32 %v9435_v26, %v9503_v20  ;;  %6083 = vpow2.f32 %v9527_v50  ;;  %v4631_v11 = vmul.f32 0.5, %v4511_v55 }
 0x4b7   :  { %v9646_v18 = vadd.f32 %v10359_v62, %v10358_v47  ;;  %v4633_v60 = vmul.f32 0.5, %v4513_v49  ;;  %v4105_v61 = vmul.f32 %v9545_v9, %v4045_v45  ;;  %v3515_v14 = vmul.f32 0.3275911, %v3455_v37 }
 0x4b8   :  { %v3457_v6 = vand.u32 2147483647, %v3397_v58  ;;  %v9650_v15 = vmul.f32 %v4785_v51, %v9222_v39  ;;  %v9653_v22 = vmul.f32 %v9453_v12, %v4256_v8  ;;  %6085 = vpow2.f32 %v4428_v54 }
 0x4b9   :  { %v3406_v26 = vmul.f32 0.70710677, %v9646_v18  ;;  %v9656_v20 = vpop.eup %6081  ;;  %v4523_v50 = vmul.f32 %v6080_v52, %v4223_v32  ;;  %v4054_v38 = vadd.f32 -0.28449672, %v3994_v34  ;;  %v4446_v25 = vmul.f32 1.442695, %v4354_v3 }
 0x4ba   :  { %v3575_v29 = vadd.f32 1.0, %v3515_v14  ;;  %v4691_v55 = vsub.f32 1.0, %v4631_v11  ;;  %v3756_v49 = vmul.f32 1.0614054, %v9656_v20  ;;  %v3517_v45 = vmul.f32 0.3275911, %v3457_v6 }
 0x4bb   :  { %v9661_v39 = vadd.f32 %v10360_v44, %v10358_v47  ;;  %v4693_v51 = vsub.f32 1.0, %v4633_v60  ;;  %v4165_v12 = vadd.f32 0.2548296, %v4105_v61  ;;  %v3466_v35 = vand.u32 2147483647, %v3406_v26  ;;  %v10362_v44 = vld [vmem:[#allocation49_spill] sm:$0xff] }
 0x4bc   :  { %6087 = vrcp.f32 %v3575_v29  ;;  %vm4571_vm7 = vcmp.ge.f32.partialorder %v9407_v31, 0.0  ;;  %v3816_v0 = vadd.f32 -1.4531521, %v3756_v49  ;;  %v4296_v27 = vmul.f32 %v9565_v53, %v9565_v53 }
 0x4bd   :  { %v3577_v8 = vadd.f32 1.0, %v3517_v45  ;;  %v4643_v54 = vmul.f32 0.5, %v4523_v50  ;;  %v4114_v3 = vmul.f32 %v9567_v56, %v4054_v38  ;;  %6089 = vpow2.f32 %v4446_v25  ;;  %v10361_v38 = vld [vmem:[#allocation48_spill] sm:$0xff] }
 0x4be   :  { %v3526_v52 = vmul.f32 0.3275911, %v3466_v35  ;;  %vm4573_vm8 = vcmp.ge.f32.partialorder %v9411_v41, 0.0  ;;  %v3876_v32 = vmul.f32 %v9656_v20, %v3816_v0  ;;  %v3408_v34 = vmul.f32 0.70710677, %v9661_v39 }
 0x4bf   :  { %6091 = vrcp.f32 %v3577_v8  ;;  %v4751_v58 = vsel %vm4571_vm7, %v4691_v55, %v4631_v11  ;;  %v4753_v62 = vsel %vm4573_vm8, %v4693_v51, %v4633_v60  ;;  %v4225_v61 = vmul.f32 %v9545_v9, %v4165_v12  ;;  %v10363_v51 = vld [vmem:[#allocation53_spill] sm:$0xff] }
 0x4c0   :  { %v3586_v14 = vadd.f32 1.0, %v3526_v52  ;;  %v9671_v26 = vpop.eup %6083  ;;  %v3936_v53 = vadd.f32 1.4214138, %v3876_v32  ;;  %v4356_v50 = vsub.f32 0.0, %v4296_v27  ;;  %v3468_v29 = vand.u32 2147483647, %v3408_v34 }
 0x4c1   :  { %v9675_v25 = vadd.f32 %v10361_v38, %v10358_v47  ;;  %vm4583_vm9 = vcmp.ge.f32.partialorder %v9465_v16, 0.0  ;;  %v4703_v49 = vsub.f32 1.0, %v4643_v54  ;;  %v4174_v45 = vadd.f32 0.2548296, %v4114_v3 }
 0x4c2   :  { %v9680_v11 = vadd.f32 %v10362_v44, %v10358_v47  ;;  %v6086_v60 = vpop.eup %6085  ;;  %v9683_v9 = vmul.f32 %v4751_v58, %v9407_v31  ;;  %6093 = vrcp.f32 %v3586_v14  ;;  %v3528_v55 = vmul.f32 0.3275911, %v3468_v29 }
 0x4c3   :  { %v9687_v12 = vadd.f32 %v10363_v51, %v8746_v36  ;;  %v9690_v0 = vmul.f32 %v4753_v62, %v9411_v41  ;;  %v4525_v27 = vmul.f32 %v6086_v60, %v4225_v61  ;;  %v4295_v8 = vmul.f32 %v3455_v37, %v3455_v37 }
 0x4c4   :  { %v3407_v3 = vmul.f32 0.70710677, %v9675_v25  ;;  %v3996_v47 = vmul.f32 %v9656_v20, %v3936_v53  ;;  %v4450_v52 = vmul.f32 1.442695, %v4356_v50  ;;  %v3588_v32 = vadd.f32 1.0, %v3528_v55 }
 0x4c5   :  { %10364 = vst [vmem:[#allocation32_spill] sm:$0xff] %v9687_v12  ;;  %v3409_v31 = vmul.f32 0.70710677, %v9680_v11  ;;  %v4763_v58 = vsel %vm4583_vm9, %v4703_v49, %v4643_v54  ;;  %v4234_v14 = vmul.f32 %v9567_v56, %v4174_v45  ;;  %v4297_v38 = vmul.f32 %v3457_v6, %v3457_v6 }
 0x4c6   :  { %v9695_v34 = vpop.eup %6087  ;;  %v3467_v41 = vand.u32 2147483647, %v3407_v3  ;;  %6095 = vrcp.f32 %v3588_v32  ;;  %v3418_v61 = vmul.f32 0.70710677, %v9687_v12  ;;  %v9702_v50 = vmul.f32 0.5, %v4525_v27 }
 0x4c7   :  { %v3755_v62 = vmul.f32 1.0614054, %v9695_v34  ;;  %v3469_v37 = vand.u32 2147483647, %v3409_v31  ;;  %v6090_v53 = vpop.eup %6089  ;;  %v4355_v44 = vsub.f32 0.0, %v4295_v8  ;;  %v4306_v60 = vmul.f32 %v3466_v35, %v3466_v35 }
 0x4c8   :  { %v3527_v55 = vmul.f32 0.3275911, %v3467_v41  ;;  %v4056_v2 = vadd.f32 -0.28449672, %v3996_v47  ;;  %6097 = vpow2.f32 %v4450_v52  ;;  %v9707_v6 = vmul.f32 %v4763_v58, %v9465_v16 }
 0x4c9   :  { %v9704_v51 = vpop.eup %6091  ;;  %v3815_v54 = vadd.f32 -1.4531521, %v3755_v62  ;;  %v3529_v56 = vmul.f32 0.3275911, %v3469_v37  ;;  %v4534_v49 = vmul.f32 %v6090_v53, %v4234_v14  ;;  %v4357_v27 = vsub.f32 0.0, %v4297_v38 }
 0x4ca   :  { %v3757_v45 = vmul.f32 1.0614054, %v9704_v51  ;;  %v3587_v3 = vadd.f32 1.0, %v3527_v55  ;;  %v9711_v8 = vand.u32 2147483647, %v3418_v61  ;;  %v4366_v12 = vsub.f32 0.0, %v4306_v60 }
 0x4cb   :  { %v3875_v32 = vmul.f32 %v9695_v34, %v3815_v54  ;;  %v3589_v31 = vadd.f32 1.0, %v3529_v56  ;;  %v4448_v35 = vmul.f32 1.442695, %v4355_v44  ;;  %v4116_v52 = vmul.f32 %v9656_v20, %v4056_v2 }
 0x4cc   :  { %v3817_v10 = vadd.f32 -1.4531521, %v3757_v45  ;;  %6099 = vrcp.f32 %v3587_v3  ;;  %v9713_v47 = vpop.eup %6093  ;;  %v4308_v58 = vmul.f32 %v3468_v29, %v3468_v29  ;;  %v9717_v62 = vmul.f32 0.5, %v4534_v49 }
 0x4cd   :  { %v3935_v16 = vadd.f32 1.4214138, %v3875_v32  ;;  %6101 = vrcp.f32 %v3589_v31  ;;  %v3766_v61 = vmul.f32 1.0614054, %v9713_v47  ;;  %v4452_v44 = vmul.f32 1.442695, %v4357_v27 }
 0x4ce   :  { %v3877_v38 = vmul.f32 %v9704_v51, %v3817_v10  ;;  %v4307_v60 = vmul.f32 %v3467_v41, %v3467_v41  ;;  %v3538_v55 = vmul.f32 0.3275911, %v9711_v8  ;;  %6103 = vpow2.f32 %v4448_v35  ;;  %v10365_v32 = vld [vmem:[#allocation57_spill] sm:$0xff]  ;;  %v10368_v35 = vld [vmem:[#allocation43_spill] sm:$0xff] }
 0x4cf   :  { %v3995_v53 = vmul.f32 %v9695_v34, %v3935_v16  ;;  %v3826_v2 = vadd.f32 -1.4531521, %v3766_v61  ;;  %v4470_v56 = vmul.f32 1.442695, %v4366_v12  ;;  %v4176_v45 = vadd.f32 0.2548296, %v4116_v52 }
 0x4d0   :  { %v3937_v54 = vadd.f32 1.4214138, %v3877_v38  ;;  %v9723_v29 = vpop.eup %6095  ;;  %v4368_v3 = vsub.f32 0.0, %v4308_v58  ;;  %v4309_v49 = vmul.f32 %v3469_v37, %v3469_v37  ;;  %v9727_v10 = vadd.f32 %v10365_v32, %v8746_v36  ;;  %v10367_v16 = vld [vmem:[#allocation16_spill] sm:$0xff] }
 0x4d1   :  { %v3886_v27 = vmul.f32 %v9713_v47, %v3826_v2  ;;  %v3768_v41 = vmul.f32 1.0614054, %v9723_v29  ;;  %v5553_v38 = vpack.c.bf16 %v10368_v35, %v10367_v16  ;;  %v4055_v12 = vadd.f32 -0.28449672, %v3995_v53  ;;  %v10369_v16 = vld [vmem:[#allocation15_spill] sm:$0xff]  ;;  %v10370_v35 = vld [vmem:[#allocation21_spill] sm:$0xff] }
 0x4d2   :  { %10366 = vst [vmem:[#allocation19_spill] sm:$0xff] %v9727_v10  ;;  %v3997_v31 = vmul.f32 %v9704_v51, %v3937_v54  ;;  %v6098_v61 = vpop.eup %6097  ;;  %v4367_v14 = vsub.f32 0.0, %v4307_v60  ;;  %v3598_v4 = vadd.f32 1.0, %v3538_v55  ;;  %v3420_v52 = vmul.f32 0.70710677, %v9727_v10 }
 0x4d3   :  { %vm4585_vm10 = vcmp.ge.f32.partialorder %v9469_v19, 0.0  ;;  %6105 = vpow2.f32 %v4452_v44  ;;  %v3946_v58 = vadd.f32 1.4214138, %v3886_v27  ;;  %v3828_v32 = vadd.f32 -1.4531521, %v3768_v41  ;;  %5554 = vmatprep.subr.bf16.mxu0 %v5553_v38  ;;  %v10372_v27 = vld [vmem:[#allocation35_spill] sm:$0xff] }
 0x4d4   :  { %v4057_v37 = vadd.f32 -0.28449672, %v3997_v31  ;;  %v4236_v54 = vmul.f32 %v9656_v20, %v4176_v45  ;;  %6107 = vpow2.f32 %v4470_v56  ;;  %v4474_v2 = vmul.f32 1.442695, %v4368_v3  ;;  %v10373_v41 = vld [vmem:[#allocation52_spill] sm:$0xff] }
 0x4d5   :  { %v9737_v1 = vand.u32 2147483647, %v3420_v52  ;;  %v10371_v53 = vpack.c.bf16 %v10369_v16, %v10370_v35  ;;  %vm4594_vm11 = vcmp.ge.f32.partialorder %v9494_v13, 0.0  ;;  %v4006_v55 = vmul.f32 %v9713_v47, %v3946_v58 }
 0x4d6   :  { %v9742_v60 = vpop.eup %6099  ;;  %v3888_v44 = vmul.f32 %v9723_v29, %v3828_v32  ;;  %v4369_v31 = vsub.f32 0.0, %v4309_v49  ;;  %v5561_v20 = vpack.c.bf16 %v10373_v41, %v10372_v27  ;;  %v4115_v45 = vmul.f32 %v9695_v34, %v4055_v12  ;;  %v10374_v27 = vld [vmem:[#allocation29_spill] sm:$0xff]  ;;  %v10375_v41 = vld [vmem:[#allocation27_spill] sm:$0xff] }
 0x4d7   :  { %5556 = vmatpush1.bf16.msra.mxu0 %v10371_v53  ;;  %v9749_v56 = vpop.eup %6101  ;;  %v3767_v3 = vmul.f32 1.0614054, %v9742_v60  ;;  %v4472_v38 = vmul.f32 1.442695, %v4367_v14  ;;  %v3540_v52 = vmul.f32 0.3275911, %v9737_v1  ;;  %v4117_v16 = vmul.f32 %v9704_v51, %v4057_v37 }
 0x4d8   :  { %v4066_v35 = vadd.f32 -0.28449672, %v4006_v55  ;;  %v3948_v53 = vadd.f32 1.4214138, %v3888_v44  ;;  %6109 = vrcp.f32 %v3598_v4  ;;  %5562 = vmatprep.subr.bf16.mxu1 %v5561_v20  ;;  %v3769_v58 = vmul.f32 1.0614054, %v9749_v56  ;;  %v6104_v12 = vpop.eup %6103 }
 0x4d9   :  { %6111 = vpow2.f32 %v4474_v2  ;;  %v3827_v49 = vadd.f32 -1.4531521, %v3767_v3  ;;  %v3600_v32 = vadd.f32 1.0, %v3540_v52  ;;  %v10376_v10 = vpack.c.bf16 %v10374_v27, %v10375_v41 }
 0x4da   :  { %v4714_v14 = vsub.f32 1.0, %v9717_v62  ;;  %v4536_v59 = vmul.f32 %v6098_v61, %v4236_v54  ;;  %v4126_v7 = vmul.f32 %v9713_v47, %v4066_v35  ;;  %v4008_v37 = vmul.f32 %v9723_v29, %v3948_v53 }
 0x4db   :  { %5564 = vmatpush1.bf16.msra.mxu1 %v10376_v10  ;;  %v4175_v55 = vadd.f32 0.2548296, %v4115_v45  ;;  %v3887_v4 = vmul.f32 %v9742_v60, %v3827_v49  ;;  %v3829_v2 = vadd.f32 -1.4531521, %v3769_v58  ;;  %v4476_v44 = vmul.f32 1.442695, %v4369_v31 }
 0x4dc   :  { %v4177_v20 = vadd.f32 0.2548296, %v4117_v16  ;;  %v4186_v3 = vadd.f32 0.2548296, %v4126_v7  ;;  %v4068_v52 = vadd.f32 -0.28449672, %v4008_v37  ;;  %6113 = vpow2.f32 %v4472_v38 }
 0x4dd   :  { %v10377_v10 = vsub.f32 1.0, %v9702_v50  ;;  %vm4596_vm12 = vcmp.ge.f32.partialorder %v9551_v48, 0.0  ;;  %vm4606_vm13 = vcmp.ge.f32.partialorder %v9646_v18, 0.0  ;;  %v3947_v61 = vadd.f32 1.4214138, %v3887_v4  ;;  %v6106_v45 = vpop.eup %6105  ;;  %v10378_v16 = vld [vmem:[#allocation11_spill] sm:$0xff] }
 0x4de   :  { %v3889_v54 = vmul.f32 %v9749_v56, %v3829_v2  ;;  %6115 = vrcp.f32 %v3600_v32  ;;  %v4656_v31 = vmul.f32 0.5, %v4536_v59  ;;  %v4246_v7 = vmul.f32 %v9713_v47, %v4186_v3  ;;  %v6108_v53 = vpop.eup %6107 }
 0x4df   :  { %v4765_v27 = vsel %vm4585_vm10, %v10377_v10, %v9702_v50  ;;  %v4128_v38 = vmul.f32 %v9723_v29, %v4068_v52  ;;  %v9775_v35 = vadd.f32 %v10378_v16, %v8746_v36  ;;  %v4774_v50 = vsel %vm4594_vm11, %v4714_v14, %v9717_v62 }
 0x4e0   :  { %v4235_v49 = vmul.f32 %v9695_v34, %v4175_v55  ;;  %v4007_v58 = vmul.f32 %v9742_v60, %v3947_v61  ;;  %v3949_v32 = vadd.f32 1.4214138, %v3889_v54  ;;  %v4237_v59 = vmul.f32 %v9704_v51, %v4177_v20 }
 0x4e1   :  { %v4546_v41 = vmul.f32 %v6108_v53, %v4246_v7  ;;  %v4188_v47 = vadd.f32 0.2548296, %v4128_v38  ;;  %6117 = vpow2.f32 %v4476_v44  ;;  %v9784_v37 = vmul.f32 %v4765_v27, %v9469_v19 }
 0x4e2   :  { %vm4608_vm15 = vcmp.ge.f32.partialorder %v9661_v39, 0.0  ;;  %v4067_v4 = vadd.f32 -0.28449672, %v4007_v58  ;;  %v4009_v2 = vmul.f32 %v9749_v56, %v3949_v32  ;;  %v9788_v3 = vpop.eup %6109  ;;  %v4716_v62 = vsub.f32 1.0, %v4656_v31 }
 0x4e3   :  { %v4666_v34 = vmul.f32 0.5, %v4546_v41  ;;  %v4248_v14 = vmul.f32 %v9723_v29, %v4188_v47  ;;  %v3419_v55 = vmul.f32 0.70710677, %v9775_v35  ;;  %v6112_v51 = vpop.eup %6111  ;;  %v9793_v20 = vmul.f32 %v4774_v50, %v9494_v13 }
 0x4e4   :  { %v4535_v44 = vmul.f32 %v6104_v12, %v4235_v49  ;;  %v4127_v19 = vmul.f32 %v9742_v60, %v4067_v4  ;;  %v4069_v52 = vadd.f32 -0.28449672, %v4009_v2  ;;  %v4537_v10 = vmul.f32 %v6106_v45, %v4237_v59  ;;  %v10379_v4 = vld [vmem:[#allocation34_spill] sm:$0xff] }
 0x4e5   :  { %v4726_v27 = vsub.f32 1.0, %v4666_v34  ;;  %v4548_v61 = vmul.f32 %v6112_v51, %v4248_v14  ;;  %v9796_v54 = vand.u32 2147483647, %v3419_v55  ;;  %v3778_v29 = vmul.f32 1.0614054, %v9788_v3 }
 0x4e6   :  { %v4187_v7 = vadd.f32 0.2548296, %v4127_v19  ;;  %v4129_v38 = vmul.f32 %v9749_v56, %v4069_v52  ;;  %v4318_v16 = vmul.f32 %v9711_v8, %v9711_v8  ;;  %v6114_v53 = vpop.eup %6113  ;;  %v4776_v13 = vsel %vm4596_vm12, %v4716_v62, %v4656_v31 }
 0x4e7   :  { %vm4595_vm0 = vcmp.ge.f32.partialorder %v9608_v24, 0.0  ;;  %v4786_v12 = vsel %vm4606_vm13, %v4726_v27, %v4666_v34  ;;  %v4668_v45 = vmul.f32 0.5, %v4548_v61  ;;  %v3539_v50 = vmul.f32 0.3275911, %v9796_v54 }
 0x4e8   :  { %v9808_v49 = vpop.eup %6115  ;;  %v4655_v58 = vmul.f32 0.5, %v4535_v44  ;;  %vm4597_vm1 = vcmp.ge.f32.partialorder %v9627_v63, 0.0  ;;  %v9812_v32 = vmul.f32 %v4786_v12, %v9646_v18  ;;  %v4247_v8 = vmul.f32 %v9742_v60, %v4187_v7  ;;  %v10380_v12 = vld [vmem:[#allocation36_spill] sm:$0xff] }
 0x4e9   :  { %v4189_v59 = vadd.f32 0.2548296, %v4129_v38  ;;  %v4657_v31 = vmul.f32 0.5, %v4537_v10  ;;  %v4728_v41 = vsub.f32 1.0, %v4668_v45  ;;  %v3599_v47 = vadd.f32 1.0, %v3539_v50 }
 0x4ea   :  { %v9817_v2 = vadd.f32 %v10379_v4, %v8746_v36  ;;  %v4547_v34 = vmul.f32 %v6114_v53, %v4247_v8  ;;  %v3838_v55 = vadd.f32 -1.4531521, %v3778_v29  ;;  %v9823_v18 = vmul.f32 %v4776_v13, %v9551_v48 }
 0x4eb   :  { %v4249_v14 = vmul.f32 %v9749_v56, %v4189_v59  ;;  %v6118_v51 = vpop.eup %6117  ;;  %v4788_v60 = vsel %vm4608_vm15, %v4728_v41, %v4668_v45  ;;  %vm4607_vm2 = vcmp.ge.f32.partialorder %v9675_v25, 0.0  ;;  %v3780_v44 = vmul.f32 1.0614054, %v9808_v49  ;;  %v10382_v59 = vld [vmem:[#allocation44_spill] sm:$0xff] }
 0x4ec   :  { %v4715_v36 = vsub.f32 1.0, %v4655_v58  ;;  %v9830_v19 = vmul.f32 %v4788_v60, %v9661_v39  ;;  %v4667_v52 = vmul.f32 0.5, %v4547_v34  ;;  %v4717_v27 = vsub.f32 1.0, %v4657_v31  ;;  %v10381_v39 = vld [vmem:[#allocation55_spill] sm:$0xff] }
 0x4ed   :  { %v4549_v10 = vmul.f32 %v6118_v51, %v4249_v14  ;;  %v4378_v56 = vsub.f32 0.0, %v4318_v16  ;;  %6119 = vrcp.f32 %v3599_v47  ;;  %v3421_v61 = vmul.f32 0.70710677, %v9817_v2 }
 0x4ee   :  { %v4727_v7 = vsub.f32 1.0, %v4667_v52  ;;  %v3898_v29 = vmul.f32 %v9788_v3, %v3838_v55  ;;  %v3840_v53 = vadd.f32 -1.4531521, %v3780_v44  ;;  %v3771_v45 = vmul.f32 1.0614054, %v10380_v12 }
 0x4ef   :  { %v4669_v38 = vmul.f32 0.5, %v4549_v10  ;;  %v3481_v13 = vand.u32 2147483647, %v3421_v61  ;;  %v5565_v50 = vpack.c.bf16 %v9387_v28, %v10381_v39  ;;  %v4775_v16 = vsel %vm4595_vm0, %v4715_v36, %v4655_v58 }
 0x4f0   :  { %vm4609_vm3 = vcmp.ge.f32.partialorder %v9680_v11, 0.0  ;;  %v3773_v41 = vmul.f32 1.0614054, %v10382_v59  ;;  %v4777_v47 = vsel %vm4597_vm1, %v4717_v27, %v4657_v31  ;;  %v4494_v4 = vmul.f32 1.442695, %v4378_v56  ;;  %v10383_v56 = vld [vmem:[#allocation23_spill] sm:$0xff] }
 0x4f1   :  { %v4729_v8 = vsub.f32 1.0, %v4669_v38  ;;  %v9847_v34 = vmul.f32 %v9737_v1, %v9737_v1  ;;  %v3541_v14 = vmul.f32 0.3275911, %v3481_v13  ;;  %v4787_v55 = vsel %vm4607_vm2, %v4727_v7, %v4667_v52 }
 0x4f2   :  { %v3831_v60 = vadd.f32 -1.4531521, %v3771_v45  ;;  %v3833_v58 = vadd.f32 -1.4531521, %v3773_v41  ;;  %v9852_v44 = vmul.f32 %v4775_v16, %v9608_v24  ;;  %v3958_v36 = vadd.f32 1.4214138, %v3898_v29 }
 0x4f3   :  { %v4789_v51 = vsel %vm4609_vm3, %v4729_v8, %v4669_v38  ;;  %v3900_v10 = vmul.f32 %v9808_v49, %v3840_v53  ;;  %v3601_v61 = vadd.f32 1.0, %v3541_v14  ;;  %v9856_v31 = vmul.f32 %v4777_v47, %v9627_v63  ;;  %v10386_v53 = vld [vmem:[#allocation42_spill] sm:$0xff] }
 0x4f4   :  { %v3891_v1 = vmul.f32 %v10380_v12, %v3831_v60  ;;  %v3893_v27 = vmul.f32 %v10382_v59, %v3833_v58  ;;  %v9863_v7 = vmul.f32 %v4787_v55, %v9675_v25  ;;  %v9866_v24 = vmul.f32 %v4789_v51, %v9680_v11 }
 0x4f5   :  { %v4319_v38 = vmul.f32 %v9796_v54, %v9796_v54  ;;  %6121 = vrcp.f32 %v3601_v61  ;;  %v4018_v25 = vmul.f32 %v9788_v3, %v3958_v36  ;;  %v3960_v8 = vadd.f32 1.4214138, %v3900_v10 }
 0x4f6   :  { %v3951_v29 = vadd.f32 1.4214138, %v3891_v1  ;;  %v3953_v63 = vadd.f32 1.4214138, %v3893_v27  ;;  %v3775_v11 = vmul.f32 1.0614054, %v9478_v33  ;;  %6123 = vpow2.f32 %v4494_v4 }
 0x4f7   :  { %v9874_v16 = vpop.eup %6119  ;;  %v3777_v41 = vmul.f32 1.0614054, %v9583_v43  ;;  %v4379_v51 = vsub.f32 0.0, %v4319_v38  ;;  %v4380_v38 = vsub.f32 0.0, %v9847_v34  ;;  %v4078_v55 = vadd.f32 -0.28449672, %v4018_v25 }
 0x4f8   :  { %v4011_v54 = vmul.f32 %v10380_v12, %v3951_v29  ;;  %v4013_v47 = vmul.f32 %v10382_v59, %v3953_v63  ;;  %v3835_v60 = vadd.f32 -1.4531521, %v3775_v11  ;;  %v3779_v27 = vmul.f32 1.0614054, %v9874_v16 }
 0x4f9   :  { %v3837_v58 = vadd.f32 -1.4531521, %v3777_v41  ;;  %v4020_v29 = vmul.f32 %v9808_v49, %v3960_v8  ;;  %v4321_v63 = vmul.f32 %v3481_v13, %v3481_v13  ;;  %vm4615_vm6 = vcmp.ge.f32.partialorder %v9332_v40, 0.0 }
 0x4fa   :  { %v4071_v10 = vadd.f32 -0.28449672, %v4011_v54  ;;  %v4073_v61 = vadd.f32 -0.28449672, %v4013_v47  ;;  %v3895_v48 = vmul.f32 %v9478_v33, %v3835_v60  ;;  %v3839_v54 = vadd.f32 -1.4531521, %v3779_v27 }
 0x4fb   :  { %v3897_v62 = vmul.f32 %v9583_v43, %v3837_v58  ;;  %v4496_v47 = vmul.f32 1.442695, %v4379_v51  ;;  %v10384_v60 = vld [vmem:[#allocation22_spill] sm:$0xff]  ;;  %v10385_v58 = vld [vmem:[#allocation41_spill] sm:$0xff]  ;;  %v4080_v34 = vadd.f32 -0.28449672, %v4020_v29  ;;  %v10397_v39 = vpack.c.bf16 %v9457_v21, %v9438_v17 }
 0x4fc   :  { %v4131_v11 = vmul.f32 %v10380_v12, %v4071_v10  ;;  %v4133_v41 = vmul.f32 %v10382_v59, %v4073_v61  ;;  %v3955_v36 = vadd.f32 1.4214138, %v3895_v48  ;;  %v3899_v13 = vmul.f32 %v9874_v16, %v3839_v54 }
 0x4fd   :  { %v3957_v1 = vadd.f32 1.4214138, %v3897_v62  ;;  %vm4611_vm4 = vcmp.ge.f32.partialorder %v10384_v60, 0.0  ;;  %vm4613_vm5 = vcmp.ge.f32.partialorder %v10385_v58, 0.0  ;;  %v4381_v10 = vsub.f32 0.0, %v4321_v63  ;;  %v10387_v63 = vld [vmem:[#allocation47_spill] sm:$0xff] }
 0x4fe   :  { %v4191_v14 = vadd.f32 0.2548296, %v4131_v11  ;;  %v4193_v45 = vadd.f32 0.2548296, %v4133_v41  ;;  %v4015_v61 = vmul.f32 %v9478_v33, %v3955_v36  ;;  %v3959_v25 = vadd.f32 1.4214138, %v3899_v13 }
 0x4ff   :  { %v9897_v8 = vpop.eup %6121  ;;  %v4017_v4 = vmul.f32 %v9583_v43, %v3957_v1  ;;  %v4498_v27 = vmul.f32 1.442695, %v4380_v38  ;;  %6125 = vpow2.f32 %v4496_v47  ;;  %v4138_v54 = vmul.f32 %v9788_v3, %v4078_v55 }
 0x500   :  { %v4251_v48 = vmul.f32 %v10380_v12, %v4191_v14  ;;  %v4253_v62 = vmul.f32 %v10382_v59, %v4193_v45  ;;  %v3781_v51 = vmul.f32 1.0614054, %v9897_v8  ;;  %v4075_v11 = vadd.f32 -0.28449672, %v4015_v61 }
 0x501   :  { %v4077_v41 = vadd.f32 -0.28449672, %v4017_v4  ;;  %v4019_v36 = vmul.f32 %v9874_v16, %v3959_v25  ;;  %v4140_v1 = vmul.f32 %v9808_v49, %v4080_v34  ;;  %v4500_v14 = vmul.f32 1.442695, %v4381_v10  ;;  %v6124_v34 = vpop.eup %6123 }
 0x502   :  { %v4551_v29 = vmul.f32 %v10386_v53, %v4251_v48  ;;  %v4553_v52 = vmul.f32 %v10387_v63, %v4253_v62  ;;  %v4135_v12 = vmul.f32 %v9478_v33, %v4075_v11  ;;  %v3841_v45 = vadd.f32 -1.4531521, %v3781_v51 }
 0x503   :  { %v4137_v59 = vmul.f32 %v9583_v43, %v4077_v41  ;;  %v4079_v13 = vadd.f32 -0.28449672, %v4019_v36  ;;  %6127 = vpow2.f32 %v4498_v27  ;;  %v4198_v4 = vadd.f32 0.2548296, %v4138_v54 }
 0x504   :  { %v4671_v38 = vmul.f32 0.5, %v4551_v29  ;;  %v4673_v47 = vmul.f32 0.5, %v4553_v52  ;;  %v4195_v61 = vadd.f32 0.2548296, %v4135_v12  ;;  %v3901_v53 = vmul.f32 %v9897_v8, %v3841_v45  ;;  %v9930_v12 = vld [vmem:[%s10039_s3] sm:$0x1] }
 0x505   :  { %v4197_v55 = vadd.f32 0.2548296, %v4137_v59  ;;  %v4139_v25 = vmul.f32 %v9874_v16, %v4079_v13  ;;  %v4200_v63 = vadd.f32 0.2548296, %v4140_v1  ;;  %6129 = vpow2.f32 %v4500_v14  ;;  %s6158_s3 = smov [#allocation2]  }
 0x506   :  { %v4731_v48 = vsub.f32 1.0, %v4671_v38  ;;  %v4733_v62 = vsub.f32 1.0, %v4673_v47  ;;  %v4255_v11 = vmul.f32 %v9478_v33, %v4195_v61  ;;  %v3961_v10 = vadd.f32 1.4214138, %v3901_v53  ;;  %s5409_s11 = sshll.u32 %s6158_s3, 4  ;;  %s5410_s11 = int_to_ptr.vmem [resolvable:$true] %s5409_s11 }
 0x507   :  { %v4257_v51 = vmul.f32 %v9583_v43, %v4197_v55  ;;  %v4199_v41 = vadd.f32 0.2548296, %v4139_v25  ;;  %v4674_v33 = vmul.f32 0.5, %v9641_v42  ;;  %v4676_v43 = vmul.f32 0.5, %v9653_v22  ;;  %v10389_v42 = vld [vmem:[#allocation7_spill] sm:$0xff]  ;;  %s6131_s12 = scalar_lea.vmem %s5410_s11, 192  ;;  %p6136_p1 = scmp.lt.s32.totalorder %s5410_s11, %s5410_s11 }
 0x508   :  { %v4791_v52 = vsel %vm4611_vm4, %v4731_v48, %v4671_v38  ;;  %v4793_v27 = vsel %vm4613_vm5, %v4733_v62, %v4673_v47  ;;  %v4555_v36 = vmul.f32 %v9487_v30, %v4255_v11  ;;  %v4021_v45 = vmul.f32 %v9897_v8, %v3961_v10  ;;  %v10392_v48 = vld [vmem:[#allocation18_spill] sm:$0xff]  ;;  %v10394_v25 = vld [vmem:[#allocation51_spill] sm:$0xff]  ;;  %p6132_p0 = scmp.ne.s32.totalorder %s5410_s11, %s6131_s12  ;;  %p6137_p2 = scmp.lt.s32.totalorder %s6131_s12, %s6131_s12 }
 0x509   :  { %v4851_v54 = vmul.f32 %v4791_v52, %v10384_v60  ;;  %v4853_v29 = vmul.f32 %v4793_v27, %v10385_v58  ;;  %v4557_v1 = vmul.f32 %v9671_v26, %v4257_v51  ;;  %v4259_v59 = vmul.f32 %v9874_v16, %v4199_v41  ;;  %v6126_v60 = vpop.eup %6125  ;;  %v10388_v26 = vld [vmem:[#allocation56_spill] sm:$0xff]  ;;  %v10399_v27 = vld [vmem:[#allocation54_spill] sm:$0xff]  ;;  %v10400_v41 = vld [vmem:[#allocation33_spill] sm:$0xff] }
 0x50a   :  { %v4675_v58 = vmul.f32 0.5, %v4555_v36  ;;  %v4081_v14 = vadd.f32 -0.28449672, %v4021_v45  ;;  %v4258_v38 = vmul.f32 %v9788_v3, %v4198_v4  ;;  %v4260_v47 = vmul.f32 %v9808_v49, %v4200_v63  ;;  %v10391_v4 = vld [vmem:[#allocation46_spill] sm:$0xff]  ;;  %p6138_p3 = por %p6137_p2, %p6136_p1 }
 0x50b   :  { %4874 = vmatprep.subr.mxu0 %v4851_v54  ;;  %4945 = vmatprep.subr.mxu1 %v4853_v29  ;;  %v4677_v30 = vmul.f32 0.5, %v4557_v1  ;;  %v4559_v22 = vmul.f32 %v6126_v60, %v4259_v59  ;;  %v4734_v61 = vsub.f32 1.0, %v4674_v33  ;;  %v4736_v55 = vsub.f32 1.0, %v4676_v43  ;;  %v10395_v63 = vld [vmem:[#allocation50_spill] sm:$0xff]  ;;  %v10404_v1 = vld [vmem:[#allocation24_spill] sm:$0xff]  ;;  %v10405_v59 = vld [vmem:[#allocation37_spill] sm:$0xff] }
 0x50c   :  { %4875 = vmatpush1.msra.mxu0 %v10388_v26  ;;  %4946 = vmatpush1.msra.mxu1 %v10389_v42  ;;  %v4735_v16 = vsub.f32 1.0, %v4675_v58  ;;  %vm4617_vm7 = vcmp.ge.f32.partialorder %v9403_v57, 0.0  ;;  %v10390_v3 = vpack.c.bf16 %v9396_v46, %v10383_v56  ;;  %v4141_v49 = vmul.f32 %v9897_v8, %v4081_v14  ;;  %p6139_p4 = pnand %p6138_p3, %p6132_p0 }
 0x50d   :  { %5495 = vmatmul.mubr.msk.f32.vlgmr.msra.gmra.mrb[10].mxu0 %vm2776_vm14, %v9930_v12  ;;  %5496 = vmatmul.mubr.msk.f32.vlgmr.msra.gmra.mrb[10].mxu1 %vm2776_vm14, %v9930_v12  ;;  %v4737_v13 = vsub.f32 1.0, %v4677_v30  ;;  %v6128_v53 = vpop.eup %6127  ;;  %v10393_v62 = vpack.c.bf16 %v10391_v4, %v10392_v48  ;;  %v10396_v11 = vpack.c.bf16 %v10394_v25, %v10395_v63  ;;  %v10398_v46 = vpack.c.bf16 %v9650_v15, %v9443_v23  ;;  %v10418_v4 = vld [vmem:[#allocation19_spill] sm:$0xff] }
 0x50e   :  { %5566 = vmatprep.subr.bf16.mxu0 %v5565_v50  ;;  %5574 = vmatprep.subr.bf16.mxu1 %v10390_v3  ;;  %v4795_v51 = vsel %vm4615_vm6, %v4735_v16, %v4675_v58  ;;  %v4679_v10 = vmul.f32 0.5, %v4559_v22  ;;  %v4201_v52 = vadd.f32 0.2548296, %v4141_v49  ;;  %vm4614_vm8 = vcmp.ge.f32.partialorder %v10399_v27, 0.0  ;;  %v10410_v16 = vld [vmem:[#allocation13_spill] sm:$0xff] }
 0x50f   :  { %5568 = vmatpush1.bf16.msra.mxu0 %v10393_v62  ;;  %5576 = vmatpush1.bf16.msra.mxu1 %v10396_v11  ;;  %v4797_v28 = vsel %vm4617_vm7, %v4737_v13, %v4677_v30  ;;  %v4855_v50 = vmul.f32 %v4795_v51, %v9332_v40  ;;  %vm4616_vm9 = vcmp.ge.f32.partialorder %v10400_v41, 0.0  ;;  %v4558_v54 = vmul.f32 %v6124_v34, %v4258_v38  ;;  %v6130_v17 = vpop.eup %6129  ;;  %v10402_v40 = vld [vmem:[#allocation10_spill] sm:$0xff] }
 0x510   :  { %5570 = vmatprep.subr.bf16.mxu0 %v10397_v39  ;;  %5578 = vmatprep.subr.bf16.mxu1 %v10398_v46  ;;  %v4857_v56 = vmul.f32 %v4797_v28, %v9403_v57  ;;  %v4560_v29 = vmul.f32 %v6128_v53, %v4260_v47  ;;  %v10401_v36 = vmov 0.0   ;;  %v4794_v21 = vsel %vm4614_vm8, %v4734_v61, %v4674_v33  ;;  %v10409_v47 = vld [vmem:[#allocation38_spill] sm:$0xff]  ;;  %v10412_v61 = vld [vmem:[#allocation31_spill] sm:$0xff]  ;;  %v5296_v46 = vpop.permute.xlu1 %5295 }
 0x511   :  { %5072 = vmatprep.mubr.f32.mxu0 %v10401_v36  ;;  %5143 = vmatprep.mubr.f32.mxu1 %v10401_v36  ;;  %v4796_v23 = vsel %vm4616_vm9, %v4736_v55, %v4676_v43  ;;  %v4261_v15 = vmul.f32 %v9897_v8, %v4201_v52  ;;  %v10403_v57 = vpack.c.bf16 %v9351_v5, %v10402_v40  ;;  %v4739_v34 = vsub.f32 1.0, %v4679_v10  ;;  %v10413_v55 = vld [vmem:[#allocation6_spill] sm:$0xff] }
 0x512   :  { %v10406_v45 = vpack.c.bf16 %v10404_v1, %v10405_v59  ;;  %v4854_v58 = vmul.f32 %v4794_v21, %v10399_v27  ;;  %v4856_v30 = vmul.f32 %v4796_v23, %v10400_v41  ;;  %v4678_v33 = vmul.f32 0.5, %v4558_v54 }
 0x513   :  { %5572 = vmatpush1.bf16.msra.mxu0 %v10403_v57  ;;  %v4561_v60 = vmul.f32 %v6130_v17, %v4261_v15  ;;  %v4680_v43 = vmul.f32 0.5, %v4560_v29  ;;  %vm4619_vm10 = vcmp.ge.f32.partialorder %v9775_v35, 0.0  ;;  %vm4621_vm11 = vcmp.ge.f32.partialorder %v9817_v2, 0.0 }
 0x514   :  { %5580 = vmatpush1.bf16.msra.mxu1 %v10406_v45  ;;  %5016 = vmatprep.subr.mxu0 %v4855_v50  ;;  %v4799_v5 = vsel %vm4619_vm10, %v4739_v34, %v4679_v10  ;;  %v4738_v42 = vsub.f32 1.0, %v4678_v33  ;;  %v10407_v14 = vpack.c.bf16 %v9707_v6, %v9683_v9  ;;  %v10408_v38 = vpack.c.bf16 %v9784_v37, %v9690_v0  ;;  %v10417_v37 = vld [vmem:[#allocation32_spill] sm:$0xff] }
 0x515   :  { %5087 = vmatprep.subr.mxu1 %v4857_v56  ;;  %v4681_v26 = vmul.f32 0.5, %v4561_v60  ;;  %v4740_v22 = vsub.f32 1.0, %v4680_v43  ;;  %v10411_v13 = vpack.c.bf16 %v10409_v47, %v10410_v16  ;;  %v10414_v3 = vpack.c.bf16 %v10412_v61, %v10413_v55 }
 0x516   :  { %v10415_v53 = vpack.c.bf16 %v9863_v7, %v9852_v44  ;;  %v10416_v9 = vpack.c.bf16 %v9866_v24, %v9856_v31  ;;  %v4859_v0 = vmul.f32 %v4799_v5, %v9775_v35  ;;  %vm4618_vm12 = vcmp.ge.f32.partialorder %v10417_v37, 0.0  ;;  %v73_v24 = vpop.permute.xlu0 %72 }
 0x517   :  { %5017 = vmatpush1.msra.mxu0 %v4854_v58  ;;  %v4741_v8 = vsub.f32 1.0, %v4681_v26  ;;  %vm4620_vm13 = vcmp.ge.f32.partialorder %v10418_v4, 0.0  ;;  %v4798_v48 = vsel %vm4618_vm12, %v4738_v42, %v4678_v33  ;;  %v10419_v44 = vpack.c.bf16 %v9812_v32, %v9793_v20 }
 0x518   :  { %5088 = vmatpush1.msra.mxu1 %v4856_v30  ;;  %5497 = vmatmul.mubr.msk.f32.vlgmr.msra.gmra.mrb[22].mxu0 %vm2776_vm14, %v9930_v12  ;;  %v4800_v62 = vsel %vm4620_vm13, %v4740_v22, %v4680_v43  ;;  %v10420_v31 = vpack.c.bf16 %v9830_v19, %v9823_v18  ;;  %v4858_v35 = vmul.f32 %v4798_v48, %v10417_v37  ;;  %v6157_v20 = vmov 1966171168  }
 0x519   :  { %5498 = vmatmul.mubr.msk.f32.vlgmr.msra.gmra.mrb[22].mxu1 %vm2776_vm14, %v9930_v12  ;;  %5582 = vmatprep.subr.bf16.mxu0 %v10407_v14  ;;  %v4801_v49 = vsel %vm4621_vm11, %v4741_v8, %v4681_v26  ;;  %v5327_v32 = vunpack.c.l.s4 %v6157_v20  ;;  %v5329_v7 = vlaneseq }
 0x51a   :  { %5590 = vmatprep.subr.bf16.mxu1 %v10408_v38  ;;  %5584 = vmatpush1.bf16.msra.mxu0 %v10411_v13  ;;  %v4861_v6 = vmul.f32 %v4801_v49, %v9817_v2  ;;  %v4860_v2 = vmul.f32 %v4800_v62, %v10418_v4 }
 0x51b   :  { %5592 = vmatpush1.bf16.msra.mxu1 %v10414_v3  ;;  %5586 = vmatprep.subr.bf16.mxu0 %v10415_v53  ;;  %v5328_v25 = vunpack.c.0.s8 %v5327_v32  ;;  %v5330_v63 = vshrl.u32 %v5329_v7, 7 }
 0x51c   :  { %5594 = vmatprep.subr.bf16.mxu1 %v10416_v9  ;;  %5214 = vmatprep.mubr.f32.mxu0 %v10401_v36 }
 0x51d   :  { %5285 = vmatprep.mubr.f32.mxu1 %v10401_v36 }
 0x51e   :  { %5588 = vmatpush1.bf16.msra.mxu0 %v10419_v44 }
 0x51f   :  { %5596 = vmatpush1.bf16.msra.mxu1 %v10420_v31  ;;  %5158 = vmatprep.subr.mxu0 %v4859_v0 }
 0x520   :  { %5229 = vmatprep.subr.mxu1 %v4861_v6 }
 0x522   :  { %5159 = vmatpush1.msra.mxu0 %v4858_v35 }
 0x523   :  { %5230 = vmatpush1.msra.mxu1 %v4860_v2  ;;  %5499 = vmatmul.mubr.msk.f32.vlgmr.msra.gmra.mrb[34].mxu0 %vm2776_vm14, %v9930_v12 }
 0x524   :  { %5500 = vmatmul.mubr.msk.f32.vlgmr.msra.gmra.mrb[34].mxu1 %vm2776_vm14, %v9930_v12  ;;  %v5331_v12 = vsub.s32 %v5328_v25, %v5330_v63  ;;  %vm5400_vm14 = vcmp.lt.s32.totalorder %v5329_v7, 512 }
 0x5e0   :  { %v4932_v18 = vpop.f32.mrb[10].mxu0  ;;  %v5003_v19 = vpop.f32.mrb[10].mxu1 }
 0x5e1   :  { %v5597_v11 = vadd.f32 %v4932_v18, %v73_v24  ;;  %v5599_v51 = vadd.f32 %v5003_v19, %v73_v24  ;;  %v4934_v28 = vpop.f32.mrb[11].mxu0  ;;  %v5005_v39 = vpop.f32.mrb[11].mxu1 }
 0x5e2   :  { %v5598_v50 = vadd.f32 %v4934_v28, %v73_v24  ;;  %v5600_v56 = vadd.f32 %v5005_v39, %v73_v24 }
 0x5e3   :  { %v5298_v10 = vadd.f32 %v5597_v11, %v5296_v46  ;;  %v5300_v52 = vadd.f32 %v5599_v51, %v5296_v46 }
 0x5e4   :  { %v5299_v27 = vadd.f32 %v5598_v50, %v5296_v46  ;;  %v5301_v41 = vadd.f32 %v5600_v56, %v5296_v46 }
 0x5e6   :  { %v5322_v54 = vcombine.low %v5298_v10, %v5299_v27  ;;  %v5323_v29 = vcombine.low %v5300_v52, %v5301_v41 }
 0x5e8   :  { %v5332_v36 = vrot.slane %v5322_v54, %v5331_v12  ;;  %v5339_v17 = vrot.slane %v5323_v29, %v5331_v12 }
 0x5ea   :  { %v5354_v21 = vcombine.low %v5332_v36, %v5339_v17 }
 0x5eb   :  { %v5074_v23 = vpop.f32.mrb[22].mxu0 }
 0x5ec   :  { %v5145_v15 = vpop.f32.mrb[22].mxu1  ;;  %v5601_v40 = vadd.f32 %v5074_v23, %v73_v24  ;;  %v5076_v1 = vpop.f32.mrb[23].mxu0  ;;  %v5362_v61 = vrot.slane %v5354_v21, %v5331_v12 }
 0x5ed   :  { %v5603_v57 = vadd.f32 %v5145_v15, %v73_v24  ;;  %v5147_v59 = vpop.f32.mrb[23].mxu1  ;;  %v5602_v45 = vadd.f32 %v5076_v1, %v73_v24 }
 0x5ee   :  { %v5604_v34 = vadd.f32 %v5147_v59, %v73_v24  ;;  %v5302_v60 = vadd.f32 %v5601_v40, %v5296_v46 }
 0x5ef   :  { %v5304_v58 = vadd.f32 %v5603_v57, %v5296_v46  ;;  %v5303_v30 = vadd.f32 %v5602_v45, %v5296_v46 }
 0x5f0   :  { %v5305_v33 = vadd.f32 %v5604_v34, %v5296_v46 }
 0x5f1   :  { %v5324_v43 = vcombine.low %v5302_v60, %v5303_v30 }
 0x5f2   :  { %v5325_v26 = vcombine.low %v5304_v58, %v5305_v33 }
 0x5f3   :  { %v5346_v5 = vrot.slane %v5324_v43, %v5331_v12 }
 0x5f4   :  { %v5353_v8 = vrot.slane %v5325_v26, %v5331_v12 }
 0x5f6   :  { %v5355_v42 = vcombine.low %v5346_v5, %v5353_v8  ;;  %v5216_v22 = vpop.f32.mrb[34].mxu0 }
 0x5f7   :  { %v5287_v14 = vpop.f32.mrb[34].mxu1  ;;  %v5605_v38 = vadd.f32 %v5216_v22, %v73_v24  ;;  %v5218_v16 = vpop.f32.mrb[35].mxu0 }
 0x5f8   :  { %v5607_v47 = vadd.f32 %v5287_v14, %v73_v24  ;;  %v5289_v13 = vpop.f32.mrb[35].mxu1  ;;  %v5369_v55 = vrot.slane %v5355_v42, %v5331_v12  ;;  %v5606_v3 = vadd.f32 %v5218_v16, %v73_v24 }
 0x5f9   :  { %v5608_v49 = vadd.f32 %v5289_v13, %v73_v24  ;;  %v5306_v53 = vadd.f32 %v5605_v38, %v5296_v46 }
 0x5fa   :  { %v5308_v9 = vadd.f32 %v5607_v47, %v5296_v46  ;;  %v5370_v0 = vcombine.low %v5362_v61, %v5369_v55  ;;  %v5307_v6 = vadd.f32 %v5606_v3, %v5296_v46 }
 0x5fb   :  { %v5309_v37 = vadd.f32 %v5608_v49, %v5296_v46 }
 0x5fc   :  { %5397 = vst [vmem:[#allocation2] sm:$0xff] %v5370_v0  ;;  %v5371_v4 = vcombine.low %v5306_v53, %v5307_v6 }
 0x5fd   :  { %v5372_v48 = vcombine.low %v5308_v9, %v5309_v37 }
 0x5fe   :  { %v5379_v62 = vrot.slane %v5371_v4, %v5331_v12 }
 0x5ff   :  { %v5386_v44 = vrot.slane %v5372_v48, %v5331_v12 }
 0x601   :  { %v5387_v31 = vcombine.low %v5379_v62, %v5386_v44 }
 0x603   :  { %v5394_v35 = vrot.slane %v5387_v31, %v5331_v12 }
 0x605   :  { %5402 = vst.msk [vmem:[#allocation2 + $0x8] sm:$0xf] %vm5400_vm14, %v5394_v35 }
 0x606   :  { %6142 = shalt.err (!%p6139_p4)
}
 0x607   :  { %s6143_s15 = scalar_lea.hbm %s10041_s5, 192 }
 0x608   :  { %p6144_p5 = scmp.ne.s32.totalorder %s10041_s5, %s6143_s15  ;;  %p6147_p6 = scmp.lt.u32.totalorder %s6143_s15, %s10041_s5 }
 0x60a   :  { %p6149_p7 = pnand %p6147_p6, %p6144_p5 }
 0x60c   :  { %6152 = shalt.err (!%p6149_p7)
}
 0x60d   :  { %5412 = dma.vmem_to_hbm [thread:$0]  %s5410_s11, 192, %s10041_s5, [#allocation3]  }
 0x60e   :  { %6153 = dma.done.wait [#allocation3], 192  }
 0x60f   :  { %6154 = vsyncadd [#allocation3], 4294967104 }
 0x610   :  { %5416 = vsyncpa [#allocation3], 1 }

</bundles_post_ra>
